<compile_context>
chip_gen: v7x
topology: tpu7x:2x2x1
jax: 0.10.0
libtpu: 0.0.40
codegen_flags: <defaults>
</compile_context>

<pallas_src>
import functools

import jax
import jax.numpy as jnp
from jax import lax
from jax.experimental import pallas as pl
from jax.experimental.pallas import tpu as pltpu

# Model dimensions fixed by the PyTorch module (+ UCI-HAR input 9 x 1 x 128).
IN_CH = 9
SEQ_LEN = 128
C1_OUT, C2_OUT = 32, 64
KW = 9                        # conv kernel width (1, 9)
W1 = SEQ_LEN - KW + 1         # 120
W1P = W1 // 2                 # 60   after MaxPool (1,2) stride 2
W2 = W1P - KW + 1             # 52
W2P = W2 // 2                 # 26
FLAT = C2_OUT * W2P           # 1664
FC1, FC2, NUM_CLASSES = 1000, 500, 6
# Lane-padded MLP dims (zero-padded weights; first 6 logits are unchanged).
FC1_P, FC2_P, OUT_P = 1024, 512, 128


# ----------------------------- Pallas kernels -----------------------------

def _dense_relu_kernel(x_ref, w_ref, b_ref, o_ref, *, relu):
    acc = jnp.dot(x_ref[...], w_ref[...], preferred_element_type=jnp.float32) + b_ref[...]
    if relu:
        acc = jnp.maximum(acc, 0.0)
    o_ref[...] = acc.astype(o_ref.dtype)


def _mlp_kernel(x_ref, w1_ref, b1_ref, w2_ref, b2_ref, w3_ref, b3_ref, o_ref):
    h = jnp.dot(x_ref[...], w1_ref[...], preferred_element_type=jnp.float32) + b1_ref[...]
    h = jnp.maximum(h, 0.0)
    h = jnp.dot(h, w2_ref[...], preferred_element_type=jnp.float32) + b2_ref[...]
    h = jnp.maximum(h, 0.0)
    o_ref[...] = (jnp.dot(h, w3_ref[...], preferred_element_type=jnp.float32)
                  + b3_ref[...]).astype(o_ref.dtype)


# ----------------------------- Pallas wrappers -----------------------------

def _round_up(x, m):
    return (x + m - 1) // m * m


def _pad_rows(x, mp):
    m = x.shape[0]
    return x if m == mp else jnp.pad(x, ((0, mp - m), (0, 0)))


def pallas_dense(x, w, b, *, relu, max_rows_per_step=1024):
    """o = relu?(x @ w + b); grid over rows, weights/bias VMEM-resident."""
    m, k = x.shape
    n = w.shape[1]
    tm = min(max_rows_per_step, _round_up(m, 8))
    mp = _round_up(m, tm)
    xp = _pad_rows(x, mp)
    out = pl.pallas_call(
        functools.partial(_dense_relu_kernel, relu=relu),
        out_shape=jax.ShapeDtypeStruct((mp, n), jnp.float32),
        grid=(mp // tm,),
        in_specs=[
            pl.BlockSpec((tm, k), lambda i: (i, 0)),
            pl.BlockSpec((k, n), lambda i: (0, 0)),   # resident weight
            pl.BlockSpec((1, n), lambda i: (0, 0)),   # resident bias
        ],
        out_specs=pl.BlockSpec((tm, n), lambda i: (i, 0)),
        compiler_params=pltpu.CompilerParams(dimension_semantics=("parallel",)),
        cost_estimate=pl.CostEstimate(
            flops=2 * mp * k * n,
            transcendentals=0,
            bytes_accessed=4 * (mp * k + k * n + n + mp * n)),
    )(xp, w, b)
    return out[:m] if mp != m else out


def pallas_mlp(x, w1, b1, w2, b2, w3, b3, *, max_rows_per_step=128):
    """Fused, lane-padded 3-layer MLP head; grid over batch rows, weights resident."""
    m, k = x.shape
    n1, n2, n3 = w1.shape[1], w2.shape[1], w3.shape[1]
    tm = min(max_rows_per_step, _round_up(m, 8))
    mp = _round_up(m, tm)
    xp = _pad_rows(x, mp)
    out = pl.pallas_call(
        _mlp_kernel,
        out_shape=jax.ShapeDtypeStruct((mp, n3), jnp.float32),
        grid=(mp // tm,),
        in_specs=[
            pl.BlockSpec((tm, k), lambda i: (i, 0)),
            pl.BlockSpec((k, n1), lambda i: (0, 0)),
            pl.BlockSpec((1, n1), lambda i: (0, 0)),
            pl.BlockSpec((n1, n2), lambda i: (0, 0)),
            pl.BlockSpec((1, n2), lambda i: (0, 0)),
            pl.BlockSpec((n2, n3), lambda i: (0, 0)),
            pl.BlockSpec((1, n3), lambda i: (0, 0)),
        ],
        out_specs=pl.BlockSpec((tm, n3), lambda i: (i, 0)),
        compiler_params=pltpu.CompilerParams(dimension_semantics=("parallel",)),
        cost_estimate=pl.CostEstimate(
            flops=2 * mp * (k * n1 + n1 * n2 + n2 * n3),
            transcendentals=0,
            bytes_accessed=4 * (mp * k + k * n1 + n1 * n2 + n2 * n3 + mp * n3)),
    )(xp, w1, b1, w2, b2, w3, b3)
    return out[:m] if mp != m else out


# ------------------------ host-side data reshuffles ------------------------
# MaxPool2d / im2col / flatten are pure data movement; they are done in plain JAX between
# the Pallas GEMM kernels (kept out of Mosaic by design).

def _im2col_w(x, kw):
    """x: (B, W, C) -> (B, W-kw+1, kw*C) patches, tap-major / channel-minor."""
    b, w, c = x.shape
    wo = w - kw + 1
    cols = jnp.stack([x[:, i:i + wo, :] for i in range(kw)], axis=2)   # (B, wo, kw, C)
    return cols.reshape(b, wo, kw * c)


def _pool_pairs(x):
    """MaxPool kernel (1,2) stride 2 along the width axis of (B, W, C)."""
    b, w, c = x.shape
    return jnp.max(x.reshape(b, w // 2, 2, c), axis=2)


def harnet_forward(x, kernel_params):
    """x: (B, 9, 1, 128) NCHW -> logits (B, 6)."""
    (wc1, bc1, wc2, bc2, w1, b1, w2, b2, w3, b3) = kernel_params
    bsz = x.shape[0]
    # NCHW -> width-major / channel-minor (B, 128, 9); H == 1.
    xw = jnp.transpose(x[:, :, 0, :], (0, 2, 1))

    # conv1 as GEMM + ReLU, then MaxPool(1,2)/2.
    p1 = _im2col_w(xw, KW).reshape(bsz * W1, KW * IN_CH)
    h1 = pallas_dense(p1, wc1, bc1, relu=True, max_rows_per_step=960)
    h1 = _pool_pairs(h1.reshape(bsz, W1, C1_OUT))                      # (B, 60, 32)

    # conv2 as GEMM + ReLU, then MaxPool(1,2)/2.
    p2 = _im2col_w(h1, KW).reshape(bsz * W2, KW * C1_OUT)
    h2 = pallas_dense(p2, wc2, bc2, relu=True, max_rows_per_step=832)
    h2 = _pool_pairs(h2.reshape(bsz, W2, C2_OUT))                      # (B, 26, 64)

    # Flatten (width-major here; fc1 columns were permuted at pack time to match
    # torch.flatten's channel-major order), then the fused MLP head.
    feats = h2.reshape(bsz, FLAT)
    logits = pallas_mlp(feats, w1, b1, w2, b2, w3, b3)
    return logits[:, :NUM_CLASSES]


# ------------------------------- parameters -------------------------------

def init_torch_params(key):
    """PyTorch-layout parameters with the default uniform(+-1/sqrt(fan_in)) init."""
    ks = jax.random.split(key, 10)

    def u(k, shape, fan_in):
        bound = 1.0 / float(fan_in) ** 0.5
        return jax.random.uniform(k, shape, minval=-bound, maxval=bound, dtype=jnp.float32)

    return dict(
        conv1_w=u(ks[0], (C1_OUT, IN_CH, 1, KW), IN_CH * KW),
        conv1_b=u(ks[1], (C1_OUT,), IN_CH * KW),
        conv2_w=u(ks[2], (C2_OUT, C1_OUT, 1, KW), C1_OUT * KW),
        conv2_b=u(ks[3], (C2_OUT,), C1_OUT * KW),
        fc1_w=u(ks[4], (FC1, FLAT), FLAT),
        fc1_b=u(ks[5], (FC1,), FLAT),
        fc2_w=u(ks[6], (FC2, FC1), FC1),
        fc2_b=u(ks[7], (FC2,), FC1),
        fc3_w=u(ks[8], (NUM_CLASSES, FC2), FC2),
        fc3_b=u(ks[9], (NUM_CLASSES,), FC2),
    )


def pack_kernel_params(p):
    """Re-layout / zero-pad the PyTorch weights for the Pallas kernels (math-preserving)."""
    # Conv weights -> im2col GEMM weights, rows ordered tap-major / channel-minor.
    wc1 = jnp.transpose(p["conv1_w"][:, :, 0, :], (2, 1, 0)).reshape(KW * IN_CH, C1_OUT)
    wc2 = jnp.transpose(p["conv2_w"][:, :, 0, :], (2, 1, 0)).reshape(KW * C1_OUT, C2_OUT)
    bc1 = p["conv1_b"].reshape(1, C1_OUT)
    bc2 = p["conv2_b"].reshape(1, C2_OUT)
    # fc1: permute columns from torch.flatten's (channel-major, width-minor) order to the
    # kernel's (width-major, channel-minor) order, transpose for right-mult, pad 1000->1024.
    w1 = p["fc1_w"].reshape(FC1, C2_OUT, W2P).transpose(0, 2, 1).reshape(FC1, FLAT).T
    w1 = jnp.pad(w1, ((0, 0), (0, FC1_P - FC1)))
    b1 = jnp.pad(p["fc1_b"], (0, FC1_P - FC1)).reshape(1, FC1_P)
    # fc2 / fc3: transpose + zero-pad to lane width.
    w2 = jnp.pad(p["fc2_w"].T, ((0, FC1_P - FC1), (0, FC2_P - FC2)))
    b2 = jnp.pad(p["fc2_b"], (0, FC2_P - FC2)).reshape(1, FC2_P)
    w3 = jnp.pad(p["fc3_w"].T, ((0, FC2_P - FC2), (0, OUT_P - NUM_CLASSES)))
    b3 = jnp.pad(p["fc3_b"], (0, OUT_P - NUM_CLASSES)).reshape(1, OUT_P)
    return (wc1, bc1, wc2, bc2, w1, b1, w2, b2, w3, b3)


# -------------------------------- reference --------------------------------

def harnet_reference(x, p):
    """Plain-JAX/XLA mirror of the PyTorch forward pass (eval mode)."""
    dn = ("NCHW", "OIHW", "NCHW")

    def conv_block(h, w, b):
        h = lax.conv_general_dilated(h, w, window_strides=(1, 1), padding="VALID",
                                     dimension_numbers=dn,
                                     precision=jax.lax.Precision.HIGHEST)
        h = jnp.maximum(h + b[None, :, None, None], 0.0)
        bsz, c, _, width = h.shape
        return jnp.max(h.reshape(bsz, c, 1, width // 2, 2), axis=-1)   # MaxPool (1,2)/2

    h = conv_block(x, p["conv1_w"], p["conv1_b"])
    h = conv_block(h, p["conv2_w"], p["conv2_b"])
    h = h.reshape(h.shape[0], -1)                                      # torch.flatten(out, 1)
    hp = jax.lax.Precision.HIGHEST
    h = jnp.maximum(jnp.dot(h, p["fc1_w"].T, precision=hp) + p["fc1_b"], 0.0)
    h = jnp.maximum(jnp.dot(h, p["fc2_w"].T, precision=hp) + p["fc2_b"], 0.0)
    return jnp.dot(h, p["fc3_w"].T, precision=hp) + p["fc3_b"]


if __name__ == "__main__":
    key = jax.random.PRNGKey(0)
    k_x, k_p = jax.random.split(key)

    batch = 4
    x = jax.random.normal(k_x, (batch, IN_CH, 1, SEQ_LEN), dtype=jnp.float32)

    torch_params = init_torch_params(k_p)
    kernel_params = pack_kernel_params(torch_params)

    fwd = jax.jit(harnet_forward)
    out = jax.block_until_ready(fwd(x, kernel_params))
    assert out.shape == (batch, NUM_CLASSES)

    ref = jax.block_until_ready(harnet_reference(x, torch_params))
    max_err = float(jnp.max(jnp.abs(out - ref)))
    assert jnp.allclose(out, ref, atol=2e-3, rtol=2e-2), (max_err, out, ref)

    print("KERNEL_OK")
</pallas_src>

<mosaic_0001>
module attributes {stable_mosaic.version = 11 : i64} {
  func.func @_dense_relu_kernel(%arg0: i32, %arg1: memref<480x81xf32, #tpu.memory_space<vmem>>, %arg2: memref<81x32xf32, #tpu.memory_space<vmem>>, %arg3: memref<1x32xf32, #tpu.memory_space<vmem>>, %arg4: memref<480x32xf32, #tpu.memory_space<vmem>>) attributes {dimension_semantics = [#tpu.dimension_semantics<parallel>], iteration_bounds = array<i64: 1>, scalar_prefetch = 0 : i64, scratch_operands = 0 : i64, tpu.core_type = #tpu.core_type<tc>, window_params = [{transform_indices = @transform_0, window_bounds = array<i64: 480, 81>}, {pipeline_mode = #tpu.pipeline_mode<synchronous>, transform_indices = @transform_1, window_bounds = array<i64: 81, 32>}, {pipeline_mode = #tpu.pipeline_mode<synchronous>, transform_indices = @transform_2, window_bounds = array<i64: 1, 32>}, {transform_indices = @transform_3, window_bounds = array<i64: 480, 32>}]} {
    %c0 = arith.constant 0 : index
    %c0_0 = arith.constant 0 : index
    %0 = vector.load %arg1[%c0, %c0_0] : memref<480x81xf32, #tpu.memory_space<vmem>>, vector<480x81xf32>
    %c0_1 = arith.constant 0 : index
    %c0_2 = arith.constant 0 : index
    %1 = vector.load %arg2[%c0_1, %c0_2] : memref<81x32xf32, #tpu.memory_space<vmem>>, vector<81x32xf32>
    %cst = arith.constant dense<0.000000e+00> : vector<480x32xf32>
    %2 = tpu.matmul %0, %1, %cst {dimension_numbers = #tpu.dot_dimension_numbers<[1], [0], [0], [1], [0, 0, 1, 1], [], []>} : vector<480x81xf32>, vector<81x32xf32>, vector<480x32xf32> -> vector<480x32xf32>
    %c0_3 = arith.constant 0 : index
    %c0_4 = arith.constant 0 : index
    %3 = vector.load %arg3[%c0_3, %c0_4] : memref<1x32xf32, #tpu.memory_space<vmem>>, vector<1x32xf32>
    %4 = vector.broadcast %3 : vector<1x32xf32> to vector<480x32xf32>
    %5 = arith.addf %2, %4 : vector<480x32xf32>
    %cst_5 = arith.constant 0.000000e+00 : f32
    %6 = vector.broadcast %cst_5 : f32 to vector<480x32xf32>
    %7 = arith.maximumf %5, %6 : vector<480x32xf32>
    %c0_6 = arith.constant 0 : index
    %c0_7 = arith.constant 0 : index
    %8 = vector.load %arg4[%c0_6, %c0_7] : memref<480x32xf32, #tpu.memory_space<vmem>>, vector<480x32xf32>
    tpu.vector_store %arg4[%c0_6, %c0_7], %7 {strides = array<i32>} : memref<480x32xf32, #tpu.memory_space<vmem>>, vector<480x32xf32>,
    return
  }
  func.func @transform_0(%arg0: i32) -> (i32, i32) {
    %c0_i32 = arith.constant 0 : i32
    %c0_i32_0 = arith.constant 0 : i32
    return %arg0, %c0_i32 : i32, i32
  }
  func.func @transform_1(%arg0: i32) -> (i32, i32) {
    %c0_i32 = arith.constant 0 : i32
    %c0_i32_0 = arith.constant 0 : i32
    %c0_i32_1 = arith.constant 0 : i32
    return %c0_i32, %c0_i32_0 : i32, i32
  }
  func.func @transform_2(%arg0: i32) -> (i32, i32) {
    %c0_i32 = arith.constant 0 : i32
    %c0_i32_0 = arith.constant 0 : i32
    %c0_i32_1 = arith.constant 0 : i32
    return %c0_i32, %c0_i32_0 : i32, i32
  }
  func.func @transform_3(%arg0: i32) -> (i32, i32) {
    %c0_i32 = arith.constant 0 : i32
    %c0_i32_0 = arith.constant 0 : i32
    return %arg0, %c0_i32 : i32, i32
  }
}

module attributes {stable_mosaic.version = 11 : i64} {
  func.func @_dense_relu_kernel(%arg0: i32, %arg1: memref<208x288xf32, #tpu.memory_space<vmem>>, %arg2: memref<288x64xf32, #tpu.memory_space<vmem>>, %arg3: memref<1x64xf32, #tpu.memory_space<vmem>>, %arg4: memref<208x64xf32, #tpu.memory_space<vmem>>) attributes {dimension_semantics = [#tpu.dimension_semantics<parallel>], iteration_bounds = array<i64: 1>, scalar_prefetch = 0 : i64, scratch_operands = 0 : i64, tpu.core_type = #tpu.core_type<tc>, window_params = [{transform_indices = @transform_0, window_bounds = array<i64: 208, 288>}, {pipeline_mode = #tpu.pipeline_mode<synchronous>, transform_indices = @transform_1, window_bounds = array<i64: 288, 64>}, {pipeline_mode = #tpu.pipeline_mode<synchronous>, transform_indices = @transform_2, window_bounds = array<i64: 1, 64>}, {transform_indices = @transform_3, window_bounds = array<i64: 208, 64>}]} {
    %c0 = arith.constant 0 : index
    %c0_0 = arith.constant 0 : index
    %0 = vector.load %arg1[%c0, %c0_0] : memref<208x288xf32, #tpu.memory_space<vmem>>, vector<208x288xf32>
    %c0_1 = arith.constant 0 : index
    %c0_2 = arith.constant 0 : index
    %1 = vector.load %arg2[%c0_1, %c0_2] : memref<288x64xf32, #tpu.memory_space<vmem>>, vector<288x64xf32>
    %cst = arith.constant dense<0.000000e+00> : vector<208x64xf32>
    %2 = tpu.matmul %0, %1, %cst {dimension_numbers = #tpu.dot_dimension_numbers<[1], [0], [0], [1], [0, 0, 1, 1], [], []>} : vector<208x288xf32>, vector<288x64xf32>, vector<208x64xf32> -> vector<208x64xf32>
    %c0_3 = arith.constant 0 : index
    %c0_4 = arith.constant 0 : index
    %3 = vector.load %arg3[%c0_3, %c0_4] : memref<1x64xf32, #tpu.memory_space<vmem>>, vector<1x64xf32>
    %4 = vector.broadcast %3 : vector<1x64xf32> to vector<208x64xf32>
    %5 = arith.addf %2, %4 : vector<208x64xf32>
    %cst_5 = arith.constant 0.000000e+00 : f32
    %6 = vector.broadcast %cst_5 : f32 to vector<208x64xf32>
    %7 = arith.maximumf %5, %6 : vector<208x64xf32>
    %c0_6 = arith.constant 0 : index
    %c0_7 = arith.constant 0 : index
    %8 = vector.load %arg4[%c0_6, %c0_7] : memref<208x64xf32, #tpu.memory_space<vmem>>, vector<208x64xf32>
    tpu.vector_store %arg4[%c0_6, %c0_7], %7 {strides = array<i32>} : memref<208x64xf32, #tpu.memory_space<vmem>>, vector<208x64xf32>,
    return
  }
  func.func @transform_0(%arg0: i32) -> (i32, i32) {
    %c0_i32 = arith.constant 0 : i32
    %c0_i32_0 = arith.constant 0 : i32
    return %arg0, %c0_i32 : i32, i32
  }
  func.func @transform_1(%arg0: i32) -> (i32, i32) {
    %c0_i32 = arith.constant 0 : i32
    %c0_i32_0 = arith.constant 0 : i32
    %c0_i32_1 = arith.constant 0 : i32
    return %c0_i32, %c0_i32_0 : i32, i32
  }
  func.func @transform_2(%arg0: i32) -> (i32, i32) {
    %c0_i32 = arith.constant 0 : i32
    %c0_i32_0 = arith.constant 0 : i32
    %c0_i32_1 = arith.constant 0 : i32
    return %c0_i32, %c0_i32_0 : i32, i32
  }
  func.func @transform_3(%arg0: i32) -> (i32, i32) {
    %c0_i32 = arith.constant 0 : i32
    %c0_i32_0 = arith.constant 0 : i32
    return %arg0, %c0_i32 : i32, i32
  }
}

module attributes {stable_mosaic.version = 11 : i64} {
  func.func @_mlp_kernel(%arg0: i32, %arg1: memref<8x1664xf32, #tpu.memory_space<vmem>>, %arg2: memref<1664x1024xf32, #tpu.memory_space<vmem>>, %arg3: memref<1x1024xf32, #tpu.memory_space<vmem>>, %arg4: memref<1024x512xf32, #tpu.memory_space<vmem>>, %arg5: memref<1x512xf32, #tpu.memory_space<vmem>>, %arg6: memref<512x128xf32, #tpu.memory_space<vmem>>, %arg7: memref<1x128xf32, #tpu.memory_space<vmem>>, %arg8: memref<8x128xf32, #tpu.memory_space<vmem>>) attributes {dimension_semantics = [#tpu.dimension_semantics<parallel>], iteration_bounds = array<i64: 1>, scalar_prefetch = 0 : i64, scratch_operands = 0 : i64, tpu.core_type = #tpu.core_type<tc>, window_params = [{transform_indices = @transform_0, window_bounds = array<i64: 8, 1664>}, {pipeline_mode = #tpu.pipeline_mode<synchronous>, transform_indices = @transform_1, window_bounds = array<i64: 1664, 1024>}, {pipeline_mode = #tpu.pipeline_mode<synchronous>, transform_indices = @transform_2, window_bounds = array<i64: 1, 1024>}, {pipeline_mode = #tpu.pipeline_mode<synchronous>, transform_indices = @transform_3, window_bounds = array<i64: 1024, 512>}, {pipeline_mode = #tpu.pipeline_mode<synchronous>, transform_indices = @transform_4, window_bounds = array<i64: 1, 512>}, {pipeline_mode = #tpu.pipeline_mode<synchronous>, transform_indices = @transform_5, window_bounds = array<i64: 512, 128>}, {pipeline_mode = #tpu.pipeline_mode<synchronous>, transform_indices = @transform_6, window_bounds = array<i64: 1, 128>}, {transform_indices = @transform_7, window_bounds = array<i64: 8, 128>}]} {
    %c0 = arith.constant 0 : index
    %c0_0 = arith.constant 0 : index
    %0 = vector.load %arg1[%c0, %c0_0] : memref<8x1664xf32, #tpu.memory_space<vmem>>, vector<8x1664xf32>
    %c0_1 = arith.constant 0 : index
    %c0_2 = arith.constant 0 : index
    %1 = vector.load %arg2[%c0_1, %c0_2] : memref<1664x1024xf32, #tpu.memory_space<vmem>>, vector<1664x1024xf32>
    %cst = arith.constant dense<0.000000e+00> : vector<8x1024xf32>
    %2 = tpu.matmul %0, %1, %cst {dimension_numbers = #tpu.dot_dimension_numbers<[1], [0], [0], [1], [0, 0, 1, 1], [], []>} : vector<8x1664xf32>, vector<1664x1024xf32>, vector<8x1024xf32> -> vector<8x1024xf32>
    %c0_3 = arith.constant 0 : index
    %c0_4 = arith.constant 0 : index
    %3 = vector.load %arg3[%c0_3, %c0_4] : memref<1x1024xf32, #tpu.memory_space<vmem>>, vector<1x1024xf32>
    %4 = vector.broadcast %3 : vector<1x1024xf32> to vector<8x1024xf32>
    %5 = arith.addf %2, %4 : vector<8x1024xf32>
    %cst_5 = arith.constant 0.000000e+00 : f32
    %6 = vector.broadcast %cst_5 : f32 to vector<8x1024xf32>
    %7 = arith.maximumf %5, %6 : vector<8x1024xf32>
    %c0_6 = arith.constant 0 : index
    %c0_7 = arith.constant 0 : index
    %8 = vector.load %arg4[%c0_6, %c0_7] : memref<1024x512xf32, #tpu.memory_space<vmem>>, vector<1024x512xf32>
    %cst_8 = arith.constant dense<0.000000e+00> : vector<8x512xf32>
    %9 = tpu.matmul %7, %8, %cst_8 {dimension_numbers = #tpu.dot_dimension_numbers<[1], [0], [0], [1], [0, 0, 1, 1], [], []>} : vector<8x1024xf32>, vector<1024x512xf32>, vector<8x512xf32> -> vector<8x512xf32>
    %c0_9 = arith.constant 0 : index
    %c0_10 = arith.constant 0 : index
    %10 = vector.load %arg5[%c0_9, %c0_10] : memref<1x512xf32, #tpu.memory_space<vmem>>, vector<1x512xf32>
    %11 = vector.broadcast %10 : vector<1x512xf32> to vector<8x512xf32>
    %12 = arith.addf %9, %11 : vector<8x512xf32>
    %cst_11 = arith.constant 0.000000e+00 : f32
    %13 = vector.broadcast %cst_11 : f32 to vector<8x512xf32>
    %14 = arith.maximumf %12, %13 : vector<8x512xf32>
    %c0_12 = arith.constant 0 : index
    %c0_13 = arith.constant 0 : index
    %15 = vector.load %arg6[%c0_12, %c0_13] : memref<512x128xf32, #tpu.memory_space<vmem>>, vector<512x128xf32>
    %cst_14 = arith.constant dense<0.000000e+00> : vector<8x128xf32>
    %16 = tpu.matmul %14, %15, %cst_14 {dimension_numbers = #tpu.dot_dimension_numbers<[1], [0], [0], [1], [0, 0, 1, 1], [], []>} : vector<8x512xf32>, vector<512x128xf32>, vector<8x128xf32> -> vector<8x128xf32>
    %c0_15 = arith.constant 0 : index
    %c0_16 = arith.constant 0 : index
    %17 = vector.load %arg7[%c0_15, %c0_16] : memref<1x128xf32, #tpu.memory_space<vmem>>, vector<1x128xf32>
    %18 = vector.broadcast %17 : vector<1x128xf32> to vector<8x128xf32>
    %19 = arith.addf %16, %18 : vector<8x128xf32>
    %c0_17 = arith.constant 0 : index
    %c0_18 = arith.constant 0 : index
    %20 = vector.load %arg8[%c0_17, %c0_18] : memref<8x128xf32, #tpu.memory_space<vmem>>, vector<8x128xf32>
    tpu.vector_store %arg8[%c0_17, %c0_18], %19 {strides = array<i32>} : memref<8x128xf32, #tpu.memory_space<vmem>>, vector<8x128xf32>,
    return
  }
  func.func @transform_0(%arg0: i32) -> (i32, i32) {
    %c0_i32 = arith.constant 0 : i32
    %c0_i32_0 = arith.constant 0 : i32
    return %arg0, %c0_i32 : i32, i32
  }
  func.func @transform_1(%arg0: i32) -> (i32, i32) {
    %c0_i32 = arith.constant 0 : i32
    %c0_i32_0 = arith.constant 0 : i32
    %c0_i32_1 = arith.constant 0 : i32
    return %c0_i32, %c0_i32_0 : i32, i32
  }
  func.func @transform_2(%arg0: i32) -> (i32, i32) {
    %c0_i32 = arith.constant 0 : i32
    %c0_i32_0 = arith.constant 0 : i32
    %c0_i32_1 = arith.constant 0 : i32
    return %c0_i32, %c0_i32_0 : i32, i32
  }
  func.func @transform_3(%arg0: i32) -> (i32, i32) {
    %c0_i32 = arith.constant 0 : i32
    %c0_i32_0 = arith.constant 0 : i32
    %c0_i32_1 = arith.constant 0 : i32
    return %c0_i32, %c0_i32_0 : i32, i32
  }
  func.func @transform_4(%arg0: i32) -> (i32, i32) {
    %c0_i32 = arith.constant 0 : i32
    %c0_i32_0 = arith.constant 0 : i32
    %c0_i32_1 = arith.constant 0 : i32
    return %c0_i32, %c0_i32_0 : i32, i32
  }
  func.func @transform_5(%arg0: i32) -> (i32, i32) {
    %c0_i32 = arith.constant 0 : i32
    %c0_i32_0 = arith.constant 0 : i32
    %c0_i32_1 = arith.constant 0 : i32
    return %c0_i32, %c0_i32_0 : i32, i32
  }
  func.func @transform_6(%arg0: i32) -> (i32, i32) {
    %c0_i32 = arith.constant 0 : i32
    %c0_i32_0 = arith.constant 0 : i32
    %c0_i32_1 = arith.constant 0 : i32
    return %c0_i32, %c0_i32_0 : i32, i32
  }
  func.func @transform_7(%arg0: i32) -> (i32, i32) {
    %c0_i32 = arith.constant 0 : i32
    %c0_i32_0 = arith.constant 0 : i32
    return %arg0, %c0_i32 : i32, i32
  }
}

</mosaic_0001>

<bundles_post_ra>
// kernel: harnet_forward.3
= control target key start
LH: loop header
LB: loop body
LE: loop exit
PB: predicated region body
PF: predicated region fallthrough
CT: control target
= control target key end

     0   :  { %8 = vsyncpa [#allocation3], 0  ;;  %s1082_s12 = smov [#allocation2]   ;;  %s1690_s0 = inlined_call_operand.vmem [shape: f32[480,81], index: 0, kind: input, shape index: {}]   ;;  %s1691_s1 = inlined_call_operand.vmem [shape: f32[81,32], index: 1, kind: input, shape index: {}]   ;;  %s1692_s2 = inlined_call_operand.hbm [shape: f32[1,32], index: 2, kind: input, shape index: {}]   ;;  %s1693_s3 = inlined_call_operand.vmem [shape: f32[480,32], index: 3, kind: output, shape index: {}]  }
   0x1   :  { %s19_s13 = sshll.u32 %s1082_s12, 4  ;;  %s1058_s16 = scalar_lea.hbm %s1692_s2, 16  ;;  %s20_s13 = int_to_ptr.vmem [resolvable:$true] %s19_s13 }
   0x2   :  { %p1059_p0 = scmp.ne.s32.totalorder %s1692_s2, %s1058_s16  ;;  %p1062_p1 = scmp.lt.u32.totalorder %s1058_s16, %s1692_s2 }
   0x4   :  { %p1064_p2 = pnand %p1062_p1, %p1059_p0 }
   0x6   :  { %1067 = shalt.err (!%p1064_p2)
}
   0x7   :  { %s1068_s21 = scalar_lea.vmem %s20_s13, 16  ;;  %s1072_s22 = scalar_lea.vmem %s20_s13, 32 }
   0x8   :  { %p1069_p3 = scmp.ne.s32.totalorder %s20_s13, %s1068_s21  ;;  %p1073_p4 = scmp.lt.s32.totalorder %s20_s13, %s20_s13 }
   0x9   :  { %p1074_p5 = scmp.lt.s32.totalorder %s1072_s22, %s1068_s21 }
   0xb   :  { %p1075_p6 = por %p1074_p5, %p1073_p4 }
   0xd   :  { %p1076_p7 = pnand %p1075_p6, %p1069_p3 }
   0xf   :  { %1079 = shalt.err (!%p1076_p7)
}
  0x10   :  { %22 = dma.hbm_to_vmem [thread:$0]  %s1692_s2, 16, %s20_s13, [#allocation3]  }
  0x11   :  { %1080 = dma.done.wait [#allocation3], 16  }
  0x12   :  { %1081 = vsyncadd [#allocation3], 4294967280  ;;  %v86_v0 = vld [vmem:[%s1691_s1] sm:$0xff]  ;;  %v87_v1 = vld [vmem:[%s1691_s1 + $0x8] sm:$0xff]  ;;  %vm104_vm0 = vcmask 662528   ;;  %vm285_vm1 = vcmask 1040384  }
  0x13   :  { %v88_v2 = vld [vmem:[%s1691_s1 + $0x10] sm:$0xff]  ;;  %v1025_v3 = vpack.c.bf16 %v87_v1, %v86_v0  ;;  %v89_v4 = vld [vmem:[%s1691_s1 + $0x18] sm:$0xff]  ;;  %v90_v6 = vld [vmem:[%s1691_s1 + $0x20] sm:$0xff]  ;;  %vm714_vm2 = vcmask 261120  }
  0x14   :  { %v1029_v5 = vpack.c.bf16 %v89_v4, %v88_v2  ;;  %v91_v7 = vld [vmem:[%s1691_s1 + $0x28] sm:$0xff]  ;;  %v26_v8 = vld [vmem:[%s1690_s0] sm:$0xff]  ;;  %v56_v9 = vld [vmem:[%s1690_s0 + $0xf0] sm:$0xff] }
  0x15   :  { %1026 = vmatprep.subr.bf16.mxu0 %v1025_v3  ;;  %1045 = vmatprep.subr.bf16.mxu1 %v1025_v3  ;;  %v1033_v10 = vpack.c.bf16 %v91_v7, %v90_v6  ;;  %v92_v11 = vld [vmem:[%s1691_s1 + $0x30] sm:$0xff]  ;;  %v93_v12 = vld [vmem:[%s1691_s1 + $0x38] sm:$0xff]  ;;  %v94_v14 = vld [vmem:[%s1691_s1 + $0x40] sm:$0xff] }
  0x16   :  { %1028 = vmatpush3.bf16.msra.mxu0 %v1025_v3  ;;  %1051 = vmatpush3.bf16.msra.mxu1 %v1025_v3  ;;  %v1037_v13 = vpack.c.bf16 %v93_v12, %v92_v11  ;;  %v95_v15 = vld [vmem:[%s1691_s1 + $0x48] sm:$0xff]  ;;  %v96_v17 = vld [vmem:[%s1691_s1 + $0x50] sm:$0x1]  ;;  %v57_v19 = vld [vmem:[%s1690_s0 + $0xf8] sm:$0xff] }
  0x17   :  { %1030 = vmatprep.subr.bf16.mxu0 %v1029_v5  ;;  %1046 = vmatprep.subr.bf16.mxu1 %v1029_v5  ;;  %v1041_v16 = vpack.c.bf16 %v95_v15, %v94_v14  ;;  %v27_v18 = vld [vmem:[%s1690_s0 + $0x8] sm:$0xff]  ;;  %v28_v20 = vld [vmem:[%s1690_s0 + $0x10] sm:$0xff]  ;;  %v58_v21 = vld [vmem:[%s1690_s0 + $0x100] sm:$0xff] }
  0x18   :  { %935 = vmatprep.mubr.msk.f32.mxu0 %vm104_vm0, %v26_v8  ;;  %980 = vmatprep.mubr.msk.f32.mxu1 %vm104_vm0, %v56_v9  ;;  %v29_v22 = vld [vmem:[%s1690_s0 + $0x18] sm:$0xff]  ;;  %v59_v23 = vld [vmem:[%s1690_s0 + $0x108] sm:$0xff]  ;;  %v30_v24 = vld [vmem:[%s1690_s0 + $0x20] sm:$0xff] }
  0x19   :  { %v60_v25 = vld [vmem:[%s1690_s0 + $0x110] sm:$0xff]  ;;  %v31_v26 = vld [vmem:[%s1690_s0 + $0x28] sm:$0xff]  ;;  %v61_v27 = vld [vmem:[%s1690_s0 + $0x118] sm:$0xff] }
  0x1a   :  { %1032 = vmatpush3.bf16.msra.mxu0 %v1029_v5  ;;  %1052 = vmatpush3.bf16.msra.mxu1 %v1029_v5  ;;  %v32_v28 = vld [vmem:[%s1690_s0 + $0x30] sm:$0xff]  ;;  %v62_v29 = vld [vmem:[%s1690_s0 + $0x120] sm:$0xff]  ;;  %v33_v30 = vld [vmem:[%s1690_s0 + $0x38] sm:$0xff] }
  0x1b   :  { %1034 = vmatprep.subr.bf16.mxu0 %v1033_v10  ;;  %1047 = vmatprep.subr.bf16.mxu1 %v1033_v10  ;;  %v63_v31 = vld [vmem:[%s1690_s0 + $0x128] sm:$0xff]  ;;  %v34_v32 = vld [vmem:[%s1690_s0 + $0x40] sm:$0xff]  ;;  %v64_v33 = vld [vmem:[%s1690_s0 + $0x130] sm:$0xff] }
  0x1c   :  { %v35_v34 = vld [vmem:[%s1690_s0 + $0x48] sm:$0xff]  ;;  %v65_v35 = vld [vmem:[%s1690_s0 + $0x138] sm:$0xff]  ;;  %v36_v36 = vld [vmem:[%s1690_s0 + $0x50] sm:$0xff] }
  0x1d   :  { %v66_v37 = vld [vmem:[%s1690_s0 + $0x140] sm:$0xff]  ;;  %v37_v38 = vld [vmem:[%s1690_s0 + $0x58] sm:$0xff]  ;;  %v67_v39 = vld [vmem:[%s1690_s0 + $0x148] sm:$0xff] }
  0x1e   :  { %1036 = vmatpush3.bf16.msra.mxu0 %v1033_v10  ;;  %1053 = vmatpush3.bf16.msra.mxu1 %v1033_v10  ;;  %v38_v40 = vld [vmem:[%s1690_s0 + $0x60] sm:$0xff]  ;;  %v68_v41 = vld [vmem:[%s1690_s0 + $0x150] sm:$0xff]  ;;  %v39_v42 = vld [vmem:[%s1690_s0 + $0x68] sm:$0xff] }
  0x1f   :  { %1038 = vmatprep.subr.bf16.mxu0 %v1037_v13  ;;  %1048 = vmatprep.subr.bf16.mxu1 %v1037_v13  ;;  %v69_v43 = vld [vmem:[%s1690_s0 + $0x158] sm:$0xff]  ;;  %v40_v44 = vld [vmem:[%s1690_s0 + $0x70] sm:$0xff]  ;;  %v70_v45 = vld [vmem:[%s1690_s0 + $0x160] sm:$0xff] }
  0x20   :  { %v41_v46 = vld [vmem:[%s1690_s0 + $0x78] sm:$0xff]  ;;  %v71_v47 = vld [vmem:[%s1690_s0 + $0x168] sm:$0xff]  ;;  %v42_v48 = vld [vmem:[%s1690_s0 + $0x80] sm:$0xff] }
  0x21   :  { %v72_v49 = vld [vmem:[%s1690_s0 + $0x170] sm:$0xff]  ;;  %v43_v50 = vld [vmem:[%s1690_s0 + $0x88] sm:$0xff]  ;;  %v73_v51 = vld [vmem:[%s1690_s0 + $0x178] sm:$0xff] }
  0x22   :  { %1040 = vmatpush3.bf16.msra.mxu0 %v1037_v13  ;;  %1054 = vmatpush3.bf16.msra.mxu1 %v1037_v13  ;;  %v44_v52 = vld [vmem:[%s1690_s0 + $0x90] sm:$0xff]  ;;  %v74_v53 = vld [vmem:[%s1690_s0 + $0x180] sm:$0xff]  ;;  %v45_v54 = vld [vmem:[%s1690_s0 + $0x98] sm:$0xff] }
  0x23   :  { %1042 = vmatprep.subr.bf16.mxu0 %v1041_v16  ;;  %1049 = vmatprep.subr.bf16.mxu1 %v1041_v16  ;;  %v75_v55 = vld [vmem:[%s1690_s0 + $0x188] sm:$0xff]  ;;  %v46_v56 = vld [vmem:[%s1690_s0 + $0xa0] sm:$0xff]  ;;  %v76_v57 = vld [vmem:[%s1690_s0 + $0x190] sm:$0xff] }
  0x24   :  { %v47_v58 = vld [vmem:[%s1690_s0 + $0xa8] sm:$0xff]  ;;  %v77_v59 = vld [vmem:[%s1690_s0 + $0x198] sm:$0xff]  ;;  %v48_v60 = vld [vmem:[%s1690_s0 + $0xb0] sm:$0xff] }
  0x25   :  { %v78_v61 = vld [vmem:[%s1690_s0 + $0x1a0] sm:$0xff]  ;;  %v49_v62 = vld [vmem:[%s1690_s0 + $0xb8] sm:$0xff]  ;;  %v79_v63 = vld [vmem:[%s1690_s0 + $0x1a8] sm:$0xff] }
  0x26   :  { %1044 = vmatpush3.bf16.msra.mxu0 %v1041_v16  ;;  %1055 = vmatpush3.bf16.msra.mxu1 %v1041_v16  ;;  %v50_v0 = vld [vmem:[%s1690_s0 + $0xc0] sm:$0xff]  ;;  %v80_v1 = vld [vmem:[%s1690_s0 + $0x1b0] sm:$0xff]  ;;  %v51_v2 = vld [vmem:[%s1690_s0 + $0xc8] sm:$0xff] }
  0x27   :  { %933 = vmatprep.subr.msk.mxu0 %vm285_vm1, %v96_v17  ;;  %1050 = vmatprep.subr.msk.mxu1 %vm285_vm1, %v96_v17  ;;  %v81_v3 = vld [vmem:[%s1690_s0 + $0x1b8] sm:$0xff]  ;;  %v52_v4 = vld [vmem:[%s1690_s0 + $0xd0] sm:$0xff]  ;;  %v82_v5 = vld [vmem:[%s1690_s0 + $0x1c0] sm:$0xff] }
  0x28   :  { %v53_v6 = vld [vmem:[%s1690_s0 + $0xd8] sm:$0xff]  ;;  %v83_v7 = vld [vmem:[%s1690_s0 + $0x1c8] sm:$0xff]  ;;  %v54_v8 = vld [vmem:[%s1690_s0 + $0xe0] sm:$0xff] }
  0x29   :  { %v84_v9 = vld [vmem:[%s1690_s0 + $0x1d0] sm:$0xff]  ;;  %v55_v10 = vld [vmem:[%s1690_s0 + $0xe8] sm:$0xff]  ;;  %v85_v11 = vld [vmem:[%s1690_s0 + $0x1d8] sm:$0xff] }
  0x2a   :  { %934 = vmatpush3.msk.msra.mxu0 %vm285_vm1, %v96_v17  ;;  %1056 = vmatpush3.msk.msra.mxu1 %vm285_vm1, %v96_v17  ;;  %v1388_v12 = vld [vmem:[#allocation2] ss:$0 sm:$0xff] }
  0x2b   :  { %936 = vmatmul.mubr.msk.f32.vlgmr.msra.gmra.mrb[0].mxu0 %vm104_vm0, %v27_v18  ;;  %981 = vmatmul.mubr.msk.f32.vlgmr.msra.gmra.mrb[0].mxu1 %vm104_vm0, %v57_v19 }
  0x2c   :  { %938 = vmatprep.mubr.msk.f32.mxu0 %vm104_vm0, %v28_v20  ;;  %983 = vmatprep.mubr.msk.f32.mxu1 %vm104_vm0, %v58_v21 }
  0x2f   :  { %939 = vmatmul.mubr.msk.f32.gmra.mrb[2].mxu0 %vm104_vm0, %v29_v22  ;;  %984 = vmatmul.mubr.msk.f32.gmra.mrb[2].mxu1 %vm104_vm0, %v59_v23 }
  0x30   :  { %941 = vmatprep.mubr.msk.f32.mxu0 %vm104_vm0, %v30_v24  ;;  %986 = vmatprep.mubr.msk.f32.mxu1 %vm104_vm0, %v60_v25 }
  0x33   :  { %942 = vmatmul.mubr.msk.f32.gmra.mrb[4].mxu0 %vm104_vm0, %v31_v26  ;;  %987 = vmatmul.mubr.msk.f32.gmra.mrb[4].mxu1 %vm104_vm0, %v61_v27 }
  0x34   :  { %944 = vmatprep.mubr.msk.f32.mxu0 %vm104_vm0, %v32_v28  ;;  %989 = vmatprep.mubr.msk.f32.mxu1 %vm104_vm0, %v62_v29 }
  0x37   :  { %945 = vmatmul.mubr.msk.f32.gmra.mrb[6].mxu0 %vm104_vm0, %v33_v30  ;;  %990 = vmatmul.mubr.msk.f32.gmra.mrb[6].mxu1 %vm104_vm0, %v63_v31 }
  0x38   :  { %947 = vmatprep.mubr.msk.f32.mxu0 %vm104_vm0, %v34_v32  ;;  %992 = vmatprep.mubr.msk.f32.mxu1 %vm104_vm0, %v64_v33 }
  0x3b   :  { %948 = vmatmul.mubr.msk.f32.gmra.mrb[8].mxu0 %vm104_vm0, %v35_v34  ;;  %993 = vmatmul.mubr.msk.f32.gmra.mrb[8].mxu1 %vm104_vm0, %v65_v35 }
  0x3c   :  { %950 = vmatprep.mubr.msk.f32.mxu0 %vm104_vm0, %v36_v36  ;;  %995 = vmatprep.mubr.msk.f32.mxu1 %vm104_vm0, %v66_v37 }
  0x3f   :  { %951 = vmatmul.mubr.msk.f32.gmra.mrb[10].mxu0 %vm104_vm0, %v37_v38  ;;  %996 = vmatmul.mubr.msk.f32.gmra.mrb[10].mxu1 %vm104_vm0, %v67_v39 }
  0x40   :  { %953 = vmatprep.mubr.msk.f32.mxu0 %vm104_vm0, %v38_v40  ;;  %998 = vmatprep.mubr.msk.f32.mxu1 %vm104_vm0, %v68_v41 }
  0x43   :  { %954 = vmatmul.mubr.msk.f32.gmra.mrb[12].mxu0 %vm104_vm0, %v39_v42  ;;  %999 = vmatmul.mubr.msk.f32.gmra.mrb[12].mxu1 %vm104_vm0, %v69_v43 }
  0x44   :  { %956 = vmatprep.mubr.msk.f32.mxu0 %vm104_vm0, %v40_v44  ;;  %1001 = vmatprep.mubr.msk.f32.mxu1 %vm104_vm0, %v70_v45 }
  0x47   :  { %957 = vmatmul.mubr.msk.f32.gmra.mrb[14].mxu0 %vm104_vm0, %v41_v46  ;;  %1002 = vmatmul.mubr.msk.f32.gmra.mrb[14].mxu1 %vm104_vm0, %v71_v47 }
  0x48   :  { %959 = vmatprep.mubr.msk.f32.mxu0 %vm104_vm0, %v42_v48  ;;  %1004 = vmatprep.mubr.msk.f32.mxu1 %vm104_vm0, %v72_v49 }
  0x4b   :  { %960 = vmatmul.mubr.msk.f32.gmra.mrb[16].mxu0 %vm104_vm0, %v43_v50  ;;  %1005 = vmatmul.mubr.msk.f32.gmra.mrb[16].mxu1 %vm104_vm0, %v73_v51 }
  0x4c   :  { %962 = vmatprep.mubr.msk.f32.mxu0 %vm104_vm0, %v44_v52  ;;  %1007 = vmatprep.mubr.msk.f32.mxu1 %vm104_vm0, %v74_v53 }
  0x4f   :  { %963 = vmatmul.mubr.msk.f32.gmra.mrb[18].mxu0 %vm104_vm0, %v45_v54  ;;  %1008 = vmatmul.mubr.msk.f32.gmra.mrb[18].mxu1 %vm104_vm0, %v75_v55 }
  0x50   :  { %965 = vmatprep.mubr.msk.f32.mxu0 %vm104_vm0, %v46_v56  ;;  %1010 = vmatprep.mubr.msk.f32.mxu1 %vm104_vm0, %v76_v57 }
  0x53   :  { %966 = vmatmul.mubr.msk.f32.gmra.mrb[20].mxu0 %vm104_vm0, %v47_v58  ;;  %1011 = vmatmul.mubr.msk.f32.gmra.mrb[20].mxu1 %vm104_vm0, %v77_v59 }
  0x54   :  { %968 = vmatprep.mubr.msk.f32.mxu0 %vm104_vm0, %v48_v60  ;;  %1013 = vmatprep.mubr.msk.f32.mxu1 %vm104_vm0, %v78_v61 }
  0x57   :  { %969 = vmatmul.mubr.msk.f32.gmra.mrb[22].mxu0 %vm104_vm0, %v49_v62  ;;  %1014 = vmatmul.mubr.msk.f32.gmra.mrb[22].mxu1 %vm104_vm0, %v79_v63 }
  0x58   :  { %971 = vmatprep.mubr.msk.f32.mxu0 %vm104_vm0, %v50_v0  ;;  %1016 = vmatprep.mubr.msk.f32.mxu1 %vm104_vm0, %v80_v1 }
  0x5b   :  { %972 = vmatmul.mubr.msk.f32.gmra.mrb[24].mxu0 %vm104_vm0, %v51_v2  ;;  %1017 = vmatmul.mubr.msk.f32.gmra.mrb[24].mxu1 %vm104_vm0, %v81_v3 }
  0x5c   :  { %974 = vmatprep.mubr.msk.f32.mxu0 %vm104_vm0, %v52_v4  ;;  %1019 = vmatprep.mubr.msk.f32.mxu1 %vm104_vm0, %v82_v5 }
  0x5f   :  { %975 = vmatmul.mubr.msk.f32.gmra.mrb[26].mxu0 %vm104_vm0, %v53_v6  ;;  %1020 = vmatmul.mubr.msk.f32.gmra.mrb[26].mxu1 %vm104_vm0, %v83_v7 }
  0x60   :  { %977 = vmatprep.mubr.msk.f32.mxu0 %vm104_vm0, %v54_v8  ;;  %1022 = vmatprep.mubr.msk.f32.mxu1 %vm104_vm0, %v84_v9 }
  0x63   :  { %978 = vmatmul.mubr.msk.f32.gmra.mrb[28].mxu0 %vm104_vm0, %v55_v10  ;;  %1023 = vmatmul.mubr.msk.f32.gmra.mrb[28].mxu1 %vm104_vm0, %v85_v11 }
  0xfe   :  { %v937_v13 = vpop.f32.mrb[0].mxu0  ;;  %v982_v14 = vpop.f32.mrb[0].mxu1 }
  0xff   :  { %v361_v15 = vadd.f32 %v937_v13, %v1388_v12  ;;  %v511_v16 = vadd.f32 %v982_v14, %v1388_v12  ;;  %v355_v17 = vpop.f32.mrb[1].mxu0  ;;  %v505_v18 = vpop.f32.mrb[1].mxu1 }
 0x100   :  { %v356_v19 = vadd.f32 %v1388_v12, %v355_v17  ;;  %v506_v20 = vadd.f32 %v1388_v12, %v505_v18 }
 0x101   :  { %v655_v21 = vmax.f32 %v361_v15, 0.0  ;;  %v685_v22 = vmax.f32 %v511_v16, 0.0 }
 0x102   :  { %v654_v23 = vmax.f32 %v356_v19, 0.0  ;;  %v684_v24 = vmax.f32 %v506_v20, 0.0  ;;  %v940_v25 = vpop.f32.mrb[2].mxu0  ;;  %v985_v26 = vpop.f32.mrb[2].mxu1 }
 0x103   :  { %716 = vst.msk [vmem:[%s1693_s3 + $0x8] sm:$0xff] %vm714_vm2, %v655_v21  ;;  %746 = vst.msk [vmem:[%s1693_s3 + $0xf8] sm:$0xff] %vm714_vm2, %v685_v22  ;;  %v371_v27 = vadd.f32 %v940_v25, %v1388_v12  ;;  %v521_v28 = vadd.f32 %v985_v26, %v1388_v12  ;;  %v365_v29 = vpop.f32.mrb[3].mxu0  ;;  %v515_v30 = vpop.f32.mrb[3].mxu1 }
 0x104   :  { %715 = vst.msk [vmem:[%s1693_s3] sm:$0xff] %vm714_vm2, %v654_v23  ;;  %745 = vst.msk [vmem:[%s1693_s3 + $0xf0] sm:$0xff] %vm714_vm2, %v684_v24  ;;  %v366_v31 = vadd.f32 %v1388_v12, %v365_v29  ;;  %v516_v32 = vadd.f32 %v1388_v12, %v515_v30 }
 0x105   :  { %v657_v33 = vmax.f32 %v371_v27, 0.0  ;;  %v687_v34 = vmax.f32 %v521_v28, 0.0 }
 0x106   :  { %v656_v35 = vmax.f32 %v366_v31, 0.0  ;;  %v686_v36 = vmax.f32 %v516_v32, 0.0  ;;  %v943_v37 = vpop.f32.mrb[4].mxu0  ;;  %v988_v38 = vpop.f32.mrb[4].mxu1 }
 0x107   :  { %718 = vst.msk [vmem:[%s1693_s3 + $0x18] sm:$0xff] %vm714_vm2, %v657_v33  ;;  %748 = vst.msk [vmem:[%s1693_s3 + $0x108] sm:$0xff] %vm714_vm2, %v687_v34  ;;  %v381_v39 = vadd.f32 %v943_v37, %v1388_v12  ;;  %v531_v40 = vadd.f32 %v988_v38, %v1388_v12  ;;  %v375_v41 = vpop.f32.mrb[5].mxu0  ;;  %v525_v42 = vpop.f32.mrb[5].mxu1 }
 0x108   :  { %717 = vst.msk [vmem:[%s1693_s3 + $0x10] sm:$0xff] %vm714_vm2, %v656_v35  ;;  %747 = vst.msk [vmem:[%s1693_s3 + $0x100] sm:$0xff] %vm714_vm2, %v686_v36  ;;  %v376_v43 = vadd.f32 %v1388_v12, %v375_v41  ;;  %v526_v44 = vadd.f32 %v1388_v12, %v525_v42 }
 0x109   :  { %v659_v45 = vmax.f32 %v381_v39, 0.0  ;;  %v689_v46 = vmax.f32 %v531_v40, 0.0 }
 0x10a   :  { %v658_v47 = vmax.f32 %v376_v43, 0.0  ;;  %v688_v48 = vmax.f32 %v526_v44, 0.0  ;;  %v946_v49 = vpop.f32.mrb[6].mxu0  ;;  %v991_v50 = vpop.f32.mrb[6].mxu1 }
 0x10b   :  { %720 = vst.msk [vmem:[%s1693_s3 + $0x28] sm:$0xff] %vm714_vm2, %v659_v45  ;;  %750 = vst.msk [vmem:[%s1693_s3 + $0x118] sm:$0xff] %vm714_vm2, %v689_v46  ;;  %v391_v51 = vadd.f32 %v946_v49, %v1388_v12  ;;  %v541_v52 = vadd.f32 %v991_v50, %v1388_v12  ;;  %v385_v53 = vpop.f32.mrb[7].mxu0  ;;  %v535_v54 = vpop.f32.mrb[7].mxu1 }
 0x10c   :  { %719 = vst.msk [vmem:[%s1693_s3 + $0x20] sm:$0xff] %vm714_vm2, %v658_v47  ;;  %749 = vst.msk [vmem:[%s1693_s3 + $0x110] sm:$0xff] %vm714_vm2, %v688_v48  ;;  %v386_v55 = vadd.f32 %v1388_v12, %v385_v53  ;;  %v536_v56 = vadd.f32 %v1388_v12, %v535_v54 }
 0x10d   :  { %v661_v57 = vmax.f32 %v391_v51, 0.0  ;;  %v691_v58 = vmax.f32 %v541_v52, 0.0 }
 0x10e   :  { %v660_v59 = vmax.f32 %v386_v55, 0.0  ;;  %v690_v60 = vmax.f32 %v536_v56, 0.0  ;;  %v949_v61 = vpop.f32.mrb[8].mxu0  ;;  %v994_v62 = vpop.f32.mrb[8].mxu1 }
 0x10f   :  { %722 = vst.msk [vmem:[%s1693_s3 + $0x38] sm:$0xff] %vm714_vm2, %v661_v57  ;;  %752 = vst.msk [vmem:[%s1693_s3 + $0x128] sm:$0xff] %vm714_vm2, %v691_v58  ;;  %v401_v63 = vadd.f32 %v949_v61, %v1388_v12  ;;  %v551_v0 = vadd.f32 %v994_v62, %v1388_v12  ;;  %v395_v1 = vpop.f32.mrb[9].mxu0  ;;  %v545_v2 = vpop.f32.mrb[9].mxu1 }
 0x110   :  { %721 = vst.msk [vmem:[%s1693_s3 + $0x30] sm:$0xff] %vm714_vm2, %v660_v59  ;;  %751 = vst.msk [vmem:[%s1693_s3 + $0x120] sm:$0xff] %vm714_vm2, %v690_v60  ;;  %v396_v3 = vadd.f32 %v1388_v12, %v395_v1  ;;  %v546_v4 = vadd.f32 %v1388_v12, %v545_v2 }
 0x111   :  { %v663_v5 = vmax.f32 %v401_v63, 0.0  ;;  %v693_v6 = vmax.f32 %v551_v0, 0.0 }
 0x112   :  { %v662_v7 = vmax.f32 %v396_v3, 0.0  ;;  %v692_v8 = vmax.f32 %v546_v4, 0.0  ;;  %v952_v9 = vpop.f32.mrb[10].mxu0  ;;  %v997_v10 = vpop.f32.mrb[10].mxu1 }
 0x113   :  { %724 = vst.msk [vmem:[%s1693_s3 + $0x48] sm:$0xff] %vm714_vm2, %v663_v5  ;;  %754 = vst.msk [vmem:[%s1693_s3 + $0x138] sm:$0xff] %vm714_vm2, %v693_v6  ;;  %v411_v11 = vadd.f32 %v952_v9, %v1388_v12  ;;  %v561_v13 = vadd.f32 %v997_v10, %v1388_v12  ;;  %v405_v14 = vpop.f32.mrb[11].mxu0  ;;  %v555_v15 = vpop.f32.mrb[11].mxu1 }
 0x114   :  { %723 = vst.msk [vmem:[%s1693_s3 + $0x40] sm:$0xff] %vm714_vm2, %v662_v7  ;;  %753 = vst.msk [vmem:[%s1693_s3 + $0x130] sm:$0xff] %vm714_vm2, %v692_v8  ;;  %v406_v16 = vadd.f32 %v1388_v12, %v405_v14  ;;  %v556_v17 = vadd.f32 %v1388_v12, %v555_v15 }
 0x115   :  { %v665_v18 = vmax.f32 %v411_v11, 0.0  ;;  %v695_v19 = vmax.f32 %v561_v13, 0.0 }
 0x116   :  { %v664_v20 = vmax.f32 %v406_v16, 0.0  ;;  %v694_v21 = vmax.f32 %v556_v17, 0.0  ;;  %v955_v22 = vpop.f32.mrb[12].mxu0  ;;  %v1000_v23 = vpop.f32.mrb[12].mxu1 }
 0x117   :  { %726 = vst.msk [vmem:[%s1693_s3 + $0x58] sm:$0xff] %vm714_vm2, %v665_v18  ;;  %756 = vst.msk [vmem:[%s1693_s3 + $0x148] sm:$0xff] %vm714_vm2, %v695_v19  ;;  %v421_v24 = vadd.f32 %v955_v22, %v1388_v12  ;;  %v571_v25 = vadd.f32 %v1000_v23, %v1388_v12  ;;  %v415_v26 = vpop.f32.mrb[13].mxu0  ;;  %v565_v27 = vpop.f32.mrb[13].mxu1 }
 0x118   :  { %725 = vst.msk [vmem:[%s1693_s3 + $0x50] sm:$0xff] %vm714_vm2, %v664_v20  ;;  %755 = vst.msk [vmem:[%s1693_s3 + $0x140] sm:$0xff] %vm714_vm2, %v694_v21  ;;  %v416_v28 = vadd.f32 %v1388_v12, %v415_v26  ;;  %v566_v29 = vadd.f32 %v1388_v12, %v565_v27 }
 0x119   :  { %v667_v30 = vmax.f32 %v421_v24, 0.0  ;;  %v697_v31 = vmax.f32 %v571_v25, 0.0 }
 0x11a   :  { %v666_v32 = vmax.f32 %v416_v28, 0.0  ;;  %v696_v33 = vmax.f32 %v566_v29, 0.0  ;;  %v958_v34 = vpop.f32.mrb[14].mxu0  ;;  %v1003_v35 = vpop.f32.mrb[14].mxu1 }
 0x11b   :  { %728 = vst.msk [vmem:[%s1693_s3 + $0x68] sm:$0xff] %vm714_vm2, %v667_v30  ;;  %758 = vst.msk [vmem:[%s1693_s3 + $0x158] sm:$0xff] %vm714_vm2, %v697_v31  ;;  %v431_v36 = vadd.f32 %v958_v34, %v1388_v12  ;;  %v581_v37 = vadd.f32 %v1003_v35, %v1388_v12  ;;  %v425_v38 = vpop.f32.mrb[15].mxu0  ;;  %v575_v39 = vpop.f32.mrb[15].mxu1 }
 0x11c   :  { %727 = vst.msk [vmem:[%s1693_s3 + $0x60] sm:$0xff] %vm714_vm2, %v666_v32  ;;  %757 = vst.msk [vmem:[%s1693_s3 + $0x150] sm:$0xff] %vm714_vm2, %v696_v33  ;;  %v426_v40 = vadd.f32 %v1388_v12, %v425_v38  ;;  %v576_v41 = vadd.f32 %v1388_v12, %v575_v39 }
 0x11d   :  { %v669_v42 = vmax.f32 %v431_v36, 0.0  ;;  %v699_v43 = vmax.f32 %v581_v37, 0.0 }
 0x11e   :  { %v668_v44 = vmax.f32 %v426_v40, 0.0  ;;  %v698_v45 = vmax.f32 %v576_v41, 0.0  ;;  %v961_v46 = vpop.f32.mrb[16].mxu0  ;;  %v1006_v47 = vpop.f32.mrb[16].mxu1 }
 0x11f   :  { %730 = vst.msk [vmem:[%s1693_s3 + $0x78] sm:$0xff] %vm714_vm2, %v669_v42  ;;  %760 = vst.msk [vmem:[%s1693_s3 + $0x168] sm:$0xff] %vm714_vm2, %v699_v43  ;;  %v441_v48 = vadd.f32 %v961_v46, %v1388_v12  ;;  %v591_v49 = vadd.f32 %v1006_v47, %v1388_v12  ;;  %v435_v50 = vpop.f32.mrb[17].mxu0  ;;  %v585_v51 = vpop.f32.mrb[17].mxu1 }
 0x120   :  { %729 = vst.msk [vmem:[%s1693_s3 + $0x70] sm:$0xff] %vm714_vm2, %v668_v44  ;;  %759 = vst.msk [vmem:[%s1693_s3 + $0x160] sm:$0xff] %vm714_vm2, %v698_v45  ;;  %v436_v52 = vadd.f32 %v1388_v12, %v435_v50  ;;  %v586_v53 = vadd.f32 %v1388_v12, %v585_v51 }
 0x121   :  { %v671_v54 = vmax.f32 %v441_v48, 0.0  ;;  %v701_v55 = vmax.f32 %v591_v49, 0.0 }
 0x122   :  { %v670_v56 = vmax.f32 %v436_v52, 0.0  ;;  %v700_v57 = vmax.f32 %v586_v53, 0.0  ;;  %v964_v58 = vpop.f32.mrb[18].mxu0  ;;  %v1009_v59 = vpop.f32.mrb[18].mxu1 }
 0x123   :  { %732 = vst.msk [vmem:[%s1693_s3 + $0x88] sm:$0xff] %vm714_vm2, %v671_v54  ;;  %762 = vst.msk [vmem:[%s1693_s3 + $0x178] sm:$0xff] %vm714_vm2, %v701_v55  ;;  %v451_v60 = vadd.f32 %v964_v58, %v1388_v12  ;;  %v601_v61 = vadd.f32 %v1009_v59, %v1388_v12  ;;  %v445_v62 = vpop.f32.mrb[19].mxu0  ;;  %v595_v63 = vpop.f32.mrb[19].mxu1 }
 0x124   :  { %731 = vst.msk [vmem:[%s1693_s3 + $0x80] sm:$0xff] %vm714_vm2, %v670_v56  ;;  %761 = vst.msk [vmem:[%s1693_s3 + $0x170] sm:$0xff] %vm714_vm2, %v700_v57  ;;  %v446_v0 = vadd.f32 %v1388_v12, %v445_v62  ;;  %v596_v1 = vadd.f32 %v1388_v12, %v595_v63 }
 0x125   :  { %v673_v2 = vmax.f32 %v451_v60, 0.0  ;;  %v703_v3 = vmax.f32 %v601_v61, 0.0 }
 0x126   :  { %v672_v4 = vmax.f32 %v446_v0, 0.0  ;;  %v702_v5 = vmax.f32 %v596_v1, 0.0  ;;  %v967_v6 = vpop.f32.mrb[20].mxu0  ;;  %v1012_v7 = vpop.f32.mrb[20].mxu1 }
 0x127   :  { %734 = vst.msk [vmem:[%s1693_s3 + $0x98] sm:$0xff] %vm714_vm2, %v673_v2  ;;  %764 = vst.msk [vmem:[%s1693_s3 + $0x188] sm:$0xff] %vm714_vm2, %v703_v3  ;;  %v461_v8 = vadd.f32 %v967_v6, %v1388_v12  ;;  %v611_v9 = vadd.f32 %v1012_v7, %v1388_v12  ;;  %v455_v10 = vpop.f32.mrb[21].mxu0  ;;  %v605_v11 = vpop.f32.mrb[21].mxu1 }
 0x128   :  { %733 = vst.msk [vmem:[%s1693_s3 + $0x90] sm:$0xff] %vm714_vm2, %v672_v4  ;;  %763 = vst.msk [vmem:[%s1693_s3 + $0x180] sm:$0xff] %vm714_vm2, %v702_v5  ;;  %v456_v13 = vadd.f32 %v1388_v12, %v455_v10  ;;  %v606_v14 = vadd.f32 %v1388_v12, %v605_v11 }
 0x129   :  { %v675_v15 = vmax.f32 %v461_v8, 0.0  ;;  %v705_v16 = vmax.f32 %v611_v9, 0.0 }
 0x12a   :  { %v674_v17 = vmax.f32 %v456_v13, 0.0  ;;  %v704_v18 = vmax.f32 %v606_v14, 0.0  ;;  %v970_v19 = vpop.f32.mrb[22].mxu0  ;;  %v1015_v20 = vpop.f32.mrb[22].mxu1 }
 0x12b   :  { %736 = vst.msk [vmem:[%s1693_s3 + $0xa8] sm:$0xff] %vm714_vm2, %v675_v15  ;;  %766 = vst.msk [vmem:[%s1693_s3 + $0x198] sm:$0xff] %vm714_vm2, %v705_v16  ;;  %v471_v21 = vadd.f32 %v970_v19, %v1388_v12  ;;  %v621_v22 = vadd.f32 %v1015_v20, %v1388_v12  ;;  %v465_v23 = vpop.f32.mrb[23].mxu0  ;;  %v615_v24 = vpop.f32.mrb[23].mxu1 }
 0x12c   :  { %735 = vst.msk [vmem:[%s1693_s3 + $0xa0] sm:$0xff] %vm714_vm2, %v674_v17  ;;  %765 = vst.msk [vmem:[%s1693_s3 + $0x190] sm:$0xff] %vm714_vm2, %v704_v18  ;;  %v466_v25 = vadd.f32 %v1388_v12, %v465_v23  ;;  %v616_v26 = vadd.f32 %v1388_v12, %v615_v24 }
 0x12d   :  { %v677_v27 = vmax.f32 %v471_v21, 0.0  ;;  %v707_v28 = vmax.f32 %v621_v22, 0.0 }
 0x12e   :  { %v676_v29 = vmax.f32 %v466_v25, 0.0  ;;  %v706_v30 = vmax.f32 %v616_v26, 0.0  ;;  %v973_v31 = vpop.f32.mrb[24].mxu0  ;;  %v1018_v32 = vpop.f32.mrb[24].mxu1 }
 0x12f   :  { %738 = vst.msk [vmem:[%s1693_s3 + $0xb8] sm:$0xff] %vm714_vm2, %v677_v27  ;;  %768 = vst.msk [vmem:[%s1693_s3 + $0x1a8] sm:$0xff] %vm714_vm2, %v707_v28  ;;  %v481_v33 = vadd.f32 %v973_v31, %v1388_v12  ;;  %v631_v34 = vadd.f32 %v1018_v32, %v1388_v12  ;;  %v475_v35 = vpop.f32.mrb[25].mxu0  ;;  %v625_v36 = vpop.f32.mrb[25].mxu1 }
 0x130   :  { %737 = vst.msk [vmem:[%s1693_s3 + $0xb0] sm:$0xff] %vm714_vm2, %v676_v29  ;;  %767 = vst.msk [vmem:[%s1693_s3 + $0x1a0] sm:$0xff] %vm714_vm2, %v706_v30  ;;  %v476_v37 = vadd.f32 %v1388_v12, %v475_v35  ;;  %v626_v38 = vadd.f32 %v1388_v12, %v625_v36 }
 0x131   :  { %v679_v39 = vmax.f32 %v481_v33, 0.0  ;;  %v709_v40 = vmax.f32 %v631_v34, 0.0 }
 0x132   :  { %v678_v41 = vmax.f32 %v476_v37, 0.0  ;;  %v708_v42 = vmax.f32 %v626_v38, 0.0  ;;  %v976_v43 = vpop.f32.mrb[26].mxu0  ;;  %v1021_v44 = vpop.f32.mrb[26].mxu1 }
 0x133   :  { %740 = vst.msk [vmem:[%s1693_s3 + $0xc8] sm:$0xff] %vm714_vm2, %v679_v39  ;;  %770 = vst.msk [vmem:[%s1693_s3 + $0x1b8] sm:$0xff] %vm714_vm2, %v709_v40  ;;  %v491_v45 = vadd.f32 %v976_v43, %v1388_v12  ;;  %v641_v46 = vadd.f32 %v1021_v44, %v1388_v12  ;;  %v485_v47 = vpop.f32.mrb[27].mxu0  ;;  %v635_v48 = vpop.f32.mrb[27].mxu1 }
 0x134   :  { %739 = vst.msk [vmem:[%s1693_s3 + $0xc0] sm:$0xff] %vm714_vm2, %v678_v41  ;;  %769 = vst.msk [vmem:[%s1693_s3 + $0x1b0] sm:$0xff] %vm714_vm2, %v708_v42  ;;  %v486_v49 = vadd.f32 %v1388_v12, %v485_v47  ;;  %v636_v50 = vadd.f32 %v1388_v12, %v635_v48 }
 0x135   :  { %v681_v51 = vmax.f32 %v491_v45, 0.0  ;;  %v711_v52 = vmax.f32 %v641_v46, 0.0 }
 0x136   :  { %v680_v53 = vmax.f32 %v486_v49, 0.0  ;;  %v710_v54 = vmax.f32 %v636_v50, 0.0  ;;  %v979_v55 = vpop.f32.mrb[28].mxu0  ;;  %v1024_v56 = vpop.f32.mrb[28].mxu1 }
 0x137   :  { %742 = vst.msk [vmem:[%s1693_s3 + $0xd8] sm:$0xff] %vm714_vm2, %v681_v51  ;;  %772 = vst.msk [vmem:[%s1693_s3 + $0x1c8] sm:$0xff] %vm714_vm2, %v711_v52  ;;  %v501_v57 = vadd.f32 %v979_v55, %v1388_v12  ;;  %v651_v58 = vadd.f32 %v1024_v56, %v1388_v12  ;;  %v495_v59 = vpop.f32.mrb[29].mxu0  ;;  %v645_v60 = vpop.f32.mrb[29].mxu1 }
 0x138   :  { %741 = vst.msk [vmem:[%s1693_s3 + $0xd0] sm:$0xff] %vm714_vm2, %v680_v53  ;;  %771 = vst.msk [vmem:[%s1693_s3 + $0x1c0] sm:$0xff] %vm714_vm2, %v710_v54  ;;  %v496_v61 = vadd.f32 %v1388_v12, %v495_v59  ;;  %v646_v62 = vadd.f32 %v1388_v12, %v645_v60 }
 0x139   :  { %v683_v63 = vmax.f32 %v501_v57, 0.0  ;;  %v713_v0 = vmax.f32 %v651_v58, 0.0 }
 0x13a   :  { %v682_v1 = vmax.f32 %v496_v61, 0.0  ;;  %v712_v2 = vmax.f32 %v646_v62, 0.0 }
 0x13b   :  { %744 = vst.msk [vmem:[%s1693_s3 + $0xe8] sm:$0xff] %vm714_vm2, %v683_v63  ;;  %774 = vst.msk [vmem:[%s1693_s3 + $0x1d8] sm:$0xff] %vm714_vm2, %v713_v0 }
 0x13c   :  { %743 = vst.msk [vmem:[%s1693_s3 + $0xe0] sm:$0xff] %vm714_vm2, %v682_v1  ;;  %773 = vst.msk [vmem:[%s1693_s3 + $0x1d0] sm:$0xff] %vm714_vm2, %v712_v2 }
 0x13d   :  { %779 = vsyncpa [#allocation3], 1 }

// kernel: harnet_forward.4
= control target key start
LH: loop header
LB: loop body
LE: loop exit
PB: predicated region body
PF: predicated region fallthrough
CT: control target
= control target key end

     0   :  { %v854_v0 = vmov 0.0|0.0   ;;  %vm135_vm0 = vcmask 261120   ;;  %vm630_vm1 = vcmask 523264   ;;  %s1428_s1 = inlined_call_operand.vmem [shape: f32[288,64], index: 1, kind: input, shape index: {}]   ;;  %s1429_s0 = inlined_call_operand.vmem [shape: f32[208,288], index: 0, kind: input, shape index: {}]   ;;  %s1430_s2 = inlined_call_operand.vmem [shape: f32[1,64], index: 2, kind: input, shape index: {}]   ;;  %s1431_s3 = inlined_call_operand.vmem [shape: f32[208,64], index: 3, kind: output, shape index: {}]  }
   0x1   :  { %765 = vmatprep.subr.bf16.mxu0 %v854_v0  ;;  %821 = vmatprep.subr.bf16.mxu1 %v854_v0  ;;  %v92_v1 = vld [vmem:[%s1428_s1] sm:$0xff]  ;;  %v93_v2 = vld [vmem:[%s1428_s1 + $0x8] sm:$0xff]  ;;  %v94_v3 = vld [vmem:[%s1428_s1 + $0x10] sm:$0xff] }
   0x2   :  { %v766_v4 = vpack.c.bf16 %v93_v2, %v92_v1  ;;  %v95_v5 = vld [vmem:[%s1428_s1 + $0x18] sm:$0xff]  ;;  %v96_v7 = vld [vmem:[%s1428_s1 + $0x20] sm:$0xff]  ;;  %v97_v8 = vld [vmem:[%s1428_s1 + $0x28] sm:$0xff] }
   0x3   :  { %v769_v6 = vpack.c.bf16 %v95_v5, %v94_v3  ;;  %v772_v9 = vpack.c.bf16 %v97_v8, %v96_v7  ;;  %v98_v10 = vld [vmem:[%s1428_s1 + $0x30] sm:$0xff]  ;;  %v99_v11 = vld [vmem:[%s1428_s1 + $0x38] sm:$0xff]  ;;  %v15_v12 = vld [vmem:[%s1429_s0 + $0x8] sm:$0xff] }
   0x4   :  { %767 = vmatpush1.bf16.msra.mxu0 %v766_v4  ;;  %837 = vmatpush1.bf16.msra.mxu1 %v766_v4  ;;  %v775_v13 = vpack.c.bf16 %v99_v11, %v98_v10  ;;  %v75_v14 = vld [vmem:[%s1429_s0 + $0x1e8] sm:$0xff]  ;;  %v100_v15 = vld [vmem:[%s1428_s1 + $0x40] sm:$0xff]  ;;  %v102_v18 = vld [vmem:[%s1428_s1 + $0x50] sm:$0xff] }
   0x5   :  { %768 = vmatprep.subr.bf16.mxu0 %v854_v0  ;;  %822 = vmatprep.subr.bf16.mxu1 %v854_v0  ;;  %v101_v16 = vld [vmem:[%s1428_s1 + $0x48] sm:$0xff]  ;;  %v103_v19 = vld [vmem:[%s1428_s1 + $0x58] sm:$0xff]  ;;  %v104_v21 = vld [vmem:[%s1428_s1 + $0x60] sm:$0xff] }
   0x6   :  { %278 = vmatprep.mubr.f32.mxu0 %v15_v12  ;;  %378 = vmatprep.mubr.f32.mxu1 %v75_v14  ;;  %v778_v17 = vpack.c.bf16 %v101_v16, %v100_v15  ;;  %v781_v20 = vpack.c.bf16 %v103_v19, %v102_v18  ;;  %v105_v22 = vld [vmem:[%s1428_s1 + $0x68] sm:$0xff]  ;;  %v106_v24 = vld [vmem:[%s1428_s1 + $0x70] sm:$0xff]  ;;  %v107_v25 = vld [vmem:[%s1428_s1 + $0x78] sm:$0xff] }
   0x7   :  { %v784_v23 = vpack.c.bf16 %v105_v22, %v104_v21  ;;  %v787_v26 = vpack.c.bf16 %v107_v25, %v106_v24  ;;  %v108_v27 = vld [vmem:[%s1428_s1 + $0x80] sm:$0xff]  ;;  %v109_v28 = vld [vmem:[%s1428_s1 + $0x88] sm:$0xff]  ;;  %v110_v30 = vld [vmem:[%s1428_s1 + $0x90] sm:$0xff] }
   0x8   :  { %770 = vmatpush1.bf16.msra.mxu0 %v769_v6  ;;  %838 = vmatpush1.bf16.msra.mxu1 %v769_v6  ;;  %v790_v29 = vpack.c.bf16 %v109_v28, %v108_v27  ;;  %v111_v31 = vld [vmem:[%s1428_s1 + $0x98] sm:$0xff]  ;;  %v112_v33 = vld [vmem:[%s1428_s1 + $0xa0] sm:$0xff]  ;;  %v113_v34 = vld [vmem:[%s1428_s1 + $0xa8] sm:$0xff] }
   0x9   :  { %771 = vmatprep.subr.bf16.mxu0 %v854_v0  ;;  %823 = vmatprep.subr.bf16.mxu1 %v854_v0  ;;  %v793_v32 = vpack.c.bf16 %v111_v31, %v110_v30  ;;  %v796_v35 = vpack.c.bf16 %v113_v34, %v112_v33  ;;  %v114_v36 = vld [vmem:[%s1428_s1 + $0xb0] sm:$0xff]  ;;  %v115_v37 = vld [vmem:[%s1428_s1 + $0xb8] sm:$0xff]  ;;  %v116_v39 = vld [vmem:[%s1428_s1 + $0xc0] sm:$0xff] }
   0xa   :  { %v799_v38 = vpack.c.bf16 %v115_v37, %v114_v36  ;;  %v117_v40 = vld [vmem:[%s1428_s1 + $0xc8] sm:$0xff]  ;;  %v118_v42 = vld [vmem:[%s1428_s1 + $0xd0] sm:$0xff]  ;;  %v119_v43 = vld [vmem:[%s1428_s1 + $0xd8] sm:$0xff] }
   0xb   :  { %v802_v41 = vpack.c.bf16 %v117_v40, %v116_v39  ;;  %v805_v44 = vpack.c.bf16 %v119_v43, %v118_v42  ;;  %v120_v45 = vld [vmem:[%s1428_s1 + $0xe0] sm:$0xff]  ;;  %v121_v46 = vld [vmem:[%s1428_s1 + $0xe8] sm:$0xff]  ;;  %v122_v48 = vld [vmem:[%s1428_s1 + $0xf0] sm:$0xff] }
   0xc   :  { %773 = vmatpush1.bf16.msra.mxu0 %v772_v9  ;;  %839 = vmatpush1.bf16.msra.mxu1 %v772_v9  ;;  %v808_v47 = vpack.c.bf16 %v121_v46, %v120_v45  ;;  %v123_v49 = vld [vmem:[%s1428_s1 + $0xf8] sm:$0xff]  ;;  %v124_v50 = vld [vmem:[%s1428_s1 + $0x100] sm:$0xff]  ;;  %v125_v51 = vld [vmem:[%s1428_s1 + $0x108] sm:$0xff] }
   0xd   :  { %774 = vmatprep.subr.bf16.mxu0 %v854_v0  ;;  %824 = vmatprep.subr.bf16.mxu1 %v854_v0  ;;  %v811_v52 = vpack.c.bf16 %v123_v49, %v122_v48  ;;  %v813_v53 = vpack.c.bf16 %v125_v51, %v124_v50  ;;  %v126_v54 = vld [vmem:[%s1428_s1 + $0x110] sm:$0xff]  ;;  %v127_v55 = vld [vmem:[%s1428_s1 + $0x118] sm:$0xff]  ;;  %v14_v56 = vld [vmem:[%s1429_s0] sm:$0xff] }
   0xe   :  { %v74_v57 = vld [vmem:[%s1429_s0 + $0x1e0] sm:$0xff]  ;;  %v817_v60 = vpack.c.bf16 %v127_v55, %v126_v54  ;;  %v17_v61 = vld [vmem:[%s1429_s0 + $0x18] sm:$0xff]  ;;  %v20_v1 = vld [vmem:[%s1429_s0 + $0x30] sm:$0xff] }
   0xf   :  { %v18_v58 = vld [vmem:[%s1429_s0 + $0x20] sm:$0xff]  ;;  %v77_v62 = vld [vmem:[%s1429_s0 + $0x1f8] sm:$0xff]  ;;  %v80_v2 = vld [vmem:[%s1429_s0 + $0x210] sm:$0xff] }
  0x10   :  { %776 = vmatpush1.bf16.msra.mxu0 %v775_v13  ;;  %840 = vmatpush1.bf16.msra.mxu1 %v775_v13  ;;  %v78_v59 = vld [vmem:[%s1429_s0 + $0x200] sm:$0xff]  ;;  %v21_v63 = vld [vmem:[%s1429_s0 + $0x38] sm:$0xff]  ;;  %v24_v3 = vld [vmem:[%s1429_s0 + $0x50] sm:$0xff] }
  0x11   :  { %777 = vmatprep.subr.bf16.mxu0 %v854_v0  ;;  %825 = vmatprep.subr.bf16.mxu1 %v854_v0  ;;  %v84_v4 = vld [vmem:[%s1429_s0 + $0x230] sm:$0xff]  ;;  %v23_v5 = vld [vmem:[%s1429_s0 + $0x48] sm:$0xff]  ;;  %v26_v9 = vld [vmem:[%s1429_s0 + $0x60] sm:$0xff] }
  0x12   :  { %v83_v6 = vld [vmem:[%s1429_s0 + $0x228] sm:$0xff]  ;;  %v86_v10 = vld [vmem:[%s1429_s0 + $0x240] sm:$0xff]  ;;  %v29_v13 = vld [vmem:[%s1429_s0 + $0x78] sm:$0xff] }
  0x13   :  { %v27_v7 = vld [vmem:[%s1429_s0 + $0x68] sm:$0xff]  ;;  %v30_v11 = vld [vmem:[%s1429_s0 + $0x80] sm:$0xff]  ;;  %v89_v14 = vld [vmem:[%s1429_s0 + $0x258] sm:$0xff] }
  0x14   :  { %779 = vmatpush1.bf16.msra.mxu0 %v778_v17  ;;  %841 = vmatpush1.bf16.msra.mxu1 %v778_v17  ;;  %v87_v8 = vld [vmem:[%s1429_s0 + $0x248] sm:$0xff]  ;;  %v90_v12 = vld [vmem:[%s1429_s0 + $0x260] sm:$0xff]  ;;  %v33_v15 = vld [vmem:[%s1429_s0 + $0x98] sm:$0xff] }
  0x15   :  { %780 = vmatprep.subr.bf16.mxu0 %v854_v0  ;;  %826 = vmatprep.subr.bf16.mxu1 %v854_v0  ;;  %v16_v16 = vld [vmem:[%s1429_s0 + $0x10] sm:$0xff]  ;;  %v19_v18 = vld [vmem:[%s1429_s0 + $0x28] sm:$0xff]  ;;  %v25_v22 = vld [vmem:[%s1429_s0 + $0x58] sm:$0xff] }
  0x16   :  { %v32_v17 = vld [vmem:[%s1429_s0 + $0x90] sm:$0xff]  ;;  %v35_v21 = vld [vmem:[%s1429_s0 + $0xa8] sm:$0xff]  ;;  %v38_v25 = vld [vmem:[%s1429_s0 + $0xc0] sm:$0xff] }
  0x17   :  { %v36_v19 = vld [vmem:[%s1429_s0 + $0xb0] sm:$0xff]  ;;  %v42_v27 = vld [vmem:[%s1429_s0 + $0xe0] sm:$0xff]  ;;  %v37_v30 = vld [vmem:[%s1429_s0 + $0xb8] sm:$0xff] }
  0x18   :  { %782 = vmatpush1.bf16.msra.mxu0 %v781_v20  ;;  %842 = vmatpush1.bf16.msra.mxu1 %v781_v20  ;;  %v22_v20 = vld [vmem:[%s1429_s0 + $0x40] sm:$0xff]  ;;  %v28_v24 = vld [vmem:[%s1429_s0 + $0x70] sm:$0xff]  ;;  %v45_v31 = vld [vmem:[%s1429_s0 + $0xf8] sm:$0xff] }
  0x19   :  { %783 = vmatprep.subr.bf16.mxu0 %v854_v0  ;;  %827 = vmatprep.subr.bf16.mxu1 %v854_v0  ;;  %v34_v28 = vld [vmem:[%s1429_s0 + $0xa0] sm:$0xff]  ;;  %v44_v33 = vld [vmem:[%s1429_s0 + $0xf0] sm:$0xff]  ;;  %v43_v34 = vld [vmem:[%s1429_s0 + $0xe8] sm:$0xff] }
  0x1a   :  { %v46_v36 = vld [vmem:[%s1429_s0 + $0x100] sm:$0xff]  ;;  %v47_v37 = vld [vmem:[%s1429_s0 + $0x108] sm:$0xff]  ;;  %v52_v40 = vld [vmem:[%s1429_s0 + $0x130] sm:$0xff] }
  0x1b   :  { %v51_v39 = vld [vmem:[%s1429_s0 + $0x128] sm:$0xff]  ;;  %v54_v43 = vld [vmem:[%s1429_s0 + $0x140] sm:$0xff]  ;;  %v53_v45 = vld [vmem:[%s1429_s0 + $0x138] sm:$0xff] }
  0x1c   :  { %785 = vmatpush1.bf16.msra.mxu0 %v784_v23  ;;  %843 = vmatpush1.bf16.msra.mxu1 %v784_v23  ;;  %v39_v23 = vld [vmem:[%s1429_s0 + $0xc8] sm:$0xff]  ;;  %v61_v46 = vld [vmem:[%s1429_s0 + $0x178] sm:$0xff]  ;;  %v64_v48 = vld [vmem:[%s1429_s0 + $0x190] sm:$0xff] }
  0x1d   :  { %786 = vmatprep.subr.bf16.mxu0 %v854_v0  ;;  %828 = vmatprep.subr.bf16.mxu1 %v854_v0  ;;  %v55_v42 = vld [vmem:[%s1429_s0 + $0x148] sm:$0xff]  ;;  %v56_v49 = vld [vmem:[%s1429_s0 + $0x150] sm:$0xff]  ;;  %v73_v54 = vld [vmem:[%s1429_s0 + $0x1d8] sm:$0xff] }
  0x1e   :  { %v67_v50 = vld [vmem:[%s1429_s0 + $0x1a8] sm:$0xff]  ;;  %v60_v51 = vld [vmem:[%s1429_s0 + $0x170] sm:$0xff] }
  0x1f   :  { %v63_v55 = vld [vmem:[%s1429_s0 + $0x188] sm:$0xff] }
  0x20   :  { %788 = vmatpush1.bf16.msra.mxu0 %v787_v26  ;;  %844 = vmatpush1.bf16.msra.mxu1 %v787_v26  ;;  %v31_v26 = vld [vmem:[%s1429_s0 + $0x88] sm:$0xff] }
  0x21   :  { %789 = vmatprep.subr.bf16.mxu0 %v854_v0  ;;  %829 = vmatprep.subr.bf16.mxu1 %v854_v0 }
  0x24   :  { %791 = vmatpush1.bf16.msra.mxu0 %v790_v29  ;;  %845 = vmatpush1.bf16.msra.mxu1 %v790_v29  ;;  %v41_v29 = vld [vmem:[%s1429_s0 + $0xd8] sm:$0xff] }
  0x25   :  { %792 = vmatprep.subr.bf16.mxu0 %v854_v0  ;;  %830 = vmatprep.subr.bf16.mxu1 %v854_v0 }
  0x28   :  { %794 = vmatpush1.bf16.msra.mxu0 %v793_v32  ;;  %846 = vmatpush1.bf16.msra.mxu1 %v793_v32  ;;  %v40_v32 = vld [vmem:[%s1429_s0 + $0xd0] sm:$0xff] }
  0x29   :  { %795 = vmatprep.subr.bf16.mxu0 %v854_v0  ;;  %831 = vmatprep.subr.bf16.mxu1 %v854_v0 }
  0x2c   :  { %797 = vmatpush1.bf16.msra.mxu0 %v796_v35  ;;  %847 = vmatpush1.bf16.msra.mxu1 %v796_v35  ;;  %v48_v35 = vld [vmem:[%s1429_s0 + $0x110] sm:$0xff] }
  0x2d   :  { %798 = vmatprep.subr.bf16.mxu0 %v854_v0  ;;  %832 = vmatprep.subr.bf16.mxu1 %v854_v0 }
  0x30   :  { %800 = vmatpush1.bf16.msra.mxu0 %v799_v38  ;;  %848 = vmatpush1.bf16.msra.mxu1 %v799_v38  ;;  %v49_v38 = vld [vmem:[%s1429_s0 + $0x118] sm:$0xff] }
  0x31   :  { %801 = vmatprep.subr.bf16.mxu0 %v854_v0  ;;  %833 = vmatprep.subr.bf16.mxu1 %v854_v0 }
  0x34   :  { %803 = vmatpush1.bf16.msra.mxu0 %v802_v41  ;;  %849 = vmatpush1.bf16.msra.mxu1 %v802_v41  ;;  %v50_v41 = vld [vmem:[%s1429_s0 + $0x120] sm:$0xff] }
  0x35   :  { %804 = vmatprep.subr.bf16.mxu0 %v854_v0  ;;  %834 = vmatprep.subr.bf16.mxu1 %v854_v0 }
  0x38   :  { %806 = vmatpush1.bf16.msra.mxu0 %v805_v44  ;;  %850 = vmatpush1.bf16.msra.mxu1 %v805_v44  ;;  %v58_v44 = vld [vmem:[%s1429_s0 + $0x160] sm:$0xff] }
  0x39   :  { %807 = vmatprep.subr.bf16.mxu0 %v854_v0  ;;  %835 = vmatprep.subr.bf16.mxu1 %v854_v0 }
  0x3c   :  { %809 = vmatpush1.bf16.msra.mxu0 %v808_v47  ;;  %851 = vmatpush1.bf16.msra.mxu1 %v808_v47  ;;  %v57_v47 = vld [vmem:[%s1429_s0 + $0x158] sm:$0xff] }
  0x3d   :  { %810 = vmatprep.subr.bf16.mxu0 %v854_v0  ;;  %836 = vmatprep.subr.bf16.mxu1 %v854_v0  ;;  %v81_v0 = vld [vmem:[%s1429_s0 + $0x218] sm:$0xff] }
  0x40   :  { %812 = vmatpush1.bf16.msra.mxu0 %v811_v52  ;;  %852 = vmatpush1.bf16.msra.mxu1 %v811_v52  ;;  %v70_v52 = vld [vmem:[%s1429_s0 + $0x1c0] sm:$0xff] }
  0x41   :  { %814 = vmatprep.subr.bf16.mxu1 %v813_v53 }
  0x43   :  { %279 = vmatmul.mubr.f32.vlgmr.msra.gmra.mrb[0].mxu0 %v14_v56  ;;  %379 = vmatmul.mubr.f32.vlgmr.msra.gmra.mrb[0].mxu1 %v74_v57  ;;  %v76_v56 = vld [vmem:[%s1429_s0 + $0x1f0] sm:$0xff]  ;;  %v62_v57 = vld [vmem:[%s1429_s0 + $0x180] sm:$0xff] }
  0x44   :  { %283 = vmatprep.mubr.f32.mxu0 %v18_v58  ;;  %383 = vmatprep.mubr.f32.mxu1 %v78_v59  ;;  %v79_v58 = vld [vmem:[%s1429_s0 + $0x208] sm:$0xff]  ;;  %v66_v59 = vld [vmem:[%s1429_s0 + $0x1a0] sm:$0xff] }
  0x45   :  { %816 = vmatpush3.bf16.msra.mxu1 %v813_v53  ;;  %v59_v53 = vld [vmem:[%s1429_s0 + $0x168] sm:$0xff] }
  0x46   :  { %818 = vmatprep.subr.bf16.mxu1 %v817_v60 }
  0x47   :  { %284 = vmatmul.mubr.f32.gmra.mrb[2].mxu0 %v17_v61  ;;  %384 = vmatmul.mubr.f32.gmra.mrb[2].mxu1 %v77_v62  ;;  %v65_v61 = vld [vmem:[%s1429_s0 + $0x198] sm:$0xff] }
  0x48   :  { %288 = vmatprep.mubr.f32.mxu0 %v21_v63  ;;  %388 = vmatprep.mubr.f32.mxu1 %v81_v0  ;;  %v85_v62 = vld [vmem:[%s1429_s0 + $0x238] sm:$0xff]  ;;  %v88_v0 = vld [vmem:[%s1429_s0 + $0x250] sm:$0xff] }
  0x49   :  { %820 = vmatpush3.bf16.msra.mxu1 %v817_v60  ;;  %v82_v60 = vld [vmem:[%s1429_s0 + $0x220] sm:$0xff]  ;;  %v69_v63 = vld [vmem:[%s1429_s0 + $0x1b8] sm:$0xff] }
  0x4b   :  { %289 = vmatmul.mubr.f32.gmra.mrb[4].mxu0 %v20_v1  ;;  %389 = vmatmul.mubr.f32.gmra.mrb[4].mxu1 %v80_v2  ;;  %v68_v1 = vld [vmem:[%s1429_s0 + $0x1b0] sm:$0xff]  ;;  %v91_v2 = vld [vmem:[%s1429_s0 + $0x268] sm:$0xff] }
  0x4c   :  { %293 = vmatprep.mubr.f32.mxu0 %v24_v3  ;;  %393 = vmatprep.mubr.f32.mxu1 %v84_v4  ;;  %v72_v3 = vld [vmem:[%s1429_s0 + $0x1d0] sm:$0xff]  ;;  %v71_v4 = vld [vmem:[%s1429_s0 + $0x1c8] sm:$0xff] }
  0x4f   :  { %294 = vmatmul.mubr.f32.gmra.mrb[6].mxu0 %v23_v5  ;;  %394 = vmatmul.mubr.f32.gmra.mrb[6].mxu1 %v83_v6 }
  0x50   :  { %298 = vmatprep.mubr.f32.mxu0 %v27_v7  ;;  %398 = vmatprep.mubr.f32.mxu1 %v87_v8 }
  0x53   :  { %299 = vmatmul.mubr.f32.gmra.mrb[8].mxu0 %v26_v9  ;;  %399 = vmatmul.mubr.f32.gmra.mrb[8].mxu1 %v86_v10 }
  0x54   :  { %303 = vmatprep.mubr.f32.mxu0 %v30_v11  ;;  %403 = vmatprep.mubr.f32.mxu1 %v90_v12 }
  0x57   :  { %304 = vmatmul.mubr.f32.gmra.mrb[10].mxu0 %v29_v13  ;;  %404 = vmatmul.mubr.f32.gmra.mrb[10].mxu1 %v89_v14 }
  0x58   :  { %308 = vmatprep.mubr.f32.mxu0 %v33_v15  ;;  %726 = vmatprep.mubr.msk.f32.mxu1 %vm135_vm0, %v16_v16 }
  0x5b   :  { %309 = vmatmul.mubr.f32.gmra.mrb[12].mxu0 %v32_v17  ;;  %727 = vmatmul.mubr.msk.f32.vlgmr.msra.gmra.mrb[12].mxu1 %vm135_vm0, %v19_v18 }
  0x5c   :  { %313 = vmatprep.mubr.f32.mxu0 %v36_v19  ;;  %729 = vmatprep.mubr.msk.f32.mxu1 %vm135_vm0, %v22_v20 }
  0x5f   :  { %314 = vmatmul.mubr.f32.gmra.mrb[14].mxu0 %v35_v21  ;;  %730 = vmatmul.mubr.msk.f32.gmra.mrb[14].mxu1 %vm135_vm0, %v25_v22 }
  0x60   :  { %318 = vmatprep.mubr.f32.mxu0 %v39_v23  ;;  %732 = vmatprep.mubr.msk.f32.mxu1 %vm135_vm0, %v28_v24 }
  0x63   :  { %319 = vmatmul.mubr.f32.gmra.mrb[16].mxu0 %v38_v25  ;;  %733 = vmatmul.mubr.msk.f32.gmra.mrb[16].mxu1 %vm135_vm0, %v31_v26 }
  0x64   :  { %323 = vmatprep.mubr.f32.mxu0 %v42_v27  ;;  %735 = vmatprep.mubr.msk.f32.mxu1 %vm135_vm0, %v34_v28  ;;  %v1290_v27 = vld [vmem:[%s1430_s2] ss:$0 sm:$0xff] }
  0x67   :  { %324 = vmatmul.mubr.f32.gmra.mrb[18].mxu0 %v41_v29  ;;  %736 = vmatmul.mubr.msk.f32.gmra.mrb[18].mxu1 %vm135_vm0, %v37_v30 }
  0x68   :  { %328 = vmatprep.mubr.f32.mxu0 %v45_v31  ;;  %738 = vmatprep.mubr.msk.f32.mxu1 %vm135_vm0, %v40_v32 }
  0x6b   :  { %329 = vmatmul.mubr.f32.gmra.mrb[20].mxu0 %v44_v33  ;;  %739 = vmatmul.mubr.msk.f32.gmra.mrb[20].mxu1 %vm135_vm0, %v43_v34 }
  0x6c   :  { %333 = vmatprep.mubr.f32.mxu0 %v48_v35  ;;  %741 = vmatprep.mubr.msk.f32.mxu1 %vm135_vm0, %v46_v36 }
  0x6f   :  { %334 = vmatmul.mubr.f32.gmra.mrb[22].mxu0 %v47_v37  ;;  %742 = vmatmul.mubr.msk.f32.gmra.mrb[22].mxu1 %vm135_vm0, %v49_v38 }
  0x70   :  { %338 = vmatprep.mubr.f32.mxu0 %v51_v39  ;;  %744 = vmatprep.mubr.msk.f32.mxu1 %vm135_vm0, %v52_v40 }
  0x73   :  { %339 = vmatmul.mubr.f32.gmra.mrb[24].mxu0 %v50_v41  ;;  %745 = vmatmul.mubr.msk.f32.gmra.mrb[24].mxu1 %vm135_vm0, %v55_v42 }
  0x74   :  { %343 = vmatprep.mubr.f32.mxu0 %v54_v43  ;;  %747 = vmatprep.mubr.msk.f32.mxu1 %vm135_vm0, %v58_v44 }
  0x77   :  { %344 = vmatmul.mubr.f32.gmra.mrb[26].mxu0 %v53_v45  ;;  %748 = vmatmul.mubr.msk.f32.gmra.mrb[26].mxu1 %vm135_vm0, %v61_v46 }
  0x78   :  { %348 = vmatprep.mubr.f32.mxu0 %v57_v47  ;;  %750 = vmatprep.mubr.msk.f32.mxu1 %vm135_vm0, %v64_v48 }
  0x7b   :  { %349 = vmatmul.mubr.f32.gmra.mrb[28].mxu0 %v56_v49  ;;  %751 = vmatmul.mubr.msk.f32.gmra.mrb[28].mxu1 %vm135_vm0, %v67_v50 }
  0x7c   :  { %353 = vmatprep.mubr.f32.mxu0 %v60_v51  ;;  %753 = vmatprep.mubr.msk.f32.mxu1 %vm135_vm0, %v70_v52 }
  0x7f   :  { %354 = vmatmul.mubr.f32.gmra.mrb[30].mxu0 %v59_v53  ;;  %754 = vmatmul.mubr.msk.f32.gmra.mrb[30].mxu1 %vm135_vm0, %v73_v54 }
  0x80   :  { %358 = vmatprep.mubr.f32.mxu0 %v63_v55  ;;  %756 = vmatprep.mubr.msk.f32.mxu1 %vm135_vm0, %v76_v56 }
  0x83   :  { %359 = vmatmul.mubr.f32.gmra.mrb[32].mxu0 %v62_v57  ;;  %757 = vmatmul.mubr.msk.f32.gmra.mrb[32].mxu1 %vm135_vm0, %v79_v58 }
  0x84   :  { %363 = vmatprep.mubr.f32.mxu0 %v66_v59  ;;  %759 = vmatprep.mubr.msk.f32.mxu1 %vm135_vm0, %v82_v60 }
  0x87   :  { %364 = vmatmul.mubr.f32.gmra.mrb[34].mxu0 %v65_v61  ;;  %760 = vmatmul.mubr.msk.f32.gmra.mrb[34].mxu1 %vm135_vm0, %v85_v62 }
  0x88   :  { %368 = vmatprep.mubr.f32.mxu0 %v69_v63  ;;  %762 = vmatprep.mubr.msk.f32.mxu1 %vm135_vm0, %v88_v0 }
  0x8b   :  { %369 = vmatmul.mubr.f32.gmra.mrb[36].mxu0 %v68_v1  ;;  %763 = vmatmul.mubr.msk.f32.gmra.mrb[36].mxu1 %vm135_vm0, %v91_v2 }
  0x8c   :  { %373 = vmatprep.mubr.f32.mxu0 %v72_v3 }
  0x8f   :  { %374 = vmatmul.mubr.f32.gmra.mrb[38].mxu0 %v71_v4 }
 0x116   :  { %v280_v5 = vpop.f32.mrb[0].mxu0  ;;  %v1275_v6 = vpop.f32.mrb[0].mxu1 }
 0x117   :  { %v282_v7 = vpop.f32.mrb[1].mxu0  ;;  %v382_v8 = vpop.f32.mrb[1].mxu1  ;;  %v281_v31 = vadd.f32 %v1290_v27, %v280_v5 }
 0x11a   :  { %v285_v9 = vpop.f32.mrb[2].mxu0  ;;  %v1277_v10 = vpop.f32.mrb[2].mxu1 }
 0x11b   :  { %v287_v11 = vpop.f32.mrb[3].mxu0  ;;  %v387_v12 = vpop.f32.mrb[3].mxu1  ;;  %v286_v30 = vadd.f32 %v1290_v27, %v285_v9 }
 0x11e   :  { %v290_v13 = vpop.f32.mrb[4].mxu0  ;;  %v1279_v14 = vpop.f32.mrb[4].mxu1 }
 0x11f   :  { %v292_v15 = vpop.f32.mrb[5].mxu0  ;;  %v392_v16 = vpop.f32.mrb[5].mxu1  ;;  %v291_v40 = vadd.f32 %v1290_v27, %v290_v13 }
 0x122   :  { %v295_v17 = vpop.f32.mrb[6].mxu0  ;;  %v1281_v18 = vpop.f32.mrb[6].mxu1 }
 0x123   :  { %v297_v19 = vpop.f32.mrb[7].mxu0  ;;  %v397_v20 = vpop.f32.mrb[7].mxu1  ;;  %v296_v38 = vadd.f32 %v1290_v27, %v295_v17 }
 0x126   :  { %v300_v21 = vpop.f32.mrb[8].mxu0  ;;  %v1283_v22 = vpop.f32.mrb[8].mxu1 }
 0x127   :  { %v302_v23 = vpop.f32.mrb[9].mxu0  ;;  %v402_v24 = vpop.f32.mrb[9].mxu1  ;;  %v301_v50 = vadd.f32 %v1290_v27, %v300_v21 }
 0x12a   :  { %v305_v25 = vpop.f32.mrb[10].mxu0  ;;  %v1285_v26 = vpop.f32.mrb[10].mxu1 }
 0x12b   :  { %v307_v28 = vpop.f32.mrb[11].mxu0  ;;  %v407_v29 = vpop.f32.mrb[11].mxu1  ;;  %v306_v48 = vadd.f32 %v1290_v27, %v305_v25 }
 0x12e   :  { %v310_v32 = vpop.f32.mrb[12].mxu0  ;;  %v728_v33 = vpop.f32.mrb[12].mxu1 }
 0x12f   :  { %v481_v34 = vadd.f32 %v728_v33, %v286_v30  ;;  %v312_v35 = vpop.f32.mrb[13].mxu0  ;;  %v475_v36 = vpop.f32.mrb[13].mxu1  ;;  %v311_v60 = vadd.f32 %v1290_v27, %v310_v32 }
 0x130   :  { %v476_v37 = vadd.f32 %v475_v36, %v281_v31 }
 0x131   :  { %v605_v39 = vmax.f32 %v481_v34, 0.0 }
 0x132   :  { %v604_v41 = vmax.f32 %v476_v37, 0.0  ;;  %v315_v42 = vpop.f32.mrb[14].mxu0  ;;  %v731_v43 = vpop.f32.mrb[14].mxu1 }
 0x133   :  { %632 = vst.msk [vmem:[%s1431_s3 + $0x8] sm:$0xff] %vm630_vm1, %v605_v39  ;;  %v491_v44 = vadd.f32 %v731_v43, %v296_v38  ;;  %v317_v45 = vpop.f32.mrb[15].mxu0  ;;  %v485_v46 = vpop.f32.mrb[15].mxu1  ;;  %v316_v58 = vadd.f32 %v1290_v27, %v315_v42 }
 0x134   :  { %631 = vst.msk [vmem:[%s1431_s3] sm:$0xff] %vm630_vm1, %v604_v41  ;;  %v486_v47 = vadd.f32 %v485_v46, %v291_v40 }
 0x135   :  { %v607_v49 = vmax.f32 %v491_v44, 0.0 }
 0x136   :  { %v606_v51 = vmax.f32 %v486_v47, 0.0  ;;  %v320_v52 = vpop.f32.mrb[16].mxu0  ;;  %v734_v53 = vpop.f32.mrb[16].mxu1 }
 0x137   :  { %634 = vst.msk [vmem:[%s1431_s3 + $0x18] sm:$0xff] %vm630_vm1, %v607_v49  ;;  %v501_v54 = vadd.f32 %v734_v53, %v306_v48  ;;  %v322_v55 = vpop.f32.mrb[17].mxu0  ;;  %v495_v56 = vpop.f32.mrb[17].mxu1  ;;  %v321_v7 = vadd.f32 %v1290_v27, %v320_v52 }
 0x138   :  { %633 = vst.msk [vmem:[%s1431_s3 + $0x10] sm:$0xff] %vm630_vm1, %v606_v51  ;;  %v496_v57 = vadd.f32 %v495_v56, %v301_v50 }
 0x139   :  { %v609_v59 = vmax.f32 %v501_v54, 0.0 }
 0x13a   :  { %v608_v61 = vmax.f32 %v496_v57, 0.0  ;;  %v325_v62 = vpop.f32.mrb[18].mxu0  ;;  %v737_v63 = vpop.f32.mrb[18].mxu1 }
 0x13b   :  { %636 = vst.msk [vmem:[%s1431_s3 + $0x28] sm:$0xff] %vm630_vm1, %v609_v59  ;;  %v511_v0 = vadd.f32 %v737_v63, %v316_v58  ;;  %v327_v1 = vpop.f32.mrb[19].mxu0  ;;  %v505_v2 = vpop.f32.mrb[19].mxu1  ;;  %v326_v4 = vadd.f32 %v1290_v27, %v325_v62  ;;  %v386_v59 = vadd.f32 %v1290_v27, %v1277_v10  ;;  %v396_v10 = vadd.f32 %v1290_v27, %v1281_v18 }
 0x13c   :  { %635 = vst.msk [vmem:[%s1431_s3 + $0x20] sm:$0xff] %vm630_vm1, %v608_v61  ;;  %v506_v3 = vadd.f32 %v505_v2, %v311_v60  ;;  %v381_v61 = vadd.f32 %v1290_v27, %v1275_v6  ;;  %v391_v6 = vadd.f32 %v1290_v27, %v1279_v14 }
 0x13d   :  { %v611_v5 = vmax.f32 %v511_v0, 0.0 }
 0x13e   :  { %v610_v8 = vmax.f32 %v506_v3, 0.0  ;;  %v330_v9 = vpop.f32.mrb[20].mxu0  ;;  %v740_v11 = vpop.f32.mrb[20].mxu1 }
 0x13f   :  { %638 = vst.msk [vmem:[%s1431_s3 + $0x38] sm:$0xff] %vm630_vm1, %v611_v5  ;;  %v521_v12 = vadd.f32 %v740_v11, %v326_v4  ;;  %v332_v13 = vpop.f32.mrb[21].mxu0  ;;  %v515_v15 = vpop.f32.mrb[21].mxu1  ;;  %v331_v19 = vadd.f32 %v1290_v27, %v330_v9 }
 0x140   :  { %637 = vst.msk [vmem:[%s1431_s3 + $0x30] sm:$0xff] %vm630_vm1, %v610_v8  ;;  %v516_v16 = vadd.f32 %v515_v15, %v321_v7 }
 0x141   :  { %v613_v17 = vmax.f32 %v521_v12, 0.0 }
 0x142   :  { %v612_v20 = vmax.f32 %v516_v16, 0.0  ;;  %v335_v21 = vpop.f32.mrb[22].mxu0  ;;  %v743_v23 = vpop.f32.mrb[22].mxu1 }
 0x143   :  { %640 = vst.msk [vmem:[%s1431_s3 + $0x48] sm:$0xff] %vm630_vm1, %v613_v17  ;;  %v336_v24 = vadd.f32 %v1290_v27, %v335_v21  ;;  %v337_v25 = vpop.f32.mrb[23].mxu0  ;;  %v525_v28 = vpop.f32.mrb[23].mxu1 }
 0x144   :  { %639 = vst.msk [vmem:[%s1431_s3 + $0x40] sm:$0xff] %vm630_vm1, %v612_v20  ;;  %v526_v29 = vadd.f32 %v525_v28, %v331_v19  ;;  %v406_v19 = vadd.f32 %v1290_v27, %v1285_v26 }
 0x145   :  { %v531_v30 = vadd.f32 %v743_v23, %v336_v24  ;;  %v401_v23 = vadd.f32 %v1290_v27, %v1283_v22 }
 0x146   :  { %v614_v31 = vmax.f32 %v526_v29, 0.0  ;;  %v340_v32 = vpop.f32.mrb[24].mxu0  ;;  %v746_v33 = vpop.f32.mrb[24].mxu1 }
 0x147   :  { %v615_v34 = vmax.f32 %v531_v30, 0.0  ;;  %v341_v35 = vadd.f32 %v1290_v27, %v340_v32  ;;  %v342_v36 = vpop.f32.mrb[25].mxu0  ;;  %v535_v37 = vpop.f32.mrb[25].mxu1 }
 0x148   :  { %641 = vst.msk [vmem:[%s1431_s3 + $0x50] sm:$0xff] %vm630_vm1, %v614_v31 }
 0x149   :  { %642 = vst.msk [vmem:[%s1431_s3 + $0x58] sm:$0xff] %vm630_vm1, %v615_v34  ;;  %v536_v38 = vadd.f32 %v535_v37, %v341_v35 }
 0x14a   :  { %v345_v39 = vpop.f32.mrb[26].mxu0  ;;  %v749_v40 = vpop.f32.mrb[26].mxu1 }
 0x14b   :  { %v616_v41 = vmax.f32 %v536_v38, 0.0  ;;  %v346_v42 = vadd.f32 %v1290_v27, %v345_v39  ;;  %v347_v43 = vpop.f32.mrb[27].mxu0  ;;  %v545_v44 = vpop.f32.mrb[27].mxu1 }
 0x14d   :  { %643 = vst.msk [vmem:[%s1431_s3 + $0x60] sm:$0xff] %vm630_vm1, %v616_v41  ;;  %v541_v45 = vadd.f32 %v746_v33, %v346_v42 }
 0x14e   :  { %v350_v46 = vpop.f32.mrb[28].mxu0  ;;  %v752_v47 = vpop.f32.mrb[28].mxu1 }
 0x14f   :  { %v617_v48 = vmax.f32 %v541_v45, 0.0  ;;  %v351_v49 = vadd.f32 %v1290_v27, %v350_v46  ;;  %v352_v50 = vpop.f32.mrb[29].mxu0  ;;  %v555_v51 = vpop.f32.mrb[29].mxu1 }
 0x151   :  { %644 = vst.msk [vmem:[%s1431_s3 + $0x68] sm:$0xff] %vm630_vm1, %v617_v48  ;;  %v546_v52 = vadd.f32 %v545_v44, %v351_v49 }
 0x152   :  { %v355_v53 = vpop.f32.mrb[30].mxu0  ;;  %v755_v54 = vpop.f32.mrb[30].mxu1 }
 0x153   :  { %v618_v55 = vmax.f32 %v546_v52, 0.0  ;;  %v356_v56 = vadd.f32 %v1290_v27, %v355_v53  ;;  %v357_v57 = vpop.f32.mrb[31].mxu0  ;;  %v565_v58 = vpop.f32.mrb[31].mxu1 }
 0x155   :  { %645 = vst.msk [vmem:[%s1431_s3 + $0x70] sm:$0xff] %vm630_vm1, %v618_v55  ;;  %v551_v60 = vadd.f32 %v749_v40, %v356_v56 }
 0x156   :  { %v360_v62 = vpop.f32.mrb[32].mxu0  ;;  %v758_v63 = vpop.f32.mrb[32].mxu1 }
 0x157   :  { %v619_v0 = vmax.f32 %v551_v60, 0.0  ;;  %v361_v1 = vadd.f32 %v1290_v27, %v360_v62  ;;  %v581_v2 = vadd.f32 %v758_v63, %v386_v59  ;;  %v362_v3 = vpop.f32.mrb[33].mxu0  ;;  %v575_v4 = vpop.f32.mrb[33].mxu1 }
 0x158   :  { %v576_v5 = vadd.f32 %v575_v4, %v381_v61 }
 0x159   :  { %646 = vst.msk [vmem:[%s1431_s3 + $0x78] sm:$0xff] %vm630_vm1, %v619_v0  ;;  %v556_v7 = vadd.f32 %v555_v51, %v361_v1  ;;  %v625_v8 = vmax.f32 %v581_v2, 0.0 }
 0x15a   :  { %v624_v9 = vmax.f32 %v576_v5, 0.0  ;;  %v365_v11 = vpop.f32.mrb[34].mxu0  ;;  %v761_v12 = vpop.f32.mrb[34].mxu1 }
 0x15b   :  { %v620_v13 = vmax.f32 %v556_v7, 0.0  ;;  %652 = vst.msk [vmem:[%s1431_s3 + $0xa8] sm:$0xff] %vm630_vm1, %v625_v8  ;;  %v366_v18 = vadd.f32 %v1290_v27, %v365_v11  ;;  %v591_v15 = vadd.f32 %v761_v12, %v396_v10  ;;  %v367_v16 = vpop.f32.mrb[35].mxu0  ;;  %v585_v17 = vpop.f32.mrb[35].mxu1 }
 0x15c   :  { %651 = vst.msk [vmem:[%s1431_s3 + $0xa0] sm:$0xff] %vm630_vm1, %v624_v9  ;;  %v586_v14 = vadd.f32 %v585_v17, %v391_v6 }
 0x15d   :  { %647 = vst.msk [vmem:[%s1431_s3 + $0x80] sm:$0xff] %vm630_vm1, %v620_v13  ;;  %v561_v20 = vadd.f32 %v752_v47, %v366_v18  ;;  %v627_v21 = vmax.f32 %v591_v15, 0.0 }
 0x15e   :  { %v626_v24 = vmax.f32 %v586_v14, 0.0  ;;  %v370_v25 = vpop.f32.mrb[36].mxu0  ;;  %v764_v28 = vpop.f32.mrb[36].mxu1 }
 0x15f   :  { %v621_v29 = vmax.f32 %v561_v20, 0.0  ;;  %654 = vst.msk [vmem:[%s1431_s3 + $0xb8] sm:$0xff] %vm630_vm1, %v627_v21  ;;  %v371_v26 = vadd.f32 %v1290_v27, %v370_v25  ;;  %v601_v30 = vadd.f32 %v764_v28, %v406_v19  ;;  %v372_v31 = vpop.f32.mrb[37].mxu0  ;;  %v595_v32 = vpop.f32.mrb[37].mxu1 }
 0x160   :  { %653 = vst.msk [vmem:[%s1431_s3 + $0xb0] sm:$0xff] %vm630_vm1, %v626_v24  ;;  %v596_v22 = vadd.f32 %v595_v32, %v401_v23 }
 0x161   :  { %648 = vst.msk [vmem:[%s1431_s3 + $0x88] sm:$0xff] %vm630_vm1, %v621_v29  ;;  %v566_v33 = vadd.f32 %v565_v58, %v371_v26  ;;  %v629_v34 = vmax.f32 %v601_v30, 0.0 }
 0x162   :  { %v628_v35 = vmax.f32 %v596_v22, 0.0  ;;  %v375_v36 = vpop.f32.mrb[38].mxu0 }
 0x163   :  { %v622_v37 = vmax.f32 %v566_v33, 0.0  ;;  %656 = vst.msk [vmem:[%s1431_s3 + $0xc8] sm:$0xff] %vm630_vm1, %v629_v34  ;;  %v376_v38 = vadd.f32 %v1290_v27, %v375_v36  ;;  %v377_v39 = vpop.f32.mrb[39].mxu0 }
 0x164   :  { %655 = vst.msk [vmem:[%s1431_s3 + $0xc0] sm:$0xff] %vm630_vm1, %v628_v35 }
 0x165   :  { %649 = vst.msk [vmem:[%s1431_s3 + $0x90] sm:$0xff] %vm630_vm1, %v622_v37  ;;  %v571_v40 = vadd.f32 %v755_v54, %v376_v38 }
 0x167   :  { %v623_v41 = vmax.f32 %v571_v40, 0.0 }
 0x169   :  { %650 = vst.msk [vmem:[%s1431_s3 + $0x98] sm:$0xff] %vm630_vm1, %v623_v41 }

// kernel: harnet_forward.5
= control target key start
LH: loop header
LB: loop body
LE: loop exit
PB: predicated region body
PF: predicated region fallthrough
CT: control target
= control target key end

     0   :  { %12 = vsyncpa [#allocation3], 0  ;;  %s7504_s24 = smov [#allocation2]   ;;  %s12896_s0 = inlined_call_operand.vmem [shape: f32[8,1664], index: 0, kind: input, shape index: {}]   ;;  %s12897_s1 = inlined_call_operand.vmem [shape: f32[1664,1024], index: 1, kind: input, shape index: {}]   ;;  %s12898_s2 = inlined_call_operand.vmem [shape: f32[1,1024], index: 2, kind: input, shape index: {}]   ;;  %s12899_s3 = inlined_call_operand.hbm [shape: f32[1024,512], index: 3, kind: input, shape index: {}]   ;;  %s12900_s4 = inlined_call_operand.vmem [shape: f32[1,512], index: 4, kind: input, shape index: {}]   ;;  %s12901_s5 = inlined_call_operand.vmem [shape: f32[512,128], index: 5, kind: input, shape index: {}]   ;;  %s12902_s6 = inlined_call_operand.vmem [shape: f32[1,128], index: 6, kind: input, shape index: {}]   ;;  %s12903_s7 = inlined_call_operand.vmem [shape: f32[8,128], index: 7, kind: output, shape index: {}]  }
   0x1   :  { %s24_s25 = sshll.u32 %s7504_s24, 4  ;;  %s7480_s28 = scalar_lea.hbm %s12899_s3, 65536  ;;  %s25_s25 = int_to_ptr.vmem [resolvable:$true] %s24_s25 }
   0x2   :  { %p7481_p0 = scmp.ne.s32.totalorder %s12899_s3, %s7480_s28  ;;  %p7484_p1 = scmp.lt.u32.totalorder %s7480_s28, %s12899_s3 }
   0x4   :  { %p7486_p2 = pnand %p7484_p1, %p7481_p0 }
   0x6   :  { %7489 = shalt.err (!%p7486_p2)
}
   0x7   :  { %s7490_s10 = scalar_lea.vmem %s25_s25, 65536  ;;  %p7495_p4 = scmp.lt.s32.totalorder %s25_s25, %s25_s25 }
   0x8   :  { %p7491_p3 = scmp.ne.s32.totalorder %s25_s25, %s7490_s10  ;;  %p7496_p5 = scmp.lt.s32.totalorder %s7490_s10, %s7490_s10 }
   0xa   :  { %p7497_p6 = por %p7496_p5, %p7495_p4 }
   0xc   :  { %p7498_p7 = pnand %p7497_p6, %p7491_p3 }
   0xe   :  { %7501 = shalt.err (!%p7498_p7)
}
   0xf   :  { %s7505_s11 = smov 512   ;;  %s7506_s12 = smov 32  }
  0x10   :  { %30 = dma.hbm_to_vmem [thread:$0]  %s12899_s3, 65536, %s25_s25, [#allocation3], %s7505_s11, %s7505_s11, %s7506_s12  }
  0x11   :  { %7502 = dma.done.wait [#allocation3], 65536  }
  0x12   :  { %7503 = vsyncadd [#allocation3], 4294901760  ;;  %v54_v0 = vld [vmem:[%s12897_s1 + $0x8] sm:$0xff]  ;;  %v56_v2 = vld [vmem:[%s12897_s1 + $0x18] sm:$0xff] }
  0x13   :  { %v62_v1 = vld [vmem:[%s12897_s1 + $0x48] sm:$0xff]  ;;  %v64_v4 = vld [vmem:[%s12897_s1 + $0x58] sm:$0xff]  ;;  %v53_v5 = vld [vmem:[%s12897_s1] sm:$0xff] }
  0x14   :  { %v5149_v3 = vpack.c.bf16 %v62_v1, %v54_v0  ;;  %v61_v6 = vld [vmem:[%s12897_s1 + $0x40] sm:$0xff]  ;;  %v5565_v7 = vpack.c.bf16 %v64_v4, %v56_v2  ;;  %v55_v9 = vld [vmem:[%s12897_s1 + $0x10] sm:$0xff]  ;;  %v70_v11 = vld [vmem:[%s12897_s1 + $0x88] sm:$0xff] }
  0x15   :  { %v5151_v8 = vpack.c.bf16 %v61_v6, %v53_v5  ;;  %v63_v10 = vld [vmem:[%s12897_s1 + $0x50] sm:$0xff]  ;;  %v78_v13 = vld [vmem:[%s12897_s1 + $0xc8] sm:$0xff]  ;;  %v72_v14 = vld [vmem:[%s12897_s1 + $0x98] sm:$0xff] }
  0x16   :  { %5150 = vmatprep.subr.bf16.mxu0 %v5149_v3  ;;  %v5567_v12 = vpack.c.bf16 %v63_v10, %v55_v9  ;;  %v80_v15 = vld [vmem:[%s12897_s1 + $0xd8] sm:$0xff]  ;;  %5566 = vmatprep.subr.bf16.mxu1 %v5565_v7  ;;  %v5153_v16 = vpack.c.bf16 %v78_v13, %v70_v11  ;;  %v69_v18 = vld [vmem:[%s12897_s1 + $0x80] sm:$0xff]  ;;  %v71_v20 = vld [vmem:[%s12897_s1 + $0x90] sm:$0xff] }
  0x17   :  { %5152 = vmatpush1.bf16.msra.mxu0 %v5151_v8  ;;  %v5569_v17 = vpack.c.bf16 %v80_v15, %v72_v14  ;;  %v77_v19 = vld [vmem:[%s12897_s1 + $0xc0] sm:$0xff]  ;;  %v79_v22 = vld [vmem:[%s12897_s1 + $0xd0] sm:$0xff]  ;;  %v86_v23 = vld [vmem:[%s12897_s1 + $0x108] sm:$0xff] }
  0x18   :  { %5568 = vmatpush1.bf16.msra.mxu1 %v5567_v12  ;;  %v5155_v21 = vpack.c.bf16 %v77_v19, %v69_v18  ;;  %v94_v24 = vld [vmem:[%s12897_s1 + $0x148] sm:$0xff]  ;;  %5154 = vmatprep.subr.bf16.mxu0 %v5153_v16  ;;  %v5571_v25 = vpack.c.bf16 %v79_v22, %v71_v20  ;;  %v88_v27 = vld [vmem:[%s12897_s1 + $0x118] sm:$0xff]  ;;  %v85_v29 = vld [vmem:[%s12897_s1 + $0x100] sm:$0xff] }
  0x19   :  { %5570 = vmatprep.subr.bf16.mxu1 %v5569_v17  ;;  %v5157_v26 = vpack.c.bf16 %v94_v24, %v86_v23  ;;  %v96_v28 = vld [vmem:[%s12897_s1 + $0x158] sm:$0xff]  ;;  %v93_v31 = vld [vmem:[%s12897_s1 + $0x140] sm:$0xff]  ;;  %v87_v32 = vld [vmem:[%s12897_s1 + $0x110] sm:$0xff] }
  0x1a   :  { %v5573_v30 = vpack.c.bf16 %v96_v28, %v88_v27  ;;  %v95_v33 = vld [vmem:[%s12897_s1 + $0x150] sm:$0xff]  ;;  %v5159_v34 = vpack.c.bf16 %v93_v31, %v85_v29  ;;  %v102_v35 = vld [vmem:[%s12897_s1 + $0x188] sm:$0xff]  ;;  %v104_v37 = vld [vmem:[%s12897_s1 + $0x198] sm:$0xff] }
  0x1b   :  { %5156 = vmatpush1.bf16.msra.mxu0 %v5155_v21  ;;  %v110_v36 = vld [vmem:[%s12897_s1 + $0x1c8] sm:$0xff]  ;;  %v5575_v38 = vpack.c.bf16 %v95_v33, %v87_v32  ;;  %v112_v40 = vld [vmem:[%s12897_s1 + $0x1d8] sm:$0xff]  ;;  %v101_v41 = vld [vmem:[%s12897_s1 + $0x180] sm:$0xff] }
  0x1c   :  { %5572 = vmatpush1.bf16.msra.mxu1 %v5571_v25  ;;  %5158 = vmatprep.subr.bf16.mxu0 %v5157_v26  ;;  %v5161_v39 = vpack.c.bf16 %v110_v36, %v102_v35  ;;  %v109_v42 = vld [vmem:[%s12897_s1 + $0x1c0] sm:$0xff]  ;;  %v5577_v43 = vpack.c.bf16 %v112_v40, %v104_v37  ;;  %v103_v44 = vld [vmem:[%s12897_s1 + $0x190] sm:$0xff]  ;;  %v118_v46 = vld [vmem:[%s12897_s1 + $0x208] sm:$0xff] }
  0x1d   :  { %5574 = vmatprep.subr.bf16.mxu1 %v5573_v30  ;;  %v111_v45 = vld [vmem:[%s12897_s1 + $0x1d0] sm:$0xff]  ;;  %v126_v47 = vld [vmem:[%s12897_s1 + $0x248] sm:$0xff]  ;;  %v120_v48 = vld [vmem:[%s12897_s1 + $0x218] sm:$0xff]  ;;  %v5163_v50 = vpack.c.bf16 %v109_v42, %v101_v41 }
  0x1e   :  { %v128_v49 = vld [vmem:[%s12897_s1 + $0x258] sm:$0xff]  ;;  %v5579_v51 = vpack.c.bf16 %v111_v45, %v103_v44  ;;  %v5165_v52 = vpack.c.bf16 %v126_v47, %v118_v46  ;;  %v117_v53 = vld [vmem:[%s12897_s1 + $0x200] sm:$0xff]  ;;  %v119_v55 = vld [vmem:[%s12897_s1 + $0x210] sm:$0xff] }
  0x1f   :  { %5160 = vmatpush1.bf16.msra.mxu0 %v5159_v34  ;;  %v125_v54 = vld [vmem:[%s12897_s1 + $0x240] sm:$0xff]  ;;  %v5581_v56 = vpack.c.bf16 %v128_v49, %v120_v48  ;;  %v127_v57 = vld [vmem:[%s12897_s1 + $0x250] sm:$0xff]  ;;  %v134_v58 = vld [vmem:[%s12897_s1 + $0x288] sm:$0xff] }
  0x20   :  { %5576 = vmatpush1.bf16.msra.mxu1 %v5575_v38  ;;  %5162 = vmatprep.subr.bf16.mxu0 %v5161_v39  ;;  %v142_v59 = vld [vmem:[%s12897_s1 + $0x2c8] sm:$0xff]  ;;  %v136_v60 = vld [vmem:[%s12897_s1 + $0x298] sm:$0xff]  ;;  %v5167_v62 = vpack.c.bf16 %v125_v54, %v117_v53  ;;  %v5583_v63 = vpack.c.bf16 %v127_v57, %v119_v55  ;;  %v133_v1 = vld [vmem:[%s12897_s1 + $0x280] sm:$0xff] }
  0x21   :  { %5578 = vmatprep.subr.bf16.mxu1 %v5577_v43  ;;  %v144_v61 = vld [vmem:[%s12897_s1 + $0x2d8] sm:$0xff]  ;;  %v5169_v0 = vpack.c.bf16 %v142_v59, %v134_v58  ;;  %v141_v2 = vld [vmem:[%s12897_s1 + $0x2c0] sm:$0xff]  ;;  %v135_v3 = vld [vmem:[%s12897_s1 + $0x290] sm:$0xff] }
  0x22   :  { %v5585_v4 = vpack.c.bf16 %v144_v61, %v136_v60  ;;  %v143_v5 = vld [vmem:[%s12897_s1 + $0x2d0] sm:$0xff]  ;;  %v150_v6 = vld [vmem:[%s12897_s1 + $0x308] sm:$0xff]  ;;  %v152_v8 = vld [vmem:[%s12897_s1 + $0x318] sm:$0xff]  ;;  %v5171_v10 = vpack.c.bf16 %v141_v2, %v133_v1 }
  0x23   :  { %5164 = vmatpush1.bf16.msra.mxu0 %v5163_v50  ;;  %v158_v7 = vld [vmem:[%s12897_s1 + $0x348] sm:$0xff]  ;;  %v160_v9 = vld [vmem:[%s12897_s1 + $0x358] sm:$0xff]  ;;  %v5587_v11 = vpack.c.bf16 %v143_v5, %v135_v3  ;;  %v149_v13 = vld [vmem:[%s12897_s1 + $0x300] sm:$0xff] }
  0x24   :  { %5580 = vmatpush1.bf16.msra.mxu1 %v5579_v51  ;;  %5166 = vmatprep.subr.bf16.mxu0 %v5165_v52  ;;  %v5173_v12 = vpack.c.bf16 %v158_v7, %v150_v6  ;;  %v157_v14 = vld [vmem:[%s12897_s1 + $0x340] sm:$0xff]  ;;  %v151_v15 = vld [vmem:[%s12897_s1 + $0x310] sm:$0xff]  ;;  %v5589_v16 = vpack.c.bf16 %v160_v9, %v152_v8  ;;  %v166_v18 = vld [vmem:[%s12897_s1 + $0x388] sm:$0xff] }
  0x25   :  { %5582 = vmatprep.subr.bf16.mxu1 %v5581_v56  ;;  %v159_v17 = vld [vmem:[%s12897_s1 + $0x350] sm:$0xff]  ;;  %v174_v19 = vld [vmem:[%s12897_s1 + $0x3c8] sm:$0xff]  ;;  %v168_v20 = vld [vmem:[%s12897_s1 + $0x398] sm:$0xff]  ;;  %v5175_v22 = vpack.c.bf16 %v157_v14, %v149_v13 }
  0x26   :  { %v176_v21 = vld [vmem:[%s12897_s1 + $0x3d8] sm:$0xff]  ;;  %v5591_v23 = vpack.c.bf16 %v159_v17, %v151_v15  ;;  %v5177_v24 = vpack.c.bf16 %v174_v19, %v166_v18  ;;  %v165_v25 = vld [vmem:[%s12897_s1 + $0x380] sm:$0xff]  ;;  %v167_v27 = vld [vmem:[%s12897_s1 + $0x390] sm:$0xff] }
  0x27   :  { %5168 = vmatpush1.bf16.msra.mxu0 %v5167_v62  ;;  %v173_v26 = vld [vmem:[%s12897_s1 + $0x3c0] sm:$0xff]  ;;  %v5593_v28 = vpack.c.bf16 %v176_v21, %v168_v20  ;;  %v175_v29 = vld [vmem:[%s12897_s1 + $0x3d0] sm:$0xff]  ;;  %v182_v30 = vld [vmem:[%s12897_s1 + $0x408] sm:$0xff] }
  0x28   :  { %5584 = vmatpush1.bf16.msra.mxu1 %v5583_v63  ;;  %5170 = vmatprep.subr.bf16.mxu0 %v5169_v0  ;;  %v190_v31 = vld [vmem:[%s12897_s1 + $0x448] sm:$0xff]  ;;  %v184_v32 = vld [vmem:[%s12897_s1 + $0x418] sm:$0xff]  ;;  %v5179_v34 = vpack.c.bf16 %v173_v26, %v165_v25  ;;  %v5595_v35 = vpack.c.bf16 %v175_v29, %v167_v27  ;;  %v181_v37 = vld [vmem:[%s12897_s1 + $0x400] sm:$0xff] }
  0x29   :  { %5586 = vmatprep.subr.bf16.mxu1 %v5585_v4  ;;  %v192_v33 = vld [vmem:[%s12897_s1 + $0x458] sm:$0xff]  ;;  %v5181_v36 = vpack.c.bf16 %v190_v31, %v182_v30  ;;  %v189_v38 = vld [vmem:[%s12897_s1 + $0x440] sm:$0xff]  ;;  %v183_v39 = vld [vmem:[%s12897_s1 + $0x410] sm:$0xff] }
  0x2a   :  { %v5597_v40 = vpack.c.bf16 %v192_v33, %v184_v32  ;;  %v191_v41 = vld [vmem:[%s12897_s1 + $0x450] sm:$0xff]  ;;  %v198_v42 = vld [vmem:[%s12897_s1 + $0x488] sm:$0xff]  ;;  %v200_v44 = vld [vmem:[%s12897_s1 + $0x498] sm:$0xff]  ;;  %v5183_v46 = vpack.c.bf16 %v189_v38, %v181_v37 }
  0x2b   :  { %5172 = vmatpush1.bf16.msra.mxu0 %v5171_v10  ;;  %v206_v43 = vld [vmem:[%s12897_s1 + $0x4c8] sm:$0xff]  ;;  %v208_v45 = vld [vmem:[%s12897_s1 + $0x4d8] sm:$0xff]  ;;  %v5599_v47 = vpack.c.bf16 %v191_v41, %v183_v39  ;;  %v197_v49 = vld [vmem:[%s12897_s1 + $0x480] sm:$0xff] }
  0x2c   :  { %5588 = vmatpush1.bf16.msra.mxu1 %v5587_v11  ;;  %5174 = vmatprep.subr.bf16.mxu0 %v5173_v12  ;;  %v5185_v48 = vpack.c.bf16 %v206_v43, %v198_v42  ;;  %v205_v50 = vld [vmem:[%s12897_s1 + $0x4c0] sm:$0xff]  ;;  %v199_v51 = vld [vmem:[%s12897_s1 + $0x490] sm:$0xff]  ;;  %v5601_v52 = vpack.c.bf16 %v208_v45, %v200_v44  ;;  %v214_v54 = vld [vmem:[%s12897_s1 + $0x508] sm:$0xff] }
  0x2d   :  { %5590 = vmatprep.subr.bf16.mxu1 %v5589_v16  ;;  %v207_v53 = vld [vmem:[%s12897_s1 + $0x4d0] sm:$0xff]  ;;  %v222_v55 = vld [vmem:[%s12897_s1 + $0x548] sm:$0xff]  ;;  %v216_v56 = vld [vmem:[%s12897_s1 + $0x518] sm:$0xff]  ;;  %v5187_v58 = vpack.c.bf16 %v205_v50, %v197_v49 }
  0x2e   :  { %v224_v57 = vld [vmem:[%s12897_s1 + $0x558] sm:$0xff]  ;;  %v5603_v59 = vpack.c.bf16 %v207_v53, %v199_v51  ;;  %v5189_v60 = vpack.c.bf16 %v222_v55, %v214_v54  ;;  %v213_v61 = vld [vmem:[%s12897_s1 + $0x500] sm:$0xff]  ;;  %v215_v63 = vld [vmem:[%s12897_s1 + $0x510] sm:$0xff] }
  0x2f   :  { %5176 = vmatpush1.bf16.msra.mxu0 %v5175_v22  ;;  %v221_v62 = vld [vmem:[%s12897_s1 + $0x540] sm:$0xff]  ;;  %v5605_v0 = vpack.c.bf16 %v224_v57, %v216_v56  ;;  %v223_v1 = vld [vmem:[%s12897_s1 + $0x550] sm:$0xff]  ;;  %v230_v2 = vld [vmem:[%s12897_s1 + $0x588] sm:$0xff] }
  0x30   :  { %5592 = vmatpush1.bf16.msra.mxu1 %v5591_v23  ;;  %5178 = vmatprep.subr.bf16.mxu0 %v5177_v24  ;;  %v238_v3 = vld [vmem:[%s12897_s1 + $0x5c8] sm:$0xff]  ;;  %v232_v4 = vld [vmem:[%s12897_s1 + $0x598] sm:$0xff]  ;;  %v5191_v6 = vpack.c.bf16 %v221_v62, %v213_v61  ;;  %v229_v7 = vld [vmem:[%s12897_s1 + $0x580] sm:$0xff]  ;;  %v5607_v8 = vpack.c.bf16 %v223_v1, %v215_v63 }
  0x31   :  { %5594 = vmatprep.subr.bf16.mxu1 %v5593_v28  ;;  %v240_v5 = vld [vmem:[%s12897_s1 + $0x5d8] sm:$0xff]  ;;  %v5193_v9 = vpack.c.bf16 %v238_v3, %v230_v2  ;;  %v237_v10 = vld [vmem:[%s12897_s1 + $0x5c0] sm:$0xff]  ;;  %v231_v11 = vld [vmem:[%s12897_s1 + $0x590] sm:$0xff] }
  0x32   :  { %v239_v12 = vld [vmem:[%s12897_s1 + $0x5d0] sm:$0xff]  ;;  %v5609_v13 = vpack.c.bf16 %v240_v5, %v232_v4  ;;  %v246_v14 = vld [vmem:[%s12897_s1 + $0x608] sm:$0xff]  ;;  %v248_v17 = vld [vmem:[%s12897_s1 + $0x618] sm:$0xff]  ;;  %v5195_v19 = vpack.c.bf16 %v237_v10, %v229_v7 }
  0x33   :  { %5180 = vmatpush1.bf16.msra.mxu0 %v5179_v34  ;;  %v254_v15 = vld [vmem:[%s12897_s1 + $0x648] sm:$0xff]  ;;  %v256_v18 = vld [vmem:[%s12897_s1 + $0x658] sm:$0xff]  ;;  %v5611_v20 = vpack.c.bf16 %v239_v12, %v231_v11  ;;  %v245_v22 = vld [vmem:[%s12897_s1 + $0x600] sm:$0xff] }
  0x34   :  { %5596 = vmatpush1.bf16.msra.mxu1 %v5595_v35  ;;  %5182 = vmatprep.subr.bf16.mxu0 %v5181_v36  ;;  %v41_v16 = vld [vmem:[%s12896_s0 + $0x8] sm:$0xff]  ;;  %v5197_v21 = vpack.c.bf16 %v254_v15, %v246_v14  ;;  %v253_v23 = vld [vmem:[%s12897_s1 + $0x640] sm:$0xff]  ;;  %v247_v24 = vld [vmem:[%s12897_s1 + $0x610] sm:$0xff]  ;;  %v5613_v25 = vpack.c.bf16 %v256_v18, %v248_v17 }
  0x35   :  { %5598 = vmatprep.subr.bf16.mxu1 %v5597_v40  ;;  %1823 = vmatprep.mubr.f32.mxu0 %v41_v16  ;;  %v255_v26 = vld [vmem:[%s12897_s1 + $0x650] sm:$0xff]  ;;  %v262_v27 = vld [vmem:[%s12897_s1 + $0x688] sm:$0xff]  ;;  %v264_v29 = vld [vmem:[%s12897_s1 + $0x698] sm:$0xff]  ;;  %v5199_v31 = vpack.c.bf16 %v253_v23, %v245_v22 }
  0x36   :  { %2320 = vmatprep.mubr.f32.mxu1 %v41_v16  ;;  %v270_v28 = vld [vmem:[%s12897_s1 + $0x6c8] sm:$0xff]  ;;  %v272_v30 = vld [vmem:[%s12897_s1 + $0x6d8] sm:$0xff]  ;;  %v5615_v32 = vpack.c.bf16 %v255_v26, %v247_v24  ;;  %v261_v34 = vld [vmem:[%s12897_s1 + $0x680] sm:$0xff] }
  0x37   :  { %5184 = vmatpush1.bf16.msra.mxu0 %v5183_v46  ;;  %v5201_v33 = vpack.c.bf16 %v270_v28, %v262_v27  ;;  %v269_v35 = vld [vmem:[%s12897_s1 + $0x6c0] sm:$0xff]  ;;  %v263_v36 = vld [vmem:[%s12897_s1 + $0x690] sm:$0xff]  ;;  %v5617_v37 = vpack.c.bf16 %v272_v30, %v264_v29  ;;  %v278_v39 = vld [vmem:[%s12897_s1 + $0x708] sm:$0xff] }
  0x38   :  { %5600 = vmatpush1.bf16.msra.mxu1 %v5599_v47  ;;  %5186 = vmatprep.subr.bf16.mxu0 %v5185_v48  ;;  %v271_v38 = vld [vmem:[%s12897_s1 + $0x6d0] sm:$0xff]  ;;  %v286_v40 = vld [vmem:[%s12897_s1 + $0x748] sm:$0xff]  ;;  %v280_v41 = vld [vmem:[%s12897_s1 + $0x718] sm:$0xff]  ;;  %v5203_v43 = vpack.c.bf16 %v269_v35, %v261_v34 }
  0x39   :  { %5602 = vmatprep.subr.bf16.mxu1 %v5601_v52  ;;  %v288_v42 = vld [vmem:[%s12897_s1 + $0x758] sm:$0xff]  ;;  %v5619_v44 = vpack.c.bf16 %v271_v38, %v263_v36  ;;  %v5205_v45 = vpack.c.bf16 %v286_v40, %v278_v39  ;;  %v277_v46 = vld [vmem:[%s12897_s1 + $0x700] sm:$0xff]  ;;  %v279_v48 = vld [vmem:[%s12897_s1 + $0x710] sm:$0xff] }
  0x3a   :  { %v285_v47 = vld [vmem:[%s12897_s1 + $0x740] sm:$0xff]  ;;  %v5621_v49 = vpack.c.bf16 %v288_v42, %v280_v41  ;;  %v287_v50 = vld [vmem:[%s12897_s1 + $0x750] sm:$0xff]  ;;  %v294_v51 = vld [vmem:[%s12897_s1 + $0x788] sm:$0xff] }
  0x3b   :  { %5188 = vmatpush1.bf16.msra.mxu0 %v5187_v58  ;;  %v302_v52 = vld [vmem:[%s12897_s1 + $0x7c8] sm:$0xff]  ;;  %v296_v53 = vld [vmem:[%s12897_s1 + $0x798] sm:$0xff]  ;;  %v5207_v55 = vpack.c.bf16 %v285_v47, %v277_v46  ;;  %v5623_v56 = vpack.c.bf16 %v287_v50, %v279_v48  ;;  %v293_v58 = vld [vmem:[%s12897_s1 + $0x780] sm:$0xff] }
  0x3c   :  { %5604 = vmatpush1.bf16.msra.mxu1 %v5603_v59  ;;  %5190 = vmatprep.subr.bf16.mxu0 %v5189_v60  ;;  %v304_v54 = vld [vmem:[%s12897_s1 + $0x7d8] sm:$0xff]  ;;  %v5209_v57 = vpack.c.bf16 %v302_v52, %v294_v51  ;;  %v301_v59 = vld [vmem:[%s12897_s1 + $0x7c0] sm:$0xff]  ;;  %v295_v60 = vld [vmem:[%s12897_s1 + $0x790] sm:$0xff] }
  0x3d   :  { %5606 = vmatprep.subr.bf16.mxu1 %v5605_v0  ;;  %v5625_v61 = vpack.c.bf16 %v304_v54, %v296_v53  ;;  %v303_v62 = vld [vmem:[%s12897_s1 + $0x7d0] sm:$0xff]  ;;  %v310_v63 = vld [vmem:[%s12897_s1 + $0x808] sm:$0xff]  ;;  %v312_v1 = vld [vmem:[%s12897_s1 + $0x818] sm:$0xff]  ;;  %v5211_v3 = vpack.c.bf16 %v301_v59, %v293_v58 }
  0x3e   :  { %v318_v0 = vld [vmem:[%s12897_s1 + $0x848] sm:$0xff]  ;;  %v320_v2 = vld [vmem:[%s12897_s1 + $0x858] sm:$0xff]  ;;  %v5627_v4 = vpack.c.bf16 %v303_v62, %v295_v60  ;;  %v317_v7 = vld [vmem:[%s12897_s1 + $0x840] sm:$0xff] }
  0x3f   :  { %5192 = vmatpush1.bf16.msra.mxu0 %v5191_v6  ;;  %v5213_v5 = vpack.c.bf16 %v318_v0, %v310_v63  ;;  %v309_v6 = vld [vmem:[%s12897_s1 + $0x800] sm:$0xff]  ;;  %v319_v10 = vld [vmem:[%s12897_s1 + $0x850] sm:$0xff]  ;;  %v326_v11 = vld [vmem:[%s12897_s1 + $0x888] sm:$0xff] }
  0x40   :  { %5608 = vmatpush1.bf16.msra.mxu1 %v5607_v8  ;;  %5194 = vmatprep.subr.bf16.mxu0 %v5193_v9  ;;  %v311_v8 = vld [vmem:[%s12897_s1 + $0x810] sm:$0xff]  ;;  %v5629_v9 = vpack.c.bf16 %v320_v2, %v312_v1  ;;  %v334_v12 = vld [vmem:[%s12897_s1 + $0x8c8] sm:$0xff]  ;;  %v336_v14 = vld [vmem:[%s12897_s1 + $0x8d8] sm:$0xff]  ;;  %v5215_v16 = vpack.c.bf16 %v317_v7, %v309_v6 }
  0x41   :  { %5610 = vmatprep.subr.bf16.mxu1 %v5609_v13  ;;  %v328_v13 = vld [vmem:[%s12897_s1 + $0x898] sm:$0xff]  ;;  %v40_v15 = vld [vmem:[%s12896_s0] sm:$0xff]  ;;  %v5631_v17 = vpack.c.bf16 %v319_v10, %v311_v8  ;;  %v5217_v18 = vpack.c.bf16 %v334_v12, %v326_v11  ;;  %v335_v23 = vld [vmem:[%s12897_s1 + $0x8d0] sm:$0xff] }
  0x42   :  { %v5633_v22 = vpack.c.bf16 %v336_v14, %v328_v13  ;;  %v342_v24 = vld [vmem:[%s12897_s1 + $0x908] sm:$0xff]  ;;  %v344_v26 = vld [vmem:[%s12897_s1 + $0x918] sm:$0xff]  ;;  %v351_v35 = vld [vmem:[%s12897_s1 + $0x950] sm:$0xff] }
  0x43   :  { %5196 = vmatpush1.bf16.msra.mxu0 %v5195_v19  ;;  %v325_v19 = vld [vmem:[%s12897_s1 + $0x880] sm:$0xff]  ;;  %v352_v27 = vld [vmem:[%s12897_s1 + $0x958] sm:$0xff]  ;;  %v358_v36 = vld [vmem:[%s12897_s1 + $0x988] sm:$0xff] }
  0x44   :  { %5612 = vmatpush1.bf16.msra.mxu1 %v5611_v20  ;;  %5198 = vmatprep.subr.bf16.mxu0 %v5197_v21  ;;  %v333_v20 = vld [vmem:[%s12897_s1 + $0x8c0] sm:$0xff]  ;;  %v327_v21 = vld [vmem:[%s12897_s1 + $0x890] sm:$0xff]  ;;  %v5637_v34 = vpack.c.bf16 %v352_v27, %v344_v26  ;;  %v360_v38 = vld [vmem:[%s12897_s1 + $0x998] sm:$0xff] }
  0x45   :  { %5614 = vmatprep.subr.bf16.mxu1 %v5613_v25  ;;  %v350_v25 = vld [vmem:[%s12897_s1 + $0x948] sm:$0xff]  ;;  %v5219_v28 = vpack.c.bf16 %v333_v20, %v325_v19  ;;  %v5635_v29 = vpack.c.bf16 %v335_v23, %v327_v21  ;;  %v368_v39 = vld [vmem:[%s12897_s1 + $0x9d8] sm:$0xff]  ;;  %v367_v47 = vld [vmem:[%s12897_s1 + $0x9d0] sm:$0xff] }
  0x46   :  { %v5221_v30 = vpack.c.bf16 %v350_v25, %v342_v24  ;;  %v5641_v46 = vpack.c.bf16 %v368_v39, %v360_v38  ;;  %v374_v48 = vld [vmem:[%s12897_s1 + $0xa08] sm:$0xff]  ;;  %v376_v50 = vld [vmem:[%s12897_s1 + $0xa18] sm:$0xff]  ;;  %v383_v59 = vld [vmem:[%s12897_s1 + $0xa50] sm:$0xff] }
  0x47   :  { %5200 = vmatpush1.bf16.msra.mxu0 %v5199_v31  ;;  %v341_v31 = vld [vmem:[%s12897_s1 + $0x900] sm:$0xff]  ;;  %v384_v51 = vld [vmem:[%s12897_s1 + $0xa58] sm:$0xff]  ;;  %v390_v60 = vld [vmem:[%s12897_s1 + $0xa88] sm:$0xff] }
  0x48   :  { %5616 = vmatpush1.bf16.msra.mxu1 %v5615_v32  ;;  %5202 = vmatprep.subr.bf16.mxu0 %v5201_v33  ;;  %v349_v32 = vld [vmem:[%s12897_s1 + $0x940] sm:$0xff]  ;;  %v343_v33 = vld [vmem:[%s12897_s1 + $0x910] sm:$0xff]  ;;  %v5645_v58 = vpack.c.bf16 %v384_v51, %v376_v50  ;;  %v392_v62 = vld [vmem:[%s12897_s1 + $0xa98] sm:$0xff] }
  0x49   :  { %5618 = vmatprep.subr.bf16.mxu1 %v5617_v37  ;;  %v366_v37 = vld [vmem:[%s12897_s1 + $0x9c8] sm:$0xff]  ;;  %v5223_v40 = vpack.c.bf16 %v349_v32, %v341_v31  ;;  %v5639_v41 = vpack.c.bf16 %v351_v35, %v343_v33  ;;  %v400_v63 = vld [vmem:[%s12897_s1 + $0xad8] sm:$0xff]  ;;  %v399_v7 = vld [vmem:[%s12897_s1 + $0xad0] sm:$0xff] }
  0x4a   :  { %v5225_v42 = vpack.c.bf16 %v366_v37, %v358_v36  ;;  %v5649_v6 = vpack.c.bf16 %v400_v63, %v392_v62  ;;  %v406_v8 = vld [vmem:[%s12897_s1 + $0xb08] sm:$0xff]  ;;  %v408_v10 = vld [vmem:[%s12897_s1 + $0xb18] sm:$0xff]  ;;  %v405_v13 = vld [vmem:[%s12897_s1 + $0xb00] sm:$0xff] }
  0x4b   :  { %5204 = vmatpush1.bf16.msra.mxu0 %v5203_v43  ;;  %v357_v43 = vld [vmem:[%s12897_s1 + $0x980] sm:$0xff]  ;;  %v416_v11 = vld [vmem:[%s12897_s1 + $0xb58] sm:$0xff]  ;;  %v422_v20 = vld [vmem:[%s12897_s1 + $0xb88] sm:$0xff] }
  0x4c   :  { %5620 = vmatpush1.bf16.msra.mxu1 %v5619_v44  ;;  %5206 = vmatprep.subr.bf16.mxu0 %v5205_v45  ;;  %v365_v44 = vld [vmem:[%s12897_s1 + $0x9c0] sm:$0xff]  ;;  %v359_v45 = vld [vmem:[%s12897_s1 + $0x990] sm:$0xff]  ;;  %v5653_v19 = vpack.c.bf16 %v416_v11, %v408_v10  ;;  %v430_v21 = vld [vmem:[%s12897_s1 + $0xbc8] sm:$0xff] }
  0x4d   :  { %5622 = vmatprep.subr.bf16.mxu1 %v5621_v49  ;;  %v382_v49 = vld [vmem:[%s12897_s1 + $0xa48] sm:$0xff]  ;;  %v5227_v52 = vpack.c.bf16 %v365_v44, %v357_v43  ;;  %v5643_v53 = vpack.c.bf16 %v367_v47, %v359_v45  ;;  %v424_v23 = vld [vmem:[%s12897_s1 + $0xb98] sm:$0xff]  ;;  %v5241_v27 = vpack.c.bf16 %v430_v21, %v422_v20  ;;  %v431_v32 = vld [vmem:[%s12897_s1 + $0xbd0] sm:$0xff] }
  0x4e   :  { %v5229_v54 = vpack.c.bf16 %v382_v49, %v374_v48  ;;  %v432_v24 = vld [vmem:[%s12897_s1 + $0xbd8] sm:$0xff]  ;;  %v438_v33 = vld [vmem:[%s12897_s1 + $0xc08] sm:$0xff]  ;;  %v447_v44 = vld [vmem:[%s12897_s1 + $0xc50] sm:$0xff] }
  0x4f   :  { %5208 = vmatpush1.bf16.msra.mxu0 %v5207_v55  ;;  %v373_v55 = vld [vmem:[%s12897_s1 + $0xa00] sm:$0xff]  ;;  %v5657_v31 = vpack.c.bf16 %v432_v24, %v424_v23  ;;  %v440_v35 = vld [vmem:[%s12897_s1 + $0xc18] sm:$0xff]  ;;  %v454_v45 = vld [vmem:[%s12897_s1 + $0xc88] sm:$0xff] }
  0x50   :  { %5624 = vmatpush1.bf16.msra.mxu1 %v5623_v56  ;;  %5210 = vmatprep.subr.bf16.mxu0 %v5209_v57  ;;  %v381_v56 = vld [vmem:[%s12897_s1 + $0xa40] sm:$0xff]  ;;  %v375_v57 = vld [vmem:[%s12897_s1 + $0xa10] sm:$0xff]  ;;  %v448_v36 = vld [vmem:[%s12897_s1 + $0xc58] sm:$0xff] }
  0x51   :  { %5626 = vmatprep.subr.bf16.mxu1 %v5625_v61  ;;  %v398_v61 = vld [vmem:[%s12897_s1 + $0xac8] sm:$0xff]  ;;  %v5231_v0 = vpack.c.bf16 %v381_v56, %v373_v55  ;;  %v5647_v1 = vpack.c.bf16 %v383_v59, %v375_v57  ;;  %v5661_v43 = vpack.c.bf16 %v448_v36, %v440_v35  ;;  %v456_v47 = vld [vmem:[%s12897_s1 + $0xc98] sm:$0xff]  ;;  %v463_v56 = vld [vmem:[%s12897_s1 + $0xcd0] sm:$0xff] }
  0x52   :  { %v5233_v2 = vpack.c.bf16 %v398_v61, %v390_v60  ;;  %v464_v48 = vld [vmem:[%s12897_s1 + $0xcd8] sm:$0xff]  ;;  %v470_v57 = vld [vmem:[%s12897_s1 + $0xd08] sm:$0xff]  ;;  %v501_v24 = vld [vmem:[%s12897_s1 + $0xe00] sm:$0xff] }
  0x53   :  { %5212 = vmatpush1.bf16.msra.mxu0 %v5211_v3  ;;  %v389_v3 = vld [vmem:[%s12897_s1 + $0xa80] sm:$0xff]  ;;  %v5665_v55 = vpack.c.bf16 %v464_v48, %v456_v47  ;;  %v472_v59 = vld [vmem:[%s12897_s1 + $0xd18] sm:$0xff] }
  0x54   :  { %5628 = vmatpush1.bf16.msra.mxu1 %v5627_v4  ;;  %5214 = vmatprep.subr.bf16.mxu0 %v5213_v5  ;;  %v397_v4 = vld [vmem:[%s12897_s1 + $0xac0] sm:$0xff]  ;;  %v391_v5 = vld [vmem:[%s12897_s1 + $0xa90] sm:$0xff]  ;;  %v480_v60 = vld [vmem:[%s12897_s1 + $0xd58] sm:$0xff] }
  0x55   :  { %5630 = vmatprep.subr.bf16.mxu1 %v5629_v9  ;;  %v414_v9 = vld [vmem:[%s12897_s1 + $0xb48] sm:$0xff]  ;;  %v5235_v12 = vpack.c.bf16 %v397_v4, %v389_v3  ;;  %v5651_v14 = vpack.c.bf16 %v399_v7, %v391_v5  ;;  %v5669_v3 = vpack.c.bf16 %v480_v60, %v472_v59  ;;  %v479_v4 = vld [vmem:[%s12897_s1 + $0xd50] sm:$0xff]  ;;  %v488_v7 = vld [vmem:[%s12897_s1 + $0xd98] sm:$0xff] }
  0x56   :  { %1824 = vmatmul.mubr.f32.vlgmr.msra.gmra.mrb[0].mxu0 %v40_v15  ;;  %v486_v5 = vld [vmem:[%s12897_s1 + $0xd88] sm:$0xff]  ;;  %v512_v20 = vld [vmem:[%s12897_s1 + $0xe58] sm:$0xff]  ;;  %v517_v36 = vld [vmem:[%s12897_s1 + $0xe80] sm:$0xff] }
  0x57   :  { %5216 = vmatpush1.bf16.msra.mxu0 %v5215_v16  ;;  %2321 = vmatmul.mubr.f32.vlgmr.msra.gmra.mrb[0].mxu1 %v40_v15  ;;  %v5237_v15 = vpack.c.bf16 %v414_v9, %v406_v8  ;;  %v413_v16 = vld [vmem:[%s12897_s1 + $0xb40] sm:$0xff]  ;;  %v496_v8 = vld [vmem:[%s12897_s1 + $0xdd8] sm:$0xff] }
  0x58   :  { %5632 = vmatpush1.bf16.msra.mxu1 %v5631_v17  ;;  %5218 = vmatprep.subr.bf16.mxu0 %v5217_v18  ;;  %v407_v17 = vld [vmem:[%s12897_s1 + $0xb10] sm:$0xff]  ;;  %v5239_v25 = vpack.c.bf16 %v413_v16, %v405_v13  ;;  %v493_v13 = vld [vmem:[%s12897_s1 + $0xdc0] sm:$0xff] }
  0x59   :  { %5634 = vmatprep.subr.bf16.mxu1 %v5633_v22  ;;  %v415_v18 = vld [vmem:[%s12897_s1 + $0xb50] sm:$0xff]  ;;  %v43_v22 = vld [vmem:[%s12896_s0 + $0x18] sm:$0xff]  ;;  %v533_v48 = vld [vmem:[%s12897_s1 + $0xf00] sm:$0xff] }
  0x5a   :  { %1894 = vmatprep.mubr.f32.mxu0 %v43_v22  ;;  %2391 = vmatprep.mubr.f32.mxu1 %v43_v22  ;;  %v5655_v26 = vpack.c.bf16 %v415_v18, %v407_v17  ;;  %v495_v16 = vld [vmem:[%s12897_s1 + $0xdd0] sm:$0xff]  ;;  %v502_v17 = vld [vmem:[%s12897_s1 + $0xe08] sm:$0xff]  ;;  %v549_v60 = vld [vmem:[%s12897_s1 + $0xf80] sm:$0xff] }
  0x5b   :  { %5220 = vmatpush1.bf16.msra.mxu0 %v5219_v28  ;;  %v421_v28 = vld [vmem:[%s12897_s1 + $0xb80] sm:$0xff]  ;;  %v510_v18 = vld [vmem:[%s12897_s1 + $0xe48] sm:$0xff] }
  0x5c   :  { %5636 = vmatpush1.bf16.msra.mxu1 %v5635_v29  ;;  %5222 = vmatprep.subr.bf16.mxu0 %v5221_v30  ;;  %v429_v29 = vld [vmem:[%s12897_s1 + $0xbc0] sm:$0xff]  ;;  %v423_v30 = vld [vmem:[%s12897_s1 + $0xb90] sm:$0xff]  ;;  %v5261_v23 = vpack.c.bf16 %v510_v18, %v502_v17 }
  0x5d   :  { %5638 = vmatprep.subr.bf16.mxu1 %v5637_v34  ;;  %v446_v34 = vld [vmem:[%s12897_s1 + $0xc48] sm:$0xff]  ;;  %v5243_v37 = vpack.c.bf16 %v429_v29, %v421_v28  ;;  %v5659_v38 = vpack.c.bf16 %v431_v32, %v423_v30  ;;  %v511_v28 = vld [vmem:[%s12897_s1 + $0xe50] sm:$0xff]  ;;  %v528_v32 = vld [vmem:[%s12897_s1 + $0xed8] sm:$0xff] }
  0x5e   :  { %v5245_v39 = vpack.c.bf16 %v446_v34, %v438_v33  ;;  %v518_v29 = vld [vmem:[%s12897_s1 + $0xe88] sm:$0xff]  ;;  %v42_v17 = vld [vmem:[%s12896_s0 + $0x10] sm:$0xff] }
  0x5f   :  { %5224 = vmatpush1.bf16.msra.mxu0 %v5223_v40  ;;  %v437_v40 = vld [vmem:[%s12897_s1 + $0xc00] sm:$0xff]  ;;  %v526_v30 = vld [vmem:[%s12897_s1 + $0xec8] sm:$0xff] }
  0x60   :  { %5640 = vmatpush1.bf16.msra.mxu1 %v5639_v41  ;;  %5226 = vmatprep.subr.bf16.mxu0 %v5225_v42  ;;  %v445_v41 = vld [vmem:[%s12897_s1 + $0xc40] sm:$0xff]  ;;  %v439_v42 = vld [vmem:[%s12897_s1 + $0xc10] sm:$0xff]  ;;  %v5265_v35 = vpack.c.bf16 %v526_v30, %v518_v29  ;;  %v608_v29 = vld [vmem:[%s12897_s1 + $0x1158] sm:$0xff] }
  0x61   :  { %5642 = vmatprep.subr.bf16.mxu1 %v5641_v46  ;;  %v462_v46 = vld [vmem:[%s12897_s1 + $0xcc8] sm:$0xff]  ;;  %v5247_v49 = vpack.c.bf16 %v445_v41, %v437_v40  ;;  %v5663_v50 = vpack.c.bf16 %v447_v44, %v439_v42  ;;  %v527_v40 = vld [vmem:[%s12897_s1 + $0xed0] sm:$0xff]  ;;  %v544_v44 = vld [vmem:[%s12897_s1 + $0xf58] sm:$0xff] }
  0x62   :  { %v5249_v51 = vpack.c.bf16 %v462_v46, %v454_v45  ;;  %v534_v41 = vld [vmem:[%s12897_s1 + $0xf08] sm:$0xff] }
  0x63   :  { %5228 = vmatpush1.bf16.msra.mxu0 %v5227_v52  ;;  %v453_v52 = vld [vmem:[%s12897_s1 + $0xc80] sm:$0xff]  ;;  %v542_v42 = vld [vmem:[%s12897_s1 + $0xf48] sm:$0xff] }
  0x64   :  { %5644 = vmatpush1.bf16.msra.mxu1 %v5643_v53  ;;  %5230 = vmatprep.subr.bf16.mxu0 %v5229_v54  ;;  %v461_v53 = vld [vmem:[%s12897_s1 + $0xcc0] sm:$0xff]  ;;  %v455_v54 = vld [vmem:[%s12897_s1 + $0xc90] sm:$0xff]  ;;  %v5269_v47 = vpack.c.bf16 %v542_v42, %v534_v41  ;;  %v45_v30 = vld [vmem:[%s12896_s0 + $0x28] sm:$0xff] }
  0x65   :  { %5646 = vmatprep.subr.bf16.mxu1 %v5645_v58  ;;  %v478_v58 = vld [vmem:[%s12897_s1 + $0xd48] sm:$0xff]  ;;  %v5251_v61 = vpack.c.bf16 %v461_v53, %v453_v52  ;;  %v5667_v62 = vpack.c.bf16 %v463_v56, %v455_v54  ;;  %v543_v52 = vld [vmem:[%s12897_s1 + $0xf50] sm:$0xff]  ;;  %v560_v56 = vld [vmem:[%s12897_s1 + $0xfd8] sm:$0xff] }
  0x66   :  { %v5253_v63 = vpack.c.bf16 %v478_v58, %v470_v57  ;;  %v550_v53 = vld [vmem:[%s12897_s1 + $0xf88] sm:$0xff]  ;;  %v616_v41 = vld [vmem:[%s12897_s1 + $0x1198] sm:$0xff] }
  0x67   :  { %5232 = vmatpush1.bf16.msra.mxu0 %v5231_v0  ;;  %v469_v0 = vld [vmem:[%s12897_s1 + $0xd00] sm:$0xff]  ;;  %v558_v54 = vld [vmem:[%s12897_s1 + $0xfc8] sm:$0xff]  ;;  %v624_v42 = vld [vmem:[%s12897_s1 + $0x11d8] sm:$0xff] }
  0x68   :  { %5648 = vmatpush1.bf16.msra.mxu1 %v5647_v1  ;;  %5234 = vmatprep.subr.bf16.mxu0 %v5233_v2  ;;  %v477_v1 = vld [vmem:[%s12897_s1 + $0xd40] sm:$0xff]  ;;  %v471_v2 = vld [vmem:[%s12897_s1 + $0xd10] sm:$0xff]  ;;  %v5273_v59 = vpack.c.bf16 %v558_v54, %v550_v53  ;;  %v632_v53 = vld [vmem:[%s12897_s1 + $0x1218] sm:$0xff] }
  0x69   :  { %5650 = vmatprep.subr.bf16.mxu1 %v5649_v6  ;;  %v494_v6 = vld [vmem:[%s12897_s1 + $0xdc8] sm:$0xff]  ;;  %v5255_v9 = vpack.c.bf16 %v477_v1, %v469_v0  ;;  %v5671_v10 = vpack.c.bf16 %v479_v4, %v471_v2  ;;  %v559_v0 = vld [vmem:[%s12897_s1 + $0xfd0] sm:$0xff]  ;;  %v576_v4 = vld [vmem:[%s12897_s1 + $0x1058] sm:$0xff] }
  0x6a   :  { %v5257_v11 = vpack.c.bf16 %v494_v6, %v486_v5  ;;  %v566_v1 = vld [vmem:[%s12897_s1 + $0x1008] sm:$0xff]  ;;  %v640_v54 = vld [vmem:[%s12897_s1 + $0x1258] sm:$0xff] }
  0x6b   :  { %5236 = vmatpush1.bf16.msra.mxu0 %v5235_v12  ;;  %v485_v12 = vld [vmem:[%s12897_s1 + $0xd80] sm:$0xff]  ;;  %v574_v2 = vld [vmem:[%s12897_s1 + $0x1048] sm:$0xff] }
  0x6c   :  { %5652 = vmatpush1.bf16.msra.mxu1 %v5651_v14  ;;  %5238 = vmatprep.subr.bf16.mxu0 %v5237_v15  ;;  %v487_v14 = vld [vmem:[%s12897_s1 + $0xd90] sm:$0xff]  ;;  %v5673_v15 = vpack.c.bf16 %v496_v8, %v488_v7  ;;  %v5259_v21 = vpack.c.bf16 %v493_v13, %v485_v12  ;;  %v5277_v7 = vpack.c.bf16 %v574_v2, %v566_v1  ;;  %v565_v8 = vld [vmem:[%s12897_s1 + $0x1000] sm:$0xff]  ;;  %v582_v13 = vld [vmem:[%s12897_s1 + $0x1088] sm:$0xff] }
  0x6d   :  { %5654 = vmatprep.subr.bf16.mxu1 %v5653_v19  ;;  %v504_v19 = vld [vmem:[%s12897_s1 + $0xe18] sm:$0xff]  ;;  %v5675_v22 = vpack.c.bf16 %v495_v16, %v487_v14  ;;  %v575_v12 = vld [vmem:[%s12897_s1 + $0x1050] sm:$0xff]  ;;  %v590_v14 = vld [vmem:[%s12897_s1 + $0x10c8] sm:$0xff] }
  0x6e   :  { %v592_v16 = vld [vmem:[%s12897_s1 + $0x10d8] sm:$0xff] }
  0x6f   :  { %5240 = vmatpush1.bf16.msra.mxu0 %v5239_v25  ;;  %v509_v25 = vld [vmem:[%s12897_s1 + $0xe40] sm:$0xff]  ;;  %v648_v1 = vld [vmem:[%s12897_s1 + $0x1298] sm:$0xff] }
  0x70   :  { %5656 = vmatpush1.bf16.msra.mxu1 %v5655_v26  ;;  %5242 = vmatprep.subr.bf16.mxu0 %v5241_v27  ;;  %v503_v26 = vld [vmem:[%s12897_s1 + $0xe10] sm:$0xff]  ;;  %v5677_v27 = vpack.c.bf16 %v512_v20, %v504_v19  ;;  %v5263_v33 = vpack.c.bf16 %v509_v25, %v501_v24  ;;  %v5281_v20 = vpack.c.bf16 %v590_v14, %v582_v13  ;;  %v656_v2 = vld [vmem:[%s12897_s1 + $0x12d8] sm:$0xff] }
  0x71   :  { %5658 = vmatprep.subr.bf16.mxu1 %v5657_v31  ;;  %v520_v31 = vld [vmem:[%s12897_s1 + $0xe98] sm:$0xff]  ;;  %v5679_v34 = vpack.c.bf16 %v511_v28, %v503_v26  ;;  %v591_v25 = vld [vmem:[%s12897_s1 + $0x10d0] sm:$0xff]  ;;  %v598_v26 = vld [vmem:[%s12897_s1 + $0x1108] sm:$0xff] }
  0x72   :  { %v600_v28 = vld [vmem:[%s12897_s1 + $0x1118] sm:$0xff] }
  0x73   :  { %5244 = vmatpush1.bf16.msra.mxu0 %v5243_v37  ;;  %v525_v37 = vld [vmem:[%s12897_s1 + $0xec0] sm:$0xff]  ;;  %v664_v13 = vld [vmem:[%s12897_s1 + $0x1318] sm:$0xff] }
  0x74   :  { %5660 = vmatpush1.bf16.msra.mxu1 %v5659_v38  ;;  %5246 = vmatprep.subr.bf16.mxu0 %v5245_v39  ;;  %v519_v38 = vld [vmem:[%s12897_s1 + $0xe90] sm:$0xff]  ;;  %v5681_v39 = vpack.c.bf16 %v528_v32, %v520_v31  ;;  %v5267_v45 = vpack.c.bf16 %v525_v37, %v517_v36  ;;  %v5701_v37 = vpack.c.bf16 %v608_v29, %v600_v28  ;;  %v672_v14 = vld [vmem:[%s12897_s1 + $0x1358] sm:$0xff] }
  0x75   :  { %5662 = vmatprep.subr.bf16.mxu1 %v5661_v43  ;;  %v536_v43 = vld [vmem:[%s12897_s1 + $0xf18] sm:$0xff]  ;;  %v5683_v46 = vpack.c.bf16 %v527_v40, %v519_v38  ;;  %v599_v36 = vld [vmem:[%s12897_s1 + $0x1110] sm:$0xff]  ;;  %v622_v40 = vld [vmem:[%s12897_s1 + $0x11c8] sm:$0xff] }
  0x76   :  { %v607_v38 = vld [vmem:[%s12897_s1 + $0x1150] sm:$0xff] }
  0x77   :  { %5248 = vmatpush1.bf16.msra.mxu0 %v5247_v49  ;;  %v541_v49 = vld [vmem:[%s12897_s1 + $0xf40] sm:$0xff] }
  0x78   :  { %5664 = vmatpush1.bf16.msra.mxu1 %v5663_v50  ;;  %5250 = vmatprep.subr.bf16.mxu0 %v5249_v51  ;;  %v535_v50 = vld [vmem:[%s12897_s1 + $0xf10] sm:$0xff]  ;;  %v5685_v51 = vpack.c.bf16 %v544_v44, %v536_v43  ;;  %v5271_v57 = vpack.c.bf16 %v541_v49, %v533_v48  ;;  %v5703_v44 = vpack.c.bf16 %v607_v38, %v599_v36  ;;  %v702_v36 = vld [vmem:[%s12897_s1 + $0x1448] sm:$0xff]  ;;  %v704_v38 = vld [vmem:[%s12897_s1 + $0x1458] sm:$0xff] }
  0x79   :  { %5666 = vmatprep.subr.bf16.mxu1 %v5665_v55  ;;  %v552_v55 = vld [vmem:[%s12897_s1 + $0xf98] sm:$0xff]  ;;  %v5687_v58 = vpack.c.bf16 %v543_v52, %v535_v50  ;;  %v615_v48 = vld [vmem:[%s12897_s1 + $0x1190] sm:$0xff]  ;;  %v5705_v49 = vpack.c.bf16 %v624_v42, %v616_v41  ;;  %v638_v52 = vld [vmem:[%s12897_s1 + $0x1248] sm:$0xff] }
  0x7a   :  { %v623_v50 = vld [vmem:[%s12897_s1 + $0x11d0] sm:$0xff]  ;;  %v693_v42 = vld [vmem:[%s12897_s1 + $0x1400] sm:$0xff] }
  0x7b   :  { %5252 = vmatpush1.bf16.msra.mxu0 %v5251_v61  ;;  %v557_v61 = vld [vmem:[%s12897_s1 + $0xfc0] sm:$0xff] }
  0x7c   :  { %5668 = vmatpush1.bf16.msra.mxu1 %v5667_v62  ;;  %5254 = vmatprep.subr.bf16.mxu0 %v5253_v63  ;;  %v551_v62 = vld [vmem:[%s12897_s1 + $0xf90] sm:$0xff]  ;;  %v5689_v63 = vpack.c.bf16 %v560_v56, %v552_v55  ;;  %v5275_v5 = vpack.c.bf16 %v557_v61, %v549_v60  ;;  %v5707_v56 = vpack.c.bf16 %v623_v50, %v615_v48  ;;  %v718_v48 = vld [vmem:[%s12897_s1 + $0x14c8] sm:$0xff]  ;;  %v720_v50 = vld [vmem:[%s12897_s1 + $0x14d8] sm:$0xff] }
  0x7d   :  { %5670 = vmatprep.subr.bf16.mxu1 %v5669_v3  ;;  %v568_v3 = vld [vmem:[%s12897_s1 + $0x1018] sm:$0xff]  ;;  %v5691_v6 = vpack.c.bf16 %v559_v0, %v551_v62  ;;  %v631_v60 = vld [vmem:[%s12897_s1 + $0x1210] sm:$0xff]  ;;  %v5709_v61 = vpack.c.bf16 %v640_v54, %v632_v53  ;;  %v654_v0 = vld [vmem:[%s12897_s1 + $0x12c8] sm:$0xff] }
  0x7e   :  { %v639_v62 = vld [vmem:[%s12897_s1 + $0x1250] sm:$0xff]  ;;  %v709_v54 = vld [vmem:[%s12897_s1 + $0x1480] sm:$0xff] }
  0x7f   :  { %5256 = vmatpush1.bf16.msra.mxu0 %v5255_v9  ;;  %v573_v9 = vld [vmem:[%s12897_s1 + $0x1040] sm:$0xff] }
  0x80   :  { %5672 = vmatpush1.bf16.msra.mxu1 %v5671_v10  ;;  %5258 = vmatprep.subr.bf16.mxu0 %v5257_v11  ;;  %v567_v10 = vld [vmem:[%s12897_s1 + $0x1010] sm:$0xff]  ;;  %v5693_v11 = vpack.c.bf16 %v576_v4, %v568_v3  ;;  %v5279_v18 = vpack.c.bf16 %v573_v9, %v565_v8  ;;  %v5711_v4 = vpack.c.bf16 %v639_v62, %v631_v60  ;;  %v734_v60 = vld [vmem:[%s12897_s1 + $0x1548] sm:$0xff]  ;;  %v736_v62 = vld [vmem:[%s12897_s1 + $0x1558] sm:$0xff] }
  0x81   :  { %5674 = vmatprep.subr.bf16.mxu1 %v5673_v15  ;;  %v584_v15 = vld [vmem:[%s12897_s1 + $0x1098] sm:$0xff]  ;;  %v5695_v19 = vpack.c.bf16 %v575_v12, %v567_v10  ;;  %v647_v8 = vld [vmem:[%s12897_s1 + $0x1290] sm:$0xff]  ;;  %v5713_v9 = vpack.c.bf16 %v656_v2, %v648_v1  ;;  %v670_v12 = vld [vmem:[%s12897_s1 + $0x1348] sm:$0xff] }
  0x82   :  { %v5697_v24 = vpack.c.bf16 %v592_v16, %v584_v15  ;;  %v655_v10 = vld [vmem:[%s12897_s1 + $0x12d0] sm:$0xff]  ;;  %v725_v2 = vld [vmem:[%s12897_s1 + $0x1500] sm:$0xff] }
  0x83   :  { %5260 = vmatpush1.bf16.msra.mxu0 %v5259_v21  ;;  %v581_v21 = vld [vmem:[%s12897_s1 + $0x1080] sm:$0xff]  ;;  %v5715_v16 = vpack.c.bf16 %v655_v10, %v647_v8  ;;  %v750_v8 = vld [vmem:[%s12897_s1 + $0x15c8] sm:$0xff]  ;;  %v752_v10 = vld [vmem:[%s12897_s1 + $0x15d8] sm:$0xff] }
  0x84   :  { %5676 = vmatpush1.bf16.msra.mxu1 %v5675_v22  ;;  %5262 = vmatprep.subr.bf16.mxu0 %v5261_v23  ;;  %v589_v22 = vld [vmem:[%s12897_s1 + $0x10c0] sm:$0xff]  ;;  %v583_v23 = vld [vmem:[%s12897_s1 + $0x1090] sm:$0xff] }
  0x85   :  { %5678 = vmatprep.subr.bf16.mxu1 %v5677_v27  ;;  %v606_v27 = vld [vmem:[%s12897_s1 + $0x1148] sm:$0xff]  ;;  %v5283_v31 = vpack.c.bf16 %v589_v22, %v581_v21  ;;  %v5699_v32 = vpack.c.bf16 %v591_v25, %v583_v23  ;;  %v5717_v21 = vpack.c.bf16 %v672_v14, %v664_v13  ;;  %v671_v22 = vld [vmem:[%s12897_s1 + $0x1350] sm:$0xff]  ;;  %v680_v25 = vld [vmem:[%s12897_s1 + $0x1398] sm:$0xff] }
  0x86   :  { %v678_v23 = vld [vmem:[%s12897_s1 + $0x1388] sm:$0xff]  ;;  %v741_v14 = vld [vmem:[%s12897_s1 + $0x1580] sm:$0xff] }
  0x87   :  { %5264 = vmatpush1.bf16.msra.mxu0 %v5263_v33  ;;  %v5285_v33 = vpack.c.bf16 %v606_v27, %v598_v26  ;;  %v688_v26 = vld [vmem:[%s12897_s1 + $0x13d8] sm:$0xff] }
  0x88   :  { %5680 = vmatpush1.bf16.msra.mxu1 %v5679_v34  ;;  %5266 = vmatprep.subr.bf16.mxu0 %v5265_v35  ;;  %v597_v34 = vld [vmem:[%s12897_s1 + $0x1100] sm:$0xff] }
  0x89   :  { %5682 = vmatprep.subr.bf16.mxu1 %v5681_v39  ;;  %v605_v35 = vld [vmem:[%s12897_s1 + $0x1140] sm:$0xff]  ;;  %v614_v39 = vld [vmem:[%s12897_s1 + $0x1188] sm:$0xff] }
  0x8a   :  { %v5287_v43 = vpack.c.bf16 %v605_v35, %v597_v34  ;;  %v687_v34 = vld [vmem:[%s12897_s1 + $0x13d0] sm:$0xff]  ;;  %v694_v35 = vld [vmem:[%s12897_s1 + $0x1408] sm:$0xff] }
  0x8b   :  { %5268 = vmatpush1.bf16.msra.mxu0 %v5267_v45  ;;  %v5289_v45 = vpack.c.bf16 %v622_v40, %v614_v39  ;;  %v5309_v41 = vpack.c.bf16 %v702_v36, %v694_v35 }
  0x8c   :  { %5684 = vmatpush1.bf16.msra.mxu1 %v5683_v46  ;;  %5270 = vmatprep.subr.bf16.mxu0 %v5269_v47  ;;  %v613_v46 = vld [vmem:[%s12897_s1 + $0x1180] sm:$0xff] }
  0x8d   :  { %5686 = vmatprep.subr.bf16.mxu1 %v5685_v51  ;;  %v621_v47 = vld [vmem:[%s12897_s1 + $0x11c0] sm:$0xff]  ;;  %v630_v51 = vld [vmem:[%s12897_s1 + $0x1208] sm:$0xff] }
  0x8e   :  { %v5291_v55 = vpack.c.bf16 %v621_v47, %v613_v46  ;;  %v703_v46 = vld [vmem:[%s12897_s1 + $0x1450] sm:$0xff]  ;;  %v710_v47 = vld [vmem:[%s12897_s1 + $0x1488] sm:$0xff] }
  0x8f   :  { %5272 = vmatpush1.bf16.msra.mxu0 %v5271_v57  ;;  %v5293_v57 = vpack.c.bf16 %v638_v52, %v630_v51  ;;  %v5313_v53 = vpack.c.bf16 %v718_v48, %v710_v47 }
  0x90   :  { %5688 = vmatpush1.bf16.msra.mxu1 %v5687_v58  ;;  %5274 = vmatprep.subr.bf16.mxu0 %v5273_v59  ;;  %v629_v58 = vld [vmem:[%s12897_s1 + $0x1200] sm:$0xff] }
  0x91   :  { %5690 = vmatprep.subr.bf16.mxu1 %v5689_v63  ;;  %v637_v59 = vld [vmem:[%s12897_s1 + $0x1240] sm:$0xff]  ;;  %v646_v63 = vld [vmem:[%s12897_s1 + $0x1288] sm:$0xff] }
  0x92   :  { %v5295_v3 = vpack.c.bf16 %v637_v59, %v629_v58  ;;  %v719_v58 = vld [vmem:[%s12897_s1 + $0x14d0] sm:$0xff]  ;;  %v726_v59 = vld [vmem:[%s12897_s1 + $0x1508] sm:$0xff] }
  0x93   :  { %5276 = vmatpush1.bf16.msra.mxu0 %v5275_v5  ;;  %v5297_v5 = vpack.c.bf16 %v654_v0, %v646_v63  ;;  %v5317_v1 = vpack.c.bf16 %v734_v60, %v726_v59 }
  0x94   :  { %5692 = vmatpush1.bf16.msra.mxu1 %v5691_v6  ;;  %5278 = vmatprep.subr.bf16.mxu0 %v5277_v7  ;;  %v645_v6 = vld [vmem:[%s12897_s1 + $0x1280] sm:$0xff] }
  0x95   :  { %5694 = vmatprep.subr.bf16.mxu1 %v5693_v11  ;;  %v653_v7 = vld [vmem:[%s12897_s1 + $0x12c0] sm:$0xff]  ;;  %v662_v11 = vld [vmem:[%s12897_s1 + $0x1308] sm:$0xff] }
  0x96   :  { %1895 = vmatmul.mubr.f32.vlgmr.msra.gmra.mrb[0].mxu0 %v42_v17  ;;  %v5299_v15 = vpack.c.bf16 %v653_v7, %v645_v6  ;;  %v735_v6 = vld [vmem:[%s12897_s1 + $0x1550] sm:$0xff]  ;;  %v742_v7 = vld [vmem:[%s12897_s1 + $0x1588] sm:$0xff] }
  0x97   :  { %5280 = vmatpush1.bf16.msra.mxu0 %v5279_v18  ;;  %2392 = vmatmul.mubr.f32.vlgmr.msra.gmra.mrb[0].mxu1 %v42_v17  ;;  %v5301_v17 = vpack.c.bf16 %v670_v12, %v662_v11  ;;  %v661_v18 = vld [vmem:[%s12897_s1 + $0x1300] sm:$0xff]  ;;  %v5321_v13 = vpack.c.bf16 %v750_v8, %v742_v7 }
  0x98   :  { %5696 = vmatpush1.bf16.msra.mxu1 %v5695_v19  ;;  %5282 = vmatprep.subr.bf16.mxu0 %v5281_v20  ;;  %v669_v19 = vld [vmem:[%s12897_s1 + $0x1340] sm:$0xff]  ;;  %v663_v20 = vld [vmem:[%s12897_s1 + $0x1310] sm:$0xff] }
  0x99   :  { %5698 = vmatprep.subr.bf16.mxu1 %v5697_v24  ;;  %1965 = vmatprep.mubr.f32.mxu0 %v45_v30  ;;  %v686_v24 = vld [vmem:[%s12897_s1 + $0x13c8] sm:$0xff]  ;;  %v5303_v27 = vpack.c.bf16 %v669_v19, %v661_v18  ;;  %v5719_v28 = vpack.c.bf16 %v671_v22, %v663_v20  ;;  %v751_v18 = vld [vmem:[%s12897_s1 + $0x15d0] sm:$0xff]  ;;  %v768_v22 = vld [vmem:[%s12897_s1 + $0x1658] sm:$0xff] }
  0x9a   :  { %2462 = vmatprep.mubr.f32.mxu1 %v45_v30  ;;  %v5305_v29 = vpack.c.bf16 %v686_v24, %v678_v23  ;;  %v677_v30 = vld [vmem:[%s12897_s1 + $0x1380] sm:$0xff]  ;;  %v758_v19 = vld [vmem:[%s12897_s1 + $0x1608] sm:$0xff] }
  0x9b   :  { %5284 = vmatpush1.bf16.msra.mxu0 %v5283_v31  ;;  %v685_v31 = vld [vmem:[%s12897_s1 + $0x13c0] sm:$0xff]  ;;  %v766_v20 = vld [vmem:[%s12897_s1 + $0x1648] sm:$0xff] }
  0x9c   :  { %5700 = vmatpush1.bf16.msra.mxu1 %v5699_v32  ;;  %5286 = vmatprep.subr.bf16.mxu0 %v5285_v33  ;;  %v679_v32 = vld [vmem:[%s12897_s1 + $0x1390] sm:$0xff]  ;;  %v5721_v33 = vpack.c.bf16 %v688_v26, %v680_v25  ;;  %v5307_v39 = vpack.c.bf16 %v685_v31, %v677_v30  ;;  %v5325_v25 = vpack.c.bf16 %v766_v20, %v758_v19  ;;  %v757_v26 = vld [vmem:[%s12897_s1 + $0x1600] sm:$0xff]  ;;  %v774_v31 = vld [vmem:[%s12897_s1 + $0x1688] sm:$0xff] }
  0x9d   :  { %5702 = vmatprep.subr.bf16.mxu1 %v5701_v37  ;;  %v696_v37 = vld [vmem:[%s12897_s1 + $0x1418] sm:$0xff]  ;;  %v5723_v40 = vpack.c.bf16 %v687_v34, %v679_v32  ;;  %v767_v30 = vld [vmem:[%s12897_s1 + $0x1650] sm:$0xff]  ;;  %v782_v32 = vld [vmem:[%s12897_s1 + $0x16c8] sm:$0xff] }
  0x9e   :  { %v784_v34 = vld [vmem:[%s12897_s1 + $0x16d8] sm:$0xff]  ;;  %v44_v19 = vld [vmem:[%s12896_s0 + $0x20] sm:$0xff] }
  0x9f   :  { %5288 = vmatpush1.bf16.msra.mxu0 %v5287_v43  ;;  %v701_v43 = vld [vmem:[%s12897_s1 + $0x1440] sm:$0xff] }
  0xa0   :  { %5704 = vmatpush1.bf16.msra.mxu1 %v5703_v44  ;;  %5290 = vmatprep.subr.bf16.mxu0 %v5289_v45  ;;  %v695_v44 = vld [vmem:[%s12897_s1 + $0x1410] sm:$0xff]  ;;  %v5725_v45 = vpack.c.bf16 %v704_v38, %v696_v37  ;;  %v5311_v51 = vpack.c.bf16 %v701_v43, %v693_v42  ;;  %v5329_v37 = vpack.c.bf16 %v782_v32, %v774_v31  ;;  %v773_v38 = vld [vmem:[%s12897_s1 + $0x1680] sm:$0xff]  ;;  %v790_v43 = vld [vmem:[%s12897_s1 + $0x1708] sm:$0xff] }
  0xa1   :  { %5706 = vmatprep.subr.bf16.mxu1 %v5705_v49  ;;  %v712_v49 = vld [vmem:[%s12897_s1 + $0x1498] sm:$0xff]  ;;  %v5727_v52 = vpack.c.bf16 %v703_v46, %v695_v44  ;;  %v783_v42 = vld [vmem:[%s12897_s1 + $0x16d0] sm:$0xff]  ;;  %v798_v44 = vld [vmem:[%s12897_s1 + $0x1748] sm:$0xff] }
  0xa2   :  { %v800_v46 = vld [vmem:[%s12897_s1 + $0x1758] sm:$0xff] }
  0xa3   :  { %5292 = vmatpush1.bf16.msra.mxu0 %v5291_v55  ;;  %v717_v55 = vld [vmem:[%s12897_s1 + $0x14c0] sm:$0xff]  ;;  %v864_v31 = vld [vmem:[%s12897_s1 + $0x1958] sm:$0xff] }
  0xa4   :  { %5708 = vmatpush1.bf16.msra.mxu1 %v5707_v56  ;;  %5294 = vmatprep.subr.bf16.mxu0 %v5293_v57  ;;  %v711_v56 = vld [vmem:[%s12897_s1 + $0x1490] sm:$0xff]  ;;  %v5729_v57 = vpack.c.bf16 %v720_v50, %v712_v49  ;;  %v5315_v63 = vpack.c.bf16 %v717_v55, %v709_v54  ;;  %v5333_v49 = vpack.c.bf16 %v798_v44, %v790_v43  ;;  %v789_v50 = vld [vmem:[%s12897_s1 + $0x1700] sm:$0xff]  ;;  %v806_v55 = vld [vmem:[%s12897_s1 + $0x1788] sm:$0xff] }
  0xa5   :  { %5710 = vmatprep.subr.bf16.mxu1 %v5709_v61  ;;  %v728_v61 = vld [vmem:[%s12897_s1 + $0x1518] sm:$0xff]  ;;  %v5731_v0 = vpack.c.bf16 %v719_v58, %v711_v56  ;;  %v799_v54 = vld [vmem:[%s12897_s1 + $0x1750] sm:$0xff]  ;;  %v814_v56 = vld [vmem:[%s12897_s1 + $0x17c8] sm:$0xff] }
  0xa6   :  { %v816_v58 = vld [vmem:[%s12897_s1 + $0x17d8] sm:$0xff] }
  0xa7   :  { %5296 = vmatpush1.bf16.msra.mxu0 %v5295_v3  ;;  %v733_v3 = vld [vmem:[%s12897_s1 + $0x1540] sm:$0xff]  ;;  %v47_v32 = vld [vmem:[%s12896_s0 + $0x38] sm:$0xff] }
  0xa8   :  { %5712 = vmatpush1.bf16.msra.mxu1 %v5711_v4  ;;  %5298 = vmatprep.subr.bf16.mxu0 %v5297_v5  ;;  %v727_v4 = vld [vmem:[%s12897_s1 + $0x1510] sm:$0xff]  ;;  %v5733_v5 = vpack.c.bf16 %v736_v62, %v728_v61  ;;  %v5319_v11 = vpack.c.bf16 %v733_v3, %v725_v2  ;;  %v5337_v61 = vpack.c.bf16 %v814_v56, %v806_v55  ;;  %v805_v62 = vld [vmem:[%s12897_s1 + $0x1780] sm:$0xff]  ;;  %v822_v3 = vld [vmem:[%s12897_s1 + $0x1808] sm:$0xff] }
  0xa9   :  { %5714 = vmatprep.subr.bf16.mxu1 %v5713_v9  ;;  %v744_v9 = vld [vmem:[%s12897_s1 + $0x1598] sm:$0xff]  ;;  %v5735_v12 = vpack.c.bf16 %v735_v6, %v727_v4  ;;  %v815_v2 = vld [vmem:[%s12897_s1 + $0x17d0] sm:$0xff]  ;;  %v830_v4 = vld [vmem:[%s12897_s1 + $0x1848] sm:$0xff] }
  0xaa   :  { %v832_v6 = vld [vmem:[%s12897_s1 + $0x1858] sm:$0xff] }
  0xab   :  { %5300 = vmatpush1.bf16.msra.mxu0 %v5299_v15  ;;  %v749_v15 = vld [vmem:[%s12897_s1 + $0x15c0] sm:$0xff]  ;;  %v872_v43 = vld [vmem:[%s12897_s1 + $0x1998] sm:$0xff] }
  0xac   :  { %5716 = vmatpush1.bf16.msra.mxu1 %v5715_v16  ;;  %5302 = vmatprep.subr.bf16.mxu0 %v5301_v17  ;;  %v743_v16 = vld [vmem:[%s12897_s1 + $0x1590] sm:$0xff]  ;;  %v5737_v17 = vpack.c.bf16 %v752_v10, %v744_v9  ;;  %v5323_v23 = vpack.c.bf16 %v749_v15, %v741_v14  ;;  %v5341_v9 = vpack.c.bf16 %v830_v4, %v822_v3  ;;  %v821_v10 = vld [vmem:[%s12897_s1 + $0x1800] sm:$0xff]  ;;  %v838_v15 = vld [vmem:[%s12897_s1 + $0x1888] sm:$0xff] }
  0xad   :  { %5718 = vmatprep.subr.bf16.mxu1 %v5717_v21  ;;  %v760_v21 = vld [vmem:[%s12897_s1 + $0x1618] sm:$0xff]  ;;  %v5739_v24 = vpack.c.bf16 %v751_v18, %v743_v16  ;;  %v831_v14 = vld [vmem:[%s12897_s1 + $0x1850] sm:$0xff]  ;;  %v846_v16 = vld [vmem:[%s12897_s1 + $0x18c8] sm:$0xff] }
  0xae   :  { %v848_v18 = vld [vmem:[%s12897_s1 + $0x18d8] sm:$0xff] }
  0xaf   :  { %5304 = vmatpush1.bf16.msra.mxu0 %v5303_v27  ;;  %v765_v27 = vld [vmem:[%s12897_s1 + $0x1640] sm:$0xff]  ;;  %v880_v44 = vld [vmem:[%s12897_s1 + $0x19d8] sm:$0xff] }
  0xb0   :  { %5720 = vmatpush1.bf16.msra.mxu1 %v5719_v28  ;;  %5306 = vmatprep.subr.bf16.mxu0 %v5305_v29  ;;  %v759_v28 = vld [vmem:[%s12897_s1 + $0x1610] sm:$0xff]  ;;  %v5741_v29 = vpack.c.bf16 %v768_v22, %v760_v21  ;;  %v5327_v35 = vpack.c.bf16 %v765_v27, %v757_v26  ;;  %v5345_v22 = vpack.c.bf16 %v846_v16, %v838_v15  ;;  %v888_v55 = vld [vmem:[%s12897_s1 + $0x1a18] sm:$0xff] }
  0xb1   :  { %5722 = vmatprep.subr.bf16.mxu1 %v5721_v33  ;;  %v776_v33 = vld [vmem:[%s12897_s1 + $0x1698] sm:$0xff]  ;;  %v5743_v36 = vpack.c.bf16 %v767_v30, %v759_v28  ;;  %v847_v27 = vld [vmem:[%s12897_s1 + $0x18d0] sm:$0xff]  ;;  %v854_v28 = vld [vmem:[%s12897_s1 + $0x1908] sm:$0xff] }
  0xb2   :  { %v856_v30 = vld [vmem:[%s12897_s1 + $0x1918] sm:$0xff] }
  0xb3   :  { %5308 = vmatpush1.bf16.msra.mxu0 %v5307_v39  ;;  %v781_v39 = vld [vmem:[%s12897_s1 + $0x16c0] sm:$0xff]  ;;  %v896_v56 = vld [vmem:[%s12897_s1 + $0x1a58] sm:$0xff] }
  0xb4   :  { %5724 = vmatpush1.bf16.msra.mxu1 %v5723_v40  ;;  %5310 = vmatprep.subr.bf16.mxu0 %v5309_v41  ;;  %v775_v40 = vld [vmem:[%s12897_s1 + $0x1690] sm:$0xff]  ;;  %v5745_v41 = vpack.c.bf16 %v784_v34, %v776_v33  ;;  %v5331_v47 = vpack.c.bf16 %v781_v39, %v773_v38  ;;  %v5765_v39 = vpack.c.bf16 %v864_v31, %v856_v30  ;;  %v904_v3 = vld [vmem:[%s12897_s1 + $0x1a98] sm:$0xff] }
  0xb5   :  { %5726 = vmatprep.subr.bf16.mxu1 %v5725_v45  ;;  %v792_v45 = vld [vmem:[%s12897_s1 + $0x1718] sm:$0xff]  ;;  %v5747_v48 = vpack.c.bf16 %v783_v42, %v775_v40  ;;  %v855_v38 = vld [vmem:[%s12897_s1 + $0x1910] sm:$0xff]  ;;  %v878_v42 = vld [vmem:[%s12897_s1 + $0x19c8] sm:$0xff] }
  0xb6   :  { %v863_v40 = vld [vmem:[%s12897_s1 + $0x1950] sm:$0xff]  ;;  %v912_v4 = vld [vmem:[%s12897_s1 + $0x1ad8] sm:$0xff] }
  0xb7   :  { %5312 = vmatpush1.bf16.msra.mxu0 %v5311_v51  ;;  %v797_v51 = vld [vmem:[%s12897_s1 + $0x1740] sm:$0xff]  ;;  %v920_v15 = vld [vmem:[%s12897_s1 + $0x1b18] sm:$0xff] }
  0xb8   :  { %5728 = vmatpush1.bf16.msra.mxu1 %v5727_v52  ;;  %5314 = vmatprep.subr.bf16.mxu0 %v5313_v53  ;;  %v791_v52 = vld [vmem:[%s12897_s1 + $0x1710] sm:$0xff]  ;;  %v5749_v53 = vpack.c.bf16 %v800_v46, %v792_v45  ;;  %v5335_v59 = vpack.c.bf16 %v797_v51, %v789_v50  ;;  %v5767_v46 = vpack.c.bf16 %v863_v40, %v855_v38  ;;  %v928_v16 = vld [vmem:[%s12897_s1 + $0x1b58] sm:$0xff]  ;;  %v958_v38 = vld [vmem:[%s12897_s1 + $0x1c48] sm:$0xff] }
  0xb9   :  { %5730 = vmatprep.subr.bf16.mxu1 %v5729_v57  ;;  %v808_v57 = vld [vmem:[%s12897_s1 + $0x1798] sm:$0xff]  ;;  %v5751_v60 = vpack.c.bf16 %v799_v54, %v791_v52  ;;  %v871_v50 = vld [vmem:[%s12897_s1 + $0x1990] sm:$0xff]  ;;  %v5769_v51 = vpack.c.bf16 %v880_v44, %v872_v43  ;;  %v894_v54 = vld [vmem:[%s12897_s1 + $0x1a48] sm:$0xff] }
  0xba   :  { %v879_v52 = vld [vmem:[%s12897_s1 + $0x19d0] sm:$0xff]  ;;  %v960_v40 = vld [vmem:[%s12897_s1 + $0x1c58] sm:$0xff]  ;;  %v949_v44 = vld [vmem:[%s12897_s1 + $0x1c00] sm:$0xff] }
  0xbb   :  { %5316 = vmatpush1.bf16.msra.mxu0 %v5315_v63  ;;  %v813_v63 = vld [vmem:[%s12897_s1 + $0x17c0] sm:$0xff] }
  0xbc   :  { %5732 = vmatpush1.bf16.msra.mxu1 %v5731_v0  ;;  %5318 = vmatprep.subr.bf16.mxu0 %v5317_v1  ;;  %v807_v0 = vld [vmem:[%s12897_s1 + $0x1790] sm:$0xff]  ;;  %v5753_v1 = vpack.c.bf16 %v816_v58, %v808_v57  ;;  %v5339_v7 = vpack.c.bf16 %v813_v63, %v805_v62  ;;  %v5771_v58 = vpack.c.bf16 %v879_v52, %v871_v50  ;;  %v974_v50 = vld [vmem:[%s12897_s1 + $0x1cc8] sm:$0xff]  ;;  %v976_v52 = vld [vmem:[%s12897_s1 + $0x1cd8] sm:$0xff] }
  0xbd   :  { %5734 = vmatprep.subr.bf16.mxu1 %v5733_v5  ;;  %v824_v5 = vld [vmem:[%s12897_s1 + $0x1818] sm:$0xff]  ;;  %v5755_v8 = vpack.c.bf16 %v815_v2, %v807_v0  ;;  %v887_v62 = vld [vmem:[%s12897_s1 + $0x1a10] sm:$0xff]  ;;  %v5773_v63 = vpack.c.bf16 %v896_v56, %v888_v55  ;;  %v910_v2 = vld [vmem:[%s12897_s1 + $0x1ac8] sm:$0xff] }
  0xbe   :  { %v895_v0 = vld [vmem:[%s12897_s1 + $0x1a50] sm:$0xff]  ;;  %v965_v56 = vld [vmem:[%s12897_s1 + $0x1c80] sm:$0xff] }
  0xbf   :  { %5320 = vmatpush1.bf16.msra.mxu0 %v5319_v11  ;;  %v829_v11 = vld [vmem:[%s12897_s1 + $0x1840] sm:$0xff] }
  0xc0   :  { %5736 = vmatpush1.bf16.msra.mxu1 %v5735_v12  ;;  %5322 = vmatprep.subr.bf16.mxu0 %v5321_v13  ;;  %v823_v12 = vld [vmem:[%s12897_s1 + $0x1810] sm:$0xff]  ;;  %v5757_v13 = vpack.c.bf16 %v832_v6, %v824_v5  ;;  %v5343_v20 = vpack.c.bf16 %v829_v11, %v821_v10  ;;  %v5775_v6 = vpack.c.bf16 %v895_v0, %v887_v62  ;;  %v990_v62 = vld [vmem:[%s12897_s1 + $0x1d48] sm:$0xff]  ;;  %v992_v0 = vld [vmem:[%s12897_s1 + $0x1d58] sm:$0xff] }
  0xc1   :  { %5738 = vmatprep.subr.bf16.mxu1 %v5737_v17  ;;  %v840_v17 = vld [vmem:[%s12897_s1 + $0x1898] sm:$0xff]  ;;  %v5759_v21 = vpack.c.bf16 %v831_v14, %v823_v12  ;;  %v903_v10 = vld [vmem:[%s12897_s1 + $0x1a90] sm:$0xff]  ;;  %v5777_v11 = vpack.c.bf16 %v912_v4, %v904_v3  ;;  %v926_v14 = vld [vmem:[%s12897_s1 + $0x1b48] sm:$0xff] }
  0xc2   :  { %v5761_v26 = vpack.c.bf16 %v848_v18, %v840_v17  ;;  %v911_v12 = vld [vmem:[%s12897_s1 + $0x1ad0] sm:$0xff]  ;;  %v981_v4 = vld [vmem:[%s12897_s1 + $0x1d00] sm:$0xff] }
  0xc3   :  { %5324 = vmatpush1.bf16.msra.mxu0 %v5323_v23  ;;  %v837_v23 = vld [vmem:[%s12897_s1 + $0x1880] sm:$0xff]  ;;  %v5779_v18 = vpack.c.bf16 %v911_v12, %v903_v10  ;;  %v1006_v10 = vld [vmem:[%s12897_s1 + $0x1dc8] sm:$0xff]  ;;  %v1008_v12 = vld [vmem:[%s12897_s1 + $0x1dd8] sm:$0xff] }
  0xc4   :  { %5740 = vmatpush1.bf16.msra.mxu1 %v5739_v24  ;;  %5326 = vmatprep.subr.bf16.mxu0 %v5325_v25  ;;  %v845_v24 = vld [vmem:[%s12897_s1 + $0x18c0] sm:$0xff]  ;;  %v839_v25 = vld [vmem:[%s12897_s1 + $0x1890] sm:$0xff] }
  0xc5   :  { %5742 = vmatprep.subr.bf16.mxu1 %v5741_v29  ;;  %v862_v29 = vld [vmem:[%s12897_s1 + $0x1948] sm:$0xff]  ;;  %v5347_v33 = vpack.c.bf16 %v845_v24, %v837_v23  ;;  %v5763_v34 = vpack.c.bf16 %v847_v27, %v839_v25  ;;  %v5781_v23 = vpack.c.bf16 %v928_v16, %v920_v15  ;;  %v927_v24 = vld [vmem:[%s12897_s1 + $0x1b50] sm:$0xff]  ;;  %v936_v27 = vld [vmem:[%s12897_s1 + $0x1b98] sm:$0xff] }
  0xc6   :  { %v934_v25 = vld [vmem:[%s12897_s1 + $0x1b88] sm:$0xff]  ;;  %v997_v16 = vld [vmem:[%s12897_s1 + $0x1d80] sm:$0xff] }
  0xc7   :  { %5328 = vmatpush1.bf16.msra.mxu0 %v5327_v35  ;;  %v5349_v35 = vpack.c.bf16 %v862_v29, %v854_v28  ;;  %v944_v28 = vld [vmem:[%s12897_s1 + $0x1bd8] sm:$0xff] }
  0xc8   :  { %5744 = vmatpush1.bf16.msra.mxu1 %v5743_v36  ;;  %5330 = vmatprep.subr.bf16.mxu0 %v5329_v37  ;;  %v853_v36 = vld [vmem:[%s12897_s1 + $0x1900] sm:$0xff] }
  0xc9   :  { %5746 = vmatprep.subr.bf16.mxu1 %v5745_v41  ;;  %v861_v37 = vld [vmem:[%s12897_s1 + $0x1940] sm:$0xff]  ;;  %v870_v41 = vld [vmem:[%s12897_s1 + $0x1988] sm:$0xff] }
  0xca   :  { %v5351_v45 = vpack.c.bf16 %v861_v37, %v853_v36  ;;  %v943_v36 = vld [vmem:[%s12897_s1 + $0x1bd0] sm:$0xff]  ;;  %v950_v37 = vld [vmem:[%s12897_s1 + $0x1c08] sm:$0xff] }
  0xcb   :  { %5332 = vmatpush1.bf16.msra.mxu0 %v5331_v47  ;;  %v5353_v47 = vpack.c.bf16 %v878_v42, %v870_v41  ;;  %v5373_v43 = vpack.c.bf16 %v958_v38, %v950_v37 }
  0xcc   :  { %5748 = vmatpush1.bf16.msra.mxu1 %v5747_v48  ;;  %5334 = vmatprep.subr.bf16.mxu0 %v5333_v49  ;;  %v869_v48 = vld [vmem:[%s12897_s1 + $0x1980] sm:$0xff] }
  0xcd   :  { %5750 = vmatprep.subr.bf16.mxu1 %v5749_v53  ;;  %v877_v49 = vld [vmem:[%s12897_s1 + $0x19c0] sm:$0xff]  ;;  %v886_v53 = vld [vmem:[%s12897_s1 + $0x1a08] sm:$0xff] }
  0xce   :  { %v5355_v57 = vpack.c.bf16 %v877_v49, %v869_v48  ;;  %v959_v48 = vld [vmem:[%s12897_s1 + $0x1c50] sm:$0xff]  ;;  %v966_v49 = vld [vmem:[%s12897_s1 + $0x1c88] sm:$0xff] }
  0xcf   :  { %5336 = vmatpush1.bf16.msra.mxu0 %v5335_v59  ;;  %v5357_v59 = vpack.c.bf16 %v894_v54, %v886_v53  ;;  %v5377_v55 = vpack.c.bf16 %v974_v50, %v966_v49 }
  0xd0   :  { %5752 = vmatpush1.bf16.msra.mxu1 %v5751_v60  ;;  %5338 = vmatprep.subr.bf16.mxu0 %v5337_v61  ;;  %v885_v60 = vld [vmem:[%s12897_s1 + $0x1a00] sm:$0xff] }
  0xd1   :  { %5754 = vmatprep.subr.bf16.mxu1 %v5753_v1  ;;  %v893_v61 = vld [vmem:[%s12897_s1 + $0x1a40] sm:$0xff]  ;;  %v902_v1 = vld [vmem:[%s12897_s1 + $0x1a88] sm:$0xff] }
  0xd2   :  { %v5359_v5 = vpack.c.bf16 %v893_v61, %v885_v60  ;;  %v975_v60 = vld [vmem:[%s12897_s1 + $0x1cd0] sm:$0xff]  ;;  %v982_v61 = vld [vmem:[%s12897_s1 + $0x1d08] sm:$0xff] }
  0xd3   :  { %5340 = vmatpush1.bf16.msra.mxu0 %v5339_v7  ;;  %v5361_v7 = vpack.c.bf16 %v910_v2, %v902_v1  ;;  %v5381_v3 = vpack.c.bf16 %v990_v62, %v982_v61 }
  0xd4   :  { %5756 = vmatpush1.bf16.msra.mxu1 %v5755_v8  ;;  %5342 = vmatprep.subr.bf16.mxu0 %v5341_v9  ;;  %v901_v8 = vld [vmem:[%s12897_s1 + $0x1a80] sm:$0xff] }
  0xd5   :  { %5758 = vmatprep.subr.bf16.mxu1 %v5757_v13  ;;  %v909_v9 = vld [vmem:[%s12897_s1 + $0x1ac0] sm:$0xff]  ;;  %v918_v13 = vld [vmem:[%s12897_s1 + $0x1b08] sm:$0xff] }
  0xd6   :  { %1966 = vmatmul.mubr.f32.vlgmr.msra.gmra.mrb[0].mxu0 %v44_v19  ;;  %v5363_v17 = vpack.c.bf16 %v909_v9, %v901_v8  ;;  %v991_v8 = vld [vmem:[%s12897_s1 + $0x1d50] sm:$0xff]  ;;  %v998_v9 = vld [vmem:[%s12897_s1 + $0x1d88] sm:$0xff] }
  0xd7   :  { %5344 = vmatpush1.bf16.msra.mxu0 %v5343_v20  ;;  %2463 = vmatmul.mubr.f32.vlgmr.msra.gmra.mrb[0].mxu1 %v44_v19  ;;  %v5365_v19 = vpack.c.bf16 %v926_v14, %v918_v13  ;;  %v917_v20 = vld [vmem:[%s12897_s1 + $0x1b00] sm:$0xff]  ;;  %v5385_v15 = vpack.c.bf16 %v1006_v10, %v998_v9 }
  0xd8   :  { %5760 = vmatpush1.bf16.msra.mxu1 %v5759_v21  ;;  %5346 = vmatprep.subr.bf16.mxu0 %v5345_v22  ;;  %v925_v21 = vld [vmem:[%s12897_s1 + $0x1b40] sm:$0xff]  ;;  %v919_v22 = vld [vmem:[%s12897_s1 + $0x1b10] sm:$0xff] }
  0xd9   :  { %5762 = vmatprep.subr.bf16.mxu1 %v5761_v26  ;;  %2036 = vmatprep.mubr.f32.mxu0 %v47_v32  ;;  %v942_v26 = vld [vmem:[%s12897_s1 + $0x1bc8] sm:$0xff]  ;;  %v5367_v29 = vpack.c.bf16 %v925_v21, %v917_v20  ;;  %v5783_v30 = vpack.c.bf16 %v927_v24, %v919_v22  ;;  %v1007_v20 = vld [vmem:[%s12897_s1 + $0x1dd0] sm:$0xff]  ;;  %v1024_v24 = vld [vmem:[%s12897_s1 + $0x1e58] sm:$0xff] }
  0xda   :  { %2533 = vmatprep.mubr.f32.mxu1 %v47_v32  ;;  %v5369_v31 = vpack.c.bf16 %v942_v26, %v934_v25  ;;  %v933_v32 = vld [vmem:[%s12897_s1 + $0x1b80] sm:$0xff]  ;;  %v1014_v21 = vld [vmem:[%s12897_s1 + $0x1e08] sm:$0xff] }
  0xdb   :  { %5348 = vmatpush1.bf16.msra.mxu0 %v5347_v33  ;;  %v941_v33 = vld [vmem:[%s12897_s1 + $0x1bc0] sm:$0xff]  ;;  %v1022_v22 = vld [vmem:[%s12897_s1 + $0x1e48] sm:$0xff] }
  0xdc   :  { %5764 = vmatpush1.bf16.msra.mxu1 %v5763_v34  ;;  %5350 = vmatprep.subr.bf16.mxu0 %v5349_v35  ;;  %v935_v34 = vld [vmem:[%s12897_s1 + $0x1b90] sm:$0xff]  ;;  %v5785_v35 = vpack.c.bf16 %v944_v28, %v936_v27  ;;  %v5371_v41 = vpack.c.bf16 %v941_v33, %v933_v32  ;;  %v5389_v27 = vpack.c.bf16 %v1022_v22, %v1014_v21  ;;  %v1013_v28 = vld [vmem:[%s12897_s1 + $0x1e00] sm:$0xff]  ;;  %v1030_v33 = vld [vmem:[%s12897_s1 + $0x1e88] sm:$0xff] }
  0xdd   :  { %5766 = vmatprep.subr.bf16.mxu1 %v5765_v39  ;;  %v952_v39 = vld [vmem:[%s12897_s1 + $0x1c18] sm:$0xff]  ;;  %v5787_v42 = vpack.c.bf16 %v943_v36, %v935_v34  ;;  %v1023_v32 = vld [vmem:[%s12897_s1 + $0x1e50] sm:$0xff]  ;;  %v1038_v34 = vld [vmem:[%s12897_s1 + $0x1ec8] sm:$0xff] }
  0xde   :  { %v1040_v36 = vld [vmem:[%s12897_s1 + $0x1ed8] sm:$0xff]  ;;  %v46_v21 = vld [vmem:[%s12896_s0 + $0x30] sm:$0xff] }
  0xdf   :  { %5352 = vmatpush1.bf16.msra.mxu0 %v5351_v45  ;;  %v957_v45 = vld [vmem:[%s12897_s1 + $0x1c40] sm:$0xff] }
  0xe0   :  { %5768 = vmatpush1.bf16.msra.mxu1 %v5767_v46  ;;  %5354 = vmatprep.subr.bf16.mxu0 %v5353_v47  ;;  %v951_v46 = vld [vmem:[%s12897_s1 + $0x1c10] sm:$0xff]  ;;  %v5789_v47 = vpack.c.bf16 %v960_v40, %v952_v39  ;;  %v5375_v53 = vpack.c.bf16 %v957_v45, %v949_v44  ;;  %v5393_v39 = vpack.c.bf16 %v1038_v34, %v1030_v33  ;;  %v1029_v40 = vld [vmem:[%s12897_s1 + $0x1e80] sm:$0xff]  ;;  %v1046_v45 = vld [vmem:[%s12897_s1 + $0x1f08] sm:$0xff] }
  0xe1   :  { %5770 = vmatprep.subr.bf16.mxu1 %v5769_v51  ;;  %v968_v51 = vld [vmem:[%s12897_s1 + $0x1c98] sm:$0xff]  ;;  %v5791_v54 = vpack.c.bf16 %v959_v48, %v951_v46  ;;  %v1039_v44 = vld [vmem:[%s12897_s1 + $0x1ed0] sm:$0xff]  ;;  %v1054_v46 = vld [vmem:[%s12897_s1 + $0x1f48] sm:$0xff] }
  0xe2   :  { %v1056_v48 = vld [vmem:[%s12897_s1 + $0x1f58] sm:$0xff]  ;;  %v49_v34 = vld [vmem:[%s12896_s0 + $0x48] sm:$0xff] }
  0xe3   :  { %5356 = vmatpush1.bf16.msra.mxu0 %v5355_v57  ;;  %v973_v57 = vld [vmem:[%s12897_s1 + $0x1cc0] sm:$0xff]  ;;  %v1120_v33 = vld [vmem:[%s12897_s1 + $0x2158] sm:$0xff] }
  0xe4   :  { %5772 = vmatpush1.bf16.msra.mxu1 %v5771_v58  ;;  %5358 = vmatprep.subr.bf16.mxu0 %v5357_v59  ;;  %v967_v58 = vld [vmem:[%s12897_s1 + $0x1c90] sm:$0xff]  ;;  %v5793_v59 = vpack.c.bf16 %v976_v52, %v968_v51  ;;  %v5379_v1 = vpack.c.bf16 %v973_v57, %v965_v56  ;;  %v5397_v51 = vpack.c.bf16 %v1054_v46, %v1046_v45  ;;  %v1045_v52 = vld [vmem:[%s12897_s1 + $0x1f00] sm:$0xff]  ;;  %v1062_v57 = vld [vmem:[%s12897_s1 + $0x1f88] sm:$0xff] }
  0xe5   :  { %5774 = vmatprep.subr.bf16.mxu1 %v5773_v63  ;;  %v984_v63 = vld [vmem:[%s12897_s1 + $0x1d18] sm:$0xff]  ;;  %v5795_v2 = vpack.c.bf16 %v975_v60, %v967_v58  ;;  %v1055_v56 = vld [vmem:[%s12897_s1 + $0x1f50] sm:$0xff]  ;;  %v1070_v58 = vld [vmem:[%s12897_s1 + $0x1fc8] sm:$0xff] }
  0xe6   :  { %v1072_v60 = vld [vmem:[%s12897_s1 + $0x1fd8] sm:$0xff] }
  0xe7   :  { %5360 = vmatpush1.bf16.msra.mxu0 %v5359_v5  ;;  %v989_v5 = vld [vmem:[%s12897_s1 + $0x1d40] sm:$0xff]  ;;  %v1128_v45 = vld [vmem:[%s12897_s1 + $0x2198] sm:$0xff] }
  0xe8   :  { %5776 = vmatpush1.bf16.msra.mxu1 %v5775_v6  ;;  %5362 = vmatprep.subr.bf16.mxu0 %v5361_v7  ;;  %v983_v6 = vld [vmem:[%s12897_s1 + $0x1d10] sm:$0xff]  ;;  %v5797_v7 = vpack.c.bf16 %v992_v0, %v984_v63  ;;  %v5383_v13 = vpack.c.bf16 %v989_v5, %v981_v4  ;;  %v5401_v63 = vpack.c.bf16 %v1070_v58, %v1062_v57  ;;  %v1061_v0 = vld [vmem:[%s12897_s1 + $0x1f80] sm:$0xff]  ;;  %v1078_v5 = vld [vmem:[%s12897_s1 + $0x2008] sm:$0xff] }
  0xe9   :  { %5778 = vmatprep.subr.bf16.mxu1 %v5777_v11  ;;  %v1000_v11 = vld [vmem:[%s12897_s1 + $0x1d98] sm:$0xff]  ;;  %v5799_v14 = vpack.c.bf16 %v991_v8, %v983_v6  ;;  %v1071_v4 = vld [vmem:[%s12897_s1 + $0x1fd0] sm:$0xff]  ;;  %v1086_v6 = vld [vmem:[%s12897_s1 + $0x2048] sm:$0xff] }
  0xea   :  { %v1088_v8 = vld [vmem:[%s12897_s1 + $0x2058] sm:$0xff] }
  0xeb   :  { %5364 = vmatpush1.bf16.msra.mxu0 %v5363_v17  ;;  %v1005_v17 = vld [vmem:[%s12897_s1 + $0x1dc0] sm:$0xff]  ;;  %v1136_v46 = vld [vmem:[%s12897_s1 + $0x21d8] sm:$0xff] }
  0xec   :  { %5780 = vmatpush1.bf16.msra.mxu1 %v5779_v18  ;;  %5366 = vmatprep.subr.bf16.mxu0 %v5365_v19  ;;  %v999_v18 = vld [vmem:[%s12897_s1 + $0x1d90] sm:$0xff]  ;;  %v5801_v19 = vpack.c.bf16 %v1008_v12, %v1000_v11  ;;  %v5387_v25 = vpack.c.bf16 %v1005_v17, %v997_v16  ;;  %v5405_v11 = vpack.c.bf16 %v1086_v6, %v1078_v5  ;;  %v1077_v12 = vld [vmem:[%s12897_s1 + $0x2000] sm:$0xff]  ;;  %v1094_v17 = vld [vmem:[%s12897_s1 + $0x2088] sm:$0xff] }
  0xed   :  { %5782 = vmatprep.subr.bf16.mxu1 %v5781_v23  ;;  %v1016_v23 = vld [vmem:[%s12897_s1 + $0x1e18] sm:$0xff]  ;;  %v5803_v26 = vpack.c.bf16 %v1007_v20, %v999_v18  ;;  %v1087_v16 = vld [vmem:[%s12897_s1 + $0x2050] sm:$0xff]  ;;  %v1102_v18 = vld [vmem:[%s12897_s1 + $0x20c8] sm:$0xff] }
  0xee   :  { %v1104_v20 = vld [vmem:[%s12897_s1 + $0x20d8] sm:$0xff] }
  0xef   :  { %5368 = vmatpush1.bf16.msra.mxu0 %v5367_v29  ;;  %v1021_v29 = vld [vmem:[%s12897_s1 + $0x1e40] sm:$0xff]  ;;  %v1144_v57 = vld [vmem:[%s12897_s1 + $0x2218] sm:$0xff] }
  0xf0   :  { %5784 = vmatpush1.bf16.msra.mxu1 %v5783_v30  ;;  %5370 = vmatprep.subr.bf16.mxu0 %v5369_v31  ;;  %v1015_v30 = vld [vmem:[%s12897_s1 + $0x1e10] sm:$0xff]  ;;  %v5805_v31 = vpack.c.bf16 %v1024_v24, %v1016_v23  ;;  %v5391_v37 = vpack.c.bf16 %v1021_v29, %v1013_v28  ;;  %v5409_v24 = vpack.c.bf16 %v1102_v18, %v1094_v17  ;;  %v1152_v58 = vld [vmem:[%s12897_s1 + $0x2258] sm:$0xff] }
  0xf1   :  { %5786 = vmatprep.subr.bf16.mxu1 %v5785_v35  ;;  %v1032_v35 = vld [vmem:[%s12897_s1 + $0x1e98] sm:$0xff]  ;;  %v5807_v38 = vpack.c.bf16 %v1023_v32, %v1015_v30  ;;  %v1103_v29 = vld [vmem:[%s12897_s1 + $0x20d0] sm:$0xff]  ;;  %v1110_v30 = vld [vmem:[%s12897_s1 + $0x2108] sm:$0xff] }
  0xf2   :  { %v1112_v32 = vld [vmem:[%s12897_s1 + $0x2118] sm:$0xff] }
  0xf3   :  { %5372 = vmatpush1.bf16.msra.mxu0 %v5371_v41  ;;  %v1037_v41 = vld [vmem:[%s12897_s1 + $0x1ec0] sm:$0xff]  ;;  %v1160_v5 = vld [vmem:[%s12897_s1 + $0x2298] sm:$0xff] }
  0xf4   :  { %5788 = vmatpush1.bf16.msra.mxu1 %v5787_v42  ;;  %5374 = vmatprep.subr.bf16.mxu0 %v5373_v43  ;;  %v1031_v42 = vld [vmem:[%s12897_s1 + $0x1e90] sm:$0xff]  ;;  %v5809_v43 = vpack.c.bf16 %v1040_v36, %v1032_v35  ;;  %v5395_v49 = vpack.c.bf16 %v1037_v41, %v1029_v40  ;;  %v5829_v41 = vpack.c.bf16 %v1120_v33, %v1112_v32  ;;  %v1168_v6 = vld [vmem:[%s12897_s1 + $0x22d8] sm:$0xff] }
  0xf5   :  { %5790 = vmatprep.subr.bf16.mxu1 %v5789_v47  ;;  %v1048_v47 = vld [vmem:[%s12897_s1 + $0x1f18] sm:$0xff]  ;;  %v5811_v50 = vpack.c.bf16 %v1039_v44, %v1031_v42  ;;  %v1111_v40 = vld [vmem:[%s12897_s1 + $0x2110] sm:$0xff]  ;;  %v1134_v44 = vld [vmem:[%s12897_s1 + $0x21c8] sm:$0xff] }
  0xf6   :  { %v1119_v42 = vld [vmem:[%s12897_s1 + $0x2150] sm:$0xff]  ;;  %v1176_v17 = vld [vmem:[%s12897_s1 + $0x2318] sm:$0xff] }
  0xf7   :  { %5376 = vmatpush1.bf16.msra.mxu0 %v5375_v53  ;;  %v1053_v53 = vld [vmem:[%s12897_s1 + $0x1f40] sm:$0xff]  ;;  %v1184_v18 = vld [vmem:[%s12897_s1 + $0x2358] sm:$0xff] }
  0xf8   :  { %5792 = vmatpush1.bf16.msra.mxu1 %v5791_v54  ;;  %5378 = vmatprep.subr.bf16.mxu0 %v5377_v55  ;;  %v1047_v54 = vld [vmem:[%s12897_s1 + $0x1f10] sm:$0xff]  ;;  %v5813_v55 = vpack.c.bf16 %v1056_v48, %v1048_v47  ;;  %v5399_v61 = vpack.c.bf16 %v1053_v53, %v1045_v52  ;;  %v5831_v48 = vpack.c.bf16 %v1119_v42, %v1111_v40  ;;  %v1214_v40 = vld [vmem:[%s12897_s1 + $0x2448] sm:$0xff]  ;;  %v1216_v42 = vld [vmem:[%s12897_s1 + $0x2458] sm:$0xff] }
  0xf9   :  { %5794 = vmatprep.subr.bf16.mxu1 %v5793_v59  ;;  %v1064_v59 = vld [vmem:[%s12897_s1 + $0x1f98] sm:$0xff]  ;;  %v5815_v62 = vpack.c.bf16 %v1055_v56, %v1047_v54  ;;  %v1127_v52 = vld [vmem:[%s12897_s1 + $0x2190] sm:$0xff]  ;;  %v5833_v53 = vpack.c.bf16 %v1136_v46, %v1128_v45  ;;  %v1150_v56 = vld [vmem:[%s12897_s1 + $0x2248] sm:$0xff] }
  0xfa   :  { %v1135_v54 = vld [vmem:[%s12897_s1 + $0x21d0] sm:$0xff]  ;;  %v1205_v46 = vld [vmem:[%s12897_s1 + $0x2400] sm:$0xff] }
  0xfb   :  { %5380 = vmatpush1.bf16.msra.mxu0 %v5379_v1  ;;  %v1069_v1 = vld [vmem:[%s12897_s1 + $0x1fc0] sm:$0xff] }
  0xfc   :  { %5796 = vmatpush1.bf16.msra.mxu1 %v5795_v2  ;;  %5382 = vmatprep.subr.bf16.mxu0 %v5381_v3  ;;  %v1063_v2 = vld [vmem:[%s12897_s1 + $0x1f90] sm:$0xff]  ;;  %v5817_v3 = vpack.c.bf16 %v1072_v60, %v1064_v59  ;;  %v5403_v9 = vpack.c.bf16 %v1069_v1, %v1061_v0  ;;  %v5835_v60 = vpack.c.bf16 %v1135_v54, %v1127_v52  ;;  %v1230_v52 = vld [vmem:[%s12897_s1 + $0x24c8] sm:$0xff]  ;;  %v1232_v54 = vld [vmem:[%s12897_s1 + $0x24d8] sm:$0xff] }
  0xfd   :  { %5798 = vmatprep.subr.bf16.mxu1 %v5797_v7  ;;  %v1080_v7 = vld [vmem:[%s12897_s1 + $0x2018] sm:$0xff]  ;;  %v5819_v10 = vpack.c.bf16 %v1071_v4, %v1063_v2  ;;  %v1143_v0 = vld [vmem:[%s12897_s1 + $0x2210] sm:$0xff]  ;;  %v5837_v1 = vpack.c.bf16 %v1152_v58, %v1144_v57  ;;  %v1166_v4 = vld [vmem:[%s12897_s1 + $0x22c8] sm:$0xff] }
  0xfe   :  { %v1151_v2 = vld [vmem:[%s12897_s1 + $0x2250] sm:$0xff]  ;;  %v1221_v58 = vld [vmem:[%s12897_s1 + $0x2480] sm:$0xff] }
  0xff   :  { %5384 = vmatpush1.bf16.msra.mxu0 %v5383_v13  ;;  %v1085_v13 = vld [vmem:[%s12897_s1 + $0x2040] sm:$0xff] }
 0x100   :  { %5800 = vmatpush1.bf16.msra.mxu1 %v5799_v14  ;;  %5386 = vmatprep.subr.bf16.mxu0 %v5385_v15  ;;  %v1079_v14 = vld [vmem:[%s12897_s1 + $0x2010] sm:$0xff]  ;;  %v5821_v15 = vpack.c.bf16 %v1088_v8, %v1080_v7  ;;  %v5407_v22 = vpack.c.bf16 %v1085_v13, %v1077_v12  ;;  %v5839_v8 = vpack.c.bf16 %v1151_v2, %v1143_v0  ;;  %v1246_v0 = vld [vmem:[%s12897_s1 + $0x2548] sm:$0xff]  ;;  %v1248_v2 = vld [vmem:[%s12897_s1 + $0x2558] sm:$0xff] }
 0x101   :  { %5802 = vmatprep.subr.bf16.mxu1 %v5801_v19  ;;  %v1096_v19 = vld [vmem:[%s12897_s1 + $0x2098] sm:$0xff]  ;;  %v5823_v23 = vpack.c.bf16 %v1087_v16, %v1079_v14  ;;  %v1159_v12 = vld [vmem:[%s12897_s1 + $0x2290] sm:$0xff]  ;;  %v5841_v13 = vpack.c.bf16 %v1168_v6, %v1160_v5  ;;  %v1182_v16 = vld [vmem:[%s12897_s1 + $0x2348] sm:$0xff] }
 0x102   :  { %v5825_v28 = vpack.c.bf16 %v1104_v20, %v1096_v19  ;;  %v1167_v14 = vld [vmem:[%s12897_s1 + $0x22d0] sm:$0xff]  ;;  %v1237_v6 = vld [vmem:[%s12897_s1 + $0x2500] sm:$0xff] }
 0x103   :  { %5388 = vmatpush1.bf16.msra.mxu0 %v5387_v25  ;;  %v1093_v25 = vld [vmem:[%s12897_s1 + $0x2080] sm:$0xff]  ;;  %v5843_v20 = vpack.c.bf16 %v1167_v14, %v1159_v12  ;;  %v1262_v12 = vld [vmem:[%s12897_s1 + $0x25c8] sm:$0xff]  ;;  %v1264_v14 = vld [vmem:[%s12897_s1 + $0x25d8] sm:$0xff] }
 0x104   :  { %5804 = vmatpush1.bf16.msra.mxu1 %v5803_v26  ;;  %5390 = vmatprep.subr.bf16.mxu0 %v5389_v27  ;;  %v1101_v26 = vld [vmem:[%s12897_s1 + $0x20c0] sm:$0xff]  ;;  %v1095_v27 = vld [vmem:[%s12897_s1 + $0x2090] sm:$0xff] }
 0x105   :  { %5806 = vmatprep.subr.bf16.mxu1 %v5805_v31  ;;  %v1118_v31 = vld [vmem:[%s12897_s1 + $0x2148] sm:$0xff]  ;;  %v5411_v35 = vpack.c.bf16 %v1101_v26, %v1093_v25  ;;  %v5827_v36 = vpack.c.bf16 %v1103_v29, %v1095_v27  ;;  %v5845_v25 = vpack.c.bf16 %v1184_v18, %v1176_v17  ;;  %v1183_v26 = vld [vmem:[%s12897_s1 + $0x2350] sm:$0xff]  ;;  %v1192_v29 = vld [vmem:[%s12897_s1 + $0x2398] sm:$0xff] }
 0x106   :  { %v1190_v27 = vld [vmem:[%s12897_s1 + $0x2388] sm:$0xff]  ;;  %v1253_v18 = vld [vmem:[%s12897_s1 + $0x2580] sm:$0xff] }
 0x107   :  { %5392 = vmatpush1.bf16.msra.mxu0 %v5391_v37  ;;  %v5413_v37 = vpack.c.bf16 %v1118_v31, %v1110_v30  ;;  %v1200_v30 = vld [vmem:[%s12897_s1 + $0x23d8] sm:$0xff] }
 0x108   :  { %5808 = vmatpush1.bf16.msra.mxu1 %v5807_v38  ;;  %5394 = vmatprep.subr.bf16.mxu0 %v5393_v39  ;;  %v1109_v38 = vld [vmem:[%s12897_s1 + $0x2100] sm:$0xff] }
 0x109   :  { %5810 = vmatprep.subr.bf16.mxu1 %v5809_v43  ;;  %v1117_v39 = vld [vmem:[%s12897_s1 + $0x2140] sm:$0xff]  ;;  %v1126_v43 = vld [vmem:[%s12897_s1 + $0x2188] sm:$0xff] }
 0x10a   :  { %v5415_v47 = vpack.c.bf16 %v1117_v39, %v1109_v38  ;;  %v1199_v38 = vld [vmem:[%s12897_s1 + $0x23d0] sm:$0xff]  ;;  %v1206_v39 = vld [vmem:[%s12897_s1 + $0x2408] sm:$0xff] }
 0x10b   :  { %5396 = vmatpush1.bf16.msra.mxu0 %v5395_v49  ;;  %v5417_v49 = vpack.c.bf16 %v1134_v44, %v1126_v43  ;;  %v5437_v45 = vpack.c.bf16 %v1214_v40, %v1206_v39 }
 0x10c   :  { %5812 = vmatpush1.bf16.msra.mxu1 %v5811_v50  ;;  %5398 = vmatprep.subr.bf16.mxu0 %v5397_v51  ;;  %v1125_v50 = vld [vmem:[%s12897_s1 + $0x2180] sm:$0xff] }
 0x10d   :  { %5814 = vmatprep.subr.bf16.mxu1 %v5813_v55  ;;  %v1133_v51 = vld [vmem:[%s12897_s1 + $0x21c0] sm:$0xff]  ;;  %v1142_v55 = vld [vmem:[%s12897_s1 + $0x2208] sm:$0xff] }
 0x10e   :  { %v5419_v59 = vpack.c.bf16 %v1133_v51, %v1125_v50  ;;  %v1215_v50 = vld [vmem:[%s12897_s1 + $0x2450] sm:$0xff]  ;;  %v1222_v51 = vld [vmem:[%s12897_s1 + $0x2488] sm:$0xff] }
 0x10f   :  { %5400 = vmatpush1.bf16.msra.mxu0 %v5399_v61  ;;  %v5421_v61 = vpack.c.bf16 %v1150_v56, %v1142_v55  ;;  %v5441_v57 = vpack.c.bf16 %v1230_v52, %v1222_v51 }
 0x110   :  { %5816 = vmatpush1.bf16.msra.mxu1 %v5815_v62  ;;  %5402 = vmatprep.subr.bf16.mxu0 %v5401_v63  ;;  %v1141_v62 = vld [vmem:[%s12897_s1 + $0x2200] sm:$0xff] }
 0x111   :  { %5818 = vmatprep.subr.bf16.mxu1 %v5817_v3  ;;  %v1149_v63 = vld [vmem:[%s12897_s1 + $0x2240] sm:$0xff]  ;;  %v1158_v3 = vld [vmem:[%s12897_s1 + $0x2288] sm:$0xff] }
 0x112   :  { %v5423_v7 = vpack.c.bf16 %v1149_v63, %v1141_v62  ;;  %v1231_v62 = vld [vmem:[%s12897_s1 + $0x24d0] sm:$0xff]  ;;  %v1238_v63 = vld [vmem:[%s12897_s1 + $0x2508] sm:$0xff] }
 0x113   :  { %5404 = vmatpush1.bf16.msra.mxu0 %v5403_v9  ;;  %v5425_v9 = vpack.c.bf16 %v1166_v4, %v1158_v3  ;;  %v5445_v5 = vpack.c.bf16 %v1246_v0, %v1238_v63 }
 0x114   :  { %5820 = vmatpush1.bf16.msra.mxu1 %v5819_v10  ;;  %5406 = vmatprep.subr.bf16.mxu0 %v5405_v11  ;;  %v1157_v10 = vld [vmem:[%s12897_s1 + $0x2280] sm:$0xff] }
 0x115   :  { %5822 = vmatprep.subr.bf16.mxu1 %v5821_v15  ;;  %v1165_v11 = vld [vmem:[%s12897_s1 + $0x22c0] sm:$0xff]  ;;  %v1174_v15 = vld [vmem:[%s12897_s1 + $0x2308] sm:$0xff] }
 0x116   :  { %2037 = vmatmul.mubr.f32.vlgmr.msra.gmra.mrb[0].mxu0 %v46_v21  ;;  %v5427_v19 = vpack.c.bf16 %v1165_v11, %v1157_v10  ;;  %v1247_v10 = vld [vmem:[%s12897_s1 + $0x2550] sm:$0xff]  ;;  %v1254_v11 = vld [vmem:[%s12897_s1 + $0x2588] sm:$0xff] }
 0x117   :  { %5408 = vmatpush1.bf16.msra.mxu0 %v5407_v22  ;;  %2534 = vmatmul.mubr.f32.vlgmr.msra.gmra.mrb[0].mxu1 %v46_v21  ;;  %v5429_v21 = vpack.c.bf16 %v1182_v16, %v1174_v15  ;;  %v1173_v22 = vld [vmem:[%s12897_s1 + $0x2300] sm:$0xff]  ;;  %v5449_v17 = vpack.c.bf16 %v1262_v12, %v1254_v11 }
 0x118   :  { %5824 = vmatpush1.bf16.msra.mxu1 %v5823_v23  ;;  %5410 = vmatprep.subr.bf16.mxu0 %v5409_v24  ;;  %v1181_v23 = vld [vmem:[%s12897_s1 + $0x2340] sm:$0xff]  ;;  %v1175_v24 = vld [vmem:[%s12897_s1 + $0x2310] sm:$0xff] }
 0x119   :  { %5826 = vmatprep.subr.bf16.mxu1 %v5825_v28  ;;  %2107 = vmatprep.mubr.f32.mxu0 %v49_v34  ;;  %v1198_v28 = vld [vmem:[%s12897_s1 + $0x23c8] sm:$0xff]  ;;  %v5431_v31 = vpack.c.bf16 %v1181_v23, %v1173_v22  ;;  %v5847_v32 = vpack.c.bf16 %v1183_v26, %v1175_v24  ;;  %v1263_v22 = vld [vmem:[%s12897_s1 + $0x25d0] sm:$0xff]  ;;  %v1280_v26 = vld [vmem:[%s12897_s1 + $0x2658] sm:$0xff] }
 0x11a   :  { %2604 = vmatprep.mubr.f32.mxu1 %v49_v34  ;;  %v5433_v33 = vpack.c.bf16 %v1198_v28, %v1190_v27  ;;  %v1189_v34 = vld [vmem:[%s12897_s1 + $0x2380] sm:$0xff]  ;;  %v1270_v23 = vld [vmem:[%s12897_s1 + $0x2608] sm:$0xff] }
 0x11b   :  { %5412 = vmatpush1.bf16.msra.mxu0 %v5411_v35  ;;  %v1197_v35 = vld [vmem:[%s12897_s1 + $0x23c0] sm:$0xff]  ;;  %v1278_v24 = vld [vmem:[%s12897_s1 + $0x2648] sm:$0xff] }
 0x11c   :  { %5828 = vmatpush1.bf16.msra.mxu1 %v5827_v36  ;;  %5414 = vmatprep.subr.bf16.mxu0 %v5413_v37  ;;  %v1191_v36 = vld [vmem:[%s12897_s1 + $0x2390] sm:$0xff]  ;;  %v5849_v37 = vpack.c.bf16 %v1200_v30, %v1192_v29  ;;  %v5435_v43 = vpack.c.bf16 %v1197_v35, %v1189_v34  ;;  %v5453_v29 = vpack.c.bf16 %v1278_v24, %v1270_v23  ;;  %v1269_v30 = vld [vmem:[%s12897_s1 + $0x2600] sm:$0xff]  ;;  %v1286_v35 = vld [vmem:[%s12897_s1 + $0x2688] sm:$0xff] }
 0x11d   :  { %5830 = vmatprep.subr.bf16.mxu1 %v5829_v41  ;;  %v1208_v41 = vld [vmem:[%s12897_s1 + $0x2418] sm:$0xff]  ;;  %v5851_v44 = vpack.c.bf16 %v1199_v38, %v1191_v36  ;;  %v1279_v34 = vld [vmem:[%s12897_s1 + $0x2650] sm:$0xff]  ;;  %v1294_v36 = vld [vmem:[%s12897_s1 + $0x26c8] sm:$0xff] }
 0x11e   :  { %v1296_v38 = vld [vmem:[%s12897_s1 + $0x26d8] sm:$0xff]  ;;  %v48_v23 = vld [vmem:[%s12896_s0 + $0x40] sm:$0xff] }
 0x11f   :  { %5416 = vmatpush1.bf16.msra.mxu0 %v5415_v47  ;;  %v1213_v47 = vld [vmem:[%s12897_s1 + $0x2440] sm:$0xff] }
 0x120   :  { %5832 = vmatpush1.bf16.msra.mxu1 %v5831_v48  ;;  %5418 = vmatprep.subr.bf16.mxu0 %v5417_v49  ;;  %v1207_v48 = vld [vmem:[%s12897_s1 + $0x2410] sm:$0xff]  ;;  %v5853_v49 = vpack.c.bf16 %v1216_v42, %v1208_v41  ;;  %v5439_v55 = vpack.c.bf16 %v1213_v47, %v1205_v46  ;;  %v5457_v41 = vpack.c.bf16 %v1294_v36, %v1286_v35  ;;  %v1285_v42 = vld [vmem:[%s12897_s1 + $0x2680] sm:$0xff]  ;;  %v1302_v47 = vld [vmem:[%s12897_s1 + $0x2708] sm:$0xff] }
 0x121   :  { %5834 = vmatprep.subr.bf16.mxu1 %v5833_v53  ;;  %v1224_v53 = vld [vmem:[%s12897_s1 + $0x2498] sm:$0xff]  ;;  %v5855_v56 = vpack.c.bf16 %v1215_v50, %v1207_v48  ;;  %v1295_v46 = vld [vmem:[%s12897_s1 + $0x26d0] sm:$0xff]  ;;  %v1310_v48 = vld [vmem:[%s12897_s1 + $0x2748] sm:$0xff] }
 0x122   :  { %v1312_v50 = vld [vmem:[%s12897_s1 + $0x2758] sm:$0xff] }
 0x123   :  { %5420 = vmatpush1.bf16.msra.mxu0 %v5419_v59  ;;  %v1229_v59 = vld [vmem:[%s12897_s1 + $0x24c0] sm:$0xff]  ;;  %v1376_v35 = vld [vmem:[%s12897_s1 + $0x2958] sm:$0xff] }
 0x124   :  { %5836 = vmatpush1.bf16.msra.mxu1 %v5835_v60  ;;  %5422 = vmatprep.subr.bf16.mxu0 %v5421_v61  ;;  %v1223_v60 = vld [vmem:[%s12897_s1 + $0x2490] sm:$0xff]  ;;  %v5857_v61 = vpack.c.bf16 %v1232_v54, %v1224_v53  ;;  %v5443_v3 = vpack.c.bf16 %v1229_v59, %v1221_v58  ;;  %v5461_v53 = vpack.c.bf16 %v1310_v48, %v1302_v47  ;;  %v1301_v54 = vld [vmem:[%s12897_s1 + $0x2700] sm:$0xff]  ;;  %v1318_v59 = vld [vmem:[%s12897_s1 + $0x2788] sm:$0xff] }
 0x125   :  { %5838 = vmatprep.subr.bf16.mxu1 %v5837_v1  ;;  %v1240_v1 = vld [vmem:[%s12897_s1 + $0x2518] sm:$0xff]  ;;  %v5859_v4 = vpack.c.bf16 %v1231_v62, %v1223_v60  ;;  %v1311_v58 = vld [vmem:[%s12897_s1 + $0x2750] sm:$0xff]  ;;  %v1326_v60 = vld [vmem:[%s12897_s1 + $0x27c8] sm:$0xff] }
 0x126   :  { %v1328_v62 = vld [vmem:[%s12897_s1 + $0x27d8] sm:$0xff] }
 0x127   :  { %5424 = vmatpush1.bf16.msra.mxu0 %v5423_v7  ;;  %v1245_v7 = vld [vmem:[%s12897_s1 + $0x2540] sm:$0xff]  ;;  %v51_v36 = vld [vmem:[%s12896_s0 + $0x58] sm:$0xff] }
 0x128   :  { %5840 = vmatpush1.bf16.msra.mxu1 %v5839_v8  ;;  %5426 = vmatprep.subr.bf16.mxu0 %v5425_v9  ;;  %v1239_v8 = vld [vmem:[%s12897_s1 + $0x2510] sm:$0xff]  ;;  %v5861_v9 = vpack.c.bf16 %v1248_v2, %v1240_v1  ;;  %v5447_v15 = vpack.c.bf16 %v1245_v7, %v1237_v6  ;;  %v5465_v1 = vpack.c.bf16 %v1326_v60, %v1318_v59  ;;  %v1317_v2 = vld [vmem:[%s12897_s1 + $0x2780] sm:$0xff]  ;;  %v1334_v7 = vld [vmem:[%s12897_s1 + $0x2808] sm:$0xff] }
 0x129   :  { %5842 = vmatprep.subr.bf16.mxu1 %v5841_v13  ;;  %v1256_v13 = vld [vmem:[%s12897_s1 + $0x2598] sm:$0xff]  ;;  %v5863_v16 = vpack.c.bf16 %v1247_v10, %v1239_v8  ;;  %v1327_v6 = vld [vmem:[%s12897_s1 + $0x27d0] sm:$0xff]  ;;  %v1342_v8 = vld [vmem:[%s12897_s1 + $0x2848] sm:$0xff] }
 0x12a   :  { %v1344_v10 = vld [vmem:[%s12897_s1 + $0x2858] sm:$0xff] }
 0x12b   :  { %5428 = vmatpush1.bf16.msra.mxu0 %v5427_v19  ;;  %v1261_v19 = vld [vmem:[%s12897_s1 + $0x25c0] sm:$0xff]  ;;  %v1384_v47 = vld [vmem:[%s12897_s1 + $0x2998] sm:$0xff] }
 0x12c   :  { %5844 = vmatpush1.bf16.msra.mxu1 %v5843_v20  ;;  %5430 = vmatprep.subr.bf16.mxu0 %v5429_v21  ;;  %v1255_v20 = vld [vmem:[%s12897_s1 + $0x2590] sm:$0xff]  ;;  %v5865_v21 = vpack.c.bf16 %v1264_v14, %v1256_v13  ;;  %v5451_v27 = vpack.c.bf16 %v1261_v19, %v1253_v18  ;;  %v5469_v13 = vpack.c.bf16 %v1342_v8, %v1334_v7  ;;  %v1333_v14 = vld [vmem:[%s12897_s1 + $0x2800] sm:$0xff]  ;;  %v1350_v19 = vld [vmem:[%s12897_s1 + $0x2888] sm:$0xff] }
 0x12d   :  { %5846 = vmatprep.subr.bf16.mxu1 %v5845_v25  ;;  %v1272_v25 = vld [vmem:[%s12897_s1 + $0x2618] sm:$0xff]  ;;  %v5867_v28 = vpack.c.bf16 %v1263_v22, %v1255_v20  ;;  %v1343_v18 = vld [vmem:[%s12897_s1 + $0x2850] sm:$0xff]  ;;  %v1358_v20 = vld [vmem:[%s12897_s1 + $0x28c8] sm:$0xff] }
 0x12e   :  { %v1360_v22 = vld [vmem:[%s12897_s1 + $0x28d8] sm:$0xff] }
 0x12f   :  { %5432 = vmatpush1.bf16.msra.mxu0 %v5431_v31  ;;  %v1277_v31 = vld [vmem:[%s12897_s1 + $0x2640] sm:$0xff]  ;;  %v1392_v48 = vld [vmem:[%s12897_s1 + $0x29d8] sm:$0xff] }
 0x130   :  { %5848 = vmatpush1.bf16.msra.mxu1 %v5847_v32  ;;  %5434 = vmatprep.subr.bf16.mxu0 %v5433_v33  ;;  %v1271_v32 = vld [vmem:[%s12897_s1 + $0x2610] sm:$0xff]  ;;  %v5869_v33 = vpack.c.bf16 %v1280_v26, %v1272_v25  ;;  %v5455_v39 = vpack.c.bf16 %v1277_v31, %v1269_v30  ;;  %v5473_v26 = vpack.c.bf16 %v1358_v20, %v1350_v19  ;;  %v1400_v59 = vld [vmem:[%s12897_s1 + $0x2a18] sm:$0xff] }
 0x131   :  { %5850 = vmatprep.subr.bf16.mxu1 %v5849_v37  ;;  %v1288_v37 = vld [vmem:[%s12897_s1 + $0x2698] sm:$0xff]  ;;  %v5871_v40 = vpack.c.bf16 %v1279_v34, %v1271_v32  ;;  %v1359_v31 = vld [vmem:[%s12897_s1 + $0x28d0] sm:$0xff]  ;;  %v1366_v32 = vld [vmem:[%s12897_s1 + $0x2908] sm:$0xff] }
 0x132   :  { %v1368_v34 = vld [vmem:[%s12897_s1 + $0x2918] sm:$0xff] }
 0x133   :  { %5436 = vmatpush1.bf16.msra.mxu0 %v5435_v43  ;;  %v1293_v43 = vld [vmem:[%s12897_s1 + $0x26c0] sm:$0xff]  ;;  %v1408_v60 = vld [vmem:[%s12897_s1 + $0x2a58] sm:$0xff] }
 0x134   :  { %5852 = vmatpush1.bf16.msra.mxu1 %v5851_v44  ;;  %5438 = vmatprep.subr.bf16.mxu0 %v5437_v45  ;;  %v1287_v44 = vld [vmem:[%s12897_s1 + $0x2690] sm:$0xff]  ;;  %v5873_v45 = vpack.c.bf16 %v1296_v38, %v1288_v37  ;;  %v5459_v51 = vpack.c.bf16 %v1293_v43, %v1285_v42  ;;  %v5893_v43 = vpack.c.bf16 %v1376_v35, %v1368_v34  ;;  %v1416_v7 = vld [vmem:[%s12897_s1 + $0x2a98] sm:$0xff] }
 0x135   :  { %5854 = vmatprep.subr.bf16.mxu1 %v5853_v49  ;;  %v1304_v49 = vld [vmem:[%s12897_s1 + $0x2718] sm:$0xff]  ;;  %v5875_v52 = vpack.c.bf16 %v1295_v46, %v1287_v44  ;;  %v1367_v42 = vld [vmem:[%s12897_s1 + $0x2910] sm:$0xff]  ;;  %v1390_v46 = vld [vmem:[%s12897_s1 + $0x29c8] sm:$0xff] }
 0x136   :  { %v1375_v44 = vld [vmem:[%s12897_s1 + $0x2950] sm:$0xff]  ;;  %v1424_v8 = vld [vmem:[%s12897_s1 + $0x2ad8] sm:$0xff] }
 0x137   :  { %5440 = vmatpush1.bf16.msra.mxu0 %v5439_v55  ;;  %v1309_v55 = vld [vmem:[%s12897_s1 + $0x2740] sm:$0xff]  ;;  %v1432_v19 = vld [vmem:[%s12897_s1 + $0x2b18] sm:$0xff] }
 0x138   :  { %5856 = vmatpush1.bf16.msra.mxu1 %v5855_v56  ;;  %5442 = vmatprep.subr.bf16.mxu0 %v5441_v57  ;;  %v1303_v56 = vld [vmem:[%s12897_s1 + $0x2710] sm:$0xff]  ;;  %v5877_v57 = vpack.c.bf16 %v1312_v50, %v1304_v49  ;;  %v5463_v63 = vpack.c.bf16 %v1309_v55, %v1301_v54  ;;  %v5895_v50 = vpack.c.bf16 %v1375_v44, %v1367_v42  ;;  %v1440_v20 = vld [vmem:[%s12897_s1 + $0x2b58] sm:$0xff]  ;;  %v1470_v42 = vld [vmem:[%s12897_s1 + $0x2c48] sm:$0xff] }
 0x139   :  { %5858 = vmatprep.subr.bf16.mxu1 %v5857_v61  ;;  %v1320_v61 = vld [vmem:[%s12897_s1 + $0x2798] sm:$0xff]  ;;  %v5879_v0 = vpack.c.bf16 %v1311_v58, %v1303_v56  ;;  %v1383_v54 = vld [vmem:[%s12897_s1 + $0x2990] sm:$0xff]  ;;  %v5897_v55 = vpack.c.bf16 %v1392_v48, %v1384_v47  ;;  %v1406_v58 = vld [vmem:[%s12897_s1 + $0x2a48] sm:$0xff] }
 0x13a   :  { %v1391_v56 = vld [vmem:[%s12897_s1 + $0x29d0] sm:$0xff]  ;;  %v1472_v44 = vld [vmem:[%s12897_s1 + $0x2c58] sm:$0xff]  ;;  %v1461_v48 = vld [vmem:[%s12897_s1 + $0x2c00] sm:$0xff] }
 0x13b   :  { %5444 = vmatpush1.bf16.msra.mxu0 %v5443_v3  ;;  %v1325_v3 = vld [vmem:[%s12897_s1 + $0x27c0] sm:$0xff] }
 0x13c   :  { %5860 = vmatpush1.bf16.msra.mxu1 %v5859_v4  ;;  %5446 = vmatprep.subr.bf16.mxu0 %v5445_v5  ;;  %v1319_v4 = vld [vmem:[%s12897_s1 + $0x2790] sm:$0xff]  ;;  %v5881_v5 = vpack.c.bf16 %v1328_v62, %v1320_v61  ;;  %v5467_v11 = vpack.c.bf16 %v1325_v3, %v1317_v2  ;;  %v5899_v62 = vpack.c.bf16 %v1391_v56, %v1383_v54  ;;  %v1486_v54 = vld [vmem:[%s12897_s1 + $0x2cc8] sm:$0xff]  ;;  %v1488_v56 = vld [vmem:[%s12897_s1 + $0x2cd8] sm:$0xff] }
 0x13d   :  { %5862 = vmatprep.subr.bf16.mxu1 %v5861_v9  ;;  %v1336_v9 = vld [vmem:[%s12897_s1 + $0x2818] sm:$0xff]  ;;  %v5883_v12 = vpack.c.bf16 %v1327_v6, %v1319_v4  ;;  %v1399_v2 = vld [vmem:[%s12897_s1 + $0x2a10] sm:$0xff]  ;;  %v5901_v3 = vpack.c.bf16 %v1408_v60, %v1400_v59  ;;  %v1422_v6 = vld [vmem:[%s12897_s1 + $0x2ac8] sm:$0xff] }
 0x13e   :  { %v1407_v4 = vld [vmem:[%s12897_s1 + $0x2a50] sm:$0xff]  ;;  %v1477_v60 = vld [vmem:[%s12897_s1 + $0x2c80] sm:$0xff] }
 0x13f   :  { %5448 = vmatpush1.bf16.msra.mxu0 %v5447_v15  ;;  %v1341_v15 = vld [vmem:[%s12897_s1 + $0x2840] sm:$0xff] }
 0x140   :  { %5864 = vmatpush1.bf16.msra.mxu1 %v5863_v16  ;;  %5450 = vmatprep.subr.bf16.mxu0 %v5449_v17  ;;  %v1335_v16 = vld [vmem:[%s12897_s1 + $0x2810] sm:$0xff]  ;;  %v5885_v17 = vpack.c.bf16 %v1344_v10, %v1336_v9  ;;  %v5471_v24 = vpack.c.bf16 %v1341_v15, %v1333_v14  ;;  %v5903_v10 = vpack.c.bf16 %v1407_v4, %v1399_v2  ;;  %v1502_v2 = vld [vmem:[%s12897_s1 + $0x2d48] sm:$0xff]  ;;  %v1504_v4 = vld [vmem:[%s12897_s1 + $0x2d58] sm:$0xff] }
 0x141   :  { %5866 = vmatprep.subr.bf16.mxu1 %v5865_v21  ;;  %v1352_v21 = vld [vmem:[%s12897_s1 + $0x2898] sm:$0xff]  ;;  %v5887_v25 = vpack.c.bf16 %v1343_v18, %v1335_v16  ;;  %v1415_v14 = vld [vmem:[%s12897_s1 + $0x2a90] sm:$0xff]  ;;  %v5905_v15 = vpack.c.bf16 %v1424_v8, %v1416_v7  ;;  %v1438_v18 = vld [vmem:[%s12897_s1 + $0x2b48] sm:$0xff] }
 0x142   :  { %v5889_v30 = vpack.c.bf16 %v1360_v22, %v1352_v21  ;;  %v1423_v16 = vld [vmem:[%s12897_s1 + $0x2ad0] sm:$0xff]  ;;  %v1493_v8 = vld [vmem:[%s12897_s1 + $0x2d00] sm:$0xff] }
 0x143   :  { %5452 = vmatpush1.bf16.msra.mxu0 %v5451_v27  ;;  %v1349_v27 = vld [vmem:[%s12897_s1 + $0x2880] sm:$0xff]  ;;  %v5907_v22 = vpack.c.bf16 %v1423_v16, %v1415_v14  ;;  %v1518_v14 = vld [vmem:[%s12897_s1 + $0x2dc8] sm:$0xff]  ;;  %v1520_v16 = vld [vmem:[%s12897_s1 + $0x2dd8] sm:$0xff] }
 0x144   :  { %5868 = vmatpush1.bf16.msra.mxu1 %v5867_v28  ;;  %5454 = vmatprep.subr.bf16.mxu0 %v5453_v29  ;;  %v1357_v28 = vld [vmem:[%s12897_s1 + $0x28c0] sm:$0xff]  ;;  %v1351_v29 = vld [vmem:[%s12897_s1 + $0x2890] sm:$0xff] }
 0x145   :  { %5870 = vmatprep.subr.bf16.mxu1 %v5869_v33  ;;  %v1374_v33 = vld [vmem:[%s12897_s1 + $0x2948] sm:$0xff]  ;;  %v5475_v37 = vpack.c.bf16 %v1357_v28, %v1349_v27  ;;  %v5891_v38 = vpack.c.bf16 %v1359_v31, %v1351_v29  ;;  %v5909_v27 = vpack.c.bf16 %v1440_v20, %v1432_v19  ;;  %v1439_v28 = vld [vmem:[%s12897_s1 + $0x2b50] sm:$0xff]  ;;  %v1448_v31 = vld [vmem:[%s12897_s1 + $0x2b98] sm:$0xff] }
 0x146   :  { %v1446_v29 = vld [vmem:[%s12897_s1 + $0x2b88] sm:$0xff]  ;;  %v1509_v20 = vld [vmem:[%s12897_s1 + $0x2d80] sm:$0xff] }
 0x147   :  { %5456 = vmatpush1.bf16.msra.mxu0 %v5455_v39  ;;  %v5477_v39 = vpack.c.bf16 %v1374_v33, %v1366_v32  ;;  %v1456_v32 = vld [vmem:[%s12897_s1 + $0x2bd8] sm:$0xff] }
 0x148   :  { %5872 = vmatpush1.bf16.msra.mxu1 %v5871_v40  ;;  %5458 = vmatprep.subr.bf16.mxu0 %v5457_v41  ;;  %v1365_v40 = vld [vmem:[%s12897_s1 + $0x2900] sm:$0xff] }
 0x149   :  { %5874 = vmatprep.subr.bf16.mxu1 %v5873_v45  ;;  %v1373_v41 = vld [vmem:[%s12897_s1 + $0x2940] sm:$0xff]  ;;  %v1382_v45 = vld [vmem:[%s12897_s1 + $0x2988] sm:$0xff] }
 0x14a   :  { %v5479_v49 = vpack.c.bf16 %v1373_v41, %v1365_v40  ;;  %v1455_v40 = vld [vmem:[%s12897_s1 + $0x2bd0] sm:$0xff]  ;;  %v1462_v41 = vld [vmem:[%s12897_s1 + $0x2c08] sm:$0xff] }
 0x14b   :  { %5460 = vmatpush1.bf16.msra.mxu0 %v5459_v51  ;;  %v5481_v51 = vpack.c.bf16 %v1390_v46, %v1382_v45  ;;  %v5501_v47 = vpack.c.bf16 %v1470_v42, %v1462_v41 }
 0x14c   :  { %5876 = vmatpush1.bf16.msra.mxu1 %v5875_v52  ;;  %5462 = vmatprep.subr.bf16.mxu0 %v5461_v53  ;;  %v1381_v52 = vld [vmem:[%s12897_s1 + $0x2980] sm:$0xff] }
 0x14d   :  { %5878 = vmatprep.subr.bf16.mxu1 %v5877_v57  ;;  %v1389_v53 = vld [vmem:[%s12897_s1 + $0x29c0] sm:$0xff]  ;;  %v1398_v57 = vld [vmem:[%s12897_s1 + $0x2a08] sm:$0xff] }
 0x14e   :  { %v5483_v61 = vpack.c.bf16 %v1389_v53, %v1381_v52  ;;  %v1471_v52 = vld [vmem:[%s12897_s1 + $0x2c50] sm:$0xff]  ;;  %v1478_v53 = vld [vmem:[%s12897_s1 + $0x2c88] sm:$0xff] }
 0x14f   :  { %5464 = vmatpush1.bf16.msra.mxu0 %v5463_v63  ;;  %v5485_v63 = vpack.c.bf16 %v1406_v58, %v1398_v57  ;;  %v5505_v59 = vpack.c.bf16 %v1486_v54, %v1478_v53 }
 0x150   :  { %5880 = vmatpush1.bf16.msra.mxu1 %v5879_v0  ;;  %5466 = vmatprep.subr.bf16.mxu0 %v5465_v1  ;;  %v1397_v0 = vld [vmem:[%s12897_s1 + $0x2a00] sm:$0xff] }
 0x151   :  { %5882 = vmatprep.subr.bf16.mxu1 %v5881_v5  ;;  %v1405_v1 = vld [vmem:[%s12897_s1 + $0x2a40] sm:$0xff]  ;;  %v1414_v5 = vld [vmem:[%s12897_s1 + $0x2a88] sm:$0xff] }
 0x152   :  { %v5487_v9 = vpack.c.bf16 %v1405_v1, %v1397_v0  ;;  %v1487_v0 = vld [vmem:[%s12897_s1 + $0x2cd0] sm:$0xff]  ;;  %v1494_v1 = vld [vmem:[%s12897_s1 + $0x2d08] sm:$0xff] }
 0x153   :  { %5468 = vmatpush1.bf16.msra.mxu0 %v5467_v11  ;;  %v5489_v11 = vpack.c.bf16 %v1422_v6, %v1414_v5  ;;  %v5509_v7 = vpack.c.bf16 %v1502_v2, %v1494_v1 }
 0x154   :  { %5884 = vmatpush1.bf16.msra.mxu1 %v5883_v12  ;;  %5470 = vmatprep.subr.bf16.mxu0 %v5469_v13  ;;  %v1413_v12 = vld [vmem:[%s12897_s1 + $0x2a80] sm:$0xff] }
 0x155   :  { %5886 = vmatprep.subr.bf16.mxu1 %v5885_v17  ;;  %v1421_v13 = vld [vmem:[%s12897_s1 + $0x2ac0] sm:$0xff]  ;;  %v1430_v17 = vld [vmem:[%s12897_s1 + $0x2b08] sm:$0xff] }
 0x156   :  { %2108 = vmatmul.mubr.f32.vlgmr.msra.gmra.mrb[0].mxu0 %v48_v23  ;;  %v5491_v21 = vpack.c.bf16 %v1421_v13, %v1413_v12  ;;  %v1503_v12 = vld [vmem:[%s12897_s1 + $0x2d50] sm:$0xff]  ;;  %v1510_v13 = vld [vmem:[%s12897_s1 + $0x2d88] sm:$0xff] }
 0x157   :  { %5472 = vmatpush1.bf16.msra.mxu0 %v5471_v24  ;;  %2605 = vmatmul.mubr.f32.vlgmr.msra.gmra.mrb[0].mxu1 %v48_v23  ;;  %v5493_v23 = vpack.c.bf16 %v1438_v18, %v1430_v17  ;;  %v1429_v24 = vld [vmem:[%s12897_s1 + $0x2b00] sm:$0xff]  ;;  %v5513_v19 = vpack.c.bf16 %v1518_v14, %v1510_v13 }
 0x158   :  { %5888 = vmatpush1.bf16.msra.mxu1 %v5887_v25  ;;  %5474 = vmatprep.subr.bf16.mxu0 %v5473_v26  ;;  %v1437_v25 = vld [vmem:[%s12897_s1 + $0x2b40] sm:$0xff]  ;;  %v1431_v26 = vld [vmem:[%s12897_s1 + $0x2b10] sm:$0xff] }
 0x159   :  { %5890 = vmatprep.subr.bf16.mxu1 %v5889_v30  ;;  %2178 = vmatprep.mubr.f32.mxu0 %v51_v36  ;;  %v1454_v30 = vld [vmem:[%s12897_s1 + $0x2bc8] sm:$0xff]  ;;  %v5495_v33 = vpack.c.bf16 %v1437_v25, %v1429_v24  ;;  %v5911_v34 = vpack.c.bf16 %v1439_v28, %v1431_v26  ;;  %v1519_v24 = vld [vmem:[%s12897_s1 + $0x2dd0] sm:$0xff]  ;;  %v1536_v28 = vld [vmem:[%s12897_s1 + $0x2e58] sm:$0xff] }
 0x15a   :  { %2675 = vmatprep.mubr.f32.mxu1 %v51_v36  ;;  %v5497_v35 = vpack.c.bf16 %v1454_v30, %v1446_v29  ;;  %v1445_v36 = vld [vmem:[%s12897_s1 + $0x2b80] sm:$0xff]  ;;  %v1526_v25 = vld [vmem:[%s12897_s1 + $0x2e08] sm:$0xff] }
 0x15b   :  { %5476 = vmatpush1.bf16.msra.mxu0 %v5475_v37  ;;  %v1453_v37 = vld [vmem:[%s12897_s1 + $0x2bc0] sm:$0xff]  ;;  %v1534_v26 = vld [vmem:[%s12897_s1 + $0x2e48] sm:$0xff] }
 0x15c   :  { %5892 = vmatpush1.bf16.msra.mxu1 %v5891_v38  ;;  %5478 = vmatprep.subr.bf16.mxu0 %v5477_v39  ;;  %v1447_v38 = vld [vmem:[%s12897_s1 + $0x2b90] sm:$0xff]  ;;  %v5913_v39 = vpack.c.bf16 %v1456_v32, %v1448_v31  ;;  %v5499_v45 = vpack.c.bf16 %v1453_v37, %v1445_v36  ;;  %v5517_v31 = vpack.c.bf16 %v1534_v26, %v1526_v25  ;;  %v1525_v32 = vld [vmem:[%s12897_s1 + $0x2e00] sm:$0xff]  ;;  %v1542_v37 = vld [vmem:[%s12897_s1 + $0x2e88] sm:$0xff] }
 0x15d   :  { %5894 = vmatprep.subr.bf16.mxu1 %v5893_v43  ;;  %v1464_v43 = vld [vmem:[%s12897_s1 + $0x2c18] sm:$0xff]  ;;  %v5915_v46 = vpack.c.bf16 %v1455_v40, %v1447_v38  ;;  %v1535_v36 = vld [vmem:[%s12897_s1 + $0x2e50] sm:$0xff]  ;;  %v1550_v38 = vld [vmem:[%s12897_s1 + $0x2ec8] sm:$0xff] }
 0x15e   :  { %v1552_v40 = vld [vmem:[%s12897_s1 + $0x2ed8] sm:$0xff]  ;;  %v50_v25 = vld [vmem:[%s12896_s0 + $0x50] sm:$0xff] }
 0x15f   :  { %5480 = vmatpush1.bf16.msra.mxu0 %v5479_v49  ;;  %v1469_v49 = vld [vmem:[%s12897_s1 + $0x2c40] sm:$0xff] }
 0x160   :  { %5896 = vmatpush1.bf16.msra.mxu1 %v5895_v50  ;;  %5482 = vmatprep.subr.bf16.mxu0 %v5481_v51  ;;  %v1463_v50 = vld [vmem:[%s12897_s1 + $0x2c10] sm:$0xff]  ;;  %v5917_v51 = vpack.c.bf16 %v1472_v44, %v1464_v43  ;;  %v5503_v57 = vpack.c.bf16 %v1469_v49, %v1461_v48  ;;  %v5521_v43 = vpack.c.bf16 %v1550_v38, %v1542_v37  ;;  %v1541_v44 = vld [vmem:[%s12897_s1 + $0x2e80] sm:$0xff]  ;;  %v1558_v49 = vld [vmem:[%s12897_s1 + $0x2f08] sm:$0xff] }
 0x161   :  { %5898 = vmatprep.subr.bf16.mxu1 %v5897_v55  ;;  %v1480_v55 = vld [vmem:[%s12897_s1 + $0x2c98] sm:$0xff]  ;;  %v5919_v58 = vpack.c.bf16 %v1471_v52, %v1463_v50  ;;  %v1551_v48 = vld [vmem:[%s12897_s1 + $0x2ed0] sm:$0xff]  ;;  %v1566_v50 = vld [vmem:[%s12897_s1 + $0x2f48] sm:$0xff] }
 0x162   :  { %v1568_v52 = vld [vmem:[%s12897_s1 + $0x2f58] sm:$0xff] }
 0x163   :  { %5484 = vmatpush1.bf16.msra.mxu0 %v5483_v61  ;;  %v1485_v61 = vld [vmem:[%s12897_s1 + $0x2cc0] sm:$0xff]  ;;  %v1632_v37 = vld [vmem:[%s12897_s1 + $0x3158] sm:$0xff] }
 0x164   :  { %5900 = vmatpush1.bf16.msra.mxu1 %v5899_v62  ;;  %5486 = vmatprep.subr.bf16.mxu0 %v5485_v63  ;;  %v1479_v62 = vld [vmem:[%s12897_s1 + $0x2c90] sm:$0xff]  ;;  %v5921_v63 = vpack.c.bf16 %v1488_v56, %v1480_v55  ;;  %v5507_v5 = vpack.c.bf16 %v1485_v61, %v1477_v60  ;;  %v5525_v55 = vpack.c.bf16 %v1566_v50, %v1558_v49  ;;  %v1557_v56 = vld [vmem:[%s12897_s1 + $0x2f00] sm:$0xff]  ;;  %v1574_v61 = vld [vmem:[%s12897_s1 + $0x2f88] sm:$0xff] }
 0x165   :  { %5902 = vmatprep.subr.bf16.mxu1 %v5901_v3  ;;  %v1496_v3 = vld [vmem:[%s12897_s1 + $0x2d18] sm:$0xff]  ;;  %v5923_v6 = vpack.c.bf16 %v1487_v0, %v1479_v62  ;;  %v1567_v60 = vld [vmem:[%s12897_s1 + $0x2f50] sm:$0xff]  ;;  %v1582_v62 = vld [vmem:[%s12897_s1 + $0x2fc8] sm:$0xff] }
 0x166   :  { %v1584_v0 = vld [vmem:[%s12897_s1 + $0x2fd8] sm:$0xff] }
 0x167   :  { %5488 = vmatpush1.bf16.msra.mxu0 %v5487_v9  ;;  %v1501_v9 = vld [vmem:[%s12897_s1 + $0x2d40] sm:$0xff]  ;;  %v1640_v49 = vld [vmem:[%s12897_s1 + $0x3198] sm:$0xff] }
 0x168   :  { %5904 = vmatpush1.bf16.msra.mxu1 %v5903_v10  ;;  %5490 = vmatprep.subr.bf16.mxu0 %v5489_v11  ;;  %v1495_v10 = vld [vmem:[%s12897_s1 + $0x2d10] sm:$0xff]  ;;  %v5925_v11 = vpack.c.bf16 %v1504_v4, %v1496_v3  ;;  %v5511_v17 = vpack.c.bf16 %v1501_v9, %v1493_v8  ;;  %v5529_v3 = vpack.c.bf16 %v1582_v62, %v1574_v61  ;;  %v1573_v4 = vld [vmem:[%s12897_s1 + $0x2f80] sm:$0xff]  ;;  %v1590_v9 = vld [vmem:[%s12897_s1 + $0x3008] sm:$0xff] }
 0x169   :  { %5906 = vmatprep.subr.bf16.mxu1 %v5905_v15  ;;  %v1512_v15 = vld [vmem:[%s12897_s1 + $0x2d98] sm:$0xff]  ;;  %v5927_v18 = vpack.c.bf16 %v1503_v12, %v1495_v10  ;;  %v1583_v8 = vld [vmem:[%s12897_s1 + $0x2fd0] sm:$0xff]  ;;  %v1598_v10 = vld [vmem:[%s12897_s1 + $0x3048] sm:$0xff] }
 0x16a   :  { %v1600_v12 = vld [vmem:[%s12897_s1 + $0x3058] sm:$0xff] }
 0x16b   :  { %5492 = vmatpush1.bf16.msra.mxu0 %v5491_v21  ;;  %v1517_v21 = vld [vmem:[%s12897_s1 + $0x2dc0] sm:$0xff]  ;;  %v1648_v50 = vld [vmem:[%s12897_s1 + $0x31d8] sm:$0xff] }
 0x16c   :  { %5908 = vmatpush1.bf16.msra.mxu1 %v5907_v22  ;;  %5494 = vmatprep.subr.bf16.mxu0 %v5493_v23  ;;  %v1511_v22 = vld [vmem:[%s12897_s1 + $0x2d90] sm:$0xff]  ;;  %v5929_v23 = vpack.c.bf16 %v1520_v16, %v1512_v15  ;;  %v5515_v29 = vpack.c.bf16 %v1517_v21, %v1509_v20  ;;  %v5533_v15 = vpack.c.bf16 %v1598_v10, %v1590_v9  ;;  %v1589_v16 = vld [vmem:[%s12897_s1 + $0x3000] sm:$0xff]  ;;  %v1606_v21 = vld [vmem:[%s12897_s1 + $0x3088] sm:$0xff] }
 0x16d   :  { %5910 = vmatprep.subr.bf16.mxu1 %v5909_v27  ;;  %v1528_v27 = vld [vmem:[%s12897_s1 + $0x2e18] sm:$0xff]  ;;  %v5931_v30 = vpack.c.bf16 %v1519_v24, %v1511_v22  ;;  %v1599_v20 = vld [vmem:[%s12897_s1 + $0x3050] sm:$0xff]  ;;  %v1614_v22 = vld [vmem:[%s12897_s1 + $0x30c8] sm:$0xff] }
 0x16e   :  { %v1616_v24 = vld [vmem:[%s12897_s1 + $0x30d8] sm:$0xff] }
 0x16f   :  { %5496 = vmatpush1.bf16.msra.mxu0 %v5495_v33  ;;  %v1533_v33 = vld [vmem:[%s12897_s1 + $0x2e40] sm:$0xff]  ;;  %v1656_v61 = vld [vmem:[%s12897_s1 + $0x3218] sm:$0xff] }
 0x170   :  { %5912 = vmatpush1.bf16.msra.mxu1 %v5911_v34  ;;  %5498 = vmatprep.subr.bf16.mxu0 %v5497_v35  ;;  %v1527_v34 = vld [vmem:[%s12897_s1 + $0x2e10] sm:$0xff]  ;;  %v5933_v35 = vpack.c.bf16 %v1536_v28, %v1528_v27  ;;  %v5519_v41 = vpack.c.bf16 %v1533_v33, %v1525_v32  ;;  %v5537_v28 = vpack.c.bf16 %v1614_v22, %v1606_v21  ;;  %v1664_v62 = vld [vmem:[%s12897_s1 + $0x3258] sm:$0xff] }
 0x171   :  { %5914 = vmatprep.subr.bf16.mxu1 %v5913_v39  ;;  %v1544_v39 = vld [vmem:[%s12897_s1 + $0x2e98] sm:$0xff]  ;;  %v5935_v42 = vpack.c.bf16 %v1535_v36, %v1527_v34  ;;  %v1615_v33 = vld [vmem:[%s12897_s1 + $0x30d0] sm:$0xff]  ;;  %v1622_v34 = vld [vmem:[%s12897_s1 + $0x3108] sm:$0xff] }
 0x172   :  { %v1624_v36 = vld [vmem:[%s12897_s1 + $0x3118] sm:$0xff] }
 0x173   :  { %5500 = vmatpush1.bf16.msra.mxu0 %v5499_v45  ;;  %v1549_v45 = vld [vmem:[%s12897_s1 + $0x2ec0] sm:$0xff]  ;;  %v1672_v9 = vld [vmem:[%s12897_s1 + $0x3298] sm:$0xff] }
 0x174   :  { %5916 = vmatpush1.bf16.msra.mxu1 %v5915_v46  ;;  %5502 = vmatprep.subr.bf16.mxu0 %v5501_v47  ;;  %v1543_v46 = vld [vmem:[%s12897_s1 + $0x2e90] sm:$0xff]  ;;  %v5937_v47 = vpack.c.bf16 %v1552_v40, %v1544_v39  ;;  %v5523_v53 = vpack.c.bf16 %v1549_v45, %v1541_v44  ;;  %v5957_v44 = vpack.c.bf16 %v1632_v37, %v1624_v36  ;;  %v1680_v10 = vld [vmem:[%s12897_s1 + $0x32d8] sm:$0xff] }
 0x175   :  { %5918 = vmatprep.subr.bf16.mxu1 %v5917_v51  ;;  %v1560_v51 = vld [vmem:[%s12897_s1 + $0x2f18] sm:$0xff]  ;;  %v5939_v54 = vpack.c.bf16 %v1551_v48, %v1543_v46  ;;  %v1631_v45 = vld [vmem:[%s12897_s1 + $0x3150] sm:$0xff]  ;;  %v1638_v46 = vld [vmem:[%s12897_s1 + $0x3188] sm:$0xff]  ;;  %v7507_v48 = vmov 0.0  }
 0x176   :  { %v1688_v21 = vld [vmem:[%s12897_s1 + $0x3318] sm:$0xff] }
 0x177   :  { %5504 = vmatpush1.bf16.msra.mxu0 %v5503_v57  ;;  %v1565_v57 = vld [vmem:[%s12897_s1 + $0x2f40] sm:$0xff]  ;;  %v1696_v22 = vld [vmem:[%s12897_s1 + $0x3358] sm:$0xff] }
 0x178   :  { %5920 = vmatpush1.bf16.msra.mxu1 %v5919_v58  ;;  %5506 = vmatprep.subr.bf16.mxu0 %v5505_v59  ;;  %v1559_v58 = vld [vmem:[%s12897_s1 + $0x2f10] sm:$0xff]  ;;  %v5941_v59 = vpack.c.bf16 %v1568_v52, %v1560_v51  ;;  %v5527_v1 = vpack.c.bf16 %v1565_v57, %v1557_v56  ;;  %v5961_v57 = vpack.c.bf16 %v1648_v50, %v1640_v49 }
 0x179   :  { %5922 = vmatprep.subr.bf16.mxu1 %v5921_v63  ;;  %v1576_v63 = vld [vmem:[%s12897_s1 + $0x2f98] sm:$0xff]  ;;  %v5943_v2 = vpack.c.bf16 %v1567_v60, %v1559_v58  ;;  %v1639_v56 = vld [vmem:[%s12897_s1 + $0x3190] sm:$0xff]  ;;  %v1662_v60 = vld [vmem:[%s12897_s1 + $0x3248] sm:$0xff] }
 0x17a   :  { %v1647_v58 = vld [vmem:[%s12897_s1 + $0x31d0] sm:$0xff] }
 0x17b   :  { %5508 = vmatpush1.bf16.msra.mxu0 %v5507_v5  ;;  %v1581_v5 = vld [vmem:[%s12897_s1 + $0x2fc0] sm:$0xff] }
 0x17c   :  { %5924 = vmatpush1.bf16.msra.mxu1 %v5923_v6  ;;  %5510 = vmatprep.subr.bf16.mxu0 %v5509_v7  ;;  %v1575_v6 = vld [vmem:[%s12897_s1 + $0x2f90] sm:$0xff]  ;;  %v5945_v7 = vpack.c.bf16 %v1584_v0, %v1576_v63  ;;  %v5531_v13 = vpack.c.bf16 %v1581_v5, %v1573_v4  ;;  %v5963_v0 = vpack.c.bf16 %v1647_v58, %v1639_v56  ;;  %v74_v56 = vld [vmem:[%s12897_s1 + $0xa8] sm:$0xff]  ;;  %v76_v58 = vld [vmem:[%s12897_s1 + $0xb8] sm:$0xff] }
 0x17d   :  { %5926 = vmatprep.subr.bf16.mxu1 %v5925_v11  ;;  %v1592_v11 = vld [vmem:[%s12897_s1 + $0x3018] sm:$0xff]  ;;  %v5947_v14 = vpack.c.bf16 %v1583_v8, %v1575_v6  ;;  %v1655_v4 = vld [vmem:[%s12897_s1 + $0x3210] sm:$0xff]  ;;  %v5965_v5 = vpack.c.bf16 %v1664_v62, %v1656_v61  ;;  %v1678_v8 = vld [vmem:[%s12897_s1 + $0x32c8] sm:$0xff] }
 0x17e   :  { %v1663_v6 = vld [vmem:[%s12897_s1 + $0x3250] sm:$0xff] }
 0x17f   :  { %5512 = vmatpush1.bf16.msra.mxu0 %v5511_v17  ;;  %v1597_v17 = vld [vmem:[%s12897_s1 + $0x3040] sm:$0xff] }
 0x180   :  { %5928 = vmatpush1.bf16.msra.mxu1 %v5927_v18  ;;  %5514 = vmatprep.subr.bf16.mxu0 %v5513_v19  ;;  %v1591_v18 = vld [vmem:[%s12897_s1 + $0x3010] sm:$0xff]  ;;  %v5949_v19 = vpack.c.bf16 %v1600_v12, %v1592_v11  ;;  %v5535_v26 = vpack.c.bf16 %v1597_v17, %v1589_v16  ;;  %v5967_v12 = vpack.c.bf16 %v1663_v6, %v1655_v4  ;;  %v98_v6 = vld [vmem:[%s12897_s1 + $0x168] sm:$0xff] }
 0x181   :  { %5930 = vmatprep.subr.bf16.mxu1 %v5929_v23  ;;  %v1608_v23 = vld [vmem:[%s12897_s1 + $0x3098] sm:$0xff]  ;;  %v5951_v27 = vpack.c.bf16 %v1599_v20, %v1591_v18  ;;  %v1671_v16 = vld [vmem:[%s12897_s1 + $0x3290] sm:$0xff]  ;;  %v5969_v17 = vpack.c.bf16 %v1680_v10, %v1672_v9  ;;  %v1694_v20 = vld [vmem:[%s12897_s1 + $0x3348] sm:$0xff] }
 0x182   :  { %v5953_v32 = vpack.c.bf16 %v1616_v24, %v1608_v23  ;;  %v1679_v18 = vld [vmem:[%s12897_s1 + $0x32d0] sm:$0xff] }
 0x183   :  { %5516 = vmatpush1.bf16.msra.mxu0 %v5515_v29  ;;  %v1605_v29 = vld [vmem:[%s12897_s1 + $0x3080] sm:$0xff]  ;;  %v5971_v24 = vpack.c.bf16 %v1679_v18, %v1671_v16  ;;  %v83_v4 = vld [vmem:[%s12897_s1 + $0xf0] sm:$0xff]  ;;  %v114_v18 = vld [vmem:[%s12897_s1 + $0x1e8] sm:$0xff] }
 0x184   :  { %5932 = vmatpush1.bf16.msra.mxu1 %v5931_v30  ;;  %5518 = vmatprep.subr.bf16.mxu0 %v5517_v31  ;;  %v1613_v30 = vld [vmem:[%s12897_s1 + $0x30c0] sm:$0xff]  ;;  %v1607_v31 = vld [vmem:[%s12897_s1 + $0x3090] sm:$0xff] }
 0x185   :  { %5934 = vmatprep.subr.bf16.mxu1 %v5933_v35  ;;  %v1630_v35 = vld [vmem:[%s12897_s1 + $0x3148] sm:$0xff]  ;;  %v5539_v38 = vpack.c.bf16 %v1613_v30, %v1605_v29  ;;  %v5955_v39 = vpack.c.bf16 %v1615_v33, %v1607_v31  ;;  %v5973_v29 = vpack.c.bf16 %v1696_v22, %v1688_v21  ;;  %v1695_v30 = vld [vmem:[%s12897_s1 + $0x3350] sm:$0xff]  ;;  %v1704_v33 = vld [vmem:[%s12897_s1 + $0x3398] sm:$0xff] }
 0x186   :  { %v5541_v40 = vpack.c.bf16 %v1630_v35, %v1622_v34  ;;  %v1702_v31 = vld [vmem:[%s12897_s1 + $0x3388] sm:$0xff]  ;;  %v1712_v34 = vld [vmem:[%s12897_s1 + $0x33d8] sm:$0xff]  ;;  %v99_v16 = vld [vmem:[%s12897_s1 + $0x170] sm:$0xff] }
 0x187   :  { %5520 = vmatpush1.bf16.msra.mxu0 %v5519_v41  ;;  %v1621_v41 = vld [vmem:[%s12897_s1 + $0x3100] sm:$0xff]  ;;  %v116_v21 = vld [vmem:[%s12897_s1 + $0x1f8] sm:$0xff] }
 0x188   :  { %5936 = vmatpush1.bf16.msra.mxu1 %v5935_v42  ;;  %5522 = vmatprep.subr.bf16.mxu0 %v5521_v43  ;;  %v1629_v42 = vld [vmem:[%s12897_s1 + $0x3140] sm:$0xff]  ;;  %v1623_v43 = vld [vmem:[%s12897_s1 + $0x3110] sm:$0xff] }
 0x189   :  { %5938 = vmatprep.subr.bf16.mxu1 %v5937_v47  ;;  %v1646_v47 = vld [vmem:[%s12897_s1 + $0x31c8] sm:$0xff]  ;;  %v5543_v51 = vpack.c.bf16 %v1629_v42, %v1621_v41  ;;  %v5959_v52 = vpack.c.bf16 %v1631_v45, %v1623_v43  ;;  %v5977_v41 = vpack.c.bf16 %v1712_v34, %v1704_v33  ;;  %v1711_v42 = vld [vmem:[%s12897_s1 + $0x33d0] sm:$0xff]  ;;  %v60_v45 = vld [vmem:[%s12897_s1 + $0x38] sm:$0xff] }
 0x18a   :  { %v58_v43 = vld [vmem:[%s12897_s1 + $0x28] sm:$0xff]  ;;  %v132_v33 = vld [vmem:[%s12897_s1 + $0x278] sm:$0xff] }
 0x18b   :  { %5524 = vmatpush1.bf16.msra.mxu0 %v5523_v53  ;;  %v5545_v53 = vpack.c.bf16 %v1646_v47, %v1638_v46  ;;  %v68_v46 = vld [vmem:[%s12897_s1 + $0x78] sm:$0xff] }
 0x18c   :  { %5940 = vmatpush1.bf16.msra.mxu1 %v5939_v54  ;;  %5526 = vmatprep.subr.bf16.mxu0 %v5525_v55  ;;  %v1637_v54 = vld [vmem:[%s12897_s1 + $0x3180] sm:$0xff] }
 0x18d   :  { %5942 = vmatprep.subr.bf16.mxu1 %v5941_v59  ;;  %v1645_v55 = vld [vmem:[%s12897_s1 + $0x31c0] sm:$0xff]  ;;  %v1654_v59 = vld [vmem:[%s12897_s1 + $0x3208] sm:$0xff] }
 0x18e   :  { %v5547_v63 = vpack.c.bf16 %v1645_v55, %v1637_v54  ;;  %v6397_v54 = vpack.c.bf16 %v68_v46, %v60_v45  ;;  %v67_v55 = vld [vmem:[%s12897_s1 + $0x70] sm:$0xff]  ;;  %v148_v45 = vld [vmem:[%s12897_s1 + $0x2f8] sm:$0xff] }
 0x18f   :  { %5528 = vmatpush1.bf16.msra.mxu0 %v5527_v1  ;;  %v5549_v1 = vpack.c.bf16 %v1662_v60, %v1654_v59  ;;  %v84_v59 = vld [vmem:[%s12897_s1 + $0xf8] sm:$0xff]  ;;  %v52_v60 = vld [vmem:[%s12896_s0 + $0x60] sm:$0xff] }
 0x190   :  { %5944 = vmatpush1.bf16.msra.mxu1 %v5943_v2  ;;  %5530 = vmatprep.subr.bf16.mxu0 %v5529_v3  ;;  %v1653_v2 = vld [vmem:[%s12897_s1 + $0x3200] sm:$0xff] }
 0x191   :  { %5946 = vmatprep.subr.bf16.mxu1 %v5945_v7  ;;  %v1661_v3 = vld [vmem:[%s12897_s1 + $0x3240] sm:$0xff]  ;;  %v1670_v7 = vld [vmem:[%s12897_s1 + $0x3288] sm:$0xff] }
 0x192   :  { %v5551_v11 = vpack.c.bf16 %v1661_v3, %v1653_v2  ;;  %v75_v2 = vld [vmem:[%s12897_s1 + $0xb0] sm:$0xff]  ;;  %v6401_v3 = vpack.c.bf16 %v84_v59, %v76_v58  ;;  %v164_v58 = vld [vmem:[%s12897_s1 + $0x378] sm:$0xff] }
 0x193   :  { %5532 = vmatpush1.bf16.msra.mxu0 %v5531_v13  ;;  %v5553_v13 = vpack.c.bf16 %v1678_v8, %v1670_v7  ;;  %v92_v7 = vld [vmem:[%s12897_s1 + $0x138] sm:$0xff]  ;;  %v6403_v10 = vpack.c.bf16 %v83_v4, %v75_v2  ;;  %v163_v2 = vld [vmem:[%s12897_s1 + $0x370] sm:$0xff]  ;;  %v178_v4 = vld [vmem:[%s12897_s1 + $0x3e8] sm:$0xff] }
 0x194   :  { %5948 = vmatpush1.bf16.msra.mxu1 %v5947_v14  ;;  %5534 = vmatprep.subr.bf16.mxu0 %v5533_v15  ;;  %v1669_v14 = vld [vmem:[%s12897_s1 + $0x3280] sm:$0xff]  ;;  %v100_v8 = vld [vmem:[%s12897_s1 + $0x178] sm:$0xff] }
 0x195   :  { %5950 = vmatprep.subr.bf16.mxu1 %v5949_v19  ;;  %v1677_v15 = vld [vmem:[%s12897_s1 + $0x32c0] sm:$0xff]  ;;  %v1686_v19 = vld [vmem:[%s12897_s1 + $0x3308] sm:$0xff] }
 0x196   :  { %2179 = vmatmul.mubr.f32.vlgmr.msra.gmra.mrb[0].mxu0 %v50_v25  ;;  %v5555_v23 = vpack.c.bf16 %v1677_v15, %v1669_v14  ;;  %v91_v14 = vld [vmem:[%s12897_s1 + $0x130] sm:$0xff]  ;;  %v6405_v15 = vpack.c.bf16 %v100_v8, %v92_v7 }
 0x197   :  { %5536 = vmatpush1.bf16.msra.mxu0 %v5535_v26  ;;  %2676 = vmatmul.mubr.f32.vlgmr.msra.gmra.mrb[0].mxu1 %v50_v25  ;;  %v5557_v25 = vpack.c.bf16 %v1694_v20, %v1686_v19  ;;  %v1685_v26 = vld [vmem:[%s12897_s1 + $0x3300] sm:$0xff]  ;;  %v7465_v19 = vld [vmem:[%s12896_s0 + $0x8] sm:$0xff]  ;;  %v108_v20 = vld [vmem:[%s12897_s1 + $0x1b8] sm:$0xff] }
 0x198   :  { %5952 = vmatpush1.bf16.msra.mxu1 %v5951_v27  ;;  %5538 = vmatprep.subr.bf16.mxu0 %v5537_v28  ;;  %v1693_v27 = vld [vmem:[%s12897_s1 + $0x3340] sm:$0xff]  ;;  %v1687_v28 = vld [vmem:[%s12897_s1 + $0x3310] sm:$0xff] }
 0x199   :  { %5954 = vmatprep.subr.bf16.mxu1 %v5953_v32  ;;  %2249 = vmatprep.mubr.f32.mxu0 %v7507_v48  ;;  %v1710_v32 = vld [vmem:[%s12897_s1 + $0x33c8] sm:$0xff]  ;;  %v5559_v35 = vpack.c.bf16 %v1693_v27, %v1685_v26  ;;  %v5975_v36 = vpack.c.bf16 %v1695_v30, %v1687_v28  ;;  %v113_v26 = vld [vmem:[%s12897_s1 + $0x1e0] sm:$0xff]  ;;  %v107_v27 = vld [vmem:[%s12897_s1 + $0x1b0] sm:$0xff]  ;;  %v6409_v28 = vpack.c.bf16 %v116_v21, %v108_v20 }
 0x19a   :  { %2746 = vmatprep.mubr.f32.mxu1 %v7507_v48  ;;  %v5561_v37 = vpack.c.bf16 %v1710_v32, %v1702_v31  ;;  %v122_v30 = vld [vmem:[%s12897_s1 + $0x228] sm:$0xff]  ;;  %v124_v32 = vld [vmem:[%s12897_s1 + $0x238] sm:$0xff] }
 0x19b   :  { %5540 = vmatpush1.bf16.msra.mxu0 %v5539_v38  ;;  %v1701_v38 = vld [vmem:[%s12897_s1 + $0x3380] sm:$0xff]  ;;  %v130_v31 = vld [vmem:[%s12897_s1 + $0x268] sm:$0xff] }
 0x19c   :  { %5956 = vmatpush1.bf16.msra.mxu1 %v5955_v39  ;;  %5542 = vmatprep.subr.bf16.mxu0 %v5541_v40  ;;  %v1709_v39 = vld [vmem:[%s12897_s1 + $0x33c0] sm:$0xff]  ;;  %v1703_v40 = vld [vmem:[%s12897_s1 + $0x3390] sm:$0xff] }
 0x19d   :  { %5958 = vmatprep.subr.bf16.mxu1 %v5957_v44  ;;  %v66_v44 = vld [vmem:[%s12897_s1 + $0x68] sm:$0xff]  ;;  %v5563_v47 = vpack.c.bf16 %v1709_v39, %v1701_v38  ;;  %v5979_v49 = vpack.c.bf16 %v1711_v42, %v1703_v40  ;;  %v129_v38 = vld [vmem:[%s12897_s1 + $0x260] sm:$0xff]  ;;  %v123_v39 = vld [vmem:[%s12897_s1 + $0x230] sm:$0xff]  ;;  %v6413_v40 = vpack.c.bf16 %v132_v33, %v124_v32 }
 0x19e   :  { %v5981_v50 = vpack.c.bf16 %v66_v44, %v58_v43  ;;  %v138_v42 = vld [vmem:[%s12897_s1 + $0x2a8] sm:$0xff]  ;;  %v140_v44 = vld [vmem:[%s12897_s1 + $0x2b8] sm:$0xff] }
 0x19f   :  { %5544 = vmatpush1.bf16.msra.mxu0 %v5543_v51  ;;  %v57_v51 = vld [vmem:[%s12897_s1 + $0x20] sm:$0xff]  ;;  %v146_v43 = vld [vmem:[%s12897_s1 + $0x2e8] sm:$0xff] }
 0x1a0   :  { %5960 = vmatpush1.bf16.msra.mxu1 %v5959_v52  ;;  %5546 = vmatprep.subr.bf16.mxu0 %v5545_v53  ;;  %v65_v52 = vld [vmem:[%s12897_s1 + $0x60] sm:$0xff]  ;;  %v59_v53 = vld [vmem:[%s12897_s1 + $0x30] sm:$0xff] }
 0x1a1   :  { %5962 = vmatprep.subr.bf16.mxu1 %v5961_v57  ;;  %v82_v57 = vld [vmem:[%s12897_s1 + $0xe8] sm:$0xff]  ;;  %v5983_v61 = vpack.c.bf16 %v65_v52, %v57_v51  ;;  %v6399_v62 = vpack.c.bf16 %v67_v55, %v59_v53  ;;  %v145_v51 = vld [vmem:[%s12897_s1 + $0x2e0] sm:$0xff]  ;;  %v139_v52 = vld [vmem:[%s12897_s1 + $0x2b0] sm:$0xff]  ;;  %v6417_v53 = vpack.c.bf16 %v148_v45, %v140_v44 }
 0x1a2   :  { %v154_v55 = vld [vmem:[%s12897_s1 + $0x328] sm:$0xff] }
 0x1a3   :  { %5548 = vmatpush1.bf16.msra.mxu0 %v5547_v63  ;;  %v5985_v63 = vpack.c.bf16 %v82_v57, %v74_v56  ;;  %v162_v56 = vld [vmem:[%s12897_s1 + $0x368] sm:$0xff]  ;;  %v156_v57 = vld [vmem:[%s12897_s1 + $0x338] sm:$0xff] }
 0x1a4   :  { %5964 = vmatpush1.bf16.msra.mxu1 %v5963_v0  ;;  %5550 = vmatprep.subr.bf16.mxu0 %v5549_v1  ;;  %v73_v0 = vld [vmem:[%s12897_s1 + $0xa0] sm:$0xff] }
 0x1a5   :  { %5966 = vmatprep.subr.bf16.mxu1 %v5965_v5  ;;  %v81_v1 = vld [vmem:[%s12897_s1 + $0xe0] sm:$0xff]  ;;  %v90_v5 = vld [vmem:[%s12897_s1 + $0x128] sm:$0xff] }
 0x1a6   :  { %v5987_v9 = vpack.c.bf16 %v81_v1, %v73_v0  ;;  %v155_v0 = vld [vmem:[%s12897_s1 + $0x330] sm:$0xff]  ;;  %v6421_v1 = vpack.c.bf16 %v164_v58, %v156_v57 }
 0x1a7   :  { %5552 = vmatpush1.bf16.msra.mxu0 %v5551_v11  ;;  %v5989_v11 = vpack.c.bf16 %v98_v6, %v90_v5  ;;  %v172_v5 = vld [vmem:[%s12897_s1 + $0x3b8] sm:$0xff]  ;;  %v6423_v8 = vpack.c.bf16 %v163_v2, %v155_v0  ;;  %v250_v0 = vld [vmem:[%s12897_s1 + $0x628] sm:$0xff] }
 0x1a8   :  { %5968 = vmatpush1.bf16.msra.mxu1 %v5967_v12  ;;  %5554 = vmatprep.subr.bf16.mxu0 %v5553_v13  ;;  %v89_v12 = vld [vmem:[%s12897_s1 + $0x120] sm:$0xff]  ;;  %v180_v6 = vld [vmem:[%s12897_s1 + $0x3f8] sm:$0xff] }
 0x1a9   :  { %5970 = vmatprep.subr.bf16.mxu1 %v5969_v17  ;;  %v97_v13 = vld [vmem:[%s12897_s1 + $0x160] sm:$0xff]  ;;  %v106_v17 = vld [vmem:[%s12897_s1 + $0x1a8] sm:$0xff]  ;;  %v252_v2 = vld [vmem:[%s12897_s1 + $0x638] sm:$0xff] }
 0x1aa   :  { %v5991_v22 = vpack.c.bf16 %v97_v13, %v89_v12  ;;  %v171_v12 = vld [vmem:[%s12897_s1 + $0x3b0] sm:$0xff]  ;;  %v6425_v13 = vpack.c.bf16 %v180_v6, %v172_v5 }
 0x1ab   :  { %5556 = vmatpush1.bf16.msra.mxu0 %v5555_v23  ;;  %v6407_v23 = vpack.c.bf16 %v99_v16, %v91_v14  ;;  %v179_v14 = vld [vmem:[%s12897_s1 + $0x3f0] sm:$0xff]  ;;  %v194_v16 = vld [vmem:[%s12897_s1 + $0x468] sm:$0xff] }
 0x1ac   :  { %5972 = vmatpush1.bf16.msra.mxu1 %v5971_v24  ;;  %5558 = vmatprep.subr.bf16.mxu0 %v5557_v25  ;;  %v5993_v24 = vpack.c.bf16 %v114_v18, %v106_v17  ;;  %v105_v25 = vld [vmem:[%s12897_s1 + $0x1a0] sm:$0xff]  ;;  %v188_v17 = vld [vmem:[%s12897_s1 + $0x438] sm:$0xff]  ;;  %v6427_v20 = vpack.c.bf16 %v179_v14, %v171_v12  ;;  %v266_v12 = vld [vmem:[%s12897_s1 + $0x6a8] sm:$0xff] }
 0x1ad   :  { %5974 = vmatprep.subr.bf16.mxu1 %v5973_v29  ;;  %v115_v29 = vld [vmem:[%s12897_s1 + $0x1f0] sm:$0xff]  ;;  %v5995_v34 = vpack.c.bf16 %v113_v26, %v105_v25  ;;  %v196_v18 = vld [vmem:[%s12897_s1 + $0x478] sm:$0xff] }
 0x1ae   :  { %v6429_v25 = vpack.c.bf16 %v196_v18, %v188_v17  ;;  %v195_v26 = vld [vmem:[%s12897_s1 + $0x470] sm:$0xff]  ;;  %v268_v14 = vld [vmem:[%s12897_s1 + $0x6b8] sm:$0xff] }
 0x1af   :  { %5560 = vmatpush1.bf16.msra.mxu0 %v5559_v35  ;;  %v6411_v35 = vpack.c.bf16 %v115_v29, %v107_v27  ;;  %v202_v27 = vld [vmem:[%s12897_s1 + $0x4a8] sm:$0xff]  ;;  %v204_v29 = vld [vmem:[%s12897_s1 + $0x4b8] sm:$0xff] }
 0x1b0   :  { %5976 = vmatpush1.bf16.msra.mxu1 %v5975_v36  ;;  %5562 = vmatprep.subr.bf16.mxu0 %v5561_v37  ;;  %v5997_v36 = vpack.c.bf16 %v130_v31, %v122_v30  ;;  %v121_v37 = vld [vmem:[%s12897_s1 + $0x220] sm:$0xff]  ;;  %v212_v30 = vld [vmem:[%s12897_s1 + $0x4f8] sm:$0xff] }
 0x1b1   :  { %5978 = vmatprep.subr.bf16.mxu1 %v5977_v41  ;;  %v131_v41 = vld [vmem:[%s12897_s1 + $0x270] sm:$0xff]  ;;  %v5999_v46 = vpack.c.bf16 %v129_v38, %v121_v37  ;;  %v6433_v37 = vpack.c.bf16 %v212_v30, %v204_v29 }
 0x1b2   :  { %v211_v38 = vld [vmem:[%s12897_s1 + $0x4f0] sm:$0xff] }
 0x1b3   :  { %5564 = vmatpush1.bf16.msra.mxu0 %v5563_v47  ;;  %v6415_v47 = vpack.c.bf16 %v131_v41, %v123_v39  ;;  %v218_v39 = vld [vmem:[%s12897_s1 + $0x528] sm:$0xff]  ;;  %v220_v41 = vld [vmem:[%s12897_s1 + $0x538] sm:$0xff] }
 0x1b4   :  { %5980 = vmatpush1.bf16.msra.mxu1 %v5979_v49  ;;  %5982 = vmatprep.subr.bf16.mxu0 %v5981_v50  ;;  %v6001_v49 = vpack.c.bf16 %v146_v43, %v138_v42  ;;  %v137_v50 = vld [vmem:[%s12897_s1 + $0x2a0] sm:$0xff]  ;;  %v228_v42 = vld [vmem:[%s12897_s1 + $0x578] sm:$0xff] }
 0x1b5   :  { %6398 = vmatprep.subr.bf16.mxu1 %v6397_v54  ;;  %v147_v54 = vld [vmem:[%s12897_s1 + $0x2f0] sm:$0xff]  ;;  %v6003_v59 = vpack.c.bf16 %v145_v51, %v137_v50  ;;  %v6437_v50 = vpack.c.bf16 %v228_v42, %v220_v41 }
 0x1b6   :  { %2250 = vmatmul.mubr.f32.vlgmr.msra.gmra.mrb[0].mxu0 %v52_v60  ;;  %v227_v51 = vld [vmem:[%s12897_s1 + $0x570] sm:$0xff] }
 0x1b7   :  { %2747 = vmatmul.mubr.f32.vlgmr.msra.gmra.mrb[0].mxu1 %v52_v60  ;;  %5984 = vmatpush1.bf16.msra.mxu0 %v5983_v61  ;;  %v6419_v60 = vpack.c.bf16 %v147_v54, %v139_v52  ;;  %v6005_v61 = vpack.c.bf16 %v162_v56, %v154_v55  ;;  %v234_v52 = vld [vmem:[%s12897_s1 + $0x5a8] sm:$0xff]  ;;  %v236_v54 = vld [vmem:[%s12897_s1 + $0x5b8] sm:$0xff] }
 0x1b8   :  { %6400 = vmatpush1.bf16.msra.mxu1 %v6399_v62  ;;  %5986 = vmatprep.subr.bf16.mxu0 %v5985_v63  ;;  %v153_v62 = vld [vmem:[%s12897_s1 + $0x320] sm:$0xff]  ;;  %v244_v55 = vld [vmem:[%s12897_s1 + $0x5f8] sm:$0xff] }
 0x1b9   :  { %6402 = vmatprep.subr.bf16.mxu1 %v6401_v3  ;;  %2817 = vmatprep.mubr.f32.mxu0 %v7465_v19  ;;  %v161_v63 = vld [vmem:[%s12897_s1 + $0x360] sm:$0xff]  ;;  %v170_v3 = vld [vmem:[%s12897_s1 + $0x3a8] sm:$0xff] }
 0x1ba   :  { %3314 = vmatprep.mubr.f32.mxu1 %v7465_v19  ;;  %v6007_v7 = vpack.c.bf16 %v161_v63, %v153_v62  ;;  %v6441_v62 = vpack.c.bf16 %v244_v55, %v236_v54  ;;  %v243_v63 = vld [vmem:[%s12897_s1 + $0x5f0] sm:$0xff] }
 0x1bb   :  { %5988 = vmatpush1.bf16.msra.mxu0 %v5987_v9  ;;  %v6009_v9 = vpack.c.bf16 %v178_v4, %v170_v3  ;;  %v260_v3 = vld [vmem:[%s12897_s1 + $0x678] sm:$0xff] }
 0x1bc   :  { %6404 = vmatpush1.bf16.msra.mxu1 %v6403_v10  ;;  %5990 = vmatprep.subr.bf16.mxu0 %v5989_v11  ;;  %v169_v10 = vld [vmem:[%s12897_s1 + $0x3a0] sm:$0xff] }
 0x1bd   :  { %6406 = vmatprep.subr.bf16.mxu1 %v6405_v15  ;;  %v177_v11 = vld [vmem:[%s12897_s1 + $0x3e0] sm:$0xff]  ;;  %v186_v15 = vld [vmem:[%s12897_s1 + $0x428] sm:$0xff] }
 0x1be   :  { %v6011_v19 = vpack.c.bf16 %v177_v11, %v169_v10  ;;  %v6013_v21 = vpack.c.bf16 %v194_v16, %v186_v15  ;;  %v6445_v10 = vpack.c.bf16 %v260_v3, %v252_v2  ;;  %v259_v11 = vld [vmem:[%s12897_s1 + $0x670] sm:$0xff]  ;;  %v276_v15 = vld [vmem:[%s12897_s1 + $0x6f8] sm:$0xff] }
 0x1bf   :  { %5992 = vmatpush1.bf16.msra.mxu0 %v5991_v22  ;;  %v185_v22 = vld [vmem:[%s12897_s1 + $0x420] sm:$0xff] }
 0x1c0   :  { %6408 = vmatpush1.bf16.msra.mxu1 %v6407_v23  ;;  %5994 = vmatprep.subr.bf16.mxu0 %v5993_v24  ;;  %v193_v23 = vld [vmem:[%s12897_s1 + $0x460] sm:$0xff]  ;;  %v187_v24 = vld [vmem:[%s12897_s1 + $0x430] sm:$0xff] }
 0x1c1   :  { %6410 = vmatprep.subr.bf16.mxu1 %v6409_v28  ;;  %v210_v28 = vld [vmem:[%s12897_s1 + $0x4e8] sm:$0xff]  ;;  %v6015_v31 = vpack.c.bf16 %v193_v23, %v185_v22  ;;  %v6431_v32 = vpack.c.bf16 %v195_v26, %v187_v24  ;;  %v6449_v22 = vpack.c.bf16 %v276_v15, %v268_v14  ;;  %v275_v23 = vld [vmem:[%s12897_s1 + $0x6f0] sm:$0xff]  ;;  %v284_v26 = vld [vmem:[%s12897_s1 + $0x738] sm:$0xff] }
 0x1c2   :  { %v6017_v33 = vpack.c.bf16 %v210_v28, %v202_v27  ;;  %v282_v24 = vld [vmem:[%s12897_s1 + $0x728] sm:$0xff]  ;;  %v292_v27 = vld [vmem:[%s12897_s1 + $0x778] sm:$0xff] }
 0x1c3   :  { %5996 = vmatpush1.bf16.msra.mxu0 %v5995_v34  ;;  %v201_v34 = vld [vmem:[%s12897_s1 + $0x4a0] sm:$0xff] }
 0x1c4   :  { %6412 = vmatpush1.bf16.msra.mxu1 %v6411_v35  ;;  %5998 = vmatprep.subr.bf16.mxu0 %v5997_v36  ;;  %v209_v35 = vld [vmem:[%s12897_s1 + $0x4e0] sm:$0xff]  ;;  %v203_v36 = vld [vmem:[%s12897_s1 + $0x4b0] sm:$0xff] }
 0x1c5   :  { %6414 = vmatprep.subr.bf16.mxu1 %v6413_v40  ;;  %v226_v40 = vld [vmem:[%s12897_s1 + $0x568] sm:$0xff]  ;;  %v6019_v43 = vpack.c.bf16 %v209_v35, %v201_v34  ;;  %v6435_v44 = vpack.c.bf16 %v211_v38, %v203_v36  ;;  %v6453_v34 = vpack.c.bf16 %v292_v27, %v284_v26  ;;  %v291_v35 = vld [vmem:[%s12897_s1 + $0x770] sm:$0xff]  ;;  %v300_v38 = vld [vmem:[%s12897_s1 + $0x7b8] sm:$0xff] }
 0x1c6   :  { %v6021_v45 = vpack.c.bf16 %v226_v40, %v218_v39  ;;  %v298_v36 = vld [vmem:[%s12897_s1 + $0x7a8] sm:$0xff]  ;;  %v308_v39 = vld [vmem:[%s12897_s1 + $0x7f8] sm:$0xff] }
 0x1c7   :  { %6000 = vmatpush1.bf16.msra.mxu0 %v5999_v46  ;;  %v217_v46 = vld [vmem:[%s12897_s1 + $0x520] sm:$0xff]  ;;  %v372_v26 = vld [vmem:[%s12897_s1 + $0x9f8] sm:$0xff] }
 0x1c8   :  { %6416 = vmatpush1.bf16.msra.mxu1 %v6415_v47  ;;  %6002 = vmatprep.subr.bf16.mxu0 %v6001_v49  ;;  %v225_v47 = vld [vmem:[%s12897_s1 + $0x560] sm:$0xff]  ;;  %v219_v49 = vld [vmem:[%s12897_s1 + $0x530] sm:$0xff] }
 0x1c9   :  { %6418 = vmatprep.subr.bf16.mxu1 %v6417_v53  ;;  %v242_v53 = vld [vmem:[%s12897_s1 + $0x5e8] sm:$0xff]  ;;  %v6023_v56 = vpack.c.bf16 %v225_v47, %v217_v46  ;;  %v6439_v57 = vpack.c.bf16 %v227_v51, %v219_v49  ;;  %v6457_v46 = vpack.c.bf16 %v308_v39, %v300_v38  ;;  %v307_v47 = vld [vmem:[%s12897_s1 + $0x7f0] sm:$0xff]  ;;  %v316_v51 = vld [vmem:[%s12897_s1 + $0x838] sm:$0xff] }
 0x1ca   :  { %v6025_v58 = vpack.c.bf16 %v242_v53, %v234_v52  ;;  %v314_v49 = vld [vmem:[%s12897_s1 + $0x828] sm:$0xff]  ;;  %v324_v52 = vld [vmem:[%s12897_s1 + $0x878] sm:$0xff] }
 0x1cb   :  { %6004 = vmatpush1.bf16.msra.mxu0 %v6003_v59  ;;  %v233_v59 = vld [vmem:[%s12897_s1 + $0x5a0] sm:$0xff]  ;;  %v388_v38 = vld [vmem:[%s12897_s1 + $0xa78] sm:$0xff] }
 0x1cc   :  { %6420 = vmatpush1.bf16.msra.mxu1 %v6419_v60  ;;  %6006 = vmatprep.subr.bf16.mxu0 %v6005_v61  ;;  %v241_v60 = vld [vmem:[%s12897_s1 + $0x5e0] sm:$0xff]  ;;  %v235_v61 = vld [vmem:[%s12897_s1 + $0x5b0] sm:$0xff] }
 0x1cd   :  { %6422 = vmatprep.subr.bf16.mxu1 %v6421_v1  ;;  %v258_v1 = vld [vmem:[%s12897_s1 + $0x668] sm:$0xff]  ;;  %v6027_v4 = vpack.c.bf16 %v241_v60, %v233_v59  ;;  %v6443_v5 = vpack.c.bf16 %v243_v63, %v235_v61  ;;  %v6461_v59 = vpack.c.bf16 %v324_v52, %v316_v51  ;;  %v323_v60 = vld [vmem:[%s12897_s1 + $0x870] sm:$0xff]  ;;  %v332_v63 = vld [vmem:[%s12897_s1 + $0x8b8] sm:$0xff] }
 0x1ce   :  { %v6029_v6 = vpack.c.bf16 %v258_v1, %v250_v0  ;;  %v330_v61 = vld [vmem:[%s12897_s1 + $0x8a8] sm:$0xff]  ;;  %v340_v0 = vld [vmem:[%s12897_s1 + $0x8f8] sm:$0xff] }
 0x1cf   :  { %6008 = vmatpush1.bf16.msra.mxu0 %v6007_v7  ;;  %v249_v7 = vld [vmem:[%s12897_s1 + $0x620] sm:$0xff]  ;;  %v404_v51 = vld [vmem:[%s12897_s1 + $0xaf8] sm:$0xff] }
 0x1d0   :  { %6424 = vmatpush1.bf16.msra.mxu1 %v6423_v8  ;;  %6010 = vmatprep.subr.bf16.mxu0 %v6009_v9  ;;  %v257_v8 = vld [vmem:[%s12897_s1 + $0x660] sm:$0xff]  ;;  %v251_v9 = vld [vmem:[%s12897_s1 + $0x630] sm:$0xff] }
 0x1d1   :  { %6426 = vmatprep.subr.bf16.mxu1 %v6425_v13  ;;  %v274_v13 = vld [vmem:[%s12897_s1 + $0x6e8] sm:$0xff]  ;;  %v6031_v16 = vpack.c.bf16 %v257_v8, %v249_v7  ;;  %v6447_v17 = vpack.c.bf16 %v259_v11, %v251_v9  ;;  %v6465_v7 = vpack.c.bf16 %v340_v0, %v332_v63  ;;  %v339_v8 = vld [vmem:[%s12897_s1 + $0x8f0] sm:$0xff]  ;;  %v7466_v11 = vld [vmem:[%s12896_s0] sm:$0xff] }
 0x1d2   :  { %v6033_v18 = vpack.c.bf16 %v274_v13, %v266_v12  ;;  %v346_v9 = vld [vmem:[%s12897_s1 + $0x928] sm:$0xff]  ;;  %v348_v12 = vld [vmem:[%s12897_s1 + $0x938] sm:$0xff] }
 0x1d3   :  { %6012 = vmatpush1.bf16.msra.mxu0 %v6011_v19  ;;  %v265_v19 = vld [vmem:[%s12897_s1 + $0x6a0] sm:$0xff]  ;;  %v356_v13 = vld [vmem:[%s12897_s1 + $0x978] sm:$0xff] }
 0x1d4   :  { %6428 = vmatpush1.bf16.msra.mxu1 %v6427_v20  ;;  %6014 = vmatprep.subr.bf16.mxu0 %v6013_v21  ;;  %v273_v20 = vld [vmem:[%s12897_s1 + $0x6e0] sm:$0xff]  ;;  %v267_v21 = vld [vmem:[%s12897_s1 + $0x6b0] sm:$0xff]  ;;  %v420_v63 = vld [vmem:[%s12897_s1 + $0xb78] sm:$0xff] }
 0x1d5   :  { %6430 = vmatprep.subr.bf16.mxu1 %v6429_v25  ;;  %v290_v25 = vld [vmem:[%s12897_s1 + $0x768] sm:$0xff]  ;;  %v6035_v28 = vpack.c.bf16 %v273_v20, %v265_v19  ;;  %v6451_v29 = vpack.c.bf16 %v275_v23, %v267_v21  ;;  %v347_v19 = vld [vmem:[%s12897_s1 + $0x930] sm:$0xff]  ;;  %v6469_v20 = vpack.c.bf16 %v356_v13, %v348_v12 }
 0x1d6   :  { %v6037_v30 = vpack.c.bf16 %v290_v25, %v282_v24  ;;  %v355_v21 = vld [vmem:[%s12897_s1 + $0x970] sm:$0xff]  ;;  %v370_v23 = vld [vmem:[%s12897_s1 + $0x9e8] sm:$0xff]  ;;  %v7467_v24 = vld [vmem:[%s12896_s0 + $0x18] sm:$0xff] }
 0x1d7   :  { %6016 = vmatpush1.bf16.msra.mxu0 %v6015_v31  ;;  %v281_v31 = vld [vmem:[%s12897_s1 + $0x720] sm:$0xff]  ;;  %v364_v25 = vld [vmem:[%s12897_s1 + $0x9b8] sm:$0xff] }
 0x1d8   :  { %6432 = vmatpush1.bf16.msra.mxu1 %v6431_v32  ;;  %6018 = vmatprep.subr.bf16.mxu0 %v6017_v33  ;;  %v289_v32 = vld [vmem:[%s12897_s1 + $0x760] sm:$0xff]  ;;  %v283_v33 = vld [vmem:[%s12897_s1 + $0x730] sm:$0xff] }
 0x1d9   :  { %6434 = vmatprep.subr.bf16.mxu1 %v6433_v37  ;;  %v306_v37 = vld [vmem:[%s12897_s1 + $0x7e8] sm:$0xff]  ;;  %v6039_v40 = vpack.c.bf16 %v289_v32, %v281_v31  ;;  %v6455_v41 = vpack.c.bf16 %v291_v35, %v283_v33  ;;  %v369_v31 = vld [vmem:[%s12897_s1 + $0x9e0] sm:$0xff]  ;;  %v363_v32 = vld [vmem:[%s12897_s1 + $0x9b0] sm:$0xff]  ;;  %v6473_v33 = vpack.c.bf16 %v372_v26, %v364_v25 }
 0x1da   :  { %v6041_v42 = vpack.c.bf16 %v306_v37, %v298_v36  ;;  %v378_v35 = vld [vmem:[%s12897_s1 + $0xa28] sm:$0xff]  ;;  %v380_v37 = vld [vmem:[%s12897_s1 + $0xa38] sm:$0xff] }
 0x1db   :  { %6020 = vmatpush1.bf16.msra.mxu0 %v6019_v43  ;;  %v297_v43 = vld [vmem:[%s12897_s1 + $0x7a0] sm:$0xff]  ;;  %v386_v36 = vld [vmem:[%s12897_s1 + $0xa68] sm:$0xff] }
 0x1dc   :  { %6436 = vmatpush1.bf16.msra.mxu1 %v6435_v44  ;;  %6022 = vmatprep.subr.bf16.mxu0 %v6021_v45  ;;  %v305_v44 = vld [vmem:[%s12897_s1 + $0x7e0] sm:$0xff]  ;;  %v299_v45 = vld [vmem:[%s12897_s1 + $0x7b0] sm:$0xff] }
 0x1dd   :  { %6438 = vmatprep.subr.bf16.mxu1 %v6437_v50  ;;  %v322_v50 = vld [vmem:[%s12897_s1 + $0x868] sm:$0xff]  ;;  %v6043_v53 = vpack.c.bf16 %v305_v44, %v297_v43  ;;  %v6459_v54 = vpack.c.bf16 %v307_v47, %v299_v45  ;;  %v385_v43 = vld [vmem:[%s12897_s1 + $0xa60] sm:$0xff]  ;;  %v379_v44 = vld [vmem:[%s12897_s1 + $0xa30] sm:$0xff]  ;;  %v6477_v45 = vpack.c.bf16 %v388_v38, %v380_v37 }
 0x1de   :  { %v6045_v55 = vpack.c.bf16 %v322_v50, %v314_v49  ;;  %v394_v47 = vld [vmem:[%s12897_s1 + $0xaa8] sm:$0xff]  ;;  %v396_v50 = vld [vmem:[%s12897_s1 + $0xab8] sm:$0xff] }
 0x1df   :  { %6024 = vmatpush1.bf16.msra.mxu0 %v6023_v56  ;;  %v313_v56 = vld [vmem:[%s12897_s1 + $0x820] sm:$0xff]  ;;  %v402_v49 = vld [vmem:[%s12897_s1 + $0xae8] sm:$0xff] }
 0x1e0   :  { %6440 = vmatpush1.bf16.msra.mxu1 %v6439_v57  ;;  %6026 = vmatprep.subr.bf16.mxu0 %v6025_v58  ;;  %v321_v57 = vld [vmem:[%s12897_s1 + $0x860] sm:$0xff]  ;;  %v315_v58 = vld [vmem:[%s12897_s1 + $0x830] sm:$0xff] }
 0x1e1   :  { %6442 = vmatprep.subr.bf16.mxu1 %v6441_v62  ;;  %v338_v62 = vld [vmem:[%s12897_s1 + $0x8e8] sm:$0xff]  ;;  %v6047_v1 = vpack.c.bf16 %v321_v57, %v313_v56  ;;  %v6463_v2 = vpack.c.bf16 %v323_v60, %v315_v58  ;;  %v401_v56 = vld [vmem:[%s12897_s1 + $0xae0] sm:$0xff]  ;;  %v395_v57 = vld [vmem:[%s12897_s1 + $0xab0] sm:$0xff]  ;;  %v6481_v58 = vpack.c.bf16 %v404_v51, %v396_v50 }
 0x1e2   :  { %v6049_v3 = vpack.c.bf16 %v338_v62, %v330_v61  ;;  %v410_v60 = vld [vmem:[%s12897_s1 + $0xb28] sm:$0xff]  ;;  %v412_v62 = vld [vmem:[%s12897_s1 + $0xb38] sm:$0xff] }
 0x1e3   :  { %6028 = vmatpush1.bf16.msra.mxu0 %v6027_v4  ;;  %v329_v4 = vld [vmem:[%s12897_s1 + $0x8a0] sm:$0xff]  ;;  %v418_v61 = vld [vmem:[%s12897_s1 + $0xb68] sm:$0xff] }
 0x1e4   :  { %6444 = vmatpush1.bf16.msra.mxu1 %v6443_v5  ;;  %6030 = vmatprep.subr.bf16.mxu0 %v6029_v6  ;;  %v337_v5 = vld [vmem:[%s12897_s1 + $0x8e0] sm:$0xff]  ;;  %v331_v6 = vld [vmem:[%s12897_s1 + $0x8b0] sm:$0xff] }
 0x1e5   :  { %6446 = vmatprep.subr.bf16.mxu1 %v6445_v10  ;;  %v354_v10 = vld [vmem:[%s12897_s1 + $0x968] sm:$0xff]  ;;  %v6051_v14 = vpack.c.bf16 %v337_v5, %v329_v4  ;;  %v6467_v15 = vpack.c.bf16 %v339_v8, %v331_v6  ;;  %v417_v4 = vld [vmem:[%s12897_s1 + $0xb60] sm:$0xff]  ;;  %v411_v5 = vld [vmem:[%s12897_s1 + $0xb30] sm:$0xff]  ;;  %v6485_v6 = vpack.c.bf16 %v420_v63, %v412_v62 }
 0x1e6   :  { %v426_v8 = vld [vmem:[%s12897_s1 + $0xba8] sm:$0xff] }
 0x1e7   :  { %6032 = vmatpush1.bf16.msra.mxu0 %v6031_v16  ;;  %v6053_v16 = vpack.c.bf16 %v354_v10, %v346_v9  ;;  %v434_v9 = vld [vmem:[%s12897_s1 + $0xbe8] sm:$0xff]  ;;  %v428_v10 = vld [vmem:[%s12897_s1 + $0xbb8] sm:$0xff] }
 0x1e8   :  { %6448 = vmatpush1.bf16.msra.mxu1 %v6447_v17  ;;  %6034 = vmatprep.subr.bf16.mxu0 %v6033_v18  ;;  %v345_v17 = vld [vmem:[%s12897_s1 + $0x920] sm:$0xff] }
 0x1e9   :  { %6450 = vmatprep.subr.bf16.mxu1 %v6449_v22  ;;  %v353_v18 = vld [vmem:[%s12897_s1 + $0x960] sm:$0xff]  ;;  %v362_v22 = vld [vmem:[%s12897_s1 + $0x9a8] sm:$0xff] }
 0x1ea   :  { %v6055_v27 = vpack.c.bf16 %v353_v18, %v345_v17  ;;  %v427_v17 = vld [vmem:[%s12897_s1 + $0xbb0] sm:$0xff] }
 0x1eb   :  { %6036 = vmatpush1.bf16.msra.mxu0 %v6035_v28  ;;  %v6471_v28 = vpack.c.bf16 %v355_v21, %v347_v19  ;;  %v435_v19 = vld [vmem:[%s12897_s1 + $0xbf0] sm:$0xff]  ;;  %v450_v21 = vld [vmem:[%s12897_s1 + $0xc68] sm:$0xff] }
 0x1ec   :  { %6452 = vmatpush1.bf16.msra.mxu1 %v6451_v29  ;;  %6038 = vmatprep.subr.bf16.mxu0 %v6037_v30  ;;  %v6057_v29 = vpack.c.bf16 %v370_v23, %v362_v22  ;;  %v361_v30 = vld [vmem:[%s12897_s1 + $0x9a0] sm:$0xff]  ;;  %v444_v22 = vld [vmem:[%s12897_s1 + $0xc38] sm:$0xff]  ;;  %v6491_v25 = vpack.c.bf16 %v435_v19, %v427_v17  ;;  %v522_v17 = vld [vmem:[%s12897_s1 + $0xea8] sm:$0xff] }
 0x1ed   :  { %6454 = vmatprep.subr.bf16.mxu1 %v6453_v34  ;;  %v371_v34 = vld [vmem:[%s12897_s1 + $0x9f0] sm:$0xff]  ;;  %v6059_v39 = vpack.c.bf16 %v369_v31, %v361_v30  ;;  %v452_v23 = vld [vmem:[%s12897_s1 + $0xc78] sm:$0xff] }
 0x1ee   :  { %v6493_v30 = vpack.c.bf16 %v452_v23, %v444_v22  ;;  %v451_v31 = vld [vmem:[%s12897_s1 + $0xc70] sm:$0xff]  ;;  %v524_v19 = vld [vmem:[%s12897_s1 + $0xeb8] sm:$0xff] }
 0x1ef   :  { %6040 = vmatpush1.bf16.msra.mxu0 %v6039_v40  ;;  %v6475_v40 = vpack.c.bf16 %v371_v34, %v363_v32  ;;  %v458_v32 = vld [vmem:[%s12897_s1 + $0xca8] sm:$0xff]  ;;  %v460_v34 = vld [vmem:[%s12897_s1 + $0xcb8] sm:$0xff] }
 0x1f0   :  { %6456 = vmatpush1.bf16.msra.mxu1 %v6455_v41  ;;  %6042 = vmatprep.subr.bf16.mxu0 %v6041_v42  ;;  %v6061_v41 = vpack.c.bf16 %v386_v36, %v378_v35  ;;  %v377_v42 = vld [vmem:[%s12897_s1 + $0xa20] sm:$0xff]  ;;  %v468_v35 = vld [vmem:[%s12897_s1 + $0xcf8] sm:$0xff] }
 0x1f1   :  { %6458 = vmatprep.subr.bf16.mxu1 %v6457_v46  ;;  %v387_v46 = vld [vmem:[%s12897_s1 + $0xa70] sm:$0xff]  ;;  %v6063_v52 = vpack.c.bf16 %v385_v43, %v377_v42  ;;  %v6497_v42 = vpack.c.bf16 %v468_v35, %v460_v34 }
 0x1f2   :  { %v467_v43 = vld [vmem:[%s12897_s1 + $0xcf0] sm:$0xff] }
 0x1f3   :  { %6044 = vmatpush1.bf16.msra.mxu0 %v6043_v53  ;;  %v6479_v53 = vpack.c.bf16 %v387_v46, %v379_v44  ;;  %v474_v44 = vld [vmem:[%s12897_s1 + $0xd28] sm:$0xff]  ;;  %v476_v46 = vld [vmem:[%s12897_s1 + $0xd38] sm:$0xff] }
 0x1f4   :  { %6460 = vmatpush1.bf16.msra.mxu1 %v6459_v54  ;;  %6046 = vmatprep.subr.bf16.mxu0 %v6045_v55  ;;  %v6065_v54 = vpack.c.bf16 %v402_v49, %v394_v47  ;;  %v393_v55 = vld [vmem:[%s12897_s1 + $0xaa0] sm:$0xff]  ;;  %v484_v47 = vld [vmem:[%s12897_s1 + $0xd78] sm:$0xff] }
 0x1f5   :  { %6462 = vmatprep.subr.bf16.mxu1 %v6461_v59  ;;  %v403_v59 = vld [vmem:[%s12897_s1 + $0xaf0] sm:$0xff]  ;;  %v6067_v0 = vpack.c.bf16 %v401_v56, %v393_v55  ;;  %v6501_v55 = vpack.c.bf16 %v484_v47, %v476_v46 }
 0x1f6   :  { %2818 = vmatmul.mubr.f32.vlgmr.msra.gmra.mrb[2].mxu0 %v7466_v11  ;;  %v483_v56 = vld [vmem:[%s12897_s1 + $0xd70] sm:$0xff] }
 0x1f7   :  { %6048 = vmatpush1.bf16.msra.mxu0 %v6047_v1  ;;  %3315 = vmatmul.mubr.f32.vlgmr.msra.gmra.mrb[2].mxu1 %v7466_v11  ;;  %v6483_v1 = vpack.c.bf16 %v403_v59, %v395_v57  ;;  %v436_v11 = vld [vmem:[%s12897_s1 + $0xbf8] sm:$0xff]  ;;  %v490_v57 = vld [vmem:[%s12897_s1 + $0xda8] sm:$0xff] }
 0x1f8   :  { %6464 = vmatpush1.bf16.msra.mxu1 %v6463_v2  ;;  %6050 = vmatprep.subr.bf16.mxu0 %v6049_v3  ;;  %v6069_v2 = vpack.c.bf16 %v418_v61, %v410_v60  ;;  %v409_v3 = vld [vmem:[%s12897_s1 + $0xb20] sm:$0xff]  ;;  %v6489_v18 = vpack.c.bf16 %v436_v11, %v428_v10  ;;  %v492_v59 = vld [vmem:[%s12897_s1 + $0xdb8] sm:$0xff] }
 0x1f9   :  { %6466 = vmatprep.subr.bf16.mxu1 %v6465_v7  ;;  %2888 = vmatprep.mubr.f32.mxu0 %v7467_v24  ;;  %v419_v7 = vld [vmem:[%s12897_s1 + $0xb70] sm:$0xff]  ;;  %v6071_v12 = vpack.c.bf16 %v417_v4, %v409_v3  ;;  %v500_v60 = vld [vmem:[%s12897_s1 + $0xdf8] sm:$0xff] }
 0x1fa   :  { %3385 = vmatprep.mubr.f32.mxu1 %v7467_v24  ;;  %v6487_v13 = vpack.c.bf16 %v419_v7, %v411_v5  ;;  %v6505_v3 = vpack.c.bf16 %v500_v60, %v492_v59  ;;  %v499_v4 = vld [vmem:[%s12897_s1 + $0xdf0] sm:$0xff]  ;;  %v506_v5 = vld [vmem:[%s12897_s1 + $0xe28] sm:$0xff]  ;;  %v508_v7 = vld [vmem:[%s12897_s1 + $0xe38] sm:$0xff] }
 0x1fb   :  { %6052 = vmatpush1.bf16.msra.mxu0 %v6051_v14  ;;  %v6073_v14 = vpack.c.bf16 %v434_v9, %v426_v8  ;;  %v516_v8 = vld [vmem:[%s12897_s1 + $0xe78] sm:$0xff] }
 0x1fc   :  { %6468 = vmatpush1.bf16.msra.mxu1 %v6467_v15  ;;  %6054 = vmatprep.subr.bf16.mxu0 %v6053_v16  ;;  %v425_v15 = vld [vmem:[%s12897_s1 + $0xba0] sm:$0xff] }
 0x1fd   :  { %6470 = vmatprep.subr.bf16.mxu1 %v6469_v20  ;;  %v433_v16 = vld [vmem:[%s12897_s1 + $0xbe0] sm:$0xff]  ;;  %v442_v20 = vld [vmem:[%s12897_s1 + $0xc28] sm:$0xff] }
 0x1fe   :  { %v6075_v24 = vpack.c.bf16 %v433_v16, %v425_v15  ;;  %v6077_v26 = vpack.c.bf16 %v450_v21, %v442_v20  ;;  %v6509_v15 = vpack.c.bf16 %v516_v8, %v508_v7  ;;  %v515_v16 = vld [vmem:[%s12897_s1 + $0xe70] sm:$0xff]  ;;  %v532_v20 = vld [vmem:[%s12897_s1 + $0xef8] sm:$0xff] }
 0x1ff   :  { %6056 = vmatpush1.bf16.msra.mxu0 %v6055_v27  ;;  %v441_v27 = vld [vmem:[%s12897_s1 + $0xc20] sm:$0xff] }
 0x200   :  { %6472 = vmatpush1.bf16.msra.mxu1 %v6471_v28  ;;  %6058 = vmatprep.subr.bf16.mxu0 %v6057_v29  ;;  %v449_v28 = vld [vmem:[%s12897_s1 + $0xc60] sm:$0xff]  ;;  %v443_v29 = vld [vmem:[%s12897_s1 + $0xc30] sm:$0xff] }
 0x201   :  { %6474 = vmatprep.subr.bf16.mxu1 %v6473_v33  ;;  %v466_v33 = vld [vmem:[%s12897_s1 + $0xce8] sm:$0xff]  ;;  %v6079_v36 = vpack.c.bf16 %v449_v28, %v441_v27  ;;  %v6495_v37 = vpack.c.bf16 %v451_v31, %v443_v29  ;;  %v6513_v27 = vpack.c.bf16 %v532_v20, %v524_v19  ;;  %v531_v28 = vld [vmem:[%s12897_s1 + $0xef0] sm:$0xff]  ;;  %v540_v31 = vld [vmem:[%s12897_s1 + $0xf38] sm:$0xff] }
 0x202   :  { %v6081_v38 = vpack.c.bf16 %v466_v33, %v458_v32  ;;  %v538_v29 = vld [vmem:[%s12897_s1 + $0xf28] sm:$0xff]  ;;  %v548_v32 = vld [vmem:[%s12897_s1 + $0xf78] sm:$0xff] }
 0x203   :  { %6060 = vmatpush1.bf16.msra.mxu0 %v6059_v39  ;;  %v457_v39 = vld [vmem:[%s12897_s1 + $0xca0] sm:$0xff] }
 0x204   :  { %6476 = vmatpush1.bf16.msra.mxu1 %v6475_v40  ;;  %6062 = vmatprep.subr.bf16.mxu0 %v6061_v41  ;;  %v465_v40 = vld [vmem:[%s12897_s1 + $0xce0] sm:$0xff]  ;;  %v459_v41 = vld [vmem:[%s12897_s1 + $0xcb0] sm:$0xff] }
 0x205   :  { %6478 = vmatprep.subr.bf16.mxu1 %v6477_v45  ;;  %v482_v45 = vld [vmem:[%s12897_s1 + $0xd68] sm:$0xff]  ;;  %v6083_v49 = vpack.c.bf16 %v465_v40, %v457_v39  ;;  %v6499_v50 = vpack.c.bf16 %v467_v43, %v459_v41  ;;  %v6517_v39 = vpack.c.bf16 %v548_v32, %v540_v31  ;;  %v547_v40 = vld [vmem:[%s12897_s1 + $0xf70] sm:$0xff]  ;;  %v556_v43 = vld [vmem:[%s12897_s1 + $0xfb8] sm:$0xff] }
 0x206   :  { %v6085_v51 = vpack.c.bf16 %v482_v45, %v474_v44  ;;  %v554_v41 = vld [vmem:[%s12897_s1 + $0xfa8] sm:$0xff]  ;;  %v564_v44 = vld [vmem:[%s12897_s1 + $0xff8] sm:$0xff] }
 0x207   :  { %6064 = vmatpush1.bf16.msra.mxu0 %v6063_v52  ;;  %v473_v52 = vld [vmem:[%s12897_s1 + $0xd20] sm:$0xff]  ;;  %v628_v31 = vld [vmem:[%s12897_s1 + $0x11f8] sm:$0xff] }
 0x208   :  { %6480 = vmatpush1.bf16.msra.mxu1 %v6479_v53  ;;  %6066 = vmatprep.subr.bf16.mxu0 %v6065_v54  ;;  %v481_v53 = vld [vmem:[%s12897_s1 + $0xd60] sm:$0xff]  ;;  %v475_v54 = vld [vmem:[%s12897_s1 + $0xd30] sm:$0xff] }
 0x209   :  { %6482 = vmatprep.subr.bf16.mxu1 %v6481_v58  ;;  %v498_v58 = vld [vmem:[%s12897_s1 + $0xde8] sm:$0xff]  ;;  %v6087_v61 = vpack.c.bf16 %v481_v53, %v473_v52  ;;  %v6503_v62 = vpack.c.bf16 %v483_v56, %v475_v54  ;;  %v6521_v52 = vpack.c.bf16 %v564_v44, %v556_v43  ;;  %v563_v53 = vld [vmem:[%s12897_s1 + $0xff0] sm:$0xff]  ;;  %v572_v56 = vld [vmem:[%s12897_s1 + $0x1038] sm:$0xff] }
 0x20a   :  { %v6089_v63 = vpack.c.bf16 %v498_v58, %v490_v57  ;;  %v570_v54 = vld [vmem:[%s12897_s1 + $0x1028] sm:$0xff]  ;;  %v580_v57 = vld [vmem:[%s12897_s1 + $0x1078] sm:$0xff] }
 0x20b   :  { %6068 = vmatpush1.bf16.msra.mxu0 %v6067_v0  ;;  %v489_v0 = vld [vmem:[%s12897_s1 + $0xda0] sm:$0xff]  ;;  %v644_v43 = vld [vmem:[%s12897_s1 + $0x1278] sm:$0xff] }
 0x20c   :  { %6484 = vmatpush1.bf16.msra.mxu1 %v6483_v1  ;;  %6070 = vmatprep.subr.bf16.mxu0 %v6069_v2  ;;  %v497_v1 = vld [vmem:[%s12897_s1 + $0xde0] sm:$0xff]  ;;  %v491_v2 = vld [vmem:[%s12897_s1 + $0xdb0] sm:$0xff] }
 0x20d   :  { %6486 = vmatprep.subr.bf16.mxu1 %v6485_v6  ;;  %v514_v6 = vld [vmem:[%s12897_s1 + $0xe68] sm:$0xff]  ;;  %v6091_v9 = vpack.c.bf16 %v497_v1, %v489_v0  ;;  %v6507_v10 = vpack.c.bf16 %v499_v4, %v491_v2  ;;  %v6525_v0 = vpack.c.bf16 %v580_v57, %v572_v56  ;;  %v579_v1 = vld [vmem:[%s12897_s1 + $0x1070] sm:$0xff]  ;;  %v588_v4 = vld [vmem:[%s12897_s1 + $0x10b8] sm:$0xff] }
 0x20e   :  { %v6093_v11 = vpack.c.bf16 %v514_v6, %v506_v5  ;;  %v586_v2 = vld [vmem:[%s12897_s1 + $0x10a8] sm:$0xff]  ;;  %v596_v5 = vld [vmem:[%s12897_s1 + $0x10f8] sm:$0xff] }
 0x20f   :  { %6072 = vmatpush1.bf16.msra.mxu0 %v6071_v12  ;;  %v505_v12 = vld [vmem:[%s12897_s1 + $0xe20] sm:$0xff]  ;;  %v660_v56 = vld [vmem:[%s12897_s1 + $0x12f8] sm:$0xff] }
 0x210   :  { %6488 = vmatpush1.bf16.msra.mxu1 %v6487_v13  ;;  %6074 = vmatprep.subr.bf16.mxu0 %v6073_v14  ;;  %v513_v13 = vld [vmem:[%s12897_s1 + $0xe60] sm:$0xff]  ;;  %v507_v14 = vld [vmem:[%s12897_s1 + $0xe30] sm:$0xff] }
 0x211   :  { %6490 = vmatprep.subr.bf16.mxu1 %v6489_v18  ;;  %v530_v18 = vld [vmem:[%s12897_s1 + $0xee8] sm:$0xff]  ;;  %v6095_v21 = vpack.c.bf16 %v513_v13, %v505_v12  ;;  %v6511_v22 = vpack.c.bf16 %v515_v16, %v507_v14  ;;  %v6529_v12 = vpack.c.bf16 %v596_v5, %v588_v4  ;;  %v595_v13 = vld [vmem:[%s12897_s1 + $0x10f0] sm:$0xff]  ;;  %v676_v4 = vld [vmem:[%s12897_s1 + $0x1378] sm:$0xff] }
 0x212   :  { %v6097_v23 = vpack.c.bf16 %v530_v18, %v522_v17  ;;  %v602_v14 = vld [vmem:[%s12897_s1 + $0x1128] sm:$0xff]  ;;  %v7468_v16 = vld [vmem:[%s12896_s0 + $0x10] sm:$0xff]  ;;  %v604_v17 = vld [vmem:[%s12897_s1 + $0x1138] sm:$0xff] }
 0x213   :  { %6076 = vmatpush1.bf16.msra.mxu0 %v6075_v24  ;;  %v521_v24 = vld [vmem:[%s12897_s1 + $0xea0] sm:$0xff]  ;;  %v612_v18 = vld [vmem:[%s12897_s1 + $0x1178] sm:$0xff] }
 0x214   :  { %6492 = vmatpush1.bf16.msra.mxu1 %v6491_v25  ;;  %6078 = vmatprep.subr.bf16.mxu0 %v6077_v26  ;;  %v529_v25 = vld [vmem:[%s12897_s1 + $0xee0] sm:$0xff]  ;;  %v523_v26 = vld [vmem:[%s12897_s1 + $0xeb0] sm:$0xff] }
 0x215   :  { %6494 = vmatprep.subr.bf16.mxu1 %v6493_v30  ;;  %v546_v30 = vld [vmem:[%s12897_s1 + $0xf68] sm:$0xff]  ;;  %v6099_v33 = vpack.c.bf16 %v529_v25, %v521_v24  ;;  %v6515_v34 = vpack.c.bf16 %v531_v28, %v523_v26  ;;  %v603_v24 = vld [vmem:[%s12897_s1 + $0x1130] sm:$0xff]  ;;  %v6533_v25 = vpack.c.bf16 %v612_v18, %v604_v17 }
 0x216   :  { %v6101_v35 = vpack.c.bf16 %v546_v30, %v538_v29  ;;  %v611_v26 = vld [vmem:[%s12897_s1 + $0x1170] sm:$0xff]  ;;  %v626_v28 = vld [vmem:[%s12897_s1 + $0x11e8] sm:$0xff]  ;;  %v620_v30 = vld [vmem:[%s12897_s1 + $0x11b8] sm:$0xff] }
 0x217   :  { %6080 = vmatpush1.bf16.msra.mxu0 %v6079_v36  ;;  %v537_v36 = vld [vmem:[%s12897_s1 + $0xf20] sm:$0xff]  ;;  %v7469_v29 = vld [vmem:[%s12896_s0 + $0x28] sm:$0xff] }
 0x218   :  { %6496 = vmatpush1.bf16.msra.mxu1 %v6495_v37  ;;  %6082 = vmatprep.subr.bf16.mxu0 %v6081_v38  ;;  %v545_v37 = vld [vmem:[%s12897_s1 + $0xf60] sm:$0xff]  ;;  %v539_v38 = vld [vmem:[%s12897_s1 + $0xf30] sm:$0xff] }
 0x219   :  { %6498 = vmatprep.subr.bf16.mxu1 %v6497_v42  ;;  %v562_v42 = vld [vmem:[%s12897_s1 + $0xfe8] sm:$0xff]  ;;  %v6103_v45 = vpack.c.bf16 %v545_v37, %v537_v36  ;;  %v6519_v46 = vpack.c.bf16 %v547_v40, %v539_v38  ;;  %v625_v36 = vld [vmem:[%s12897_s1 + $0x11e0] sm:$0xff]  ;;  %v619_v37 = vld [vmem:[%s12897_s1 + $0x11b0] sm:$0xff]  ;;  %v6537_v38 = vpack.c.bf16 %v628_v31, %v620_v30 }
 0x21a   :  { %v6105_v47 = vpack.c.bf16 %v562_v42, %v554_v41  ;;  %v634_v40 = vld [vmem:[%s12897_s1 + $0x1228] sm:$0xff]  ;;  %v636_v42 = vld [vmem:[%s12897_s1 + $0x1238] sm:$0xff] }
 0x21b   :  { %6084 = vmatpush1.bf16.msra.mxu0 %v6083_v49  ;;  %v553_v49 = vld [vmem:[%s12897_s1 + $0xfa0] sm:$0xff]  ;;  %v642_v41 = vld [vmem:[%s12897_s1 + $0x1268] sm:$0xff] }
 0x21c   :  { %6500 = vmatpush1.bf16.msra.mxu1 %v6499_v50  ;;  %6086 = vmatprep.subr.bf16.mxu0 %v6085_v51  ;;  %v561_v50 = vld [vmem:[%s12897_s1 + $0xfe0] sm:$0xff]  ;;  %v555_v51 = vld [vmem:[%s12897_s1 + $0xfb0] sm:$0xff] }
 0x21d   :  { %6502 = vmatprep.subr.bf16.mxu1 %v6501_v55  ;;  %v578_v55 = vld [vmem:[%s12897_s1 + $0x1068] sm:$0xff]  ;;  %v6107_v58 = vpack.c.bf16 %v561_v50, %v553_v49  ;;  %v6523_v59 = vpack.c.bf16 %v563_v53, %v555_v51  ;;  %v641_v49 = vld [vmem:[%s12897_s1 + $0x1260] sm:$0xff]  ;;  %v635_v50 = vld [vmem:[%s12897_s1 + $0x1230] sm:$0xff]  ;;  %v6541_v51 = vpack.c.bf16 %v644_v43, %v636_v42 }
 0x21e   :  { %v6109_v60 = vpack.c.bf16 %v578_v55, %v570_v54  ;;  %v650_v53 = vld [vmem:[%s12897_s1 + $0x12a8] sm:$0xff]  ;;  %v652_v55 = vld [vmem:[%s12897_s1 + $0x12b8] sm:$0xff] }
 0x21f   :  { %6088 = vmatpush1.bf16.msra.mxu0 %v6087_v61  ;;  %v569_v61 = vld [vmem:[%s12897_s1 + $0x1020] sm:$0xff]  ;;  %v658_v54 = vld [vmem:[%s12897_s1 + $0x12e8] sm:$0xff] }
 0x220   :  { %6504 = vmatpush1.bf16.msra.mxu1 %v6503_v62  ;;  %6090 = vmatprep.subr.bf16.mxu0 %v6089_v63  ;;  %v577_v62 = vld [vmem:[%s12897_s1 + $0x1060] sm:$0xff]  ;;  %v571_v63 = vld [vmem:[%s12897_s1 + $0x1030] sm:$0xff] }
 0x221   :  { %6506 = vmatprep.subr.bf16.mxu1 %v6505_v3  ;;  %v594_v3 = vld [vmem:[%s12897_s1 + $0x10e8] sm:$0xff]  ;;  %v6111_v6 = vpack.c.bf16 %v577_v62, %v569_v61  ;;  %v6527_v7 = vpack.c.bf16 %v579_v1, %v571_v63  ;;  %v657_v61 = vld [vmem:[%s12897_s1 + $0x12e0] sm:$0xff]  ;;  %v651_v62 = vld [vmem:[%s12897_s1 + $0x12b0] sm:$0xff]  ;;  %v6545_v63 = vpack.c.bf16 %v660_v56, %v652_v55 }
 0x222   :  { %v6113_v8 = vpack.c.bf16 %v594_v3, %v586_v2  ;;  %v666_v1 = vld [vmem:[%s12897_s1 + $0x1328] sm:$0xff]  ;;  %v668_v3 = vld [vmem:[%s12897_s1 + $0x1338] sm:$0xff] }
 0x223   :  { %6092 = vmatpush1.bf16.msra.mxu0 %v6091_v9  ;;  %v585_v9 = vld [vmem:[%s12897_s1 + $0x10a0] sm:$0xff]  ;;  %v674_v2 = vld [vmem:[%s12897_s1 + $0x1368] sm:$0xff] }
 0x224   :  { %6508 = vmatpush1.bf16.msra.mxu1 %v6507_v10  ;;  %6094 = vmatprep.subr.bf16.mxu0 %v6093_v11  ;;  %v593_v10 = vld [vmem:[%s12897_s1 + $0x10e0] sm:$0xff]  ;;  %v587_v11 = vld [vmem:[%s12897_s1 + $0x10b0] sm:$0xff] }
 0x225   :  { %6510 = vmatprep.subr.bf16.mxu1 %v6509_v15  ;;  %v610_v15 = vld [vmem:[%s12897_s1 + $0x1168] sm:$0xff]  ;;  %v6115_v19 = vpack.c.bf16 %v593_v10, %v585_v9  ;;  %v6531_v20 = vpack.c.bf16 %v595_v13, %v587_v11  ;;  %v673_v9 = vld [vmem:[%s12897_s1 + $0x1360] sm:$0xff]  ;;  %v667_v10 = vld [vmem:[%s12897_s1 + $0x1330] sm:$0xff]  ;;  %v6549_v11 = vpack.c.bf16 %v676_v4, %v668_v3 }
 0x226   :  { %v682_v13 = vld [vmem:[%s12897_s1 + $0x13a8] sm:$0xff] }
 0x227   :  { %6096 = vmatpush1.bf16.msra.mxu0 %v6095_v21  ;;  %v6117_v21 = vpack.c.bf16 %v610_v15, %v602_v14  ;;  %v690_v14 = vld [vmem:[%s12897_s1 + $0x13e8] sm:$0xff]  ;;  %v684_v15 = vld [vmem:[%s12897_s1 + $0x13b8] sm:$0xff] }
 0x228   :  { %6512 = vmatpush1.bf16.msra.mxu1 %v6511_v22  ;;  %6098 = vmatprep.subr.bf16.mxu0 %v6097_v23  ;;  %v601_v22 = vld [vmem:[%s12897_s1 + $0x1120] sm:$0xff] }
 0x229   :  { %6514 = vmatprep.subr.bf16.mxu1 %v6513_v27  ;;  %v609_v23 = vld [vmem:[%s12897_s1 + $0x1160] sm:$0xff]  ;;  %v618_v27 = vld [vmem:[%s12897_s1 + $0x11a8] sm:$0xff] }
 0x22a   :  { %v6119_v32 = vpack.c.bf16 %v609_v23, %v601_v22  ;;  %v683_v22 = vld [vmem:[%s12897_s1 + $0x13b0] sm:$0xff] }
 0x22b   :  { %6100 = vmatpush1.bf16.msra.mxu0 %v6099_v33  ;;  %v6535_v33 = vpack.c.bf16 %v611_v26, %v603_v24  ;;  %v691_v24 = vld [vmem:[%s12897_s1 + $0x13f0] sm:$0xff]  ;;  %v706_v26 = vld [vmem:[%s12897_s1 + $0x1468] sm:$0xff] }
 0x22c   :  { %6516 = vmatpush1.bf16.msra.mxu1 %v6515_v34  ;;  %6102 = vmatprep.subr.bf16.mxu0 %v6101_v35  ;;  %v6121_v34 = vpack.c.bf16 %v626_v28, %v618_v27  ;;  %v617_v35 = vld [vmem:[%s12897_s1 + $0x11a0] sm:$0xff]  ;;  %v700_v27 = vld [vmem:[%s12897_s1 + $0x1438] sm:$0xff]  ;;  %v6555_v30 = vpack.c.bf16 %v691_v24, %v683_v22  ;;  %v778_v22 = vld [vmem:[%s12897_s1 + $0x16a8] sm:$0xff] }
 0x22d   :  { %6518 = vmatprep.subr.bf16.mxu1 %v6517_v39  ;;  %v627_v39 = vld [vmem:[%s12897_s1 + $0x11f0] sm:$0xff]  ;;  %v6123_v44 = vpack.c.bf16 %v625_v36, %v617_v35  ;;  %v708_v28 = vld [vmem:[%s12897_s1 + $0x1478] sm:$0xff] }
 0x22e   :  { %v6557_v35 = vpack.c.bf16 %v708_v28, %v700_v27  ;;  %v707_v36 = vld [vmem:[%s12897_s1 + $0x1470] sm:$0xff]  ;;  %v780_v24 = vld [vmem:[%s12897_s1 + $0x16b8] sm:$0xff] }
 0x22f   :  { %6104 = vmatpush1.bf16.msra.mxu0 %v6103_v45  ;;  %v6539_v45 = vpack.c.bf16 %v627_v39, %v619_v37  ;;  %v714_v37 = vld [vmem:[%s12897_s1 + $0x14a8] sm:$0xff]  ;;  %v716_v39 = vld [vmem:[%s12897_s1 + $0x14b8] sm:$0xff] }
 0x230   :  { %6520 = vmatpush1.bf16.msra.mxu1 %v6519_v46  ;;  %6106 = vmatprep.subr.bf16.mxu0 %v6105_v47  ;;  %v6125_v46 = vpack.c.bf16 %v642_v41, %v634_v40  ;;  %v633_v47 = vld [vmem:[%s12897_s1 + $0x1220] sm:$0xff]  ;;  %v724_v40 = vld [vmem:[%s12897_s1 + $0x14f8] sm:$0xff] }
 0x231   :  { %6522 = vmatprep.subr.bf16.mxu1 %v6521_v52  ;;  %v643_v52 = vld [vmem:[%s12897_s1 + $0x1270] sm:$0xff]  ;;  %v6127_v57 = vpack.c.bf16 %v641_v49, %v633_v47  ;;  %v6561_v47 = vpack.c.bf16 %v724_v40, %v716_v39 }
 0x232   :  { %v723_v49 = vld [vmem:[%s12897_s1 + $0x14f0] sm:$0xff] }
 0x233   :  { %6108 = vmatpush1.bf16.msra.mxu0 %v6107_v58  ;;  %v6543_v58 = vpack.c.bf16 %v643_v52, %v635_v50  ;;  %v730_v50 = vld [vmem:[%s12897_s1 + $0x1528] sm:$0xff]  ;;  %v732_v52 = vld [vmem:[%s12897_s1 + $0x1538] sm:$0xff] }
 0x234   :  { %6524 = vmatpush1.bf16.msra.mxu1 %v6523_v59  ;;  %6110 = vmatprep.subr.bf16.mxu0 %v6109_v60  ;;  %v6129_v59 = vpack.c.bf16 %v658_v54, %v650_v53  ;;  %v649_v60 = vld [vmem:[%s12897_s1 + $0x12a0] sm:$0xff]  ;;  %v740_v53 = vld [vmem:[%s12897_s1 + $0x1578] sm:$0xff] }
 0x235   :  { %6526 = vmatprep.subr.bf16.mxu1 %v6525_v0  ;;  %v659_v0 = vld [vmem:[%s12897_s1 + $0x12f0] sm:$0xff]  ;;  %v6131_v5 = vpack.c.bf16 %v657_v61, %v649_v60  ;;  %v6565_v60 = vpack.c.bf16 %v740_v53, %v732_v52 }
 0x236   :  { %2889 = vmatmul.mubr.f32.vlgmr.msra.gmra.mrb[2].mxu0 %v7468_v16  ;;  %v739_v61 = vld [vmem:[%s12897_s1 + $0x1570] sm:$0xff] }
 0x237   :  { %6112 = vmatpush1.bf16.msra.mxu0 %v6111_v6  ;;  %3386 = vmatmul.mubr.f32.vlgmr.msra.gmra.mrb[2].mxu1 %v7468_v16  ;;  %v6547_v6 = vpack.c.bf16 %v659_v0, %v651_v62  ;;  %v692_v16 = vld [vmem:[%s12897_s1 + $0x13f8] sm:$0xff]  ;;  %v746_v62 = vld [vmem:[%s12897_s1 + $0x15a8] sm:$0xff] }
 0x238   :  { %6528 = vmatpush1.bf16.msra.mxu1 %v6527_v7  ;;  %6114 = vmatprep.subr.bf16.mxu0 %v6113_v8  ;;  %v6133_v7 = vpack.c.bf16 %v674_v2, %v666_v1  ;;  %v665_v8 = vld [vmem:[%s12897_s1 + $0x1320] sm:$0xff]  ;;  %v6553_v23 = vpack.c.bf16 %v692_v16, %v684_v15  ;;  %v748_v0 = vld [vmem:[%s12897_s1 + $0x15b8] sm:$0xff] }
 0x239   :  { %6530 = vmatprep.subr.bf16.mxu1 %v6529_v12  ;;  %2959 = vmatprep.mubr.f32.mxu0 %v7469_v29  ;;  %v675_v12 = vld [vmem:[%s12897_s1 + $0x1370] sm:$0xff]  ;;  %v6135_v17 = vpack.c.bf16 %v673_v9, %v665_v8  ;;  %v756_v1 = vld [vmem:[%s12897_s1 + $0x15f8] sm:$0xff] }
 0x23a   :  { %3456 = vmatprep.mubr.f32.mxu1 %v7469_v29  ;;  %v6551_v18 = vpack.c.bf16 %v675_v12, %v667_v10  ;;  %v6569_v8 = vpack.c.bf16 %v756_v1, %v748_v0  ;;  %v755_v9 = vld [vmem:[%s12897_s1 + $0x15f0] sm:$0xff]  ;;  %v762_v10 = vld [vmem:[%s12897_s1 + $0x1628] sm:$0xff]  ;;  %v764_v12 = vld [vmem:[%s12897_s1 + $0x1638] sm:$0xff] }
 0x23b   :  { %6116 = vmatpush1.bf16.msra.mxu0 %v6115_v19  ;;  %v6137_v19 = vpack.c.bf16 %v690_v14, %v682_v13  ;;  %v772_v13 = vld [vmem:[%s12897_s1 + $0x1678] sm:$0xff] }
 0x23c   :  { %6532 = vmatpush1.bf16.msra.mxu1 %v6531_v20  ;;  %6118 = vmatprep.subr.bf16.mxu0 %v6117_v21  ;;  %v681_v20 = vld [vmem:[%s12897_s1 + $0x13a0] sm:$0xff] }
 0x23d   :  { %6534 = vmatprep.subr.bf16.mxu1 %v6533_v25  ;;  %v689_v21 = vld [vmem:[%s12897_s1 + $0x13e0] sm:$0xff]  ;;  %v698_v25 = vld [vmem:[%s12897_s1 + $0x1428] sm:$0xff] }
 0x23e   :  { %v6139_v29 = vpack.c.bf16 %v689_v21, %v681_v20  ;;  %v6141_v31 = vpack.c.bf16 %v706_v26, %v698_v25  ;;  %v6573_v20 = vpack.c.bf16 %v772_v13, %v764_v12  ;;  %v771_v21 = vld [vmem:[%s12897_s1 + $0x1670] sm:$0xff]  ;;  %v788_v25 = vld [vmem:[%s12897_s1 + $0x16f8] sm:$0xff] }
 0x23f   :  { %6120 = vmatpush1.bf16.msra.mxu0 %v6119_v32  ;;  %v697_v32 = vld [vmem:[%s12897_s1 + $0x1420] sm:$0xff] }
 0x240   :  { %6536 = vmatpush1.bf16.msra.mxu1 %v6535_v33  ;;  %6122 = vmatprep.subr.bf16.mxu0 %v6121_v34  ;;  %v705_v33 = vld [vmem:[%s12897_s1 + $0x1460] sm:$0xff]  ;;  %v699_v34 = vld [vmem:[%s12897_s1 + $0x1430] sm:$0xff] }
 0x241   :  { %6538 = vmatprep.subr.bf16.mxu1 %v6537_v38  ;;  %v722_v38 = vld [vmem:[%s12897_s1 + $0x14e8] sm:$0xff]  ;;  %v6143_v41 = vpack.c.bf16 %v705_v33, %v697_v32  ;;  %v6559_v42 = vpack.c.bf16 %v707_v36, %v699_v34  ;;  %v6577_v32 = vpack.c.bf16 %v788_v25, %v780_v24  ;;  %v787_v33 = vld [vmem:[%s12897_s1 + $0x16f0] sm:$0xff]  ;;  %v796_v36 = vld [vmem:[%s12897_s1 + $0x1738] sm:$0xff] }
 0x242   :  { %v6145_v43 = vpack.c.bf16 %v722_v38, %v714_v37  ;;  %v794_v34 = vld [vmem:[%s12897_s1 + $0x1728] sm:$0xff]  ;;  %v804_v37 = vld [vmem:[%s12897_s1 + $0x1778] sm:$0xff] }
 0x243   :  { %6124 = vmatpush1.bf16.msra.mxu0 %v6123_v44  ;;  %v713_v44 = vld [vmem:[%s12897_s1 + $0x14a0] sm:$0xff] }
 0x244   :  { %6540 = vmatpush1.bf16.msra.mxu1 %v6539_v45  ;;  %6126 = vmatprep.subr.bf16.mxu0 %v6125_v46  ;;  %v721_v45 = vld [vmem:[%s12897_s1 + $0x14e0] sm:$0xff]  ;;  %v715_v46 = vld [vmem:[%s12897_s1 + $0x14b0] sm:$0xff] }
 0x245   :  { %6542 = vmatprep.subr.bf16.mxu1 %v6541_v51  ;;  %v738_v51 = vld [vmem:[%s12897_s1 + $0x1568] sm:$0xff]  ;;  %v6147_v54 = vpack.c.bf16 %v721_v45, %v713_v44  ;;  %v6563_v55 = vpack.c.bf16 %v723_v49, %v715_v46  ;;  %v6581_v44 = vpack.c.bf16 %v804_v37, %v796_v36  ;;  %v803_v45 = vld [vmem:[%s12897_s1 + $0x1770] sm:$0xff]  ;;  %v812_v49 = vld [vmem:[%s12897_s1 + $0x17b8] sm:$0xff] }
 0x246   :  { %v6149_v56 = vpack.c.bf16 %v738_v51, %v730_v50  ;;  %v810_v46 = vld [vmem:[%s12897_s1 + $0x17a8] sm:$0xff]  ;;  %v820_v50 = vld [vmem:[%s12897_s1 + $0x17f8] sm:$0xff] }
 0x247   :  { %6128 = vmatpush1.bf16.msra.mxu0 %v6127_v57  ;;  %v729_v57 = vld [vmem:[%s12897_s1 + $0x1520] sm:$0xff]  ;;  %v884_v36 = vld [vmem:[%s12897_s1 + $0x19f8] sm:$0xff] }
 0x248   :  { %6544 = vmatpush1.bf16.msra.mxu1 %v6543_v58  ;;  %6130 = vmatprep.subr.bf16.mxu0 %v6129_v59  ;;  %v737_v58 = vld [vmem:[%s12897_s1 + $0x1560] sm:$0xff]  ;;  %v731_v59 = vld [vmem:[%s12897_s1 + $0x1530] sm:$0xff] }
 0x249   :  { %6546 = vmatprep.subr.bf16.mxu1 %v6545_v63  ;;  %v754_v63 = vld [vmem:[%s12897_s1 + $0x15e8] sm:$0xff]  ;;  %v6151_v2 = vpack.c.bf16 %v737_v58, %v729_v57  ;;  %v6567_v3 = vpack.c.bf16 %v739_v61, %v731_v59  ;;  %v6585_v57 = vpack.c.bf16 %v820_v50, %v812_v49  ;;  %v819_v58 = vld [vmem:[%s12897_s1 + $0x17f0] sm:$0xff]  ;;  %v828_v61 = vld [vmem:[%s12897_s1 + $0x1838] sm:$0xff] }
 0x24a   :  { %v6153_v4 = vpack.c.bf16 %v754_v63, %v746_v62  ;;  %v826_v59 = vld [vmem:[%s12897_s1 + $0x1828] sm:$0xff]  ;;  %v836_v62 = vld [vmem:[%s12897_s1 + $0x1878] sm:$0xff] }
 0x24b   :  { %6132 = vmatpush1.bf16.msra.mxu0 %v6131_v5  ;;  %v745_v5 = vld [vmem:[%s12897_s1 + $0x15a0] sm:$0xff]  ;;  %v900_v49 = vld [vmem:[%s12897_s1 + $0x1a78] sm:$0xff] }
 0x24c   :  { %6548 = vmatpush1.bf16.msra.mxu1 %v6547_v6  ;;  %6134 = vmatprep.subr.bf16.mxu0 %v6133_v7  ;;  %v753_v6 = vld [vmem:[%s12897_s1 + $0x15e0] sm:$0xff]  ;;  %v747_v7 = vld [vmem:[%s12897_s1 + $0x15b0] sm:$0xff] }
 0x24d   :  { %6550 = vmatprep.subr.bf16.mxu1 %v6549_v11  ;;  %v770_v11 = vld [vmem:[%s12897_s1 + $0x1668] sm:$0xff]  ;;  %v6155_v14 = vpack.c.bf16 %v753_v6, %v745_v5  ;;  %v6571_v15 = vpack.c.bf16 %v755_v9, %v747_v7  ;;  %v6589_v5 = vpack.c.bf16 %v836_v62, %v828_v61  ;;  %v835_v6 = vld [vmem:[%s12897_s1 + $0x1870] sm:$0xff]  ;;  %v844_v9 = vld [vmem:[%s12897_s1 + $0x18b8] sm:$0xff] }
 0x24e   :  { %v6157_v16 = vpack.c.bf16 %v770_v11, %v762_v10  ;;  %v842_v7 = vld [vmem:[%s12897_s1 + $0x18a8] sm:$0xff]  ;;  %v852_v10 = vld [vmem:[%s12897_s1 + $0x18f8] sm:$0xff] }
 0x24f   :  { %6136 = vmatpush1.bf16.msra.mxu0 %v6135_v17  ;;  %v761_v17 = vld [vmem:[%s12897_s1 + $0x1620] sm:$0xff]  ;;  %v916_v61 = vld [vmem:[%s12897_s1 + $0x1af8] sm:$0xff] }
 0x250   :  { %6552 = vmatpush1.bf16.msra.mxu1 %v6551_v18  ;;  %6138 = vmatprep.subr.bf16.mxu0 %v6137_v19  ;;  %v769_v18 = vld [vmem:[%s12897_s1 + $0x1660] sm:$0xff]  ;;  %v763_v19 = vld [vmem:[%s12897_s1 + $0x1630] sm:$0xff] }
 0x251   :  { %6554 = vmatprep.subr.bf16.mxu1 %v6553_v23  ;;  %v786_v23 = vld [vmem:[%s12897_s1 + $0x16e8] sm:$0xff]  ;;  %v6159_v26 = vpack.c.bf16 %v769_v18, %v761_v17  ;;  %v6575_v27 = vpack.c.bf16 %v771_v21, %v763_v19  ;;  %v6593_v17 = vpack.c.bf16 %v852_v10, %v844_v9  ;;  %v851_v18 = vld [vmem:[%s12897_s1 + $0x18f0] sm:$0xff]  ;;  %v7470_v21 = vld [vmem:[%s12896_s0 + $0x20] sm:$0xff] }
 0x252   :  { %v6161_v28 = vpack.c.bf16 %v786_v23, %v778_v22  ;;  %v858_v19 = vld [vmem:[%s12897_s1 + $0x1928] sm:$0xff]  ;;  %v860_v22 = vld [vmem:[%s12897_s1 + $0x1938] sm:$0xff] }
 0x253   :  { %6140 = vmatpush1.bf16.msra.mxu0 %v6139_v29  ;;  %v777_v29 = vld [vmem:[%s12897_s1 + $0x16a0] sm:$0xff]  ;;  %v868_v23 = vld [vmem:[%s12897_s1 + $0x1978] sm:$0xff] }
 0x254   :  { %6556 = vmatpush1.bf16.msra.mxu1 %v6555_v30  ;;  %6142 = vmatprep.subr.bf16.mxu0 %v6141_v31  ;;  %v785_v30 = vld [vmem:[%s12897_s1 + $0x16e0] sm:$0xff]  ;;  %v779_v31 = vld [vmem:[%s12897_s1 + $0x16b0] sm:$0xff]  ;;  %v932_v9 = vld [vmem:[%s12897_s1 + $0x1b78] sm:$0xff] }
 0x255   :  { %6558 = vmatprep.subr.bf16.mxu1 %v6557_v35  ;;  %v802_v35 = vld [vmem:[%s12897_s1 + $0x1768] sm:$0xff]  ;;  %v6163_v38 = vpack.c.bf16 %v785_v30, %v777_v29  ;;  %v6579_v39 = vpack.c.bf16 %v787_v33, %v779_v31  ;;  %v859_v29 = vld [vmem:[%s12897_s1 + $0x1930] sm:$0xff]  ;;  %v6597_v30 = vpack.c.bf16 %v868_v23, %v860_v22  ;;  %v940_v23 = vld [vmem:[%s12897_s1 + $0x1bb8] sm:$0xff] }
 0x256   :  { %v6165_v40 = vpack.c.bf16 %v802_v35, %v794_v34  ;;  %v867_v31 = vld [vmem:[%s12897_s1 + $0x1970] sm:$0xff]  ;;  %v882_v33 = vld [vmem:[%s12897_s1 + $0x19e8] sm:$0xff]  ;;  %v7471_v34 = vld [vmem:[%s12896_s0 + $0x38] sm:$0xff] }
 0x257   :  { %6144 = vmatpush1.bf16.msra.mxu0 %v6143_v41  ;;  %v793_v41 = vld [vmem:[%s12897_s1 + $0x1720] sm:$0xff]  ;;  %v876_v35 = vld [vmem:[%s12897_s1 + $0x19b8] sm:$0xff] }
 0x258   :  { %6560 = vmatpush1.bf16.msra.mxu1 %v6559_v42  ;;  %6146 = vmatprep.subr.bf16.mxu0 %v6145_v43  ;;  %v801_v42 = vld [vmem:[%s12897_s1 + $0x1760] sm:$0xff]  ;;  %v795_v43 = vld [vmem:[%s12897_s1 + $0x1730] sm:$0xff] }
 0x259   :  { %6562 = vmatprep.subr.bf16.mxu1 %v6561_v47  ;;  %v818_v47 = vld [vmem:[%s12897_s1 + $0x17e8] sm:$0xff]  ;;  %v6167_v51 = vpack.c.bf16 %v801_v42, %v793_v41  ;;  %v6583_v52 = vpack.c.bf16 %v803_v45, %v795_v43  ;;  %v881_v41 = vld [vmem:[%s12897_s1 + $0x19e0] sm:$0xff]  ;;  %v875_v42 = vld [vmem:[%s12897_s1 + $0x19b0] sm:$0xff]  ;;  %v6601_v43 = vpack.c.bf16 %v884_v36, %v876_v35 }
 0x25a   :  { %v6169_v53 = vpack.c.bf16 %v818_v47, %v810_v46  ;;  %v890_v45 = vld [vmem:[%s12897_s1 + $0x1a28] sm:$0xff]  ;;  %v892_v47 = vld [vmem:[%s12897_s1 + $0x1a38] sm:$0xff] }
 0x25b   :  { %6148 = vmatpush1.bf16.msra.mxu0 %v6147_v54  ;;  %v809_v54 = vld [vmem:[%s12897_s1 + $0x17a0] sm:$0xff]  ;;  %v898_v46 = vld [vmem:[%s12897_s1 + $0x1a68] sm:$0xff]  ;;  %v956_v36 = vld [vmem:[%s12897_s1 + $0x1c38] sm:$0xff] }
 0x25c   :  { %6564 = vmatpush1.bf16.msra.mxu1 %v6563_v55  ;;  %6150 = vmatprep.subr.bf16.mxu0 %v6149_v56  ;;  %v817_v55 = vld [vmem:[%s12897_s1 + $0x17e0] sm:$0xff]  ;;  %v811_v56 = vld [vmem:[%s12897_s1 + $0x17b0] sm:$0xff]  ;;  %v962_v35 = vld [vmem:[%s12897_s1 + $0x1c68] sm:$0xff] }
 0x25d   :  { %6566 = vmatprep.subr.bf16.mxu1 %v6565_v60  ;;  %v834_v60 = vld [vmem:[%s12897_s1 + $0x1868] sm:$0xff]  ;;  %v6171_v63 = vpack.c.bf16 %v817_v55, %v809_v54  ;;  %v6587_v0 = vpack.c.bf16 %v819_v58, %v811_v56  ;;  %v897_v54 = vld [vmem:[%s12897_s1 + $0x1a60] sm:$0xff]  ;;  %v891_v55 = vld [vmem:[%s12897_s1 + $0x1a30] sm:$0xff]  ;;  %v6605_v56 = vpack.c.bf16 %v900_v49, %v892_v47 }
 0x25e   :  { %v6173_v1 = vpack.c.bf16 %v834_v60, %v826_v59  ;;  %v906_v58 = vld [vmem:[%s12897_s1 + $0x1aa8] sm:$0xff]  ;;  %v908_v60 = vld [vmem:[%s12897_s1 + $0x1ab8] sm:$0xff] }
 0x25f   :  { %6152 = vmatpush1.bf16.msra.mxu0 %v6151_v2  ;;  %v825_v2 = vld [vmem:[%s12897_s1 + $0x1820] sm:$0xff]  ;;  %v914_v59 = vld [vmem:[%s12897_s1 + $0x1ae8] sm:$0xff]  ;;  %v972_v49 = vld [vmem:[%s12897_s1 + $0x1cb8] sm:$0xff] }
 0x260   :  { %6568 = vmatpush1.bf16.msra.mxu1 %v6567_v3  ;;  %6154 = vmatprep.subr.bf16.mxu0 %v6153_v4  ;;  %v833_v3 = vld [vmem:[%s12897_s1 + $0x1860] sm:$0xff]  ;;  %v827_v4 = vld [vmem:[%s12897_s1 + $0x1830] sm:$0xff]  ;;  %v978_v47 = vld [vmem:[%s12897_s1 + $0x1ce8] sm:$0xff] }
 0x261   :  { %6570 = vmatprep.subr.bf16.mxu1 %v6569_v8  ;;  %v850_v8 = vld [vmem:[%s12897_s1 + $0x18e8] sm:$0xff]  ;;  %v6175_v11 = vpack.c.bf16 %v833_v3, %v825_v2  ;;  %v6591_v12 = vpack.c.bf16 %v835_v6, %v827_v4  ;;  %v913_v2 = vld [vmem:[%s12897_s1 + $0x1ae0] sm:$0xff]  ;;  %v907_v3 = vld [vmem:[%s12897_s1 + $0x1ab0] sm:$0xff]  ;;  %v6609_v4 = vpack.c.bf16 %v916_v61, %v908_v60 }
 0x262   :  { %v6177_v13 = vpack.c.bf16 %v850_v8, %v842_v7  ;;  %v922_v6 = vld [vmem:[%s12897_s1 + $0x1b28] sm:$0xff]  ;;  %v924_v8 = vld [vmem:[%s12897_s1 + $0x1b38] sm:$0xff] }
 0x263   :  { %6156 = vmatpush1.bf16.msra.mxu0 %v6155_v14  ;;  %v841_v14 = vld [vmem:[%s12897_s1 + $0x18a0] sm:$0xff]  ;;  %v930_v7 = vld [vmem:[%s12897_s1 + $0x1b68] sm:$0xff]  ;;  %v988_v61 = vld [vmem:[%s12897_s1 + $0x1d38] sm:$0xff] }
 0x264   :  { %6572 = vmatpush1.bf16.msra.mxu1 %v6571_v15  ;;  %6158 = vmatprep.subr.bf16.mxu0 %v6157_v16  ;;  %v849_v15 = vld [vmem:[%s12897_s1 + $0x18e0] sm:$0xff]  ;;  %v843_v16 = vld [vmem:[%s12897_s1 + $0x18b0] sm:$0xff]  ;;  %v994_v60 = vld [vmem:[%s12897_s1 + $0x1d68] sm:$0xff] }
 0x265   :  { %6574 = vmatprep.subr.bf16.mxu1 %v6573_v20  ;;  %v866_v20 = vld [vmem:[%s12897_s1 + $0x1968] sm:$0xff]  ;;  %v6179_v24 = vpack.c.bf16 %v849_v15, %v841_v14  ;;  %v6595_v25 = vpack.c.bf16 %v851_v18, %v843_v16  ;;  %v929_v14 = vld [vmem:[%s12897_s1 + $0x1b60] sm:$0xff]  ;;  %v923_v15 = vld [vmem:[%s12897_s1 + $0x1b30] sm:$0xff] }
 0x266   :  { %v931_v18 = vld [vmem:[%s12897_s1 + $0x1b70] sm:$0xff] }
 0x267   :  { %6160 = vmatpush1.bf16.msra.mxu0 %v6159_v26  ;;  %v6181_v26 = vpack.c.bf16 %v866_v20, %v858_v19  ;;  %v938_v19 = vld [vmem:[%s12897_s1 + $0x1ba8] sm:$0xff] }
 0x268   :  { %6576 = vmatpush1.bf16.msra.mxu1 %v6575_v27  ;;  %6162 = vmatprep.subr.bf16.mxu0 %v6161_v28  ;;  %v857_v27 = vld [vmem:[%s12897_s1 + $0x1920] sm:$0xff]  ;;  %v946_v20 = vld [vmem:[%s12897_s1 + $0x1be8] sm:$0xff] }
 0x269   :  { %6578 = vmatprep.subr.bf16.mxu1 %v6577_v32  ;;  %v865_v28 = vld [vmem:[%s12897_s1 + $0x1960] sm:$0xff]  ;;  %v874_v32 = vld [vmem:[%s12897_s1 + $0x19a8] sm:$0xff] }
 0x26a   :  { %v6183_v37 = vpack.c.bf16 %v865_v28, %v857_v27  ;;  %v6615_v27 = vpack.c.bf16 %v931_v18, %v923_v15  ;;  %v6201_v28 = vpack.c.bf16 %v946_v20, %v938_v19  ;;  %v1009_v15 = vld [vmem:[%s12897_s1 + $0x1de0] sm:$0xff]  ;;  %v1011_v19 = vld [vmem:[%s12897_s1 + $0x1df0] sm:$0xff]  ;;  %v1018_v20 = vld [vmem:[%s12897_s1 + $0x1e28] sm:$0xff] }
 0x26b   :  { %6164 = vmatpush1.bf16.msra.mxu0 %v6163_v38  ;;  %v6599_v38 = vpack.c.bf16 %v867_v31, %v859_v29  ;;  %v937_v29 = vld [vmem:[%s12897_s1 + $0x1ba0] sm:$0xff]  ;;  %v939_v31 = vld [vmem:[%s12897_s1 + $0x1bb0] sm:$0xff] }
 0x26c   :  { %6580 = vmatpush1.bf16.msra.mxu1 %v6579_v39  ;;  %6166 = vmatprep.subr.bf16.mxu0 %v6165_v40  ;;  %v6185_v39 = vpack.c.bf16 %v882_v33, %v874_v32  ;;  %v873_v40 = vld [vmem:[%s12897_s1 + $0x19a0] sm:$0xff]  ;;  %v947_v33 = vld [vmem:[%s12897_s1 + $0x1bf0] sm:$0xff] }
 0x26d   :  { %6582 = vmatprep.subr.bf16.mxu1 %v6581_v44  ;;  %v883_v44 = vld [vmem:[%s12897_s1 + $0x19f0] sm:$0xff]  ;;  %v6187_v50 = vpack.c.bf16 %v881_v41, %v873_v40  ;;  %v953_v41 = vld [vmem:[%s12897_s1 + $0x1c20] sm:$0xff] }
 0x26f   :  { %6168 = vmatpush1.bf16.msra.mxu0 %v6167_v51  ;;  %v6603_v51 = vpack.c.bf16 %v883_v44, %v875_v42  ;;  %v961_v42 = vld [vmem:[%s12897_s1 + $0x1c60] sm:$0xff] }
 0x270   :  { %6584 = vmatpush1.bf16.msra.mxu1 %v6583_v52  ;;  %6170 = vmatprep.subr.bf16.mxu0 %v6169_v53  ;;  %v6189_v52 = vpack.c.bf16 %v898_v46, %v890_v45  ;;  %v889_v53 = vld [vmem:[%s12897_s1 + $0x1a20] sm:$0xff]  ;;  %v963_v45 = vld [vmem:[%s12897_s1 + $0x1c70] sm:$0xff]  ;;  %v970_v46 = vld [vmem:[%s12897_s1 + $0x1ca8] sm:$0xff] }
 0x271   :  { %6586 = vmatprep.subr.bf16.mxu1 %v6585_v57  ;;  %v899_v57 = vld [vmem:[%s12897_s1 + $0x1a70] sm:$0xff]  ;;  %v6191_v62 = vpack.c.bf16 %v897_v54, %v889_v53  ;;  %v6209_v53 = vpack.c.bf16 %v978_v47, %v970_v46  ;;  %v969_v54 = vld [vmem:[%s12897_s1 + $0x1ca0] sm:$0xff]  ;;  %v1050_v47 = vld [vmem:[%s12897_s1 + $0x1f28] sm:$0xff] }
 0x272   :  { %v1043_v46 = vld [vmem:[%s12897_s1 + $0x1ef0] sm:$0xff] }
 0x273   :  { %6172 = vmatpush1.bf16.msra.mxu0 %v6171_v63  ;;  %v6607_v63 = vpack.c.bf16 %v899_v57, %v891_v55  ;;  %v977_v55 = vld [vmem:[%s12897_s1 + $0x1ce0] sm:$0xff] }
 0x274   :  { %6588 = vmatpush1.bf16.msra.mxu1 %v6587_v0  ;;  %6174 = vmatprep.subr.bf16.mxu0 %v6173_v1  ;;  %v6193_v0 = vpack.c.bf16 %v914_v59, %v906_v58  ;;  %v905_v1 = vld [vmem:[%s12897_s1 + $0x1aa0] sm:$0xff]  ;;  %v979_v58 = vld [vmem:[%s12897_s1 + $0x1cf0] sm:$0xff]  ;;  %v986_v59 = vld [vmem:[%s12897_s1 + $0x1d28] sm:$0xff] }
 0x275   :  { %6590 = vmatprep.subr.bf16.mxu1 %v6589_v5  ;;  %v915_v5 = vld [vmem:[%s12897_s1 + $0x1af0] sm:$0xff]  ;;  %v6195_v10 = vpack.c.bf16 %v913_v2, %v905_v1  ;;  %v6213_v1 = vpack.c.bf16 %v994_v60, %v986_v59  ;;  %v985_v2 = vld [vmem:[%s12897_s1 + $0x1d20] sm:$0xff]  ;;  %v1066_v60 = vld [vmem:[%s12897_s1 + $0x1fa8] sm:$0xff] }
 0x276   :  { %2960 = vmatmul.mubr.f32.vlgmr.msra.gmra.mrb[2].mxu0 %v7470_v21  ;;  %v1059_v59 = vld [vmem:[%s12897_s1 + $0x1f70] sm:$0xff] }
 0x277   :  { %6176 = vmatpush1.bf16.msra.mxu0 %v6175_v11  ;;  %3457 = vmatmul.mubr.f32.vlgmr.msra.gmra.mrb[2].mxu1 %v7470_v21  ;;  %v6611_v11 = vpack.c.bf16 %v915_v5, %v907_v3  ;;  %v993_v3 = vld [vmem:[%s12897_s1 + $0x1d60] sm:$0xff] }
 0x278   :  { %6592 = vmatpush1.bf16.msra.mxu1 %v6591_v12  ;;  %6178 = vmatprep.subr.bf16.mxu0 %v6177_v13  ;;  %v6197_v12 = vpack.c.bf16 %v930_v7, %v922_v6  ;;  %v921_v13 = vld [vmem:[%s12897_s1 + $0x1b20] sm:$0xff]  ;;  %v995_v6 = vld [vmem:[%s12897_s1 + $0x1d70] sm:$0xff]  ;;  %v1002_v7 = vld [vmem:[%s12897_s1 + $0x1da8] sm:$0xff] }
 0x279   :  { %6594 = vmatprep.subr.bf16.mxu1 %v6593_v17  ;;  %3030 = vmatprep.mubr.f32.mxu0 %v7471_v34  ;;  %v6613_v17 = vpack.c.bf16 %v932_v9, %v924_v8  ;;  %v1010_v8 = vld [vmem:[%s12897_s1 + $0x1de8] sm:$0xff]  ;;  %v1004_v9 = vld [vmem:[%s12897_s1 + $0x1db8] sm:$0xff] }
 0x27a   :  { %3527 = vmatprep.mubr.f32.mxu1 %v7471_v34  ;;  %v954_v34 = vld [vmem:[%s12897_s1 + $0x1c28] sm:$0xff] }
 0x27b   :  { %6180 = vmatpush1.bf16.msra.mxu0 %v6179_v24  ;;  %v948_v24 = vld [vmem:[%s12897_s1 + $0x1bf8] sm:$0xff]  ;;  %v6205_v40 = vpack.c.bf16 %v962_v35, %v954_v34  ;;  %v1027_v34 = vld [vmem:[%s12897_s1 + $0x1e70] sm:$0xff]  ;;  %v1034_v35 = vld [vmem:[%s12897_s1 + $0x1ea8] sm:$0xff] }
 0x27c   :  { %6596 = vmatpush1.bf16.msra.mxu1 %v6595_v25  ;;  %6182 = vmatprep.subr.bf16.mxu0 %v6181_v26  ;;  %v6199_v26 = vpack.c.bf16 %v929_v14, %v921_v13  ;;  %v6617_v32 = vpack.c.bf16 %v948_v24, %v940_v23  ;;  %v6217_v13 = vpack.c.bf16 %v1010_v8, %v1002_v7  ;;  %v1001_v14 = vld [vmem:[%s12897_s1 + $0x1da0] sm:$0xff]  ;;  %v1026_v23 = vld [vmem:[%s12897_s1 + $0x1e68] sm:$0xff]  ;;  %v1020_v24 = vld [vmem:[%s12897_s1 + $0x1e38] sm:$0xff] }
 0x27d   :  { %6598 = vmatprep.subr.bf16.mxu1 %v6597_v30  ;;  %v945_v30 = vld [vmem:[%s12897_s1 + $0x1be0] sm:$0xff]  ;;  %v1075_v7 = vld [vmem:[%s12897_s1 + $0x1ff0] sm:$0xff]  ;;  %v1082_v8 = vld [vmem:[%s12897_s1 + $0x2028] sm:$0xff] }
 0x27f   :  { %6184 = vmatpush1.bf16.msra.mxu0 %v6183_v37  ;;  %v964_v37 = vld [vmem:[%s12897_s1 + $0x1c78] sm:$0xff] }
 0x280   :  { %6600 = vmatpush1.bf16.msra.mxu1 %v6599_v38  ;;  %6186 = vmatprep.subr.bf16.mxu0 %v6185_v39  ;;  %v6203_v38 = vpack.c.bf16 %v945_v30, %v937_v29  ;;  %v6619_v39 = vpack.c.bf16 %v947_v33, %v939_v31  ;;  %v6621_v44 = vpack.c.bf16 %v964_v37, %v956_v36  ;;  %v1017_v30 = vld [vmem:[%s12897_s1 + $0x1e20] sm:$0xff]  ;;  %v1042_v36 = vld [vmem:[%s12897_s1 + $0x1ee8] sm:$0xff]  ;;  %v1036_v37 = vld [vmem:[%s12897_s1 + $0x1eb8] sm:$0xff] }
 0x281   :  { %6602 = vmatprep.subr.bf16.mxu1 %v6601_v43  ;;  %v955_v43 = vld [vmem:[%s12897_s1 + $0x1c30] sm:$0xff]  ;;  %v6221_v29 = vpack.c.bf16 %v1026_v23, %v1018_v20  ;;  %v1025_v31 = vld [vmem:[%s12897_s1 + $0x1e60] sm:$0xff]  ;;  %v1098_v23 = vld [vmem:[%s12897_s1 + $0x20a8] sm:$0xff] }
 0x282   :  { %v1091_v20 = vld [vmem:[%s12897_s1 + $0x2070] sm:$0xff] }
 0x283   :  { %6188 = vmatpush1.bf16.msra.mxu0 %v6187_v50  ;;  %v980_v50 = vld [vmem:[%s12897_s1 + $0x1cf8] sm:$0xff] }
 0x284   :  { %6604 = vmatpush1.bf16.msra.mxu1 %v6603_v51  ;;  %6190 = vmatprep.subr.bf16.mxu0 %v6189_v52  ;;  %v6207_v51 = vpack.c.bf16 %v961_v42, %v953_v41  ;;  %v6623_v52 = vpack.c.bf16 %v963_v45, %v955_v43  ;;  %v6625_v57 = vpack.c.bf16 %v980_v50, %v972_v49  ;;  %v1033_v42 = vld [vmem:[%s12897_s1 + $0x1ea0] sm:$0xff]  ;;  %v1058_v49 = vld [vmem:[%s12897_s1 + $0x1f68] sm:$0xff]  ;;  %v1052_v50 = vld [vmem:[%s12897_s1 + $0x1f38] sm:$0xff] }
 0x285   :  { %6606 = vmatprep.subr.bf16.mxu1 %v6605_v56  ;;  %v971_v56 = vld [vmem:[%s12897_s1 + $0x1cb0] sm:$0xff]  ;;  %v6225_v41 = vpack.c.bf16 %v1042_v36, %v1034_v35  ;;  %v1041_v43 = vld [vmem:[%s12897_s1 + $0x1ee0] sm:$0xff]  ;;  %v1114_v36 = vld [vmem:[%s12897_s1 + $0x2128] sm:$0xff] }
 0x286   :  { %v1107_v35 = vld [vmem:[%s12897_s1 + $0x20f0] sm:$0xff] }
 0x287   :  { %6192 = vmatpush1.bf16.msra.mxu0 %v6191_v62  ;;  %v996_v62 = vld [vmem:[%s12897_s1 + $0x1d78] sm:$0xff] }
 0x288   :  { %6608 = vmatpush1.bf16.msra.mxu1 %v6607_v63  ;;  %6194 = vmatprep.subr.bf16.mxu0 %v6193_v0  ;;  %v6211_v63 = vpack.c.bf16 %v977_v55, %v969_v54  ;;  %v6627_v0 = vpack.c.bf16 %v979_v58, %v971_v56  ;;  %v6629_v5 = vpack.c.bf16 %v996_v62, %v988_v61  ;;  %v1049_v55 = vld [vmem:[%s12897_s1 + $0x1f20] sm:$0xff]  ;;  %v1074_v61 = vld [vmem:[%s12897_s1 + $0x1fe8] sm:$0xff]  ;;  %v1068_v62 = vld [vmem:[%s12897_s1 + $0x1fb8] sm:$0xff] }
 0x289   :  { %v11435_v16 = vpop.f32.mrb[0].mxu0  ;;  %6610 = vmatprep.subr.bf16.mxu1 %v6609_v4  ;;  %v987_v4 = vld [vmem:[%s12897_s1 + $0x1d30] sm:$0xff]  ;;  %v6229_v54 = vpack.c.bf16 %v1058_v49, %v1050_v47  ;;  %v1057_v56 = vld [vmem:[%s12897_s1 + $0x1f60] sm:$0xff] }
 0x28a   :  { %v11446_v21 = vpop.f32.mrb[0].mxu1  ;;  %v11448_v22 = vpop.f32.mrb[1].mxu0  ;;  %v1123_v49 = vld [vmem:[%s12897_s1 + $0x2170] sm:$0xff] }
 0x28b   :  { %v11456_v25 = vpop.f32.mrb[1].mxu1  ;;  %6196 = vmatpush1.bf16.msra.mxu0 %v6195_v10  ;;  %v1012_v10 = vld [vmem:[%s12897_s1 + $0x1df8] sm:$0xff] }
 0x28c   :  { %6612 = vmatpush1.bf16.msra.mxu1 %v6611_v11  ;;  %6198 = vmatprep.subr.bf16.mxu0 %v6197_v12  ;;  %v6215_v11 = vpack.c.bf16 %v993_v3, %v985_v2  ;;  %v6631_v12 = vpack.c.bf16 %v995_v6, %v987_v4  ;;  %v6633_v18 = vpack.c.bf16 %v1012_v10, %v1004_v9  ;;  %v1065_v3 = vld [vmem:[%s12897_s1 + $0x1fa0] sm:$0xff]  ;;  %v1090_v9 = vld [vmem:[%s12897_s1 + $0x2068] sm:$0xff]  ;;  %v1084_v10 = vld [vmem:[%s12897_s1 + $0x2038] sm:$0xff] }
 0x28d   :  { %6614 = vmatprep.subr.bf16.mxu1 %v6613_v17  ;;  %v1003_v17 = vld [vmem:[%s12897_s1 + $0x1db0] sm:$0xff]  ;;  %v6233_v2 = vpack.c.bf16 %v1074_v61, %v1066_v60  ;;  %v1073_v4 = vld [vmem:[%s12897_s1 + $0x1fe0] sm:$0xff] }
 0x28e   :  { %v1131_v60 = vld [vmem:[%s12897_s1 + $0x21b0] sm:$0xff] }
 0x28f   :  { %6200 = vmatpush1.bf16.msra.mxu0 %v6199_v26  ;;  %v1028_v26 = vld [vmem:[%s12897_s1 + $0x1e78] sm:$0xff] }
 0x290   :  { %6616 = vmatpush1.bf16.msra.mxu1 %v6615_v27  ;;  %6202 = vmatprep.subr.bf16.mxu0 %v6201_v28  ;;  %v6219_v27 = vpack.c.bf16 %v1009_v15, %v1001_v14  ;;  %v6635_v28 = vpack.c.bf16 %v1011_v19, %v1003_v17  ;;  %v6637_v33 = vpack.c.bf16 %v1028_v26, %v1020_v24  ;;  %v1081_v15 = vld [vmem:[%s12897_s1 + $0x2020] sm:$0xff]  ;;  %v1106_v24 = vld [vmem:[%s12897_s1 + $0x20e8] sm:$0xff]  ;;  %v1100_v26 = vld [vmem:[%s12897_s1 + $0x20b8] sm:$0xff] }
 0x291   :  { %6618 = vmatprep.subr.bf16.mxu1 %v6617_v32  ;;  %v1019_v32 = vld [vmem:[%s12897_s1 + $0x1e30] sm:$0xff]  ;;  %v6237_v14 = vpack.c.bf16 %v1090_v9, %v1082_v8  ;;  %v1089_v17 = vld [vmem:[%s12897_s1 + $0x2060] sm:$0xff] }
 0x292   :  { %v1147_v8 = vld [vmem:[%s12897_s1 + $0x2230] sm:$0xff] }
 0x293   :  { %6204 = vmatpush1.bf16.msra.mxu0 %v6203_v38  ;;  %v1044_v38 = vld [vmem:[%s12897_s1 + $0x1ef8] sm:$0xff] }
 0x294   :  { %6620 = vmatpush1.bf16.msra.mxu1 %v6619_v39  ;;  %6206 = vmatprep.subr.bf16.mxu0 %v6205_v40  ;;  %v6223_v39 = vpack.c.bf16 %v1025_v31, %v1017_v30  ;;  %v6639_v40 = vpack.c.bf16 %v1027_v34, %v1019_v32  ;;  %v6641_v45 = vpack.c.bf16 %v1044_v38, %v1036_v37  ;;  %v1097_v31 = vld [vmem:[%s12897_s1 + $0x20a0] sm:$0xff]  ;;  %v1122_v37 = vld [vmem:[%s12897_s1 + $0x2168] sm:$0xff]  ;;  %v7472_v38 = vld [vmem:[%s12896_s0 + $0x30] sm:$0xff] }
 0x295   :  { %6622 = vmatprep.subr.bf16.mxu1 %v6621_v44  ;;  %v1035_v44 = vld [vmem:[%s12897_s1 + $0x1eb0] sm:$0xff]  ;;  %v6241_v30 = vpack.c.bf16 %v1106_v24, %v1098_v23  ;;  %v1105_v32 = vld [vmem:[%s12897_s1 + $0x20e0] sm:$0xff] }
 0x296   :  { %v1163_v23 = vld [vmem:[%s12897_s1 + $0x22b0] sm:$0xff] }
 0x297   :  { %6208 = vmatpush1.bf16.msra.mxu0 %v6207_v51  ;;  %v1060_v51 = vld [vmem:[%s12897_s1 + $0x1f78] sm:$0xff] }
 0x298   :  { %6624 = vmatpush1.bf16.msra.mxu1 %v6623_v52  ;;  %6210 = vmatprep.subr.bf16.mxu0 %v6209_v53  ;;  %v6227_v52 = vpack.c.bf16 %v1041_v43, %v1033_v42  ;;  %v6643_v53 = vpack.c.bf16 %v1043_v46, %v1035_v44  ;;  %v6645_v58 = vpack.c.bf16 %v1060_v51, %v1052_v50  ;;  %v1113_v44 = vld [vmem:[%s12897_s1 + $0x2120] sm:$0xff]  ;;  %v1115_v46 = vld [vmem:[%s12897_s1 + $0x2130] sm:$0xff]  ;;  %v1130_v50 = vld [vmem:[%s12897_s1 + $0x21a8] sm:$0xff] }
 0x299   :  { %6626 = vmatprep.subr.bf16.mxu1 %v6625_v57  ;;  %v1051_v57 = vld [vmem:[%s12897_s1 + $0x1f30] sm:$0xff]  ;;  %v6245_v43 = vpack.c.bf16 %v1122_v37, %v1114_v36  ;;  %v1138_v51 = vld [vmem:[%s12897_s1 + $0x21e8] sm:$0xff] }
 0x29a   :  { %v1179_v36 = vld [vmem:[%s12897_s1 + $0x2330] sm:$0xff] }
 0x29b   :  { %6212 = vmatpush1.bf16.msra.mxu0 %v6211_v63  ;;  %v1076_v63 = vld [vmem:[%s12897_s1 + $0x1ff8] sm:$0xff] }
 0x29c   :  { %6628 = vmatpush1.bf16.msra.mxu1 %v6627_v0  ;;  %6214 = vmatprep.subr.bf16.mxu0 %v6213_v1  ;;  %v6231_v0 = vpack.c.bf16 %v1057_v56, %v1049_v55  ;;  %v6647_v1 = vpack.c.bf16 %v1059_v59, %v1051_v57  ;;  %v6649_v6 = vpack.c.bf16 %v1076_v63, %v1068_v62  ;;  %v1137_v59 = vld [vmem:[%s12897_s1 + $0x21e0] sm:$0xff]  ;;  %v1139_v62 = vld [vmem:[%s12897_s1 + $0x21f0] sm:$0xff]  ;;  %v1146_v63 = vld [vmem:[%s12897_s1 + $0x2228] sm:$0xff] }
 0x29d   :  { %6630 = vmatprep.subr.bf16.mxu1 %v6629_v5  ;;  %v1067_v5 = vld [vmem:[%s12897_s1 + $0x1fb0] sm:$0xff]  ;;  %v6663_v56 = vpack.c.bf16 %v1123_v49, %v1115_v46  ;;  %v6249_v57 = vpack.c.bf16 %v1138_v51, %v1130_v50  ;;  %v1193_v46 = vld [vmem:[%s12897_s1 + $0x23a0] sm:$0xff] }
 0x29e   :  { %v1195_v49 = vld [vmem:[%s12897_s1 + $0x23b0] sm:$0xff] }
 0x29f   :  { %6216 = vmatpush1.bf16.msra.mxu0 %v6215_v11  ;;  %v1092_v11 = vld [vmem:[%s12897_s1 + $0x2078] sm:$0xff]  ;;  %v1203_v51 = vld [vmem:[%s12897_s1 + $0x23f0] sm:$0xff] }
 0x2a0   :  { %6632 = vmatpush1.bf16.msra.mxu1 %v6631_v12  ;;  %6218 = vmatprep.subr.bf16.mxu0 %v6217_v13  ;;  %v6235_v12 = vpack.c.bf16 %v1073_v4, %v1065_v3  ;;  %v6651_v13 = vpack.c.bf16 %v1075_v7, %v1067_v5  ;;  %v6653_v19 = vpack.c.bf16 %v1092_v11, %v1084_v10  ;;  %v1153_v7 = vld [vmem:[%s12897_s1 + $0x2260] sm:$0xff]  ;;  %v1155_v10 = vld [vmem:[%s12897_s1 + $0x2270] sm:$0xff]  ;;  %v1162_v11 = vld [vmem:[%s12897_s1 + $0x22a8] sm:$0xff] }
 0x2a1   :  { %6634 = vmatprep.subr.bf16.mxu1 %v6633_v18  ;;  %v1083_v18 = vld [vmem:[%s12897_s1 + $0x2030] sm:$0xff]  ;;  %v6667_v4 = vpack.c.bf16 %v1139_v62, %v1131_v60  ;;  %v1217_v60 = vld [vmem:[%s12897_s1 + $0x2460] sm:$0xff] }
 0x2a3   :  { %6220 = vmatpush1.bf16.msra.mxu0 %v6219_v27  ;;  %v1108_v27 = vld [vmem:[%s12897_s1 + $0x20f8] sm:$0xff] }
 0x2a4   :  { %6636 = vmatpush1.bf16.msra.mxu1 %v6635_v28  ;;  %6222 = vmatprep.subr.bf16.mxu0 %v6221_v29  ;;  %v6239_v28 = vpack.c.bf16 %v1089_v17, %v1081_v15  ;;  %v6655_v29 = vpack.c.bf16 %v1091_v20, %v1083_v18  ;;  %v6657_v34 = vpack.c.bf16 %v1108_v27, %v1100_v26  ;;  %v1169_v20 = vld [vmem:[%s12897_s1 + $0x22e0] sm:$0xff]  ;;  %v1171_v26 = vld [vmem:[%s12897_s1 + $0x22f0] sm:$0xff]  ;;  %v1178_v27 = vld [vmem:[%s12897_s1 + $0x2328] sm:$0xff] }
 0x2a5   :  { %6638 = vmatprep.subr.bf16.mxu1 %v6637_v33  ;;  %v1099_v33 = vld [vmem:[%s12897_s1 + $0x20b0] sm:$0xff]  ;;  %v6671_v17 = vpack.c.bf16 %v1155_v10, %v1147_v8  ;;  %v1233_v8 = vld [vmem:[%s12897_s1 + $0x24e0] sm:$0xff] }
 0x2a6   :  { %v6659_v42 = vpack.c.bf16 %v1107_v35, %v1099_v33  ;;  %v1185_v35 = vld [vmem:[%s12897_s1 + $0x2360] sm:$0xff] }
 0x2a7   :  { %6224 = vmatpush1.bf16.msra.mxu0 %v6223_v39  ;;  %v1116_v39 = vld [vmem:[%s12897_s1 + $0x2138] sm:$0xff] }
 0x2a8   :  { %6640 = vmatpush1.bf16.msra.mxu1 %v6639_v40  ;;  %6226 = vmatprep.subr.bf16.mxu0 %v6225_v41  ;;  %v1124_v40 = vld [vmem:[%s12897_s1 + $0x2178] sm:$0xff]  ;;  %v6243_v41 = vpack.c.bf16 %v1105_v32, %v1097_v31  ;;  %v6675_v32 = vpack.c.bf16 %v1171_v26, %v1163_v23  ;;  %v1249_v23 = vld [vmem:[%s12897_s1 + $0x2560] sm:$0xff] }
 0x2a9   :  { %6642 = vmatprep.subr.bf16.mxu1 %v6641_v45  ;;  %v1121_v45 = vld [vmem:[%s12897_s1 + $0x2160] sm:$0xff]  ;;  %v6661_v47 = vpack.c.bf16 %v1124_v40, %v1116_v39  ;;  %v1194_v39 = vld [vmem:[%s12897_s1 + $0x23a8] sm:$0xff] }
 0x2aa   :  { %v6247_v55 = vpack.c.bf16 %v1121_v45, %v1113_v44  ;;  %v1202_v40 = vld [vmem:[%s12897_s1 + $0x23e8] sm:$0xff] }
 0x2ab   :  { %6228 = vmatpush1.bf16.msra.mxu0 %v6227_v52  ;;  %v7473_v52 = vld [vmem:[%s12896_s0 + $0x48] sm:$0xff]  ;;  %v6265_v45 = vpack.c.bf16 %v1202_v40, %v1194_v39  ;;  %v1267_v39 = vld [vmem:[%s12897_s1 + $0x25f0] sm:$0xff] }
 0x2ac   :  { %6644 = vmatpush1.bf16.msra.mxu1 %v6643_v53  ;;  %6230 = vmatprep.subr.bf16.mxu0 %v6229_v54  ;;  %v1132_v53 = vld [vmem:[%s12897_s1 + $0x21b8] sm:$0xff]  ;;  %v1274_v40 = vld [vmem:[%s12897_s1 + $0x2628] sm:$0xff] }
 0x2ad   :  { %6646 = vmatprep.subr.bf16.mxu1 %v6645_v58  ;;  %v1140_v54 = vld [vmem:[%s12897_s1 + $0x21f8] sm:$0xff]  ;;  %v1129_v58 = vld [vmem:[%s12897_s1 + $0x21a0] sm:$0xff] }
 0x2ae   :  { %v6665_v61 = vpack.c.bf16 %v1140_v54, %v1132_v53  ;;  %v6251_v3 = vpack.c.bf16 %v1137_v59, %v1129_v58  ;;  %v1218_v53 = vld [vmem:[%s12897_s1 + $0x2468] sm:$0xff]  ;;  %v1212_v54 = vld [vmem:[%s12897_s1 + $0x2438] sm:$0xff]  ;;  %v1209_v59 = vld [vmem:[%s12897_s1 + $0x2420] sm:$0xff] }
 0x2af   :  { %6232 = vmatpush1.bf16.msra.mxu0 %v6231_v0  ;;  %v1154_v0 = vld [vmem:[%s12897_s1 + $0x2268] sm:$0xff] }
 0x2b0   :  { %6648 = vmatpush1.bf16.msra.mxu1 %v6647_v1  ;;  %6234 = vmatprep.subr.bf16.mxu0 %v6233_v2  ;;  %v1148_v1 = vld [vmem:[%s12897_s1 + $0x2238] sm:$0xff]  ;;  %v6253_v5 = vpack.c.bf16 %v1154_v0, %v1146_v63  ;;  %v1219_v63 = vld [vmem:[%s12897_s1 + $0x2470] sm:$0xff]  ;;  %v1226_v0 = vld [vmem:[%s12897_s1 + $0x24a8] sm:$0xff] }
 0x2b1   :  { %6650 = vmatprep.subr.bf16.mxu1 %v6649_v6  ;;  %v1156_v2 = vld [vmem:[%s12897_s1 + $0x2278] sm:$0xff]  ;;  %v1145_v6 = vld [vmem:[%s12897_s1 + $0x2220] sm:$0xff] }
 0x2b2   :  { %v6669_v9 = vpack.c.bf16 %v1156_v2, %v1148_v1  ;;  %v6255_v15 = vpack.c.bf16 %v1153_v7, %v1145_v6  ;;  %v1234_v1 = vld [vmem:[%s12897_s1 + $0x24e8] sm:$0xff]  ;;  %v1228_v2 = vld [vmem:[%s12897_s1 + $0x24b8] sm:$0xff]  ;;  %v1225_v7 = vld [vmem:[%s12897_s1 + $0x24a0] sm:$0xff] }
 0x2b3   :  { %6236 = vmatpush1.bf16.msra.mxu0 %v6235_v12  ;;  %v1170_v12 = vld [vmem:[%s12897_s1 + $0x22e8] sm:$0xff]  ;;  %v6273_v6 = vpack.c.bf16 %v1234_v1, %v1226_v0  ;;  %v1299_v0 = vld [vmem:[%s12897_s1 + $0x26f0] sm:$0xff] }
 0x2b4   :  { %6652 = vmatpush1.bf16.msra.mxu1 %v6651_v13  ;;  %6238 = vmatprep.subr.bf16.mxu0 %v6237_v14  ;;  %v1164_v13 = vld [vmem:[%s12897_s1 + $0x22b8] sm:$0xff]  ;;  %v6257_v18 = vpack.c.bf16 %v1170_v12, %v1162_v11  ;;  %v1235_v11 = vld [vmem:[%s12897_s1 + $0x24f0] sm:$0xff]  ;;  %v1242_v12 = vld [vmem:[%s12897_s1 + $0x2528] sm:$0xff] }
 0x2b5   :  { %6654 = vmatprep.subr.bf16.mxu1 %v6653_v19  ;;  %v1172_v14 = vld [vmem:[%s12897_s1 + $0x22f8] sm:$0xff]  ;;  %v1161_v19 = vld [vmem:[%s12897_s1 + $0x22a0] sm:$0xff]  ;;  %v1306_v1 = vld [vmem:[%s12897_s1 + $0x2728] sm:$0xff] }
 0x2b6   :  { %3031 = vmatmul.mubr.f32.vlgmr.msra.gmra.mrb[2].mxu0 %v7472_v38  ;;  %v6673_v24 = vpack.c.bf16 %v1172_v14, %v1164_v13  ;;  %v6259_v31 = vpack.c.bf16 %v1169_v20, %v1161_v19  ;;  %v1250_v13 = vld [vmem:[%s12897_s1 + $0x2568] sm:$0xff]  ;;  %v1244_v14 = vld [vmem:[%s12897_s1 + $0x2538] sm:$0xff]  ;;  %v1241_v20 = vld [vmem:[%s12897_s1 + $0x2520] sm:$0xff] }
 0x2b7   :  { %6240 = vmatpush1.bf16.msra.mxu0 %v6239_v28  ;;  %3528 = vmatmul.mubr.f32.vlgmr.msra.gmra.mrb[2].mxu1 %v7472_v38  ;;  %v1186_v28 = vld [vmem:[%s12897_s1 + $0x2368] sm:$0xff]  ;;  %v1187_v38 = vld [vmem:[%s12897_s1 + $0x2370] sm:$0xff]  ;;  %v6277_v19 = vpack.c.bf16 %v1250_v13, %v1242_v12 }
 0x2b8   :  { %6656 = vmatpush1.bf16.msra.mxu1 %v6655_v29  ;;  %6242 = vmatprep.subr.bf16.mxu0 %v6241_v30  ;;  %v1180_v29 = vld [vmem:[%s12897_s1 + $0x2338] sm:$0xff]  ;;  %v6261_v33 = vpack.c.bf16 %v1186_v28, %v1178_v27  ;;  %v6679_v44 = vpack.c.bf16 %v1187_v38, %v1179_v36  ;;  %v1251_v27 = vld [vmem:[%s12897_s1 + $0x2570] sm:$0xff]  ;;  %v1258_v28 = vld [vmem:[%s12897_s1 + $0x25a8] sm:$0xff] }
 0x2b9   :  { %6658 = vmatprep.subr.bf16.mxu1 %v6657_v34  ;;  %3101 = vmatprep.mubr.f32.mxu0 %v7473_v52  ;;  %v1188_v30 = vld [vmem:[%s12897_s1 + $0x2378] sm:$0xff]  ;;  %v1177_v34 = vld [vmem:[%s12897_s1 + $0x2320] sm:$0xff]  ;;  %v1315_v12 = vld [vmem:[%s12897_s1 + $0x2770] sm:$0xff] }
 0x2ba   :  { %3598 = vmatprep.mubr.f32.mxu1 %v7473_v52  ;;  %v6677_v37 = vpack.c.bf16 %v1188_v30, %v1180_v29  ;;  %v1210_v52 = vld [vmem:[%s12897_s1 + $0x2428] sm:$0xff]  ;;  %v1260_v30 = vld [vmem:[%s12897_s1 + $0x25b8] sm:$0xff]  ;;  %v1265_v36 = vld [vmem:[%s12897_s1 + $0x25e0] sm:$0xff] }
 0x2bb   :  { %6244 = vmatpush1.bf16.msra.mxu0 %v6243_v41  ;;  %v1196_v41 = vld [vmem:[%s12897_s1 + $0x23b8] sm:$0xff]  ;;  %v6269_v58 = vpack.c.bf16 %v1218_v53, %v1210_v52  ;;  %v1266_v29 = vld [vmem:[%s12897_s1 + $0x25e8] sm:$0xff]  ;;  %v1283_v52 = vld [vmem:[%s12897_s1 + $0x2670] sm:$0xff] }
 0x2bc   :  { %6660 = vmatpush1.bf16.msra.mxu1 %v6659_v42  ;;  %6246 = vmatprep.subr.bf16.mxu0 %v6245_v43  ;;  %v1204_v42 = vld [vmem:[%s12897_s1 + $0x23f8] sm:$0xff]  ;;  %v6263_v43 = vpack.c.bf16 %v1185_v35, %v1177_v34  ;;  %v6281_v34 = vpack.c.bf16 %v1266_v29, %v1258_v28  ;;  %v1257_v35 = vld [vmem:[%s12897_s1 + $0x25a0] sm:$0xff]  ;;  %v1290_v53 = vld [vmem:[%s12897_s1 + $0x26a8] sm:$0xff] }
 0x2bd   :  { %6662 = vmatprep.subr.bf16.mxu1 %v6661_v47  ;;  %v1201_v47 = vld [vmem:[%s12897_s1 + $0x23e0] sm:$0xff]  ;;  %v6681_v50 = vpack.c.bf16 %v1204_v42, %v1196_v41  ;;  %v1282_v41 = vld [vmem:[%s12897_s1 + $0x2668] sm:$0xff]  ;;  %v1276_v42 = vld [vmem:[%s12897_s1 + $0x2638] sm:$0xff] }
 0x2be   :  { %v1322_v13 = vld [vmem:[%s12897_s1 + $0x27a8] sm:$0xff]  ;;  %v1331_v28 = vld [vmem:[%s12897_s1 + $0x27f0] sm:$0xff] }
 0x2bf   :  { %6248 = vmatpush1.bf16.msra.mxu0 %v6247_v55  ;;  %v1220_v55 = vld [vmem:[%s12897_s1 + $0x2478] sm:$0xff]  ;;  %v1338_v29 = vld [vmem:[%s12897_s1 + $0x2828] sm:$0xff] }
 0x2c0   :  { %6664 = vmatpush1.bf16.msra.mxu1 %v6663_v56  ;;  %6250 = vmatprep.subr.bf16.mxu0 %v6249_v57  ;;  %v6267_v56 = vpack.c.bf16 %v1201_v47, %v1193_v46  ;;  %v6683_v57 = vpack.c.bf16 %v1203_v51, %v1195_v49  ;;  %v6685_v62 = vpack.c.bf16 %v1220_v55, %v1212_v54  ;;  %v1273_v47 = vld [vmem:[%s12897_s1 + $0x2620] sm:$0xff]  ;;  %v1298_v54 = vld [vmem:[%s12897_s1 + $0x26e8] sm:$0xff]  ;;  %v1292_v55 = vld [vmem:[%s12897_s1 + $0x26b8] sm:$0xff] }
 0x2c1   :  { %6666 = vmatprep.subr.bf16.mxu1 %v6665_v61  ;;  %v1211_v61 = vld [vmem:[%s12897_s1 + $0x2430] sm:$0xff]  ;;  %v6285_v46 = vpack.c.bf16 %v1282_v41, %v1274_v40  ;;  %v1281_v49 = vld [vmem:[%s12897_s1 + $0x2660] sm:$0xff]  ;;  %v1354_v41 = vld [vmem:[%s12897_s1 + $0x28a8] sm:$0xff] }
 0x2c2   :  { %v1347_v40 = vld [vmem:[%s12897_s1 + $0x2870] sm:$0xff] }
 0x2c3   :  { %6252 = vmatpush1.bf16.msra.mxu0 %v6251_v3  ;;  %v1236_v3 = vld [vmem:[%s12897_s1 + $0x24f8] sm:$0xff] }
 0x2c4   :  { %6668 = vmatpush1.bf16.msra.mxu1 %v6667_v4  ;;  %6254 = vmatprep.subr.bf16.mxu0 %v6253_v5  ;;  %v6271_v4 = vpack.c.bf16 %v1217_v60, %v1209_v59  ;;  %v6687_v5 = vpack.c.bf16 %v1219_v63, %v1211_v61  ;;  %v6689_v10 = vpack.c.bf16 %v1236_v3, %v1228_v2  ;;  %v1289_v60 = vld [vmem:[%s12897_s1 + $0x26a0] sm:$0xff]  ;;  %v1314_v2 = vld [vmem:[%s12897_s1 + $0x2768] sm:$0xff]  ;;  %v1308_v3 = vld [vmem:[%s12897_s1 + $0x2738] sm:$0xff] }
 0x2c5   :  { %6670 = vmatprep.subr.bf16.mxu1 %v6669_v9  ;;  %v1227_v9 = vld [vmem:[%s12897_s1 + $0x24b0] sm:$0xff]  ;;  %v6289_v59 = vpack.c.bf16 %v1298_v54, %v1290_v53  ;;  %v1297_v61 = vld [vmem:[%s12897_s1 + $0x26e0] sm:$0xff]  ;;  %v1370_v54 = vld [vmem:[%s12897_s1 + $0x2928] sm:$0xff] }
 0x2c6   :  { %v1363_v53 = vld [vmem:[%s12897_s1 + $0x28f0] sm:$0xff] }
 0x2c7   :  { %6256 = vmatpush1.bf16.msra.mxu0 %v6255_v15  ;;  %v1252_v15 = vld [vmem:[%s12897_s1 + $0x2578] sm:$0xff] }
 0x2c8   :  { %6672 = vmatpush1.bf16.msra.mxu1 %v6671_v17  ;;  %6258 = vmatprep.subr.bf16.mxu0 %v6257_v18  ;;  %v6275_v17 = vpack.c.bf16 %v1233_v8, %v1225_v7  ;;  %v6691_v18 = vpack.c.bf16 %v1235_v11, %v1227_v9  ;;  %v6693_v26 = vpack.c.bf16 %v1252_v15, %v1244_v14  ;;  %v1305_v8 = vld [vmem:[%s12897_s1 + $0x2720] sm:$0xff]  ;;  %v1330_v14 = vld [vmem:[%s12897_s1 + $0x27e8] sm:$0xff]  ;;  %v1324_v15 = vld [vmem:[%s12897_s1 + $0x27b8] sm:$0xff] }
 0x2c9   :  { %6674 = vmatprep.subr.bf16.mxu1 %v6673_v24  ;;  %v1243_v24 = vld [vmem:[%s12897_s1 + $0x2530] sm:$0xff]  ;;  %v6293_v7 = vpack.c.bf16 %v1314_v2, %v1306_v1  ;;  %v1313_v9 = vld [vmem:[%s12897_s1 + $0x2760] sm:$0xff] }
 0x2ca   :  { %v1379_v2 = vld [vmem:[%s12897_s1 + $0x2970] sm:$0xff] }
 0x2cb   :  { %6260 = vmatpush1.bf16.msra.mxu0 %v6259_v31  ;;  %v1268_v31 = vld [vmem:[%s12897_s1 + $0x25f8] sm:$0xff] }
 0x2cc   :  { %6676 = vmatpush1.bf16.msra.mxu1 %v6675_v32  ;;  %6262 = vmatprep.subr.bf16.mxu0 %v6261_v33  ;;  %v6279_v32 = vpack.c.bf16 %v1249_v23, %v1241_v20  ;;  %v6695_v33 = vpack.c.bf16 %v1251_v27, %v1243_v24  ;;  %v6697_v38 = vpack.c.bf16 %v1268_v31, %v1260_v30  ;;  %v1321_v23 = vld [vmem:[%s12897_s1 + $0x27a0] sm:$0xff]  ;;  %v1346_v30 = vld [vmem:[%s12897_s1 + $0x2868] sm:$0xff]  ;;  %v1340_v31 = vld [vmem:[%s12897_s1 + $0x2838] sm:$0xff] }
 0x2cd   :  { %6678 = vmatprep.subr.bf16.mxu1 %v6677_v37  ;;  %v1259_v37 = vld [vmem:[%s12897_s1 + $0x25b0] sm:$0xff]  ;;  %v6297_v20 = vpack.c.bf16 %v1330_v14, %v1322_v13  ;;  %v1329_v24 = vld [vmem:[%s12897_s1 + $0x27e0] sm:$0xff] }
 0x2ce   :  { %v1387_v13 = vld [vmem:[%s12897_s1 + $0x29b0] sm:$0xff] }
 0x2cf   :  { %6264 = vmatpush1.bf16.msra.mxu0 %v6263_v43  ;;  %v1284_v43 = vld [vmem:[%s12897_s1 + $0x2678] sm:$0xff] }
 0x2d0   :  { %6680 = vmatpush1.bf16.msra.mxu1 %v6679_v44  ;;  %6266 = vmatprep.subr.bf16.mxu0 %v6265_v45  ;;  %v6283_v44 = vpack.c.bf16 %v1265_v36, %v1257_v35  ;;  %v6699_v45 = vpack.c.bf16 %v1267_v39, %v1259_v37  ;;  %v6701_v51 = vpack.c.bf16 %v1284_v43, %v1276_v42  ;;  %v1337_v36 = vld [vmem:[%s12897_s1 + $0x2820] sm:$0xff]  ;;  %v1362_v42 = vld [vmem:[%s12897_s1 + $0x28e8] sm:$0xff]  ;;  %v1356_v43 = vld [vmem:[%s12897_s1 + $0x28b8] sm:$0xff] }
 0x2d1   :  { %6682 = vmatprep.subr.bf16.mxu1 %v6681_v50  ;;  %v1275_v50 = vld [vmem:[%s12897_s1 + $0x2630] sm:$0xff]  ;;  %v6301_v35 = vpack.c.bf16 %v1346_v30, %v1338_v29  ;;  %v1345_v37 = vld [vmem:[%s12897_s1 + $0x2860] sm:$0xff] }
 0x2d2   :  { %v1403_v29 = vld [vmem:[%s12897_s1 + $0x2a30] sm:$0xff] }
 0x2d3   :  { %6268 = vmatpush1.bf16.msra.mxu0 %v6267_v56  ;;  %v1300_v56 = vld [vmem:[%s12897_s1 + $0x26f8] sm:$0xff] }
 0x2d4   :  { %6684 = vmatpush1.bf16.msra.mxu1 %v6683_v57  ;;  %6270 = vmatprep.subr.bf16.mxu0 %v6269_v58  ;;  %v6287_v57 = vpack.c.bf16 %v1281_v49, %v1273_v47  ;;  %v6703_v58 = vpack.c.bf16 %v1283_v52, %v1275_v50  ;;  %v6705_v63 = vpack.c.bf16 %v1300_v56, %v1292_v55  ;;  %v1353_v49 = vld [vmem:[%s12897_s1 + $0x28a0] sm:$0xff]  ;;  %v1378_v55 = vld [vmem:[%s12897_s1 + $0x2968] sm:$0xff] }
 0x2d5   :  { %6686 = vmatprep.subr.bf16.mxu1 %v6685_v62  ;;  %v1291_v62 = vld [vmem:[%s12897_s1 + $0x26b0] sm:$0xff]  ;;  %v6305_v47 = vpack.c.bf16 %v1362_v42, %v1354_v41  ;;  %v1361_v50 = vld [vmem:[%s12897_s1 + $0x28e0] sm:$0xff] }
 0x2d6   :  { %v7474_v56 = vld [vmem:[%s12896_s0 + $0x40] sm:$0xff]  ;;  %v1419_v41 = vld [vmem:[%s12897_s1 + $0x2ab0] sm:$0xff] }
 0x2d7   :  { %6272 = vmatpush1.bf16.msra.mxu0 %v6271_v4  ;;  %v1316_v4 = vld [vmem:[%s12897_s1 + $0x2778] sm:$0xff] }
 0x2d8   :  { %6688 = vmatpush1.bf16.msra.mxu1 %v6687_v5  ;;  %6274 = vmatprep.subr.bf16.mxu0 %v6273_v6  ;;  %v6291_v5 = vpack.c.bf16 %v1297_v61, %v1289_v60  ;;  %v6707_v6 = vpack.c.bf16 %v1299_v0, %v1291_v62  ;;  %v6709_v11 = vpack.c.bf16 %v1316_v4, %v1308_v3  ;;  %v1369_v62 = vld [vmem:[%s12897_s1 + $0x2920] sm:$0xff]  ;;  %v1371_v0 = vld [vmem:[%s12897_s1 + $0x2930] sm:$0xff]  ;;  %v1386_v3 = vld [vmem:[%s12897_s1 + $0x29a8] sm:$0xff] }
 0x2d9   :  { %6690 = vmatprep.subr.bf16.mxu1 %v6689_v10  ;;  %v1307_v10 = vld [vmem:[%s12897_s1 + $0x2730] sm:$0xff]  ;;  %v6309_v61 = vpack.c.bf16 %v1378_v55, %v1370_v54  ;;  %v1394_v4 = vld [vmem:[%s12897_s1 + $0x29e8] sm:$0xff] }
 0x2da   :  { %v1435_v54 = vld [vmem:[%s12897_s1 + $0x2b30] sm:$0xff] }
 0x2db   :  { %6276 = vmatpush1.bf16.msra.mxu0 %v6275_v17  ;;  %v1332_v17 = vld [vmem:[%s12897_s1 + $0x27f8] sm:$0xff] }
 0x2dc   :  { %6692 = vmatpush1.bf16.msra.mxu1 %v6691_v18  ;;  %6278 = vmatprep.subr.bf16.mxu0 %v6277_v19  ;;  %v6295_v18 = vpack.c.bf16 %v1313_v9, %v1305_v8  ;;  %v6711_v19 = vpack.c.bf16 %v1315_v12, %v1307_v10  ;;  %v6713_v27 = vpack.c.bf16 %v1332_v17, %v1324_v15  ;;  %v1393_v12 = vld [vmem:[%s12897_s1 + $0x29e0] sm:$0xff]  ;;  %v1395_v15 = vld [vmem:[%s12897_s1 + $0x29f0] sm:$0xff]  ;;  %v1402_v17 = vld [vmem:[%s12897_s1 + $0x2a28] sm:$0xff] }
 0x2dd   :  { %6694 = vmatprep.subr.bf16.mxu1 %v6693_v26  ;;  %v1323_v26 = vld [vmem:[%s12897_s1 + $0x27b0] sm:$0xff]  ;;  %v6727_v9 = vpack.c.bf16 %v1379_v2, %v1371_v0  ;;  %v6313_v10 = vpack.c.bf16 %v1394_v4, %v1386_v3  ;;  %v1449_v0 = vld [vmem:[%s12897_s1 + $0x2ba0] sm:$0xff] }
 0x2de   :  { %v1451_v2 = vld [vmem:[%s12897_s1 + $0x2bb0] sm:$0xff] }
 0x2df   :  { %6280 = vmatpush1.bf16.msra.mxu0 %v6279_v32  ;;  %v1348_v32 = vld [vmem:[%s12897_s1 + $0x2878] sm:$0xff]  ;;  %v1459_v4 = vld [vmem:[%s12897_s1 + $0x2bf0] sm:$0xff] }
 0x2e0   :  { %6696 = vmatpush1.bf16.msra.mxu1 %v6695_v33  ;;  %6282 = vmatprep.subr.bf16.mxu0 %v6281_v34  ;;  %v6299_v33 = vpack.c.bf16 %v1329_v24, %v1321_v23  ;;  %v6715_v34 = vpack.c.bf16 %v1331_v28, %v1323_v26  ;;  %v6717_v39 = vpack.c.bf16 %v1348_v32, %v1340_v31  ;;  %v1409_v28 = vld [vmem:[%s12897_s1 + $0x2a60] sm:$0xff]  ;;  %v1411_v31 = vld [vmem:[%s12897_s1 + $0x2a70] sm:$0xff]  ;;  %v1418_v32 = vld [vmem:[%s12897_s1 + $0x2aa8] sm:$0xff] }
 0x2e1   :  { %6698 = vmatprep.subr.bf16.mxu1 %v6697_v38  ;;  %v1339_v38 = vld [vmem:[%s12897_s1 + $0x2830] sm:$0xff]  ;;  %v6731_v24 = vpack.c.bf16 %v1395_v15, %v1387_v13  ;;  %v1473_v13 = vld [vmem:[%s12897_s1 + $0x2c60] sm:$0xff] }
 0x2e3   :  { %6284 = vmatpush1.bf16.msra.mxu0 %v6283_v44  ;;  %v1364_v44 = vld [vmem:[%s12897_s1 + $0x28f8] sm:$0xff] }
 0x2e4   :  { %6700 = vmatpush1.bf16.msra.mxu1 %v6699_v45  ;;  %6286 = vmatprep.subr.bf16.mxu0 %v6285_v46  ;;  %v6303_v45 = vpack.c.bf16 %v1345_v37, %v1337_v36  ;;  %v6719_v46 = vpack.c.bf16 %v1347_v40, %v1339_v38  ;;  %v6721_v52 = vpack.c.bf16 %v1364_v44, %v1356_v43  ;;  %v1425_v40 = vld [vmem:[%s12897_s1 + $0x2ae0] sm:$0xff]  ;;  %v1427_v43 = vld [vmem:[%s12897_s1 + $0x2af0] sm:$0xff]  ;;  %v1434_v44 = vld [vmem:[%s12897_s1 + $0x2b28] sm:$0xff] }
 0x2e5   :  { %6702 = vmatprep.subr.bf16.mxu1 %v6701_v51  ;;  %v1355_v51 = vld [vmem:[%s12897_s1 + $0x28b0] sm:$0xff]  ;;  %v6735_v37 = vpack.c.bf16 %v1411_v31, %v1403_v29  ;;  %v1489_v29 = vld [vmem:[%s12897_s1 + $0x2ce0] sm:$0xff] }
 0x2e6   :  { %v6723_v60 = vpack.c.bf16 %v1363_v53, %v1355_v51  ;;  %v1441_v53 = vld [vmem:[%s12897_s1 + $0x2b60] sm:$0xff] }
 0x2e7   :  { %6288 = vmatpush1.bf16.msra.mxu0 %v6287_v57  ;;  %v1372_v57 = vld [vmem:[%s12897_s1 + $0x2938] sm:$0xff] }
 0x2e8   :  { %6704 = vmatpush1.bf16.msra.mxu1 %v6703_v58  ;;  %6290 = vmatprep.subr.bf16.mxu0 %v6289_v59  ;;  %v1380_v58 = vld [vmem:[%s12897_s1 + $0x2978] sm:$0xff]  ;;  %v6307_v59 = vpack.c.bf16 %v1361_v50, %v1353_v49  ;;  %v6739_v50 = vpack.c.bf16 %v1427_v43, %v1419_v41  ;;  %v1505_v41 = vld [vmem:[%s12897_s1 + $0x2d60] sm:$0xff] }
 0x2e9   :  { %6706 = vmatprep.subr.bf16.mxu1 %v6705_v63  ;;  %v1377_v63 = vld [vmem:[%s12897_s1 + $0x2960] sm:$0xff]  ;;  %v6725_v1 = vpack.c.bf16 %v1380_v58, %v1372_v57  ;;  %v1450_v57 = vld [vmem:[%s12897_s1 + $0x2ba8] sm:$0xff] }
 0x2ea   :  { %v6311_v8 = vpack.c.bf16 %v1377_v63, %v1369_v62  ;;  %v1458_v58 = vld [vmem:[%s12897_s1 + $0x2be8] sm:$0xff] }
 0x2eb   :  { %6292 = vmatpush1.bf16.msra.mxu0 %v6291_v5  ;;  %v7475_v5 = vld [vmem:[%s12896_s0 + $0x58] sm:$0xff]  ;;  %v6329_v63 = vpack.c.bf16 %v1458_v58, %v1450_v57  ;;  %v1523_v57 = vld [vmem:[%s12897_s1 + $0x2df0] sm:$0xff]  ;;  %v1530_v58 = vld [vmem:[%s12897_s1 + $0x2e28] sm:$0xff] }
 0x2ec   :  { %6708 = vmatpush1.bf16.msra.mxu1 %v6707_v6  ;;  %6294 = vmatprep.subr.bf16.mxu0 %v6293_v7  ;;  %v1388_v6 = vld [vmem:[%s12897_s1 + $0x29b8] sm:$0xff] }
 0x2ed   :  { %6710 = vmatprep.subr.bf16.mxu1 %v6709_v11  ;;  %v1396_v7 = vld [vmem:[%s12897_s1 + $0x29f8] sm:$0xff]  ;;  %v1385_v11 = vld [vmem:[%s12897_s1 + $0x29a0] sm:$0xff] }
 0x2ee   :  { %v6729_v14 = vpack.c.bf16 %v1396_v7, %v1388_v6  ;;  %v6315_v23 = vpack.c.bf16 %v1393_v12, %v1385_v11  ;;  %v1474_v6 = vld [vmem:[%s12897_s1 + $0x2c68] sm:$0xff]  ;;  %v1468_v7 = vld [vmem:[%s12897_s1 + $0x2c38] sm:$0xff]  ;;  %v1465_v12 = vld [vmem:[%s12897_s1 + $0x2c20] sm:$0xff] }
 0x2ef   :  { %6296 = vmatpush1.bf16.msra.mxu0 %v6295_v18  ;;  %v1410_v18 = vld [vmem:[%s12897_s1 + $0x2a68] sm:$0xff] }
 0x2f0   :  { %6712 = vmatpush1.bf16.msra.mxu1 %v6711_v19  ;;  %6298 = vmatprep.subr.bf16.mxu0 %v6297_v20  ;;  %v1404_v19 = vld [vmem:[%s12897_s1 + $0x2a38] sm:$0xff]  ;;  %v6317_v26 = vpack.c.bf16 %v1410_v18, %v1402_v17  ;;  %v1475_v17 = vld [vmem:[%s12897_s1 + $0x2c70] sm:$0xff]  ;;  %v1482_v18 = vld [vmem:[%s12897_s1 + $0x2ca8] sm:$0xff] }
 0x2f1   :  { %6714 = vmatprep.subr.bf16.mxu1 %v6713_v27  ;;  %v1412_v20 = vld [vmem:[%s12897_s1 + $0x2a78] sm:$0xff]  ;;  %v1401_v27 = vld [vmem:[%s12897_s1 + $0x2a20] sm:$0xff] }
 0x2f2   :  { %v6733_v30 = vpack.c.bf16 %v1412_v20, %v1404_v19  ;;  %v6319_v36 = vpack.c.bf16 %v1409_v28, %v1401_v27  ;;  %v1490_v19 = vld [vmem:[%s12897_s1 + $0x2ce8] sm:$0xff]  ;;  %v1484_v20 = vld [vmem:[%s12897_s1 + $0x2cb8] sm:$0xff]  ;;  %v1481_v28 = vld [vmem:[%s12897_s1 + $0x2ca0] sm:$0xff] }
 0x2f3   :  { %6300 = vmatpush1.bf16.msra.mxu0 %v6299_v33  ;;  %v1426_v33 = vld [vmem:[%s12897_s1 + $0x2ae8] sm:$0xff]  ;;  %v6337_v27 = vpack.c.bf16 %v1490_v19, %v1482_v18  ;;  %v1555_v18 = vld [vmem:[%s12897_s1 + $0x2ef0] sm:$0xff] }
 0x2f4   :  { %6716 = vmatpush1.bf16.msra.mxu1 %v6715_v34  ;;  %6302 = vmatprep.subr.bf16.mxu0 %v6301_v35  ;;  %v1420_v34 = vld [vmem:[%s12897_s1 + $0x2ab8] sm:$0xff]  ;;  %v6321_v38 = vpack.c.bf16 %v1426_v33, %v1418_v32  ;;  %v1491_v32 = vld [vmem:[%s12897_s1 + $0x2cf0] sm:$0xff]  ;;  %v1498_v33 = vld [vmem:[%s12897_s1 + $0x2d28] sm:$0xff] }
 0x2f5   :  { %6718 = vmatprep.subr.bf16.mxu1 %v6717_v39  ;;  %v1428_v35 = vld [vmem:[%s12897_s1 + $0x2af8] sm:$0xff]  ;;  %v1417_v39 = vld [vmem:[%s12897_s1 + $0x2aa0] sm:$0xff]  ;;  %v1562_v19 = vld [vmem:[%s12897_s1 + $0x2f28] sm:$0xff] }
 0x2f6   :  { %3102 = vmatmul.mubr.f32.vlgmr.msra.gmra.mrb[2].mxu0 %v7474_v56  ;;  %v6737_v42 = vpack.c.bf16 %v1428_v35, %v1420_v34  ;;  %v6323_v49 = vpack.c.bf16 %v1425_v40, %v1417_v39  ;;  %v1506_v34 = vld [vmem:[%s12897_s1 + $0x2d68] sm:$0xff]  ;;  %v1500_v35 = vld [vmem:[%s12897_s1 + $0x2d38] sm:$0xff]  ;;  %v1497_v40 = vld [vmem:[%s12897_s1 + $0x2d20] sm:$0xff] }
 0x2f7   :  { %6304 = vmatpush1.bf16.msra.mxu0 %v6303_v45  ;;  %3599 = vmatmul.mubr.f32.vlgmr.msra.gmra.mrb[2].mxu1 %v7474_v56  ;;  %v1442_v45 = vld [vmem:[%s12897_s1 + $0x2b68] sm:$0xff]  ;;  %v1443_v56 = vld [vmem:[%s12897_s1 + $0x2b70] sm:$0xff]  ;;  %v6341_v39 = vpack.c.bf16 %v1506_v34, %v1498_v33 }
 0x2f8   :  { %6720 = vmatpush1.bf16.msra.mxu1 %v6719_v46  ;;  %6306 = vmatprep.subr.bf16.mxu0 %v6305_v47  ;;  %v1436_v46 = vld [vmem:[%s12897_s1 + $0x2b38] sm:$0xff]  ;;  %v6325_v51 = vpack.c.bf16 %v1442_v45, %v1434_v44  ;;  %v6743_v62 = vpack.c.bf16 %v1443_v56, %v1435_v54  ;;  %v1507_v44 = vld [vmem:[%s12897_s1 + $0x2d70] sm:$0xff]  ;;  %v1514_v45 = vld [vmem:[%s12897_s1 + $0x2da8] sm:$0xff] }
 0x2f9   :  { %6722 = vmatprep.subr.bf16.mxu1 %v6721_v52  ;;  %3172 = vmatprep.mubr.f32.mxu0 %v7475_v5  ;;  %v1444_v47 = vld [vmem:[%s12897_s1 + $0x2b78] sm:$0xff]  ;;  %v1433_v52 = vld [vmem:[%s12897_s1 + $0x2b20] sm:$0xff]  ;;  %v1571_v33 = vld [vmem:[%s12897_s1 + $0x2f70] sm:$0xff] }
 0x2fa   :  { %3669 = vmatprep.mubr.f32.mxu1 %v7475_v5  ;;  %v6741_v55 = vpack.c.bf16 %v1444_v47, %v1436_v46  ;;  %v1466_v5 = vld [vmem:[%s12897_s1 + $0x2c28] sm:$0xff]  ;;  %v1516_v47 = vld [vmem:[%s12897_s1 + $0x2db8] sm:$0xff]  ;;  %v1521_v54 = vld [vmem:[%s12897_s1 + $0x2de0] sm:$0xff] }
 0x2fb   :  { %6308 = vmatpush1.bf16.msra.mxu0 %v6307_v59  ;;  %v1452_v59 = vld [vmem:[%s12897_s1 + $0x2bb8] sm:$0xff]  ;;  %v6333_v11 = vpack.c.bf16 %v1474_v6, %v1466_v5  ;;  %v1522_v46 = vld [vmem:[%s12897_s1 + $0x2de8] sm:$0xff]  ;;  %v1539_v5 = vld [vmem:[%s12897_s1 + $0x2e70] sm:$0xff] }
 0x2fc   :  { %6724 = vmatpush1.bf16.msra.mxu1 %v6723_v60  ;;  %6310 = vmatprep.subr.bf16.mxu0 %v6309_v61  ;;  %v1460_v60 = vld [vmem:[%s12897_s1 + $0x2bf8] sm:$0xff]  ;;  %v6327_v61 = vpack.c.bf16 %v1441_v53, %v1433_v52  ;;  %v6345_v52 = vpack.c.bf16 %v1522_v46, %v1514_v45  ;;  %v1513_v53 = vld [vmem:[%s12897_s1 + $0x2da0] sm:$0xff]  ;;  %v1546_v6 = vld [vmem:[%s12897_s1 + $0x2ea8] sm:$0xff] }
 0x2fd   :  { %6726 = vmatprep.subr.bf16.mxu1 %v6725_v1  ;;  %v1457_v1 = vld [vmem:[%s12897_s1 + $0x2be0] sm:$0xff]  ;;  %v6745_v3 = vpack.c.bf16 %v1460_v60, %v1452_v59  ;;  %v1538_v59 = vld [vmem:[%s12897_s1 + $0x2e68] sm:$0xff]  ;;  %v1532_v60 = vld [vmem:[%s12897_s1 + $0x2e38] sm:$0xff] }
 0x2fe   :  { %v1578_v34 = vld [vmem:[%s12897_s1 + $0x2fa8] sm:$0xff]  ;;  %v1587_v45 = vld [vmem:[%s12897_s1 + $0x2ff0] sm:$0xff] }
 0x2ff   :  { %6312 = vmatpush1.bf16.msra.mxu0 %v6311_v8  ;;  %v1476_v8 = vld [vmem:[%s12897_s1 + $0x2c78] sm:$0xff]  ;;  %v1594_v46 = vld [vmem:[%s12897_s1 + $0x3028] sm:$0xff] }
 0x300   :  { %6728 = vmatpush1.bf16.msra.mxu1 %v6727_v9  ;;  %6314 = vmatprep.subr.bf16.mxu0 %v6313_v10  ;;  %v6331_v9 = vpack.c.bf16 %v1457_v1, %v1449_v0  ;;  %v6747_v10 = vpack.c.bf16 %v1459_v4, %v1451_v2  ;;  %v6749_v15 = vpack.c.bf16 %v1476_v8, %v1468_v7  ;;  %v1529_v1 = vld [vmem:[%s12897_s1 + $0x2e20] sm:$0xff]  ;;  %v1554_v7 = vld [vmem:[%s12897_s1 + $0x2ee8] sm:$0xff]  ;;  %v1548_v8 = vld [vmem:[%s12897_s1 + $0x2eb8] sm:$0xff] }
 0x301   :  { %6730 = vmatprep.subr.bf16.mxu1 %v6729_v14  ;;  %v1467_v14 = vld [vmem:[%s12897_s1 + $0x2c30] sm:$0xff]  ;;  %v6349_v0 = vpack.c.bf16 %v1538_v59, %v1530_v58  ;;  %v1537_v2 = vld [vmem:[%s12897_s1 + $0x2e60] sm:$0xff]  ;;  %v1610_v59 = vld [vmem:[%s12897_s1 + $0x30a8] sm:$0xff] }
 0x302   :  { %v1603_v58 = vld [vmem:[%s12897_s1 + $0x3070] sm:$0xff] }
 0x303   :  { %6316 = vmatpush1.bf16.msra.mxu0 %v6315_v23  ;;  %v1492_v23 = vld [vmem:[%s12897_s1 + $0x2cf8] sm:$0xff] }
 0x304   :  { %6732 = vmatpush1.bf16.msra.mxu1 %v6731_v24  ;;  %6318 = vmatprep.subr.bf16.mxu0 %v6317_v26  ;;  %v6335_v24 = vpack.c.bf16 %v1473_v13, %v1465_v12  ;;  %v6751_v26 = vpack.c.bf16 %v1475_v17, %v1467_v14  ;;  %v6753_v31 = vpack.c.bf16 %v1492_v23, %v1484_v20  ;;  %v1545_v13 = vld [vmem:[%s12897_s1 + $0x2ea0] sm:$0xff]  ;;  %v1570_v20 = vld [vmem:[%s12897_s1 + $0x2f68] sm:$0xff]  ;;  %v1564_v23 = vld [vmem:[%s12897_s1 + $0x2f38] sm:$0xff] }
 0x305   :  { %6734 = vmatprep.subr.bf16.mxu1 %v6733_v30  ;;  %v1483_v30 = vld [vmem:[%s12897_s1 + $0x2cb0] sm:$0xff]  ;;  %v6353_v12 = vpack.c.bf16 %v1554_v7, %v1546_v6  ;;  %v1553_v14 = vld [vmem:[%s12897_s1 + $0x2ee0] sm:$0xff]  ;;  %v1626_v7 = vld [vmem:[%s12897_s1 + $0x3128] sm:$0xff] }
 0x306   :  { %v1619_v6 = vld [vmem:[%s12897_s1 + $0x30f0] sm:$0xff] }
 0x307   :  { %6320 = vmatpush1.bf16.msra.mxu0 %v6319_v36  ;;  %v1508_v36 = vld [vmem:[%s12897_s1 + $0x2d78] sm:$0xff] }
 0x308   :  { %6736 = vmatpush1.bf16.msra.mxu1 %v6735_v37  ;;  %6322 = vmatprep.subr.bf16.mxu0 %v6321_v38  ;;  %v6339_v37 = vpack.c.bf16 %v1489_v29, %v1481_v28  ;;  %v6755_v38 = vpack.c.bf16 %v1491_v32, %v1483_v30  ;;  %v6757_v43 = vpack.c.bf16 %v1508_v36, %v1500_v35  ;;  %v1561_v29 = vld [vmem:[%s12897_s1 + $0x2f20] sm:$0xff]  ;;  %v1586_v35 = vld [vmem:[%s12897_s1 + $0x2fe8] sm:$0xff]  ;;  %v1580_v36 = vld [vmem:[%s12897_s1 + $0x2fb8] sm:$0xff] }
 0x309   :  { %6738 = vmatprep.subr.bf16.mxu1 %v6737_v42  ;;  %v1499_v42 = vld [vmem:[%s12897_s1 + $0x2d30] sm:$0xff]  ;;  %v6357_v28 = vpack.c.bf16 %v1570_v20, %v1562_v19  ;;  %v1569_v30 = vld [vmem:[%s12897_s1 + $0x2f60] sm:$0xff] }
 0x30a   :  { %v1635_v20 = vld [vmem:[%s12897_s1 + $0x3170] sm:$0xff] }
 0x30b   :  { %6324 = vmatpush1.bf16.msra.mxu0 %v6323_v49  ;;  %v1524_v49 = vld [vmem:[%s12897_s1 + $0x2df8] sm:$0xff] }
 0x30c   :  { %6740 = vmatpush1.bf16.msra.mxu1 %v6739_v50  ;;  %6326 = vmatprep.subr.bf16.mxu0 %v6325_v51  ;;  %v6343_v50 = vpack.c.bf16 %v1505_v41, %v1497_v40  ;;  %v6759_v51 = vpack.c.bf16 %v1507_v44, %v1499_v42  ;;  %v6761_v56 = vpack.c.bf16 %v1524_v49, %v1516_v47  ;;  %v1577_v41 = vld [vmem:[%s12897_s1 + $0x2fa0] sm:$0xff]  ;;  %v1602_v47 = vld [vmem:[%s12897_s1 + $0x3068] sm:$0xff]  ;;  %v1596_v49 = vld [vmem:[%s12897_s1 + $0x3038] sm:$0xff] }
 0x30d   :  { %6742 = vmatprep.subr.bf16.mxu1 %v6741_v55  ;;  %v1515_v55 = vld [vmem:[%s12897_s1 + $0x2db0] sm:$0xff]  ;;  %v6361_v40 = vpack.c.bf16 %v1586_v35, %v1578_v34  ;;  %v1585_v42 = vld [vmem:[%s12897_s1 + $0x2fe0] sm:$0xff]  ;;  %v1658_v35 = vld [vmem:[%s12897_s1 + $0x3228] sm:$0xff] }
 0x30e   :  { %v1651_v34 = vld [vmem:[%s12897_s1 + $0x31f0] sm:$0xff] }
 0x30f   :  { %6328 = vmatpush1.bf16.msra.mxu0 %v6327_v61  ;;  %v1540_v61 = vld [vmem:[%s12897_s1 + $0x2e78] sm:$0xff] }
 0x310   :  { %6744 = vmatpush1.bf16.msra.mxu1 %v6743_v62  ;;  %6330 = vmatprep.subr.bf16.mxu0 %v6329_v63  ;;  %v6347_v62 = vpack.c.bf16 %v1521_v54, %v1513_v53  ;;  %v6763_v63 = vpack.c.bf16 %v1523_v57, %v1515_v55  ;;  %v6765_v4 = vpack.c.bf16 %v1540_v61, %v1532_v60  ;;  %v1593_v54 = vld [vmem:[%s12897_s1 + $0x3020] sm:$0xff]  ;;  %v1618_v60 = vld [vmem:[%s12897_s1 + $0x30e8] sm:$0xff]  ;;  %v1612_v61 = vld [vmem:[%s12897_s1 + $0x30b8] sm:$0xff] }
 0x311   :  { %6746 = vmatprep.subr.bf16.mxu1 %v6745_v3  ;;  %v1531_v3 = vld [vmem:[%s12897_s1 + $0x2e30] sm:$0xff]  ;;  %v6365_v53 = vpack.c.bf16 %v1602_v47, %v1594_v46  ;;  %v1601_v55 = vld [vmem:[%s12897_s1 + $0x3060] sm:$0xff]  ;;  %v1674_v47 = vld [vmem:[%s12897_s1 + $0x32a8] sm:$0xff] }
 0x312   :  { %v1667_v46 = vld [vmem:[%s12897_s1 + $0x3270] sm:$0xff] }
 0x313   :  { %6332 = vmatpush1.bf16.msra.mxu0 %v6331_v9  ;;  %v1556_v9 = vld [vmem:[%s12897_s1 + $0x2ef8] sm:$0xff] }
 0x314   :  { %6748 = vmatpush1.bf16.msra.mxu1 %v6747_v10  ;;  %6334 = vmatprep.subr.bf16.mxu0 %v6333_v11  ;;  %v6351_v10 = vpack.c.bf16 %v1537_v2, %v1529_v1  ;;  %v6767_v11 = vpack.c.bf16 %v1539_v5, %v1531_v3  ;;  %v6769_v17 = vpack.c.bf16 %v1556_v9, %v1548_v8  ;;  %v1609_v2 = vld [vmem:[%s12897_s1 + $0x30a0] sm:$0xff]  ;;  %v1634_v8 = vld [vmem:[%s12897_s1 + $0x3168] sm:$0xff]  ;;  %v7476_v9 = vld [vmem:[%s12896_s0 + $0x50] sm:$0xff] }
 0x315   :  { %6750 = vmatprep.subr.bf16.mxu1 %v6749_v15  ;;  %v1547_v15 = vld [vmem:[%s12897_s1 + $0x2eb0] sm:$0xff]  ;;  %v6369_v1 = vpack.c.bf16 %v1618_v60, %v1610_v59  ;;  %v1617_v3 = vld [vmem:[%s12897_s1 + $0x30e0] sm:$0xff] }
 0x316   :  { %v1683_v60 = vld [vmem:[%s12897_s1 + $0x32f0] sm:$0xff] }
 0x317   :  { %6336 = vmatpush1.bf16.msra.mxu0 %v6335_v24  ;;  %v1572_v24 = vld [vmem:[%s12897_s1 + $0x2f78] sm:$0xff] }
 0x318   :  { %6752 = vmatpush1.bf16.msra.mxu1 %v6751_v26  ;;  %6338 = vmatprep.subr.bf16.mxu0 %v6337_v27  ;;  %v6355_v26 = vpack.c.bf16 %v1553_v14, %v1545_v13  ;;  %v6771_v27 = vpack.c.bf16 %v1555_v18, %v1547_v15  ;;  %v6773_v32 = vpack.c.bf16 %v1572_v24, %v1564_v23  ;;  %v1625_v15 = vld [vmem:[%s12897_s1 + $0x3120] sm:$0xff]  ;;  %v1627_v18 = vld [vmem:[%s12897_s1 + $0x3130] sm:$0xff]  ;;  %v1642_v23 = vld [vmem:[%s12897_s1 + $0x31a8] sm:$0xff] }
 0x319   :  { %6754 = vmatprep.subr.bf16.mxu1 %v6753_v31  ;;  %v1563_v31 = vld [vmem:[%s12897_s1 + $0x2f30] sm:$0xff]  ;;  %v6373_v14 = vpack.c.bf16 %v1634_v8, %v1626_v7  ;;  %v1650_v24 = vld [vmem:[%s12897_s1 + $0x31e8] sm:$0xff] }
 0x31a   :  { %v1691_v7 = vld [vmem:[%s12897_s1 + $0x3330] sm:$0xff] }
 0x31b   :  { %6340 = vmatpush1.bf16.msra.mxu0 %v6339_v37  ;;  %v1588_v37 = vld [vmem:[%s12897_s1 + $0x2ff8] sm:$0xff] }
 0x31c   :  { %6756 = vmatpush1.bf16.msra.mxu1 %v6755_v38  ;;  %6342 = vmatprep.subr.bf16.mxu0 %v6341_v39  ;;  %v6359_v38 = vpack.c.bf16 %v1569_v30, %v1561_v29  ;;  %v6775_v39 = vpack.c.bf16 %v1571_v33, %v1563_v31  ;;  %v6777_v44 = vpack.c.bf16 %v1588_v37, %v1580_v36  ;;  %v1641_v31 = vld [vmem:[%s12897_s1 + $0x31a0] sm:$0xff]  ;;  %v1643_v33 = vld [vmem:[%s12897_s1 + $0x31b0] sm:$0xff]  ;;  %v1666_v36 = vld [vmem:[%s12897_s1 + $0x3268] sm:$0xff] }
 0x31d   :  { %6758 = vmatprep.subr.bf16.mxu1 %v6757_v43  ;;  %v1579_v43 = vld [vmem:[%s12897_s1 + $0x2fb0] sm:$0xff]  ;;  %v6791_v29 = vpack.c.bf16 %v1635_v20, %v1627_v18  ;;  %v6377_v30 = vpack.c.bf16 %v1650_v24, %v1642_v23  ;;  %v1660_v37 = vld [vmem:[%s12897_s1 + $0x3238] sm:$0xff]  ;;  %v1705_v20 = vld [vmem:[%s12897_s1 + $0x33a0] sm:$0xff] }
 0x31e   :  { %v1713_v23 = vld [vmem:[%s12897_s1 + $0x33e0] sm:$0xff]  ;;  %v1707_v24 = vld [vmem:[%s12897_s1 + $0x33b0] sm:$0xff] }
 0x31f   :  { %6344 = vmatpush1.bf16.msra.mxu0 %v6343_v50  ;;  %v1604_v50 = vld [vmem:[%s12897_s1 + $0x3078] sm:$0xff] }
 0x320   :  { %6760 = vmatpush1.bf16.msra.mxu1 %v6759_v51  ;;  %6346 = vmatprep.subr.bf16.mxu0 %v6345_v52  ;;  %v6363_v51 = vpack.c.bf16 %v1585_v42, %v1577_v41  ;;  %v6779_v52 = vpack.c.bf16 %v1587_v45, %v1579_v43  ;;  %v6781_v57 = vpack.c.bf16 %v1604_v50, %v1596_v49  ;;  %v1657_v42 = vld [vmem:[%s12897_s1 + $0x3220] sm:$0xff]  ;;  %v1682_v49 = vld [vmem:[%s12897_s1 + $0x32e8] sm:$0xff]  ;;  %v1719_v50 = vlaneseq }
 0x321   :  { %6762 = vmatprep.subr.bf16.mxu1 %v6761_v56  ;;  %v1595_v56 = vld [vmem:[%s12897_s1 + $0x3030] sm:$0xff]  ;;  %v6381_v41 = vpack.c.bf16 %v1666_v36, %v1658_v35  ;;  %v1665_v43 = vld [vmem:[%s12897_s1 + $0x3260] sm:$0xff] }
 0x322   :  { %v3755_v35 = vld [vmem:[#allocation2] sm:$0xff] }
 0x323   :  { %6348 = vmatpush1.bf16.msra.mxu0 %v6347_v62  ;;  %v1620_v62 = vld [vmem:[%s12897_s1 + $0x30f8] sm:$0xff]  ;;  %v3759_v36 = vld [vmem:[#allocation2 + $0x20] sm:$0xff] }
 0x324   :  { %6764 = vmatpush1.bf16.msra.mxu1 %v6763_v63  ;;  %6350 = vmatprep.subr.bf16.mxu0 %v6349_v0  ;;  %v6367_v63 = vpack.c.bf16 %v1601_v55, %v1593_v54  ;;  %v6783_v0 = vpack.c.bf16 %v1603_v58, %v1595_v56  ;;  %v6785_v5 = vpack.c.bf16 %v1620_v62, %v1612_v61  ;;  %v1673_v56 = vld [vmem:[%s12897_s1 + $0x32a0] sm:$0xff]  ;;  %v1675_v58 = vld [vmem:[%s12897_s1 + $0x32b0] sm:$0xff]  ;;  %v1690_v61 = vld [vmem:[%s12897_s1 + $0x3328] sm:$0xff] }
 0x325   :  { %6766 = vmatprep.subr.bf16.mxu1 %v6765_v4  ;;  %v1611_v4 = vld [vmem:[%s12897_s1 + $0x30b0] sm:$0xff]  ;;  %v6385_v55 = vpack.c.bf16 %v1682_v49, %v1674_v47  ;;  %v1698_v62 = vld [vmem:[%s12897_s1 + $0x3368] sm:$0xff]  ;;  %v3763_v47 = vld [vmem:[#allocation2 + $0x40] sm:$0xff] }
 0x326   :  { %v6787_v13 = vpack.c.bf16 %v1619_v6, %v1611_v4  ;;  %v6389_v4 = vpack.c.bf16 %v1698_v62, %v1690_v61  ;;  %v1697_v6 = vld [vmem:[%s12897_s1 + $0x3360] sm:$0xff] }
 0x327   :  { %6352 = vmatpush1.bf16.msra.mxu0 %v6351_v10  ;;  %v1628_v10 = vld [vmem:[%s12897_s1 + $0x3138] sm:$0xff]  ;;  %v3767_v49 = vld [vmem:[#allocation2 + $0x60] sm:$0xff] }
 0x328   :  { %6768 = vmatpush1.bf16.msra.mxu1 %v6767_v11  ;;  %6354 = vmatprep.subr.bf16.mxu0 %v6353_v12  ;;  %v1636_v11 = vld [vmem:[%s12897_s1 + $0x3178] sm:$0xff]  ;;  %v6371_v12 = vpack.c.bf16 %v1617_v3, %v1609_v2  ;;  %v6803_v3 = vpack.c.bf16 %v1683_v60, %v1675_v58  ;;  %v3771_v62 = vld [vmem:[#allocation2 + $0x80] sm:$0xff] }
 0x329   :  { %6770 = vmatprep.subr.bf16.mxu1 %v6769_v17  ;;  %v1633_v17 = vld [vmem:[%s12897_s1 + $0x3160] sm:$0xff]  ;;  %v6789_v19 = vpack.c.bf16 %v1636_v11, %v1628_v10  ;;  %v1706_v10 = vld [vmem:[%s12897_s1 + $0x33a8] sm:$0xff]  ;;  %v3778_v58 = vld [vmem:[#allocation2 + $0xb8] sm:$0xff] }
 0x32a   :  { %v1714_v11 = vld [vmem:[%s12897_s1 + $0x33e8] sm:$0xff] }
 0x32b   :  { %6356 = vmatpush1.bf16.msra.mxu0 %v6355_v26  ;;  %v1644_v26 = vld [vmem:[%s12897_s1 + $0x31b8] sm:$0xff] }
 0x32c   :  { %6772 = vmatpush1.bf16.msra.mxu1 %v6771_v27  ;;  %6358 = vmatprep.subr.bf16.mxu0 %v6357_v28  ;;  %v1652_v27 = vld [vmem:[%s12897_s1 + $0x31f8] sm:$0xff]  ;;  %v6375_v28 = vpack.c.bf16 %v1633_v17, %v1625_v15  ;;  %v12633_v15 = vld [vmem:[%s12898_s2] sm:$0xff] }
 0x32d   :  { %6774 = vmatprep.subr.bf16.mxu1 %v6773_v32  ;;  %v1649_v32 = vld [vmem:[%s12897_s1 + $0x31e0] sm:$0xff] }
 0x32f   :  { %6360 = vmatpush1.bf16.msra.mxu0 %v6359_v38  ;;  %v1668_v38 = vld [vmem:[%s12897_s1 + $0x3278] sm:$0xff] }
 0x330   :  { %6776 = vmatpush1.bf16.msra.mxu1 %v6775_v39  ;;  %6362 = vmatprep.subr.bf16.mxu0 %v6361_v40  ;;  %v6379_v39 = vpack.c.bf16 %v1649_v32, %v1641_v31  ;;  %v6795_v40 = vpack.c.bf16 %v1651_v34, %v1643_v33  ;;  %v6797_v45 = vpack.c.bf16 %v1668_v38, %v1660_v37  ;;  %v3758_v31 = vld [vmem:[#allocation2 + $0x18] sm:$0xff]  ;;  %v3757_v38 = vld [vmem:[#allocation2 + $0x10] sm:$0xff] }
 0x331   :  { %6778 = vmatprep.subr.bf16.mxu1 %v6777_v44  ;;  %v1659_v44 = vld [vmem:[%s12897_s1 + $0x3230] sm:$0xff]  ;;  %v3762_v32 = vld [vmem:[#allocation2 + $0x38] sm:$0xff]  ;;  %v6395_v33 = vpack.c.bf16 %v1713_v23, %v1705_v20  ;;  %v3792_v20 = vld [vmem:[#allocation2 + $0x128] sm:$0xff] }
 0x332   :  { %v6799_v54 = vpack.c.bf16 %v1667_v46, %v1659_v44  ;;  %v7069_v37 = vpack.c.bf16 %v3762_v32, %v3758_v31  ;;  %v3766_v44 = vld [vmem:[#allocation2 + $0x58] sm:$0xff]  ;;  %v3789_v31 = vld [vmem:[#allocation2 + $0x110] sm:$0xff] }
 0x333   :  { %6364 = vmatpush1.bf16.msra.mxu0 %v6363_v51  ;;  %v1676_v51 = vld [vmem:[%s12897_s1 + $0x32b8] sm:$0xff] }
 0x334   :  { %6780 = vmatpush1.bf16.msra.mxu1 %v6779_v52  ;;  %6366 = vmatprep.subr.bf16.mxu0 %v6365_v53  ;;  %v1684_v52 = vld [vmem:[%s12897_s1 + $0x32f8] sm:$0xff]  ;;  %v6383_v53 = vpack.c.bf16 %v1665_v43, %v1657_v42  ;;  %v3768_v42 = vld [vmem:[#allocation2 + $0x68] sm:$0xff]  ;;  %v6815_v43 = vpack.c.bf16 %v3759_v36, %v3755_v35 }
 0x335   :  { %6782 = vmatprep.subr.bf16.mxu1 %v6781_v57  ;;  %v1681_v57 = vld [vmem:[%s12897_s1 + $0x32e0] sm:$0xff]  ;;  %v6801_v59 = vpack.c.bf16 %v1684_v52, %v1676_v51  ;;  %v3769_v52 = vld [vmem:[#allocation2 + $0x70] sm:$0xff]  ;;  %v3790_v23 = vld [vmem:[#allocation2 + $0x118] sm:$0xff] }
 0x336   :  { %3173 = vmatmul.mubr.f32.vlgmr.msra.gmra.mrb[2].mxu0 %v7476_v9  ;;  %v6387_v2 = vpack.c.bf16 %v1681_v57, %v1673_v56  ;;  %v3774_v57 = vld [vmem:[#allocation2 + $0x98] sm:$0xff] }
 0x337   :  { %6368 = vmatpush1.bf16.msra.mxu0 %v6367_v63  ;;  %3670 = vmatmul.mubr.f32.vlgmr.msra.gmra.mrb[2].mxu1 %v7476_v9  ;;  %v12597_v63 = vshrl.u32 %v1719_v50, 7  ;;  %v1699_v9 = vld [vmem:[%s12897_s1 + $0x3370] sm:$0xff]  ;;  %v3798_v35 = vld [vmem:[#allocation2 + $0x158] sm:$0xff] }
 0x338   :  { %6784 = vmatpush1.bf16.msra.mxu1 %v6783_v0  ;;  %6370 = vmatprep.subr.bf16.mxu0 %v6369_v1  ;;  %v1692_v0 = vld [vmem:[%s12897_s1 + $0x3338] sm:$0xff]  ;;  %v6807_v18 = vpack.c.bf16 %v1699_v9, %v1691_v7  ;;  %v3765_v50 = vld [vmem:[#allocation2 + $0x50] sm:$0xff] }
 0x339   :  { %6786 = vmatprep.subr.bf16.mxu1 %v6785_v5  ;;  %3243 = vmatprep.mubr.f32.mxu0 %v7507_v48  ;;  %v1700_v1 = vld [vmem:[%s12897_s1 + $0x3378] sm:$0xff]  ;;  %v1689_v5 = vld [vmem:[%s12897_s1 + $0x3320] sm:$0xff]  ;;  %v7075_v60 = vpack.c.bf16 %v3769_v52, %v3765_v50 }
 0x33a   :  { %3740 = vmatprep.mubr.f32.mxu1 %v7507_v48  ;;  %v6793_v48 = vpack.c.bf16 %v1652_v27, %v1644_v26  ;;  %v6805_v8 = vpack.c.bf16 %v1700_v1, %v1692_v0  ;;  %v6391_v17 = vpack.c.bf16 %v1697_v6, %v1689_v5  ;;  %v1715_v27 = vld [vmem:[%s12897_s1 + $0x33f0] sm:$0xff]  ;;  %v3775_v0 = vld [vmem:[#allocation2 + $0xa0] sm:$0xff]  ;;  %v3784_v5 = vld [vmem:[#allocation2 + $0xe8] sm:$0xff] }
 0x33b   :  { %6372 = vmatpush1.bf16.msra.mxu0 %v6371_v12  ;;  %v1725_v12 = vsub.s32 1, %v12597_v63  ;;  %v3773_v1 = vld [vmem:[#allocation2 + $0x90] sm:$0xff]  ;;  %v3782_v6 = vld [vmem:[#allocation2 + $0xd8] sm:$0xff] }
 0x33c   :  { %6788 = vmatpush1.bf16.msra.mxu1 %v6787_v13  ;;  %6374 = vmatprep.subr.bf16.mxu0 %v6373_v14  ;;  %v1708_v13 = vld [vmem:[%s12897_s1 + $0x33b8] sm:$0xff] }
 0x33d   :  { %6790 = vmatprep.subr.bf16.mxu1 %v6789_v19  ;;  %v1716_v14 = vld [vmem:[%s12897_s1 + $0x33f8] sm:$0xff]  ;;  %v6393_v19 = vpack.c.bf16 %v1714_v11, %v1706_v10  ;;  %v3779_v11 = vld [vmem:[#allocation2 + $0xc0] sm:$0xff] }
 0x33e   :  { %v6809_v26 = vpack.c.bf16 %v1716_v14, %v1708_v13  ;;  %v3786_v7 = vld [vmem:[#allocation2 + $0xf8] sm:$0xff]  ;;  %v3783_v13 = vld [vmem:[#allocation2 + $0xe0] sm:$0xff]  ;;  %v3781_v14 = vld [vmem:[#allocation2 + $0xd0] sm:$0xff] }
 0x33f   :  { %6376 = vmatpush1.bf16.msra.mxu0 %v6375_v28  ;;  %v3756_v28 = vld [vmem:[#allocation2 + $0x8] sm:$0xff]  ;;  %v3802_v36 = vld [vmem:[#allocation2 + $0x178] sm:$0xff] }
 0x340   :  { %6792 = vmatpush1.bf16.msra.mxu1 %v6791_v29  ;;  %6378 = vmatprep.subr.bf16.mxu0 %v6377_v30  ;;  %v3760_v29 = vld [vmem:[#allocation2 + $0x28] sm:$0xff]  ;;  %v1726_v30 = vrot.slane %v12633_v15, %v1725_v12 }
 0x341   :  { %6794 = vmatprep.subr.bf16.mxu1 %v6793_v48  ;;  %v6811_v48 = vpack.c.bf16 %v1715_v27, %v1707_v24  ;;  %v6813_v34 = vpack.c.bf16 %v3760_v29, %v3756_v28  ;;  %v3794_v24 = vld [vmem:[#allocation2 + $0x138] sm:$0xff]  ;;  %v3787_v29 = vld [vmem:[#allocation2 + $0x100] sm:$0xff] }
 0x342   :  { %v7085_v32 = vpack.c.bf16 %v3794_v24, %v3790_v23  ;;  %v3828_v23 = vld [vmem:[#allocation2 + $0x248] sm:$0xff] }
 0x343   :  { %6380 = vmatpush1.bf16.msra.mxu0 %v6379_v39  ;;  %v3761_v39 = vld [vmem:[#allocation2 + $0x30] sm:$0xff]  ;;  %v3832_v24 = vld [vmem:[#allocation2 + $0x268] sm:$0xff] }
 0x344   :  { %6796 = vmatpush1.bf16.msra.mxu1 %v6795_v40  ;;  %6382 = vmatprep.subr.bf16.mxu0 %v6381_v41  ;;  %v7390_v40 = vadd.f32 %v11448_v22, %v1726_v30  ;;  %v3764_v41 = vld [vmem:[#allocation2 + $0x48] sm:$0xff]  ;;  %v7071_v46 = vpack.c.bf16 %v3761_v39, %v3757_v38  ;;  %v7477_v22 = vld [vmem:[%s12896_s0 + $0x60] sm:$0xff] }
 0x345   :  { %6798 = vmatprep.subr.bf16.mxu1 %v6797_v45  ;;  %v3770_v45 = vld [vmem:[#allocation2 + $0x78] sm:$0xff]  ;;  %v6817_v51 = vpack.c.bf16 %v3768_v42, %v3764_v41  ;;  %v3791_v30 = vld [vmem:[#allocation2 + $0x120] sm:$0xff]  ;;  %v3797_v42 = vld [vmem:[#allocation2 + $0x150] sm:$0xff] }
 0x346   :  { %v7073_v56 = vpack.c.bf16 %v3770_v45, %v3766_v44  ;;  %v3799_v41 = vld [vmem:[#allocation2 + $0x160] sm:$0xff]  ;;  %v3801_v44 = vld [vmem:[#allocation2 + $0x170] sm:$0xff]  ;;  %v3804_v45 = vld [vmem:[#allocation2 + $0x188] sm:$0xff] }
 0x347   :  { %6384 = vmatpush1.bf16.msra.mxu0 %v6383_v53  ;;  %v3772_v53 = vld [vmem:[#allocation2 + $0x88] sm:$0xff] }
 0x348   :  { %6800 = vmatpush1.bf16.msra.mxu1 %v6799_v54  ;;  %6386 = vmatprep.subr.bf16.mxu0 %v6385_v55  ;;  %v3776_v54 = vld [vmem:[#allocation2 + $0xa8] sm:$0xff]  ;;  %v3748_v55 = vmax.f32 %v7390_v40, 0.0  ;;  %v3795_v40 = vld [vmem:[#allocation2 + $0x140] sm:$0xff] }
 0x349   :  { %6802 = vmatprep.subr.bf16.mxu1 %v6801_v59  ;;  %v6819_v59 = vpack.c.bf16 %v3767_v49, %v3763_v47  ;;  %v6821_v61 = vpack.c.bf16 %v3776_v54, %v3772_v53  ;;  %v3806_v47 = vld [vmem:[#allocation2 + $0x198] sm:$0xff]  ;;  %v6835_v50 = vpack.c.bf16 %v3799_v41, %v3795_v40  ;;  %v3803_v53 = vld [vmem:[#allocation2 + $0x180] sm:$0xff] }
 0x34a   :  { %v3810_v49 = vld [vmem:[#allocation2 + $0x1b8] sm:$0xff]  ;;  %v3807_v54 = vld [vmem:[#allocation2 + $0x1a0] sm:$0xff] }
 0x34b   :  { %6388 = vmatpush1.bf16.msra.mxu0 %v6387_v2  ;;  %v7077_v2 = vpack.c.bf16 %v3778_v58, %v3774_v57  ;;  %v3812_v57 = vld [vmem:[#allocation2 + $0x1c8] sm:$0xff] }
 0x34c   :  { %6804 = vmatpush1.bf16.msra.mxu1 %v6803_v3  ;;  %6390 = vmatprep.subr.bf16.mxu0 %v6389_v4  ;;  %v3777_v3 = vld [vmem:[#allocation2 + $0xb0] sm:$0xff]  ;;  %v3780_v4 = vld [vmem:[#allocation2 + $0xc8] sm:$0xff] }
 0x34d   :  { %6806 = vmatprep.subr.bf16.mxu1 %v6805_v8  ;;  %v6823_v8 = vpack.c.bf16 %v3775_v0, %v3771_v62  ;;  %v7079_v9 = vpack.c.bf16 %v3777_v3, %v3773_v1  ;;  %v6825_v10 = vpack.c.bf16 %v3784_v5, %v3780_v4  ;;  %v3816_v58 = vld [vmem:[#allocation2 + $0x1e8] sm:$0xff]  ;;  %v3811_v1 = vld [vmem:[#allocation2 + $0x1c0] sm:$0xff]  ;;  %v3813_v3 = vld [vmem:[#allocation2 + $0x1d0] sm:$0xff] }
 0x34e   :  { %v6841_v0 = vpack.c.bf16 %v3816_v58, %v3812_v57  ;;  %v3817_v5 = vld [vmem:[#allocation2 + $0x1f0] sm:$0xff] }
 0x34f   :  { %6392 = vmatpush1.bf16.msra.mxu0 %v6391_v17  ;;  %v7081_v17 = vpack.c.bf16 %v3786_v7, %v3782_v6  ;;  %v3820_v6 = vld [vmem:[#allocation2 + $0x208] sm:$0xff]  ;;  %v3849_v58 = vld [vmem:[#allocation2 + $0x2f0] sm:$0xff] }
 0x350   :  { %6808 = vmatpush1.bf16.msra.mxu1 %v6807_v18  ;;  %6394 = vmatprep.subr.bf16.mxu0 %v6393_v19  ;;  %v3785_v18 = vld [vmem:[#allocation2 + $0xf0] sm:$0xff]  ;;  %v3788_v19 = vld [vmem:[#allocation2 + $0x108] sm:$0xff] }
 0x351   :  { %6810 = vmatprep.subr.bf16.mxu1 %v6809_v26  ;;  %v6827_v26 = vpack.c.bf16 %v3783_v13, %v3779_v11  ;;  %v7083_v27 = vpack.c.bf16 %v3785_v18, %v3781_v14  ;;  %v6829_v28 = vpack.c.bf16 %v3792_v20, %v3788_v19  ;;  %v3824_v7 = vld [vmem:[#allocation2 + $0x228] sm:$0xff]  ;;  %v7099_v11 = vpack.c.bf16 %v3817_v5, %v3813_v3  ;;  %v3819_v14 = vld [vmem:[#allocation2 + $0x200] sm:$0xff]  ;;  %v3821_v18 = vld [vmem:[#allocation2 + $0x210] sm:$0xff] }
 0x352   :  { %v6845_v13 = vpack.c.bf16 %v3824_v7, %v3820_v6  ;;  %v3825_v20 = vld [vmem:[#allocation2 + $0x230] sm:$0xff]  ;;  %v3851_v3 = vld [vmem:[#allocation2 + $0x300] sm:$0xff] }
 0x353   :  { %6396 = vmatpush1.bf16.msra.mxu0 %v6395_v33  ;;  %v3793_v33 = vld [vmem:[#allocation2 + $0x130] sm:$0xff] }
 0x354   :  { %6812 = vmatpush1.bf16.msra.mxu1 %v6811_v48  ;;  %6814 = vmatprep.subr.bf16.mxu0 %v6813_v34  ;;  %v3796_v48 = vld [vmem:[#allocation2 + $0x148] sm:$0xff]  ;;  %v7087_v38 = vpack.c.bf16 %v3793_v33, %v3789_v31  ;;  %v3827_v31 = vld [vmem:[#allocation2 + $0x240] sm:$0xff]  ;;  %v3829_v33 = vld [vmem:[#allocation2 + $0x250] sm:$0xff] }
 0x355   :  { %7070 = vmatprep.subr.bf16.mxu1 %v7069_v37  ;;  %v3800_v34 = vld [vmem:[#allocation2 + $0x168] sm:$0xff]  ;;  %v6831_v37 = vpack.c.bf16 %v3791_v30, %v3787_v29  ;;  %v7103_v29 = vpack.c.bf16 %v3825_v20, %v3821_v18  ;;  %v6849_v30 = vpack.c.bf16 %v3832_v24, %v3828_v23  ;;  %v3853_v5 = vld [vmem:[#allocation2 + $0x310] sm:$0xff]  ;;  %v3859_v18 = vld [vmem:[#allocation2 + $0x340] sm:$0xff] }
 0x356   :  { %3244 = vmatmul.mubr.f32.vlgmr.msra.gmra.mrb[2].mxu0 %v7477_v22  ;;  %v6833_v39 = vpack.c.bf16 %v3800_v34, %v3796_v48  ;;  %v3833_v34 = vld [vmem:[#allocation2 + $0x270] sm:$0xff] }
 0x357   :  { %3741 = vmatmul.mubr.f32.vlgmr.msra.gmra.mrb[2].mxu1 %v7477_v22  ;;  %6816 = vmatpush1.bf16.msra.mxu0 %v6815_v43  ;;  %v7089_v43 = vpack.c.bf16 %v3802_v36, %v3798_v35  ;;  %v7093_v22 = vpack.c.bf16 %v3810_v49, %v3806_v47  ;;  %v3836_v35 = vld [vmem:[#allocation2 + $0x288] sm:$0xff]  ;;  %v7107_v40 = vpack.c.bf16 %v3833_v34, %v3829_v33  ;;  %v3857_v7 = vld [vmem:[#allocation2 + $0x330] sm:$0xff]  ;;  %v3871_v34 = vld [vmem:[#allocation2 + $0x3a0] sm:$0xff] }
 0x358   :  { %4353 = vmatprep.mubr.f32.mxu0 %v3748_v55  ;;  %7072 = vmatpush1.bf16.msra.mxu1 %v7071_v46  ;;  %v3808_v46 = vld [vmem:[#allocation2 + $0x1a8] sm:$0xff]  ;;  %v3861_v20 = vld [vmem:[#allocation2 + $0x350] sm:$0xff] }
 0x359   :  { %4637 = vmatprep.mubr.f32.mxu1 %v3748_v55  ;;  %6818 = vmatprep.subr.bf16.mxu0 %v6817_v51  ;;  %v7091_v51 = vpack.c.bf16 %v3801_v44, %v3797_v42  ;;  %v6837_v52 = vpack.c.bf16 %v3808_v46, %v3804_v45  ;;  %v3805_v55 = vld [vmem:[#allocation2 + $0x190] sm:$0xff]  ;;  %v3840_v36 = vld [vmem:[#allocation2 + $0x2a8] sm:$0xff]  ;;  %v3835_v42 = vld [vmem:[#allocation2 + $0x280] sm:$0xff] }
 0x35a   :  { %7074 = vmatprep.subr.bf16.mxu1 %v7073_v56  ;;  %v3809_v56 = vld [vmem:[#allocation2 + $0x1b0] sm:$0xff]  ;;  %v6853_v41 = vpack.c.bf16 %v3840_v36, %v3836_v35  ;;  %v3844_v47 = vld [vmem:[#allocation2 + $0x2c8] sm:$0xff] }
 0x35b   :  { %6820 = vmatpush1.bf16.msra.mxu0 %v6819_v59  ;;  %v3814_v59 = vld [vmem:[#allocation2 + $0x1d8] sm:$0xff]  ;;  %v7095_v62 = vpack.c.bf16 %v3809_v56, %v3805_v55  ;;  %v3837_v44 = vld [vmem:[#allocation2 + $0x290] sm:$0xff]  ;;  %v3848_v49 = vld [vmem:[#allocation2 + $0x2e8] sm:$0xff] }
 0x35c   :  { %7076 = vmatpush1.bf16.msra.mxu1 %v7075_v60  ;;  %6822 = vmatprep.subr.bf16.mxu0 %v6821_v61  ;;  %v3818_v60 = vld [vmem:[#allocation2 + $0x1f8] sm:$0xff]  ;;  %v6839_v61 = vpack.c.bf16 %v3807_v54, %v3803_v53  ;;  %v3841_v46 = vld [vmem:[#allocation2 + $0x2b0] sm:$0xff]  ;;  %v6857_v54 = vpack.c.bf16 %v3848_v49, %v3844_v47  ;;  %v3843_v55 = vld [vmem:[#allocation2 + $0x2c0] sm:$0xff] }
 0x35d   :  { %7078 = vmatprep.subr.bf16.mxu1 %v7077_v2  ;;  %v3815_v2 = vld [vmem:[#allocation2 + $0x1e0] sm:$0xff]  ;;  %v7097_v4 = vpack.c.bf16 %v3818_v60, %v3814_v59  ;;  %v7111_v53 = vpack.c.bf16 %v3841_v46, %v3837_v44  ;;  %v3845_v56 = vld [vmem:[#allocation2 + $0x2d0] sm:$0xff]  ;;  %v3852_v59 = vld [vmem:[#allocation2 + $0x308] sm:$0xff] }
 0x35e   :  { %v3856_v60 = vld [vmem:[#allocation2 + $0x328] sm:$0xff]  ;;  %v3865_v24 = vld [vmem:[#allocation2 + $0x370] sm:$0xff]  ;;  %v3875_v47 = vld [vmem:[#allocation2 + $0x3c0] sm:$0xff] }
 0x35f   :  { %6824 = vmatpush1.bf16.msra.mxu0 %v6823_v8  ;;  %v3822_v8 = vld [vmem:[#allocation2 + $0x218] sm:$0xff]  ;;  %v3869_v35 = vld [vmem:[#allocation2 + $0x390] sm:$0xff]  ;;  %v3879_v49 = vld [vmem:[#allocation2 + $0x3e0] sm:$0xff] }
 0x360   :  { %7080 = vmatpush1.bf16.msra.mxu1 %v7079_v9  ;;  %6826 = vmatprep.subr.bf16.mxu0 %v6825_v10  ;;  %v3826_v9 = vld [vmem:[#allocation2 + $0x238] sm:$0xff]  ;;  %v6843_v10 = vpack.c.bf16 %v3815_v2, %v3811_v1  ;;  %v7115_v1 = vpack.c.bf16 %v3849_v58, %v3845_v56  ;;  %v6861_v2 = vpack.c.bf16 %v3856_v60, %v3852_v59 }
 0x361   :  { %7082 = vmatprep.subr.bf16.mxu1 %v7081_v17  ;;  %v3823_v17 = vld [vmem:[#allocation2 + $0x220] sm:$0xff]  ;;  %v7101_v19 = vpack.c.bf16 %v3826_v9, %v3822_v8  ;;  %v3860_v8 = vld [vmem:[#allocation2 + $0x348] sm:$0xff]  ;;  %v3890_v56 = vld [vmem:[#allocation2 + $0x438] sm:$0xff] }
 0x362   :  { %v3864_v9 = vld [vmem:[#allocation2 + $0x368] sm:$0xff] }
 0x363   :  { %6828 = vmatpush1.bf16.msra.mxu0 %v6827_v26  ;;  %v3830_v26 = vld [vmem:[#allocation2 + $0x258] sm:$0xff] }
 0x364   :  { %7084 = vmatpush1.bf16.msra.mxu1 %v7083_v27  ;;  %6830 = vmatprep.subr.bf16.mxu0 %v6829_v28  ;;  %v3834_v27 = vld [vmem:[#allocation2 + $0x278] sm:$0xff]  ;;  %v6847_v28 = vpack.c.bf16 %v3823_v17, %v3819_v14  ;;  %v7119_v14 = vpack.c.bf16 %v3857_v7, %v3853_v5  ;;  %v6865_v17 = vpack.c.bf16 %v3864_v9, %v3860_v8  ;;  %v3891_v9 = vld [vmem:[#allocation2 + $0x440] sm:$0xff] }
 0x365   :  { %7086 = vmatprep.subr.bf16.mxu1 %v7085_v32  ;;  %v3831_v32 = vld [vmem:[#allocation2 + $0x260] sm:$0xff]  ;;  %v7105_v48 = vpack.c.bf16 %v3834_v27, %v3830_v26  ;;  %v3868_v26 = vld [vmem:[#allocation2 + $0x388] sm:$0xff]  ;;  %v3898_v7 = vld [vmem:[#allocation2 + $0x478] sm:$0xff] }
 0x366   :  { %v3872_v27 = vld [vmem:[#allocation2 + $0x3a8] sm:$0xff] }
 0x367   :  { %6832 = vmatpush1.bf16.msra.mxu0 %v6831_v37  ;;  %v3838_v37 = vld [vmem:[#allocation2 + $0x298] sm:$0xff]  ;;  %v6869_v33 = vpack.c.bf16 %v3872_v27, %v3868_v26 }
 0x368   :  { %7088 = vmatpush1.bf16.msra.mxu1 %v7087_v38  ;;  %6834 = vmatprep.subr.bf16.mxu0 %v6833_v39  ;;  %v3842_v38 = vld [vmem:[#allocation2 + $0x2b8] sm:$0xff]  ;;  %v6851_v39 = vpack.c.bf16 %v3831_v32, %v3827_v31  ;;  %v1721_v31 = vsub.s32 0, %v12597_v63  ;;  %v7123_v32 = vpack.c.bf16 %v3865_v24, %v3861_v20 }
 0x369   :  { %7090 = vmatprep.subr.bf16.mxu1 %v7089_v43  ;;  %v3839_v43 = vld [vmem:[#allocation2 + $0x2a0] sm:$0xff]  ;;  %v7109_v45 = vpack.c.bf16 %v3842_v38, %v3838_v37  ;;  %v3873_v37 = vld [vmem:[#allocation2 + $0x3b0] sm:$0xff]  ;;  %v3876_v38 = vld [vmem:[#allocation2 + $0x3c8] sm:$0xff] }
 0x36a   :  { %v1722_v44 = vrot.slane %v12633_v15, %v1721_v31  ;;  %v3902_v20 = vld [vmem:[#allocation2 + $0x498] sm:$0xff] }
 0x36b   :  { %6836 = vmatpush1.bf16.msra.mxu0 %v6835_v50  ;;  %v3846_v50 = vld [vmem:[#allocation2 + $0x2d8] sm:$0xff] }
 0x36c   :  { %7092 = vmatpush1.bf16.msra.mxu1 %v7091_v51  ;;  %6838 = vmatprep.subr.bf16.mxu0 %v6837_v52  ;;  %v3850_v51 = vld [vmem:[#allocation2 + $0x2f8] sm:$0xff]  ;;  %v6855_v52 = vpack.c.bf16 %v3839_v43, %v3835_v42  ;;  %v7389_v58 = vadd.f32 %v11435_v16, %v1722_v44 }
 0x36d   :  { %7094 = vmatprep.subr.bf16.mxu1 %v7093_v22  ;;  %v3847_v22 = vld [vmem:[#allocation2 + $0x2e0] sm:$0xff]  ;;  %v7113_v57 = vpack.c.bf16 %v3850_v51, %v3846_v50  ;;  %v3882_v42 = vld [vmem:[#allocation2 + $0x3f8] sm:$0xff]  ;;  %v3877_v50 = vld [vmem:[#allocation2 + $0x3d0] sm:$0xff] }
 0x36e   :  { %v3747_v8 = vmax.f32 %v7389_v58, 0.0  ;;  %v3924_v58 = vld [vmem:[#allocation2 + $0x548] sm:$0xff] }
 0x36f   :  { %6840 = vmatpush1.bf16.msra.mxu0 %v6839_v61  ;;  %v3854_v61 = vld [vmem:[#allocation2 + $0x318] sm:$0xff] }
 0x370   :  { %7096 = vmatpush1.bf16.msra.mxu1 %v7095_v62  ;;  %6842 = vmatprep.subr.bf16.mxu0 %v6841_v0  ;;  %v3858_v62 = vld [vmem:[#allocation2 + $0x338] sm:$0xff]  ;;  %v6859_v0 = vpack.c.bf16 %v3847_v22, %v3843_v55 }
 0x371   :  { %7098 = vmatprep.subr.bf16.mxu1 %v7097_v4  ;;  %v3855_v4 = vld [vmem:[#allocation2 + $0x320] sm:$0xff]  ;;  %v7117_v6 = vpack.c.bf16 %v3858_v62, %v3854_v61  ;;  %v3886_v22 = vld [vmem:[#allocation2 + $0x418] sm:$0xff] }
 0x372   :  { %v3883_v61 = vld [vmem:[#allocation2 + $0x400] sm:$0xff] }
 0x373   :  { %6844 = vmatpush1.bf16.msra.mxu0 %v6843_v10  ;;  %v3862_v10 = vld [vmem:[#allocation2 + $0x358] sm:$0xff]  ;;  %v3887_v62 = vld [vmem:[#allocation2 + $0x420] sm:$0xff] }
 0x374   :  { %7100 = vmatpush1.bf16.msra.mxu1 %v7099_v11  ;;  %6846 = vmatprep.subr.bf16.mxu0 %v6845_v13  ;;  %v3866_v11 = vld [vmem:[#allocation2 + $0x378] sm:$0xff]  ;;  %v6863_v13 = vpack.c.bf16 %v3855_v4, %v3851_v3  ;;  %v3892_v4 = vld [vmem:[#allocation2 + $0x448] sm:$0xff]  ;;  %v6879_v5 = vpack.c.bf16 %v3887_v62, %v3883_v61 }
 0x375   :  { %7102 = vmatprep.subr.bf16.mxu1 %v7101_v19  ;;  %v3863_v19 = vld [vmem:[#allocation2 + $0x360] sm:$0xff]  ;;  %v7121_v23 = vpack.c.bf16 %v3866_v11, %v3862_v10  ;;  %v3893_v11 = vld [vmem:[#allocation2 + $0x450] sm:$0xff]  ;;  %v3930_v61 = vld [vmem:[#allocation2 + $0x578] sm:$0xff] }
 0x376   :  { %v3895_v10 = vld [vmem:[#allocation2 + $0x460] sm:$0xff] }
 0x377   :  { %6848 = vmatpush1.bf16.msra.mxu0 %v6847_v28  ;;  %v3870_v28 = vld [vmem:[#allocation2 + $0x398] sm:$0xff]  ;;  %v6883_v24 = vpack.c.bf16 %v3895_v10, %v3891_v9 }
 0x378   :  { %7104 = vmatpush1.bf16.msra.mxu1 %v7103_v29  ;;  %6850 = vmatprep.subr.bf16.mxu0 %v6849_v30  ;;  %v3874_v29 = vld [vmem:[#allocation2 + $0x3b8] sm:$0xff]  ;;  %v6867_v30 = vpack.c.bf16 %v3863_v19, %v3859_v18  ;;  %v3904_v18 = vld [vmem:[#allocation2 + $0x4a8] sm:$0xff] }
 0x379   :  { %7106 = vmatprep.subr.bf16.mxu1 %v7105_v48  ;;  %v3867_v48 = vld [vmem:[#allocation2 + $0x380] sm:$0xff]  ;;  %v7125_v36 = vpack.c.bf16 %v3874_v29, %v3870_v28 }
 0x37a   :  { %v6871_v43 = vpack.c.bf16 %v3871_v34, %v3867_v48  ;;  %v3899_v28 = vld [vmem:[#allocation2 + $0x480] sm:$0xff]  ;;  %v3908_v48 = vld [vmem:[#allocation2 + $0x4c8] sm:$0xff] }
 0x37b   :  { %6852 = vmatpush1.bf16.msra.mxu0 %v6851_v39  ;;  %v3880_v39 = vld [vmem:[#allocation2 + $0x3e8] sm:$0xff]  ;;  %v3903_v29 = vld [vmem:[#allocation2 + $0x4a0] sm:$0xff] }
 0x37c   :  { %7108 = vmatpush1.bf16.msra.mxu1 %v7107_v40  ;;  %6854 = vmatprep.subr.bf16.mxu0 %v6853_v41  ;;  %v1733_v40 = vsub.s32 3, %v12597_v63  ;;  %v3878_v41 = vld [vmem:[#allocation2 + $0x3d8] sm:$0xff]  ;;  %v6873_v46 = vpack.c.bf16 %v3880_v39, %v3876_v38  ;;  %v3912_v34 = vld [vmem:[#allocation2 + $0x4e8] sm:$0xff] }
 0x37d   :  { %7110 = vmatprep.subr.bf16.mxu1 %v7109_v45  ;;  %v7127_v45 = vpack.c.bf16 %v3873_v37, %v3869_v35  ;;  %v7129_v51 = vpack.c.bf16 %v3882_v42, %v3878_v41  ;;  %v3910_v35 = vld [vmem:[#allocation2 + $0x4d8] sm:$0xff]  ;;  %v6887_v37 = vpack.c.bf16 %v3903_v29, %v3899_v28  ;;  %v6889_v39 = vpack.c.bf16 %v3912_v34, %v3908_v48  ;;  %v3907_v41 = vld [vmem:[#allocation2 + $0x4c0] sm:$0xff]  ;;  %v3945_v48 = vld [vmem:[#allocation2 + $0x5f0] sm:$0xff] }
 0x37e   :  { %v1734_v55 = vrot.slane %v12633_v15, %v1733_v40  ;;  %v3896_v15 = vld [vmem:[#allocation2 + $0x468] sm:$0xff]  ;;  %v3911_v42 = vld [vmem:[#allocation2 + $0x4e0] sm:$0xff] }
 0x37f   :  { %6856 = vmatpush1.bf16.msra.mxu0 %v6855_v52  ;;  %v3881_v52 = vld [vmem:[#allocation2 + $0x3f0] sm:$0xff]  ;;  %v3939_v29 = vld [vmem:[#allocation2 + $0x5c0] sm:$0xff]  ;;  %v3948_v34 = vld [vmem:[#allocation2 + $0x608] sm:$0xff] }
 0x380   :  { %7112 = vmatpush1.bf16.msra.mxu1 %v7111_v53  ;;  %6858 = vmatprep.subr.bf16.mxu0 %v6857_v54  ;;  %v3884_v53 = vld [vmem:[#allocation2 + $0x408] sm:$0xff]  ;;  %v7131_v59 = vpack.c.bf16 %v3881_v52, %v3877_v50  ;;  %v7392_v3 = vadd.f32 %v11456_v25, %v1734_v55  ;;  %v3922_v50 = vld [vmem:[#allocation2 + $0x538] sm:$0xff]  ;;  %v3919_v55 = vld [vmem:[#allocation2 + $0x520] sm:$0xff] }
 0x381   :  { %7114 = vmatprep.subr.bf16.mxu1 %v7113_v57  ;;  %v3888_v54 = vld [vmem:[#allocation2 + $0x428] sm:$0xff]  ;;  %v6875_v57 = vpack.c.bf16 %v3879_v49, %v3875_v47  ;;  %v3918_v49 = vld [vmem:[#allocation2 + $0x518] sm:$0xff] }
 0x382   :  { %v6877_v60 = vpack.c.bf16 %v3888_v54, %v3884_v53  ;;  %v3750_v19 = vmax.f32 %v7392_v3, 0.0  ;;  %v3920_v47 = vld [vmem:[#allocation2 + $0x528] sm:$0xff]  ;;  %v3915_v54 = vld [vmem:[#allocation2 + $0x500] sm:$0xff] }
 0x383   :  { %6860 = vmatpush1.bf16.msra.mxu0 %v6859_v0  ;;  %v7133_v0 = vpack.c.bf16 %v3890_v56, %v3886_v22  ;;  %v3917_v22 = vld [vmem:[#allocation2 + $0x510] sm:$0xff]  ;;  %v7149_v56 = vpack.c.bf16 %v3922_v50, %v3918_v49  ;;  %v6895_v62 = vpack.c.bf16 %v3919_v55, %v3915_v54  ;;  %v3927_v3 = vld [vmem:[#allocation2 + $0x560] sm:$0xff]  ;;  %v3960_v49 = vld [vmem:[#allocation2 + $0x668] sm:$0xff] }
 0x384   :  { %7116 = vmatpush1.bf16.msra.mxu1 %v7115_v1  ;;  %6862 = vmatprep.subr.bf16.mxu0 %v6861_v2  ;;  %v3885_v1 = vld [vmem:[#allocation2 + $0x410] sm:$0xff]  ;;  %v3958_v50 = vld [vmem:[#allocation2 + $0x658] sm:$0xff]  ;;  %v3955_v55 = vld [vmem:[#allocation2 + $0x640] sm:$0xff] }
 0x385   :  { %7118 = vmatprep.subr.bf16.mxu1 %v7117_v6  ;;  %v3889_v2 = vld [vmem:[#allocation2 + $0x430] sm:$0xff]  ;;  %v3894_v6 = vld [vmem:[#allocation2 + $0x458] sm:$0xff] }
 0x386   :  { %v7135_v16 = vpack.c.bf16 %v3889_v2, %v3885_v1  ;;  %v7137_v25 = vpack.c.bf16 %v3898_v7, %v3894_v6  ;;  %v3923_v2 = vld [vmem:[#allocation2 + $0x540] sm:$0xff]  ;;  %v3932_v6 = vld [vmem:[#allocation2 + $0x588] sm:$0xff] }
 0x387   :  { %6864 = vmatpush1.bf16.msra.mxu0 %v6863_v13  ;;  %v6881_v13 = vpack.c.bf16 %v3896_v15, %v3892_v4  ;;  %v3925_v4 = vld [vmem:[#allocation2 + $0x550] sm:$0xff]  ;;  %v3936_v7 = vld [vmem:[#allocation2 + $0x5a8] sm:$0xff]  ;;  %v6899_v9 = vpack.c.bf16 %v3927_v3, %v3923_v2  ;;  %v3963_v3 = vld [vmem:[#allocation2 + $0x680] sm:$0xff] }
 0x388   :  { %7120 = vmatpush1.bf16.msra.mxu1 %v7119_v14  ;;  %6866 = vmatprep.subr.bf16.mxu0 %v6865_v17  ;;  %v3897_v14 = vld [vmem:[#allocation2 + $0x470] sm:$0xff]  ;;  %v3900_v17 = vld [vmem:[#allocation2 + $0x488] sm:$0xff] }
 0x389   :  { %7122 = vmatprep.subr.bf16.mxu1 %v7121_v23  ;;  %v3906_v23 = vld [vmem:[#allocation2 + $0x4b8] sm:$0xff]  ;;  %v7139_v26 = vpack.c.bf16 %v3897_v14, %v3893_v11  ;;  %v6885_v27 = vpack.c.bf16 %v3904_v18, %v3900_v17  ;;  %v6901_v11 = vpack.c.bf16 %v3936_v7, %v3932_v6  ;;  %v3935_v14 = vld [vmem:[#allocation2 + $0x5a0] sm:$0xff]  ;;  %v3933_v17 = vld [vmem:[#allocation2 + $0x590] sm:$0xff] }
 0x38a   :  { %v3969_v6 = vld [vmem:[#allocation2 + $0x6b0] sm:$0xff]  ;;  %v3972_v7 = vld [vmem:[#allocation2 + $0x6c8] sm:$0xff] }
 0x38b   :  { %6868 = vmatpush1.bf16.msra.mxu0 %v6867_v30  ;;  %v3901_v30 = vld [vmem:[#allocation2 + $0x490] sm:$0xff] }
 0x38c   :  { %7124 = vmatpush1.bf16.msra.mxu1 %v7123_v32  ;;  %6870 = vmatprep.subr.bf16.mxu0 %v6869_v33  ;;  %v7141_v32 = vpack.c.bf16 %v3906_v23, %v3902_v20  ;;  %v3905_v33 = vld [vmem:[#allocation2 + $0x4b0] sm:$0xff]  ;;  %v3944_v20 = vld [vmem:[#allocation2 + $0x5e8] sm:$0xff]  ;;  %v3942_v23 = vld [vmem:[#allocation2 + $0x5d8] sm:$0xff] }
 0x38d   :  { %7126 = vmatprep.subr.bf16.mxu1 %v7125_v36  ;;  %v3914_v36 = vld [vmem:[#allocation2 + $0x4f8] sm:$0xff]  ;;  %v7143_v38 = vpack.c.bf16 %v3905_v33, %v3901_v30  ;;  %v3943_v30 = vld [vmem:[#allocation2 + $0x5e0] sm:$0xff] }
 0x38e   :  { %v7145_v44 = vpack.c.bf16 %v3914_v36, %v3910_v35  ;;  %v3952_v35 = vld [vmem:[#allocation2 + $0x628] sm:$0xff]  ;;  %v3950_v36 = vld [vmem:[#allocation2 + $0x618] sm:$0xff] }
 0x38f   :  { %6872 = vmatpush1.bf16.msra.mxu0 %v6871_v43  ;;  %v3909_v43 = vld [vmem:[#allocation2 + $0x4d0] sm:$0xff] }
 0x390   :  { %7128 = vmatpush1.bf16.msra.mxu1 %v7127_v45  ;;  %6874 = vmatprep.subr.bf16.mxu0 %v6873_v46  ;;  %v3913_v45 = vld [vmem:[#allocation2 + $0x4f0] sm:$0xff]  ;;  %v3916_v46 = vld [vmem:[#allocation2 + $0x508] sm:$0xff] }
 0x391   :  { %7130 = vmatprep.subr.bf16.mxu1 %v7129_v51  ;;  %v6891_v51 = vpack.c.bf16 %v3911_v42, %v3907_v41  ;;  %v7147_v52 = vpack.c.bf16 %v3913_v45, %v3909_v43  ;;  %v6893_v53 = vpack.c.bf16 %v3920_v47, %v3916_v46  ;;  %v6909_v41 = vpack.c.bf16 %v3952_v35, %v3948_v34  ;;  %v3947_v42 = vld [vmem:[#allocation2 + $0x600] sm:$0xff]  ;;  %v3953_v46 = vld [vmem:[#allocation2 + $0x630] sm:$0xff]  ;;  %v3956_v47 = vld [vmem:[#allocation2 + $0x648] sm:$0xff] }
 0x392   :  { %v3951_v43 = vld [vmem:[#allocation2 + $0x620] sm:$0xff]  ;;  %v6913_v54 = vpack.c.bf16 %v3960_v49, %v3956_v47  ;;  %v3985_v34 = vld [vmem:[#allocation2 + $0x730] sm:$0xff]  ;;  %v3988_v35 = vld [vmem:[#allocation2 + $0x748] sm:$0xff] }
 0x393   :  { %6876 = vmatpush1.bf16.msra.mxu0 %v6875_v57  ;;  %v3921_v57 = vld [vmem:[#allocation2 + $0x530] sm:$0xff]  ;;  %v3996_v49 = vld [vmem:[#allocation2 + $0x788] sm:$0xff] }
 0x394   :  { %7132 = vmatpush1.bf16.msra.mxu1 %v7131_v59  ;;  %6878 = vmatprep.subr.bf16.mxu0 %v6877_v60  ;;  %v3928_v59 = vld [vmem:[#allocation2 + $0x568] sm:$0xff]  ;;  %v3926_v60 = vld [vmem:[#allocation2 + $0x558] sm:$0xff]  ;;  %v3993_v47 = vld [vmem:[#allocation2 + $0x770] sm:$0xff] }
 0x395   :  { %7134 = vmatprep.subr.bf16.mxu1 %v7133_v0  ;;  %v7151_v0 = vpack.c.bf16 %v3921_v57, %v3917_v22  ;;  %v6897_v1 = vpack.c.bf16 %v3928_v59, %v3924_v58  ;;  %v7153_v15 = vpack.c.bf16 %v3930_v61, %v3926_v60  ;;  %v3959_v22 = vld [vmem:[#allocation2 + $0x660] sm:$0xff]  ;;  %v3961_v58 = vld [vmem:[#allocation2 + $0x670] sm:$0xff]  ;;  %v3964_v59 = vld [vmem:[#allocation2 + $0x688] sm:$0xff] }
 0x396   :  { %4354 = vmatmul.mubr.f32.vlgmr.msra.gmra.mrb[4].mxu0 %v3747_v8  ;;  %v3968_v60 = vld [vmem:[#allocation2 + $0x6a8] sm:$0xff]  ;;  %v3966_v61 = vld [vmem:[#allocation2 + $0x698] sm:$0xff] }
 0x397   :  { %4638 = vmatmul.mubr.f32.vlgmr.msra.gmra.mrb[4].mxu1 %v3747_v8  ;;  %6880 = vmatpush1.bf16.msra.mxu0 %v6879_v5  ;;  %v3929_v5 = vld [vmem:[#allocation2 + $0x570] sm:$0xff]  ;;  %v3934_v8 = vld [vmem:[#allocation2 + $0x598] sm:$0xff]  ;;  %v6917_v2 = vpack.c.bf16 %v3968_v60, %v3964_v59 }
 0x398   :  { %4424 = vmatprep.mubr.f32.mxu0 %v3750_v19  ;;  %7136 = vmatpush1.bf16.msra.mxu1 %v7135_v16  ;;  %v3938_v16 = vld [vmem:[#allocation2 + $0x5b8] sm:$0xff]  ;;  %v7155_v10 = vpack.c.bf16 %v3929_v5, %v3925_v4  ;;  %v3967_v4 = vld [vmem:[#allocation2 + $0x6a0] sm:$0xff]  ;;  %v4001_v60 = vld [vmem:[#allocation2 + $0x7b0] sm:$0xff] }
 0x399   :  { %4708 = vmatprep.mubr.f32.mxu1 %v3750_v19  ;;  %6882 = vmatprep.subr.bf16.mxu0 %v6881_v13  ;;  %v3931_v13 = vld [vmem:[#allocation2 + $0x580] sm:$0xff]  ;;  %v7157_v18 = vpack.c.bf16 %v3938_v16, %v3934_v8  ;;  %v3937_v19 = vld [vmem:[#allocation2 + $0x5b0] sm:$0xff]  ;;  %v3976_v8 = vld [vmem:[#allocation2 + $0x6e8] sm:$0xff] }
 0x39a   :  { %7138 = vmatprep.subr.bf16.mxu1 %v7137_v25  ;;  %v3940_v25 = vld [vmem:[#allocation2 + $0x5c8] sm:$0xff]  ;;  %v3974_v16 = vld [vmem:[#allocation2 + $0x6d8] sm:$0xff] }
 0x39b   :  { %6884 = vmatpush1.bf16.msra.mxu0 %v6883_v24  ;;  %v3946_v24 = vld [vmem:[#allocation2 + $0x5f8] sm:$0xff]  ;;  %v6905_v28 = vpack.c.bf16 %v3944_v20, %v3940_v25  ;;  %v3977_v25 = vld [vmem:[#allocation2 + $0x6f0] sm:$0xff]  ;;  %v3980_v20 = vld [vmem:[#allocation2 + $0x708] sm:$0xff] }
 0x39c   :  { %7140 = vmatpush1.bf16.msra.mxu1 %v7139_v26  ;;  %6886 = vmatprep.subr.bf16.mxu0 %v6885_v27  ;;  %v6903_v26 = vpack.c.bf16 %v3935_v14, %v3931_v13  ;;  %v7159_v27 = vpack.c.bf16 %v3937_v19, %v3933_v17  ;;  %v7161_v33 = vpack.c.bf16 %v3946_v24, %v3942_v23  ;;  %v3971_v14 = vld [vmem:[#allocation2 + $0x6c0] sm:$0xff]  ;;  %v3984_v23 = vld [vmem:[#allocation2 + $0x728] sm:$0xff]  ;;  %v3982_v24 = vld [vmem:[#allocation2 + $0x718] sm:$0xff] }
 0x39d   :  { %7142 = vmatprep.subr.bf16.mxu1 %v7141_v32  ;;  %v3941_v32 = vld [vmem:[#allocation2 + $0x5d0] sm:$0xff]  ;;  %v6921_v13 = vpack.c.bf16 %v3976_v8, %v3972_v7  ;;  %v3975_v17 = vld [vmem:[#allocation2 + $0x6e0] sm:$0xff] }
 0x39e   :  { %v4007_v7 = vld [vmem:[#allocation2 + $0x7e0] sm:$0xff]  ;;  %v4005_v8 = vld [vmem:[#allocation2 + $0x7d0] sm:$0xff] }
 0x39f   :  { %6888 = vmatpush1.bf16.msra.mxu0 %v6887_v37  ;;  %v3954_v37 = vld [vmem:[#allocation2 + $0x638] sm:$0xff] }
 0x3a0   :  { %7144 = vmatpush1.bf16.msra.mxu1 %v7143_v38  ;;  %6890 = vmatprep.subr.bf16.mxu0 %v6889_v39  ;;  %v6907_v38 = vpack.c.bf16 %v3943_v30, %v3939_v29  ;;  %v7163_v39 = vpack.c.bf16 %v3945_v48, %v3941_v32  ;;  %v7165_v45 = vpack.c.bf16 %v3954_v37, %v3950_v36  ;;  %v3979_v30 = vld [vmem:[#allocation2 + $0x700] sm:$0xff]  ;;  %v3992_v36 = vld [vmem:[#allocation2 + $0x768] sm:$0xff]  ;;  %v3990_v37 = vld [vmem:[#allocation2 + $0x758] sm:$0xff] }
 0x3a1   :  { %7146 = vmatprep.subr.bf16.mxu1 %v7145_v44  ;;  %v3949_v44 = vld [vmem:[#allocation2 + $0x610] sm:$0xff]  ;;  %v6925_v29 = vpack.c.bf16 %v3984_v23, %v3980_v20  ;;  %v3983_v32 = vld [vmem:[#allocation2 + $0x720] sm:$0xff] }
 0x3a2   :  { %v4011_v20 = vld [vmem:[#allocation2 + $0x800] sm:$0xff] }
 0x3a3   :  { %6892 = vmatpush1.bf16.msra.mxu0 %v6891_v51  ;;  %v3962_v51 = vld [vmem:[#allocation2 + $0x678] sm:$0xff]  ;;  %v4015_v23 = vld [vmem:[#allocation2 + $0x820] sm:$0xff] }
 0x3a4   :  { %7148 = vmatpush1.bf16.msra.mxu1 %v7147_v52  ;;  %6894 = vmatprep.subr.bf16.mxu0 %v6893_v53  ;;  %v6911_v52 = vpack.c.bf16 %v3951_v43, %v3947_v42  ;;  %v7167_v53 = vpack.c.bf16 %v3953_v46, %v3949_v44  ;;  %v7169_v57 = vpack.c.bf16 %v3962_v51, %v3958_v50  ;;  %v3987_v43 = vld [vmem:[#allocation2 + $0x740] sm:$0xff]  ;;  %v4000_v50 = vld [vmem:[#allocation2 + $0x7a8] sm:$0xff]  ;;  %v3998_v51 = vld [vmem:[#allocation2 + $0x798] sm:$0xff] }
 0x3a5   :  { %7150 = vmatprep.subr.bf16.mxu1 %v7149_v56  ;;  %v3957_v56 = vld [vmem:[#allocation2 + $0x650] sm:$0xff]  ;;  %v6929_v42 = vpack.c.bf16 %v3992_v36, %v3988_v35  ;;  %v3991_v44 = vld [vmem:[#allocation2 + $0x760] sm:$0xff] }
 0x3a6   :  { %v4019_v35 = vld [vmem:[#allocation2 + $0x840] sm:$0xff] }
 0x3a7   :  { %6896 = vmatpush1.bf16.msra.mxu0 %v6895_v62  ;;  %v3970_v62 = vld [vmem:[#allocation2 + $0x6b8] sm:$0xff]  ;;  %v4023_v36 = vld [vmem:[#allocation2 + $0x860] sm:$0xff] }
 0x3a8   :  { %7152 = vmatpush1.bf16.msra.mxu1 %v7151_v0  ;;  %6898 = vmatprep.subr.bf16.mxu0 %v6897_v1  ;;  %v6915_v0 = vpack.c.bf16 %v3959_v22, %v3955_v55  ;;  %v7171_v1 = vpack.c.bf16 %v3961_v58, %v3957_v56  ;;  %v7173_v5 = vpack.c.bf16 %v3970_v62, %v3966_v61  ;;  %v3995_v56 = vld [vmem:[#allocation2 + $0x780] sm:$0xff]  ;;  %v3997_v58 = vld [vmem:[#allocation2 + $0x790] sm:$0xff]  ;;  %v4004_v61 = vld [vmem:[#allocation2 + $0x7c8] sm:$0xff] }
 0x3a9   :  { %7154 = vmatprep.subr.bf16.mxu1 %v7153_v15  ;;  %v3965_v15 = vld [vmem:[#allocation2 + $0x690] sm:$0xff]  ;;  %v6933_v22 = vpack.c.bf16 %v4000_v50, %v3996_v49  ;;  %v4008_v62 = vld [vmem:[#allocation2 + $0x7e8] sm:$0xff]  ;;  %v4027_v49 = vld [vmem:[#allocation2 + $0x880] sm:$0xff] }
 0x3aa   :  { %v4031_v50 = vld [vmem:[#allocation2 + $0x8a0] sm:$0xff] }
 0x3ab   :  { %6900 = vmatpush1.bf16.msra.mxu0 %v6899_v9  ;;  %v3978_v9 = vld [vmem:[#allocation2 + $0x6f8] sm:$0xff] }
 0x3ac   :  { %7156 = vmatpush1.bf16.msra.mxu1 %v7155_v10  ;;  %6902 = vmatprep.subr.bf16.mxu0 %v6901_v11  ;;  %v6919_v10 = vpack.c.bf16 %v3967_v4, %v3963_v3  ;;  %v7175_v11 = vpack.c.bf16 %v3969_v6, %v3965_v15  ;;  %v7177_v19 = vpack.c.bf16 %v3978_v9, %v3974_v16  ;;  %v12668_v3 = vld [vmem:[%s12898_s2] sm:$0xff]  ;;  %v4009_v9 = vld [vmem:[#allocation2 + $0x7f0] sm:$0xff] }
 0x3ad   :  { %7158 = vmatprep.subr.bf16.mxu1 %v7157_v18  ;;  %v3973_v18 = vld [vmem:[#allocation2 + $0x6d0] sm:$0xff]  ;;  %v7191_v15 = vpack.c.bf16 %v4001_v60, %v3997_v58  ;;  %v4003_v6 = vld [vmem:[#allocation2 + $0x7c0] sm:$0xff]  ;;  %v6951_v58 = vpack.c.bf16 %v4031_v50, %v4027_v49 }
 0x3af   :  { %6904 = vmatpush1.bf16.msra.mxu0 %v6903_v26  ;;  %v3986_v26 = vld [vmem:[#allocation2 + $0x738] sm:$0xff] }
 0x3b0   :  { %7160 = vmatpush1.bf16.msra.mxu1 %v7159_v27  ;;  %6906 = vmatprep.subr.bf16.mxu0 %v6905_v28  ;;  %v6923_v27 = vpack.c.bf16 %v3975_v17, %v3971_v14  ;;  %v7179_v28 = vpack.c.bf16 %v3977_v25, %v3973_v18  ;;  %v7181_v48 = vpack.c.bf16 %v3986_v26, %v3982_v24  ;;  %v4018_v14 = vld [vmem:[#allocation2 + $0x838] sm:$0xff]  ;;  %v4013_v24 = vld [vmem:[#allocation2 + $0x810] sm:$0xff] }
 0x3b1   :  { %7162 = vmatprep.subr.bf16.mxu1 %v7161_v33  ;;  %v3981_v33 = vld [vmem:[#allocation2 + $0x710] sm:$0xff]  ;;  %v6939_v17 = vpack.c.bf16 %v4007_v7, %v4003_v6  ;;  %v4050_v6 = vld [vmem:[#allocation2 + $0x938] sm:$0xff] }
 0x3b3   :  { %6908 = vmatpush1.bf16.msra.mxu0 %v6907_v38  ;;  %v3994_v38 = vld [vmem:[#allocation2 + $0x778] sm:$0xff] }
 0x3b4   :  { %7164 = vmatpush1.bf16.msra.mxu1 %v7163_v39  ;;  %6910 = vmatprep.subr.bf16.mxu0 %v6909_v41  ;;  %v6927_v39 = vpack.c.bf16 %v3983_v32, %v3979_v30  ;;  %v7183_v41 = vpack.c.bf16 %v3985_v34, %v3981_v33  ;;  %v7185_v46 = vpack.c.bf16 %v3994_v38, %v3990_v37  ;;  %v4022_v30 = vld [vmem:[#allocation2 + $0x858] sm:$0xff]  ;;  %v4021_v37 = vld [vmem:[#allocation2 + $0x850] sm:$0xff] }
 0x3b5   :  { %7166 = vmatprep.subr.bf16.mxu1 %v7165_v45  ;;  %v3989_v45 = vld [vmem:[#allocation2 + $0x750] sm:$0xff]  ;;  %v4026_v32 = vld [vmem:[#allocation2 + $0x878] sm:$0xff]  ;;  %v6943_v33 = vpack.c.bf16 %v4015_v23, %v4011_v20 }
 0x3b6   :  { %v7187_v55 = vpack.c.bf16 %v3993_v47, %v3989_v45  ;;  %v7201_v38 = vpack.c.bf16 %v4026_v32, %v4022_v30  ;;  %v6947_v45 = vpack.c.bf16 %v4023_v36, %v4019_v35  ;;  %v4057_v30 = vld [vmem:[#allocation2 + $0x970] sm:$0xff]  ;;  %v4060_v32 = vld [vmem:[#allocation2 + $0x988] sm:$0xff] }
 0x3b7   :  { %6912 = vmatpush1.bf16.msra.mxu0 %v6911_v52  ;;  %v4002_v52 = vld [vmem:[#allocation2 + $0x7b8] sm:$0xff] }
 0x3b8   :  { %7168 = vmatpush1.bf16.msra.mxu1 %v7167_v53  ;;  %6914 = vmatprep.subr.bf16.mxu0 %v6913_v54  ;;  %v6931_v53 = vpack.c.bf16 %v3991_v44, %v3987_v43  ;;  %v1729_v54 = vsub.s32 2, %v12597_v63  ;;  %v7189_v59 = vpack.c.bf16 %v4002_v52, %v3998_v51  ;;  %v4030_v43 = vld [vmem:[#allocation2 + $0x898] sm:$0xff]  ;;  %v4029_v51 = vld [vmem:[#allocation2 + $0x890] sm:$0xff] }
 0x3b9   :  { %7170 = vmatprep.subr.bf16.mxu1 %v7169_v57  ;;  %v3999_v57 = vld [vmem:[#allocation2 + $0x7a0] sm:$0xff]  ;;  %v4034_v44 = vld [vmem:[#allocation2 + $0x8b8] sm:$0xff] }
 0x3ba   :  { %v1730_v4 = vrot.slane %v12668_v3, %v1729_v54  ;;  %v7205_v52 = vpack.c.bf16 %v4034_v44, %v4030_v43  ;;  %v4068_v43 = vld [vmem:[#allocation2 + $0x9c8] sm:$0xff] }
 0x3bb   :  { %6916 = vmatpush1.bf16.msra.mxu0 %v6915_v0  ;;  %v4006_v0 = vld [vmem:[#allocation2 + $0x7d8] sm:$0xff]  ;;  %v4072_v44 = vld [vmem:[#allocation2 + $0x9e8] sm:$0xff] }
 0x3bc   :  { %7172 = vmatpush1.bf16.msra.mxu1 %v7171_v1  ;;  %6918 = vmatprep.subr.bf16.mxu0 %v6917_v2  ;;  %v4010_v1 = vld [vmem:[#allocation2 + $0x7f8] sm:$0xff]  ;;  %v6935_v2 = vpack.c.bf16 %v3999_v57, %v3995_v56  ;;  %v7391_v18 = vadd.f32 %v11446_v21, %v1730_v4  ;;  %v4044_v4 = vld [vmem:[#allocation2 + $0x908] sm:$0xff]  ;;  %v6969_v50 = vpack.c.bf16 %v4072_v44, %v4068_v43  ;;  %v4105_v44 = vld [vmem:[#allocation2 + $0xaf0] sm:$0xff] }
 0x3bd   :  { %7174 = vmatprep.subr.bf16.mxu1 %v7173_v5  ;;  %v6937_v5 = vpack.c.bf16 %v4008_v62, %v4004_v61  ;;  %v7193_v16 = vpack.c.bf16 %v4010_v1, %v4006_v0  ;;  %v4038_v56 = vld [vmem:[#allocation2 + $0x8d8] sm:$0xff]  ;;  %v4035_v61 = vld [vmem:[#allocation2 + $0x8c0] sm:$0xff]  ;;  %v4037_v0 = vld [vmem:[#allocation2 + $0x8d0] sm:$0xff] }
 0x3be   :  { %v4042_v57 = vld [vmem:[#allocation2 + $0x8f8] sm:$0xff]  ;;  %v4039_v62 = vld [vmem:[#allocation2 + $0x8e0] sm:$0xff] }
 0x3bf   :  { %6920 = vmatpush1.bf16.msra.mxu0 %v6919_v10  ;;  %v4012_v10 = vld [vmem:[#allocation2 + $0x808] sm:$0xff]  ;;  %v7209_v1 = vpack.c.bf16 %v4042_v57, %v4038_v56  ;;  %v6955_v7 = vpack.c.bf16 %v4039_v62, %v4035_v61 }
 0x3c0   :  { %7176 = vmatpush1.bf16.msra.mxu1 %v7175_v11  ;;  %6922 = vmatprep.subr.bf16.mxu0 %v6921_v13  ;;  %v4016_v11 = vld [vmem:[#allocation2 + $0x828] sm:$0xff]  ;;  %v4014_v13 = vld [vmem:[#allocation2 + $0x818] sm:$0xff] }
 0x3c1   :  { %7178 = vmatprep.subr.bf16.mxu1 %v7177_v19  ;;  %v7195_v19 = vpack.c.bf16 %v4009_v9, %v4005_v8  ;;  %v6941_v25 = vpack.c.bf16 %v4016_v11, %v4012_v10  ;;  %v7197_v26 = vpack.c.bf16 %v4018_v14, %v4014_v13  ;;  %v4043_v9 = vld [vmem:[#allocation2 + $0x900] sm:$0xff]  ;;  %v4045_v11 = vld [vmem:[#allocation2 + $0x910] sm:$0xff]  ;;  %v4076_v56 = vld [vmem:[#allocation2 + $0xa08] sm:$0xff] }
 0x3c2   :  { %v4047_v10 = vld [vmem:[#allocation2 + $0x920] sm:$0xff]  ;;  %v4049_v14 = vld [vmem:[#allocation2 + $0x930] sm:$0xff]  ;;  %v4080_v57 = vld [vmem:[#allocation2 + $0xa28] sm:$0xff] }
 0x3c3   :  { %6924 = vmatpush1.bf16.msra.mxu0 %v6923_v27  ;;  %v4017_v27 = vld [vmem:[#allocation2 + $0x830] sm:$0xff]  ;;  %v6959_v20 = vpack.c.bf16 %v4047_v10, %v4043_v9  ;;  %v7215_v23 = vpack.c.bf16 %v4049_v14, %v4045_v11  ;;  %v6973_v62 = vpack.c.bf16 %v4080_v57, %v4076_v56  ;;  %v4083_v11 = vld [vmem:[#allocation2 + $0xa40] sm:$0xff] }
 0x3c4   :  { %7180 = vmatpush1.bf16.msra.mxu1 %v7179_v28  ;;  %6926 = vmatprep.subr.bf16.mxu0 %v6925_v29  ;;  %v4020_v28 = vld [vmem:[#allocation2 + $0x848] sm:$0xff]  ;;  %v7199_v21 = vpack.c.bf16 %v4017_v27, %v4013_v24  ;;  %v4055_v27 = vld [vmem:[#allocation2 + $0x960] sm:$0xff]  ;;  %v4085_v14 = vld [vmem:[#allocation2 + $0xa50] sm:$0xff] }
 0x3c5   :  { %7182 = vmatprep.subr.bf16.mxu1 %v7181_v48  ;;  %v4024_v29 = vld [vmem:[#allocation2 + $0x868] sm:$0xff]  ;;  %v3749_v48 = vmax.f32 %v7391_v18, 0.0  ;;  %v4113_v57 = vld [vmem:[#allocation2 + $0xb30] sm:$0xff] }
 0x3c6   :  { %v6945_v34 = vpack.c.bf16 %v4024_v29, %v4020_v28  ;;  %v4056_v18 = vld [vmem:[#allocation2 + $0x968] sm:$0xff]  ;;  %v4053_v28 = vld [vmem:[#allocation2 + $0x950] sm:$0xff] }
 0x3c7   :  { %6928 = vmatpush1.bf16.msra.mxu0 %v6927_v39  ;;  %v4025_v39 = vld [vmem:[#allocation2 + $0x870] sm:$0xff]  ;;  %v7219_v35 = vpack.c.bf16 %v4057_v30, %v4053_v28  ;;  %v4091_v28 = vld [vmem:[#allocation2 + $0xa80] sm:$0xff] }
 0x3c8   :  { %7184 = vmatpush1.bf16.msra.mxu1 %v7183_v41  ;;  %6930 = vmatprep.subr.bf16.mxu0 %v6929_v42  ;;  %v4028_v41 = vld [vmem:[#allocation2 + $0x888] sm:$0xff]  ;;  %v4093_v30 = vld [vmem:[#allocation2 + $0xa90] sm:$0xff] }
 0x3c9   :  { %7186 = vmatprep.subr.bf16.mxu1 %v7185_v46  ;;  %v4032_v42 = vld [vmem:[#allocation2 + $0x8a8] sm:$0xff]  ;;  %v7203_v46 = vpack.c.bf16 %v4025_v39, %v4021_v37  ;;  %v4059_v37 = vld [vmem:[#allocation2 + $0x980] sm:$0xff]  ;;  %v4061_v39 = vld [vmem:[#allocation2 + $0x990] sm:$0xff] }
 0x3ca   :  { %v6949_v47 = vpack.c.bf16 %v4032_v42, %v4028_v41  ;;  %v4065_v42 = vld [vmem:[#allocation2 + $0x9b0] sm:$0xff] }
 0x3cb   :  { %6932 = vmatpush1.bf16.msra.mxu0 %v6931_v53  ;;  %v4033_v53 = vld [vmem:[#allocation2 + $0x8b0] sm:$0xff]  ;;  %v7223_v49 = vpack.c.bf16 %v4065_v42, %v4061_v39  ;;  %v4099_v39 = vld [vmem:[#allocation2 + $0xac0] sm:$0xff] }
 0x3cc   :  { %7188 = vmatpush1.bf16.msra.mxu1 %v7187_v55  ;;  %6934 = vmatprep.subr.bf16.mxu0 %v6933_v22  ;;  %v4036_v55 = vld [vmem:[#allocation2 + $0x8c8] sm:$0xff]  ;;  %v4101_v42 = vld [vmem:[#allocation2 + $0xad0] sm:$0xff] }
 0x3cd   :  { %7190 = vmatprep.subr.bf16.mxu1 %v7189_v59  ;;  %v4040_v22 = vld [vmem:[#allocation2 + $0x8e8] sm:$0xff]  ;;  %v7207_v59 = vpack.c.bf16 %v4033_v53, %v4029_v51  ;;  %v4067_v51 = vld [vmem:[#allocation2 + $0x9c0] sm:$0xff]  ;;  %v4069_v53 = vld [vmem:[#allocation2 + $0x9d0] sm:$0xff] }
 0x3ce   :  { %v6953_v60 = vpack.c.bf16 %v4040_v22, %v4036_v55  ;;  %v4073_v22 = vld [vmem:[#allocation2 + $0x9f0] sm:$0xff] }
 0x3cf   :  { %6936 = vmatpush1.bf16.msra.mxu0 %v6935_v2  ;;  %v4041_v2 = vld [vmem:[#allocation2 + $0x8f0] sm:$0xff]  ;;  %v7227_v61 = vpack.c.bf16 %v4073_v22, %v4069_v53  ;;  %v4107_v53 = vld [vmem:[#allocation2 + $0xb00] sm:$0xff] }
 0x3d0   :  { %7192 = vmatpush1.bf16.msra.mxu1 %v7191_v15  ;;  %6938 = vmatprep.subr.bf16.mxu0 %v6937_v5  ;;  %v4048_v15 = vld [vmem:[#allocation2 + $0x928] sm:$0xff]  ;;  %v4046_v5 = vld [vmem:[#allocation2 + $0x918] sm:$0xff]  ;;  %v7211_v8 = vpack.c.bf16 %v4041_v2, %v4037_v0  ;;  %v4075_v0 = vld [vmem:[#allocation2 + $0xa00] sm:$0xff] }
 0x3d1   :  { %7194 = vmatprep.subr.bf16.mxu1 %v7193_v16  ;;  %v6957_v16 = vpack.c.bf16 %v4048_v15, %v4044_v4  ;;  %v7213_v13 = vpack.c.bf16 %v4050_v6, %v4046_v5  ;;  %v4077_v2 = vld [vmem:[#allocation2 + $0xa10] sm:$0xff]  ;;  %v4084_v5 = vld [vmem:[#allocation2 + $0xa48] sm:$0xff] }
 0x3d2   :  { %v4081_v15 = vld [vmem:[#allocation2 + $0xa30] sm:$0xff]  ;;  %v4088_v6 = vld [vmem:[#allocation2 + $0xa68] sm:$0xff] }
 0x3d3   :  { %6940 = vmatpush1.bf16.msra.mxu0 %v6939_v17  ;;  %v4052_v17 = vld [vmem:[#allocation2 + $0x948] sm:$0xff]  ;;  %v7231_v9 = vpack.c.bf16 %v4081_v15, %v4077_v2  ;;  %v6977_v10 = vpack.c.bf16 %v4088_v6, %v4084_v5  ;;  %v4109_v22 = vld [vmem:[#allocation2 + $0xb10] sm:$0xff]  ;;  %v4115_v2 = vld [vmem:[#allocation2 + $0xb40] sm:$0xff] }
 0x3d4   :  { %7196 = vmatpush1.bf16.msra.mxu1 %v7195_v19  ;;  %6942 = vmatprep.subr.bf16.mxu0 %v6941_v25  ;;  %v4054_v19 = vld [vmem:[#allocation2 + $0x958] sm:$0xff]  ;;  %v6961_v24 = vpack.c.bf16 %v4056_v18, %v4052_v17  ;;  %v4089_v18 = vld [vmem:[#allocation2 + $0xa70] sm:$0xff] }
 0x3d5   :  { %7198 = vmatprep.subr.bf16.mxu1 %v7197_v26  ;;  %v4058_v25 = vld [vmem:[#allocation2 + $0x978] sm:$0xff]  ;;  %v4051_v26 = vld [vmem:[#allocation2 + $0x940] sm:$0xff]  ;;  %v4117_v15 = vld [vmem:[#allocation2 + $0xb50] sm:$0xff] }
 0x3d6   :  { %4425 = vmatmul.mubr.f32.vlgmr.msra.gmra.mrb[4].mxu0 %v3749_v48  ;;  %v7217_v29 = vpack.c.bf16 %v4058_v25, %v4054_v19  ;;  %v4092_v19 = vld [vmem:[#allocation2 + $0xa88] sm:$0xff]  ;;  %v4121_v6 = vld [vmem:[#allocation2 + $0xb70] sm:$0xff] }
 0x3d7   :  { %4709 = vmatmul.mubr.f32.vlgmr.msra.gmra.mrb[4].mxu1 %v3749_v48  ;;  %6944 = vmatpush1.bf16.msra.mxu0 %v6943_v33  ;;  %v4064_v33 = vld [vmem:[#allocation2 + $0x9a8] sm:$0xff]  ;;  %v4062_v48 = vld [vmem:[#allocation2 + $0x998] sm:$0xff] }
 0x3d8   :  { %7200 = vmatpush1.bf16.msra.mxu1 %v7199_v21  ;;  %6946 = vmatprep.subr.bf16.mxu0 %v6945_v34  ;;  %v4066_v21 = vld [vmem:[#allocation2 + $0x9b8] sm:$0xff]  ;;  %v6963_v34 = vpack.c.bf16 %v4055_v27, %v4051_v26  ;;  %v6965_v36 = vpack.c.bf16 %v4064_v33, %v4060_v32  ;;  %v4096_v25 = vld [vmem:[#allocation2 + $0xaa8] sm:$0xff]  ;;  %v7235_v26 = vpack.c.bf16 %v4089_v18, %v4085_v14  ;;  %v4097_v33 = vld [vmem:[#allocation2 + $0xab0] sm:$0xff] }
 0x3d9   :  { %7202 = vmatprep.subr.bf16.mxu1 %v7201_v38  ;;  %v4063_v38 = vld [vmem:[#allocation2 + $0x9a0] sm:$0xff]  ;;  %v7221_v41 = vpack.c.bf16 %v4066_v21, %v4062_v48  ;;  %v6981_v27 = vpack.c.bf16 %v4096_v25, %v4092_v19  ;;  %v4100_v48 = vld [vmem:[#allocation2 + $0xac8] sm:$0xff]  ;;  %v4125_v18 = vld [vmem:[#allocation2 + $0xb90] sm:$0xff] }
 0x3da   :  { %v4104_v21 = vld [vmem:[#allocation2 + $0xae8] sm:$0xff]  ;;  %v4123_v14 = vld [vmem:[#allocation2 + $0xb80] sm:$0xff]  ;;  %v4129_v25 = vld [vmem:[#allocation2 + $0xbb0] sm:$0xff] }
 0x3db   :  { %6948 = vmatpush1.bf16.msra.mxu0 %v6947_v45  ;;  %v4070_v45 = vld [vmem:[#allocation2 + $0x9d8] sm:$0xff] }
 0x3dc   :  { %7204 = vmatpush1.bf16.msra.mxu1 %v7203_v46  ;;  %6950 = vmatprep.subr.bf16.mxu0 %v6949_v47  ;;  %v4074_v46 = vld [vmem:[#allocation2 + $0x9f8] sm:$0xff]  ;;  %v6967_v47 = vpack.c.bf16 %v4063_v38, %v4059_v37  ;;  %v7239_v37 = vpack.c.bf16 %v4097_v33, %v4093_v30  ;;  %v6985_v38 = vpack.c.bf16 %v4104_v21, %v4100_v48  ;;  %v4131_v30 = vld [vmem:[#allocation2 + $0xbc0] sm:$0xff]  ;;  %v4133_v33 = vld [vmem:[#allocation2 + $0xbd0] sm:$0xff] }
 0x3dd   :  { %7206 = vmatprep.subr.bf16.mxu1 %v7205_v52  ;;  %v4071_v52 = vld [vmem:[#allocation2 + $0x9e0] sm:$0xff]  ;;  %v7225_v55 = vpack.c.bf16 %v4074_v46, %v4070_v45  ;;  %v4108_v45 = vld [vmem:[#allocation2 + $0xb08] sm:$0xff]  ;;  %v4137_v21 = vld [vmem:[#allocation2 + $0xbf0] sm:$0xff] }
 0x3de   :  { %v4112_v46 = vld [vmem:[#allocation2 + $0xb28] sm:$0xff] }
 0x3df   :  { %6952 = vmatpush1.bf16.msra.mxu0 %v6951_v58  ;;  %v4078_v58 = vld [vmem:[#allocation2 + $0xa18] sm:$0xff] }
 0x3e0   :  { %7208 = vmatpush1.bf16.msra.mxu1 %v7207_v59  ;;  %6954 = vmatprep.subr.bf16.mxu0 %v6953_v60  ;;  %v4082_v59 = vld [vmem:[#allocation2 + $0xa38] sm:$0xff]  ;;  %v6971_v60 = vpack.c.bf16 %v4071_v52, %v4067_v51  ;;  %v7243_v51 = vpack.c.bf16 %v4105_v44, %v4101_v42  ;;  %v6989_v52 = vpack.c.bf16 %v4112_v46, %v4108_v45  ;;  %v1741_v44 = vsub.s32 5, %v12597_v63 }
 0x3e1   :  { %7210 = vmatprep.subr.bf16.mxu1 %v7209_v1  ;;  %v4079_v1 = vld [vmem:[#allocation2 + $0xa20] sm:$0xff]  ;;  %v7229_v4 = vpack.c.bf16 %v4082_v59, %v4078_v58  ;;  %v4116_v58 = vld [vmem:[#allocation2 + $0xb48] sm:$0xff]  ;;  %v1749_v45 = vsub.s32 7, %v12597_v63 }
 0x3e2   :  { %v4120_v59 = vld [vmem:[#allocation2 + $0xb68] sm:$0xff] }
 0x3e3   :  { %6956 = vmatpush1.bf16.msra.mxu0 %v6955_v7  ;;  %v4086_v7 = vld [vmem:[#allocation2 + $0xa58] sm:$0xff] }
 0x3e4   :  { %7212 = vmatpush1.bf16.msra.mxu1 %v7211_v8  ;;  %6958 = vmatprep.subr.bf16.mxu0 %v6957_v16  ;;  %v4090_v8 = vld [vmem:[#allocation2 + $0xa78] sm:$0xff]  ;;  %v6975_v16 = vpack.c.bf16 %v4079_v1, %v4075_v0  ;;  %v7247_v0 = vpack.c.bf16 %v4113_v57, %v4109_v22  ;;  %v6993_v1 = vpack.c.bf16 %v4120_v59, %v4116_v58  ;;  %v4143_v22 = vld [vmem:[#allocation2 + $0xc20] sm:$0xff]  ;;  %v4145_v57 = vld [vmem:[#allocation2 + $0xc30] sm:$0xff] }
 0x3e5   :  { %7214 = vmatprep.subr.bf16.mxu1 %v7213_v13  ;;  %v4087_v13 = vld [vmem:[#allocation2 + $0xa60] sm:$0xff]  ;;  %v7233_v17 = vpack.c.bf16 %v4090_v8, %v4086_v7  ;;  %v4124_v7 = vld [vmem:[#allocation2 + $0xb88] sm:$0xff] }
 0x3e6   :  { %v4128_v8 = vld [vmem:[#allocation2 + $0xba8] sm:$0xff] }
 0x3e7   :  { %6960 = vmatpush1.bf16.msra.mxu0 %v6959_v20  ;;  %v4094_v20 = vld [vmem:[#allocation2 + $0xa98] sm:$0xff] }
 0x3e8   :  { %7216 = vmatpush1.bf16.msra.mxu1 %v7215_v23  ;;  %6962 = vmatprep.subr.bf16.mxu0 %v6961_v24  ;;  %v4098_v23 = vld [vmem:[#allocation2 + $0xab8] sm:$0xff]  ;;  %v6979_v24 = vpack.c.bf16 %v4087_v13, %v4083_v11  ;;  %v7251_v11 = vpack.c.bf16 %v4121_v6, %v4117_v15  ;;  %v6997_v13 = vpack.c.bf16 %v4128_v8, %v4124_v7  ;;  %v4149_v7 = vld [vmem:[#allocation2 + $0xc50] sm:$0xff] }
 0x3e9   :  { %7218 = vmatprep.subr.bf16.mxu1 %v7217_v29  ;;  %v4095_v29 = vld [vmem:[#allocation2 + $0xaa0] sm:$0xff]  ;;  %v7237_v32 = vpack.c.bf16 %v4098_v23, %v4094_v20  ;;  %v4132_v20 = vld [vmem:[#allocation2 + $0xbc8] sm:$0xff]  ;;  %v4153_v8 = vld [vmem:[#allocation2 + $0xc70] sm:$0xff] }
 0x3ea   :  { %v4136_v23 = vld [vmem:[#allocation2 + $0xbe8] sm:$0xff] }
 0x3eb   :  { %6964 = vmatpush1.bf16.msra.mxu0 %v6963_v34  ;;  %v4102_v34 = vld [vmem:[#allocation2 + $0xad8] sm:$0xff] }
 0x3ec   :  { %7220 = vmatpush1.bf16.msra.mxu1 %v7219_v35  ;;  %6966 = vmatprep.subr.bf16.mxu0 %v6965_v36  ;;  %v4106_v35 = vld [vmem:[#allocation2 + $0xaf8] sm:$0xff]  ;;  %v6983_v36 = vpack.c.bf16 %v4095_v29, %v4091_v28  ;;  %v7255_v28 = vpack.c.bf16 %v4129_v25, %v4125_v18  ;;  %v7001_v29 = vpack.c.bf16 %v4136_v23, %v4132_v20  ;;  %v4155_v25 = vld [vmem:[#allocation2 + $0xc80] sm:$0xff] }
 0x3ed   :  { %7222 = vmatprep.subr.bf16.mxu1 %v7221_v41  ;;  %v4103_v41 = vld [vmem:[#allocation2 + $0xae0] sm:$0xff]  ;;  %v7241_v43 = vpack.c.bf16 %v4106_v35, %v4102_v34  ;;  %v4140_v34 = vld [vmem:[#allocation2 + $0xc08] sm:$0xff] }
 0x3ee   :  { %v4144_v35 = vld [vmem:[#allocation2 + $0xc28] sm:$0xff]  ;;  %v4159_v20 = vld [vmem:[#allocation2 + $0xca0] sm:$0xff] }
 0x3ef   :  { %6968 = vmatpush1.bf16.msra.mxu0 %v6967_v47  ;;  %v4110_v47 = vld [vmem:[#allocation2 + $0xb18] sm:$0xff] }
 0x3f0   :  { %7224 = vmatpush1.bf16.msra.mxu1 %v7223_v49  ;;  %6970 = vmatprep.subr.bf16.mxu0 %v6969_v50  ;;  %v4114_v49 = vld [vmem:[#allocation2 + $0xb38] sm:$0xff]  ;;  %v6987_v50 = vpack.c.bf16 %v4103_v41, %v4099_v39  ;;  %v7259_v39 = vpack.c.bf16 %v4137_v21, %v4133_v33  ;;  %v7005_v41 = vpack.c.bf16 %v4144_v35, %v4140_v34  ;;  %v4163_v21 = vld [vmem:[#allocation2 + $0xcc0] sm:$0xff] }
 0x3f1   :  { %7226 = vmatprep.subr.bf16.mxu1 %v7225_v55  ;;  %v4111_v55 = vld [vmem:[#allocation2 + $0xb20] sm:$0xff]  ;;  %v7245_v56 = vpack.c.bf16 %v4114_v49, %v4110_v47  ;;  %v1742_v47 = vrot.slane %v12668_v3, %v1741_v44  ;;  %v1750_v49 = vrot.slane %v12668_v3, %v1749_v45  ;;  %v7015_v33 = vpack.c.bf16 %v4159_v20, %v4155_v25 }
 0x3f2   :  { %v4167_v34 = vld [vmem:[#allocation2 + $0xce0] sm:$0xff] }
 0x3f3   :  { %6972 = vmatpush1.bf16.msra.mxu0 %v6971_v60  ;;  %v4118_v60 = vld [vmem:[#allocation2 + $0xb58] sm:$0xff]  ;;  %v7019_v44 = vpack.c.bf16 %v4167_v34, %v4163_v21 }
 0x3f4   :  { %7228 = vmatpush1.bf16.msra.mxu1 %v7227_v61  ;;  %6974 = vmatprep.subr.bf16.mxu0 %v6973_v62  ;;  %v4122_v61 = vld [vmem:[#allocation2 + $0xb78] sm:$0xff]  ;;  %v6991_v62 = vpack.c.bf16 %v4111_v55, %v4107_v53 }
 0x3f5   :  { %7230 = vmatprep.subr.bf16.mxu1 %v7229_v4  ;;  %v4119_v4 = vld [vmem:[#allocation2 + $0xb60] sm:$0xff]  ;;  %v7249_v5 = vpack.c.bf16 %v4122_v61, %v4118_v60  ;;  %v4148_v60 = vld [vmem:[#allocation2 + $0xc48] sm:$0xff] }
 0x3f7   :  { %6976 = vmatpush1.bf16.msra.mxu0 %v6975_v16  ;;  %v4126_v16 = vld [vmem:[#allocation2 + $0xb98] sm:$0xff] }
 0x3f8   :  { %7232 = vmatpush1.bf16.msra.mxu1 %v7231_v9  ;;  %6978 = vmatprep.subr.bf16.mxu0 %v6977_v10  ;;  %v4130_v9 = vld [vmem:[#allocation2 + $0xbb8] sm:$0xff]  ;;  %v6995_v10 = vpack.c.bf16 %v4119_v4, %v4115_v2 }
 0x3f9   :  { %7234 = vmatprep.subr.bf16.mxu1 %v7233_v17  ;;  %v4127_v17 = vld [vmem:[#allocation2 + $0xba0] sm:$0xff]  ;;  %v7253_v19 = vpack.c.bf16 %v4130_v9, %v4126_v16  ;;  %v4156_v16 = vld [vmem:[#allocation2 + $0xc88] sm:$0xff] }
 0x3fb   :  { %6980 = vmatpush1.bf16.msra.mxu0 %v6979_v24  ;;  %v4134_v24 = vld [vmem:[#allocation2 + $0xbd8] sm:$0xff] }
 0x3fc   :  { %7236 = vmatpush1.bf16.msra.mxu1 %v7235_v26  ;;  %6982 = vmatprep.subr.bf16.mxu0 %v6981_v27  ;;  %v4138_v26 = vld [vmem:[#allocation2 + $0xbf8] sm:$0xff]  ;;  %v6999_v27 = vpack.c.bf16 %v4127_v17, %v4123_v14 }
 0x3fd   :  { %7238 = vmatprep.subr.bf16.mxu1 %v7237_v32  ;;  %v4135_v32 = vld [vmem:[#allocation2 + $0xbe0] sm:$0xff]  ;;  %v7257_v48 = vpack.c.bf16 %v4138_v26, %v4134_v24  ;;  %v4162_v14 = vld [vmem:[#allocation2 + $0xcb8] sm:$0xff]  ;;  %v4157_v26 = vld [vmem:[#allocation2 + $0xc90] sm:$0xff] }
 0x3ff   :  { %6984 = vmatpush1.bf16.msra.mxu0 %v6983_v36  ;;  %v4142_v36 = vld [vmem:[#allocation2 + $0xc18] sm:$0xff] }
 0x400   :  { %7240 = vmatpush1.bf16.msra.mxu1 %v7239_v37  ;;  %6986 = vmatprep.subr.bf16.mxu0 %v6985_v38  ;;  %v4146_v37 = vld [vmem:[#allocation2 + $0xc38] sm:$0xff]  ;;  %v7003_v38 = vpack.c.bf16 %v4135_v32, %v4131_v30 }
 0x401   :  { %7242 = vmatprep.subr.bf16.mxu1 %v7241_v43  ;;  %v7261_v42 = vpack.c.bf16 %v4146_v37, %v4142_v36  ;;  %v1737_v43 = vsub.s32 4, %v12597_v63  ;;  %v4166_v30 = vld [vmem:[#allocation2 + $0xcd8] sm:$0xff]  ;;  %v4165_v37 = vld [vmem:[#allocation2 + $0xcd0] sm:$0xff] }
 0x402   :  { %v4170_v32 = vld [vmem:[#allocation2 + $0xcf8] sm:$0xff] }
 0x403   :  { %6988 = vmatpush1.bf16.msra.mxu0 %v6987_v50  ;;  %v1738_v46 = vrot.slane %v12668_v3, %v1737_v43  ;;  %v4147_v3 = vld [vmem:[#allocation2 + $0xc40] sm:$0xff]  ;;  %v7273_v36 = vpack.c.bf16 %v4170_v32, %v4166_v30  ;;  %v4178_v43 = vld [vmem:[#allocation2 + $0xd38] sm:$0xff]  ;;  %v4204_v30 = vld [vmem:[#allocation2 + $0xe08] sm:$0xff] }
 0x404   :  { %7244 = vmatpush1.bf16.msra.mxu1 %v7243_v51  ;;  %6990 = vmatprep.subr.bf16.mxu0 %v6989_v52  ;;  %v4139_v51 = vld [vmem:[#allocation2 + $0xc00] sm:$0xff]  ;;  %v4208_v32 = vld [vmem:[#allocation2 + $0xe28] sm:$0xff] }
 0x405   :  { %7246 = vmatprep.subr.bf16.mxu1 %v7245_v56  ;;  %v4141_v56 = vld [vmem:[#allocation2 + $0xc10] sm:$0xff]  ;;  %v7007_v4 = vpack.c.bf16 %v4143_v22, %v4139_v51  ;;  %v4184_v22 = vld [vmem:[#allocation2 + $0xd68] sm:$0xff] }
 0x406   :  { %v7263_v15 = vpack.c.bf16 %v4145_v57, %v4141_v56  ;;  %v4173_v51 = vld [vmem:[#allocation2 + $0xd10] sm:$0xff]  ;;  %v4182_v56 = vld [vmem:[#allocation2 + $0xd58] sm:$0xff] }
 0x407   :  { %6992 = vmatpush1.bf16.msra.mxu0 %v6991_v62  ;;  %v4152_v62 = vld [vmem:[#allocation2 + $0xc68] sm:$0xff]  ;;  %v4186_v57 = vld [vmem:[#allocation2 + $0xd78] sm:$0xff] }
 0x408   :  { %7248 = vmatpush1.bf16.msra.mxu1 %v7247_v0  ;;  %6994 = vmatprep.subr.bf16.mxu0 %v6993_v1  ;;  %v4150_v0 = vld [vmem:[#allocation2 + $0xc58] sm:$0xff]  ;;  %v7009_v9 = vpack.c.bf16 %v4152_v62, %v4148_v60  ;;  %v4179_v60 = vld [vmem:[#allocation2 + $0xd40] sm:$0xff] }
 0x409   :  { %7250 = vmatprep.subr.bf16.mxu1 %v7249_v5  ;;  %v4154_v1 = vld [vmem:[#allocation2 + $0xc78] sm:$0xff]  ;;  %v4151_v5 = vld [vmem:[#allocation2 + $0xc60] sm:$0xff] }
 0x40a   :  { %v7011_v18 = vpack.c.bf16 %v4151_v5, %v4147_v3  ;;  %v4190_v3 = vld [vmem:[#allocation2 + $0xd98] sm:$0xff] }
 0x40b   :  { %6996 = vmatpush1.bf16.msra.mxu0 %v6995_v10  ;;  %v7265_v10 = vpack.c.bf16 %v4154_v1, %v4150_v0  ;;  %v7281_v0 = vpack.c.bf16 %v4186_v57, %v4182_v56  ;;  %v4181_v1 = vld [vmem:[#allocation2 + $0xd50] sm:$0xff]  ;;  %v4194_v5 = vld [vmem:[#allocation2 + $0xdb8] sm:$0xff]  ;;  %v4220_v56 = vld [vmem:[#allocation2 + $0xe88] sm:$0xff] }
 0x40c   :  { %7252 = vmatpush1.bf16.msra.mxu1 %v7251_v11  ;;  %6998 = vmatprep.subr.bf16.mxu0 %v6997_v13  ;;  %v4160_v11 = vld [vmem:[#allocation2 + $0xca8] sm:$0xff]  ;;  %v4158_v13 = vld [vmem:[#allocation2 + $0xc98] sm:$0xff] }
 0x40d   :  { %7254 = vmatprep.subr.bf16.mxu1 %v7253_v19  ;;  %v7267_v19 = vpack.c.bf16 %v4153_v8, %v4149_v7  ;;  %v7013_v23 = vpack.c.bf16 %v4160_v11, %v4156_v16  ;;  %v7269_v24 = vpack.c.bf16 %v4162_v14, %v4158_v13  ;;  %v4187_v8 = vld [vmem:[#allocation2 + $0xd80] sm:$0xff]  ;;  %v4189_v11 = vld [vmem:[#allocation2 + $0xd90] sm:$0xff]  ;;  %v4196_v14 = vld [vmem:[#allocation2 + $0xdc8] sm:$0xff] }
 0x40e   :  { %v4191_v16 = vld [vmem:[#allocation2 + $0xda0] sm:$0xff]  ;;  %v4193_v13 = vld [vmem:[#allocation2 + $0xdb0] sm:$0xff]  ;;  %v4224_v57 = vld [vmem:[#allocation2 + $0xea8] sm:$0xff] }
 0x40f   :  { %7000 = vmatpush1.bf16.msra.mxu0 %v6999_v27  ;;  %v4161_v27 = vld [vmem:[#allocation2 + $0xcb0] sm:$0xff]  ;;  %v7031_v25 = vpack.c.bf16 %v4191_v16, %v4187_v8  ;;  %v7287_v20 = vpack.c.bf16 %v4193_v13, %v4189_v11 }
 0x410   :  { %7256 = vmatpush1.bf16.msra.mxu1 %v7255_v28  ;;  %7002 = vmatprep.subr.bf16.mxu0 %v7001_v29  ;;  %v4164_v28 = vld [vmem:[#allocation2 + $0xcc8] sm:$0xff] }
 0x411   :  { %7258 = vmatprep.subr.bf16.mxu1 %v7257_v48  ;;  %v4168_v29 = vld [vmem:[#allocation2 + $0xce8] sm:$0xff]  ;;  %v7271_v48 = vpack.c.bf16 %v4161_v27, %v4157_v26 }
 0x412   :  { %v7017_v35 = vpack.c.bf16 %v4168_v29, %v4164_v28  ;;  %v4197_v28 = vld [vmem:[#allocation2 + $0xdd0] sm:$0xff] }
 0x413   :  { %7004 = vmatpush1.bf16.msra.mxu0 %v7003_v38  ;;  %v4169_v38 = vld [vmem:[#allocation2 + $0xcf0] sm:$0xff] }
 0x414   :  { %7260 = vmatpush1.bf16.msra.mxu1 %v7259_v39  ;;  %7006 = vmatprep.subr.bf16.mxu0 %v7005_v41  ;;  %v4172_v39 = vld [vmem:[#allocation2 + $0xd08] sm:$0xff]  ;;  %v7275_v45 = vpack.c.bf16 %v4169_v38, %v4165_v37  ;;  %v4201_v29 = vld [vmem:[#allocation2 + $0xdf0] sm:$0xff]  ;;  %v7037_v37 = vpack.c.bf16 %v4208_v32, %v4204_v30 }
 0x415   :  { %7262 = vmatprep.subr.bf16.mxu1 %v7261_v42  ;;  %v4176_v41 = vld [vmem:[#allocation2 + $0xd28] sm:$0xff]  ;;  %v4174_v42 = vld [vmem:[#allocation2 + $0xd18] sm:$0xff]  ;;  %v7291_v34 = vpack.c.bf16 %v4201_v29, %v4197_v28  ;;  %v4237_v30 = vld [vmem:[#allocation2 + $0xf10] sm:$0xff] }
 0x416   :  { %v4241_v32 = vld [vmem:[#allocation2 + $0xf30] sm:$0xff] }
 0x429   :  { %v3245_v50 = vpop.f32.mrb[2].mxu0 }
 0x42a   :  { %v7393_v52 = vadd.f32 %v3245_v50, %v1738_v46  ;;  %v12680_v53 = vpop.f32.mrb[2].mxu1  ;;  %v3247_v55 = vpop.f32.mrb[3].mxu0  ;;  %v4171_v46 = vld [vmem:[#allocation2 + $0xd00] sm:$0xff]  ;;  %v7277_v50 = vpack.c.bf16 %v4178_v43, %v4174_v42  ;;  %v4212_v42 = vld [vmem:[#allocation2 + $0xe48] sm:$0xff] }
 0x42b   :  { %v7394_v58 = vadd.f32 %v3247_v55, %v1742_v47  ;;  %v3744_v59 = vpop.f32.mrb[3].mxu1  ;;  %v4175_v47 = vld [vmem:[#allocation2 + $0xd20] sm:$0xff]  ;;  %v4180_v55 = vld [vmem:[#allocation2 + $0xd48] sm:$0xff] }
 0x42c   :  { %v7396_v61 = vadd.f32 %v3744_v59, %v1750_v49  ;;  %v3751_v6 = vmax.f32 %v7393_v52, 0.0  ;;  %v7021_v49 = vpack.c.bf16 %v4176_v41, %v4172_v39  ;;  %v4177_v52 = vld [vmem:[#allocation2 + $0xd30] sm:$0xff]  ;;  %v7025_v62 = vpack.c.bf16 %v4184_v22, %v4180_v55  ;;  %v4216_v43 = vld [vmem:[#allocation2 + $0xe68] sm:$0xff] }
 0x42d   :  { %v3752_v2 = vmax.f32 %v7394_v58, 0.0  ;;  %v7023_v58 = vpack.c.bf16 %v4175_v47, %v4171_v46  ;;  %v7279_v59 = vpack.c.bf16 %v4177_v52, %v4173_v51  ;;  %v4205_v39 = vld [vmem:[#allocation2 + $0xe10] sm:$0xff]  ;;  %v7041_v51 = vpack.c.bf16 %v4216_v43, %v4212_v42 }
 0x42e   :  { %v3754_v17 = vmax.f32 %v7396_v61, 0.0  ;;  %v4183_v61 = vld [vmem:[#allocation2 + $0xd60] sm:$0xff]  ;;  %v4209_v41 = vld [vmem:[#allocation2 + $0xe30] sm:$0xff] }
 0x42f   :  { %4495 = vmatprep.mubr.f32.mxu0 %v3752_v2  ;;  %4779 = vmatprep.mubr.f32.mxu1 %v3752_v2  ;;  %v4185_v2 = vld [vmem:[#allocation2 + $0xd70] sm:$0xff]  ;;  %v7295_v47 = vpack.c.bf16 %v4209_v41, %v4205_v39 }
 0x430   :  { %4496 = vmatmul.mubr.f32.vlgmr.msra.gmra.mrb[4].mxu0 %v3751_v6  ;;  %4780 = vmatmul.mubr.f32.vlgmr.msra.gmra.mrb[4].mxu1 %v3751_v6  ;;  %v7027_v6 = vpack.c.bf16 %v4183_v61, %v4179_v60  ;;  %v7283_v7 = vpack.c.bf16 %v4185_v2, %v4181_v1  ;;  %v4213_v55 = vld [vmem:[#allocation2 + $0xe50] sm:$0xff]  ;;  %v7045_v1 = vpack.c.bf16 %v4224_v57, %v4220_v56 }
 0x431   :  { %7008 = vmatpush1.bf16.msra.mxu0 %v7007_v4  ;;  %7264 = vmatpush1.bf16.msra.mxu1 %v7263_v15  ;;  %v4188_v4 = vld [vmem:[#allocation2 + $0xd88] sm:$0xff]  ;;  %v4217_v22 = vld [vmem:[#allocation2 + $0xe70] sm:$0xff] }
 0x432   :  { %4566 = vmatprep.mubr.f32.mxu0 %v3754_v17  ;;  %4850 = vmatprep.mubr.f32.mxu1 %v3754_v17  ;;  %v4192_v15 = vld [vmem:[#allocation2 + $0xda8] sm:$0xff]  ;;  %v7299_v61 = vpack.c.bf16 %v4217_v22, %v4213_v55  ;;  %v4245_v42 = vld [vmem:[#allocation2 + $0xf50] sm:$0xff]  ;;  %v1745_v55 = vsub.s32 6, %v12597_v63  ;;  %v5078_v63 = vld [vmem:[%s12902_s6] ss:$0 sm:$0xff] }
 0x433   :  { %7010 = vmatprep.subr.bf16.mxu0 %v7009_v9  ;;  %7266 = vmatprep.subr.bf16.mxu1 %v7265_v10  ;;  %v7029_v9 = vpack.c.bf16 %v4192_v15, %v4188_v4  ;;  %v7285_v10 = vpack.c.bf16 %v4194_v5, %v4190_v3  ;;  %v4200_v17 = vld [vmem:[#allocation2 + $0xde8] sm:$0xff]  ;;  %v4221_v4 = vld [vmem:[#allocation2 + $0xe90] sm:$0xff] }
 0x434   :  { %v7033_v26 = vpack.c.bf16 %v4200_v17, %v4196_v14  ;;  %v4225_v15 = vld [vmem:[#allocation2 + $0xeb0] sm:$0xff]  ;;  %v4228_v3 = vld [vmem:[#allocation2 + $0xec8] sm:$0xff] }
 0x435   :  { %7012 = vmatpush1.bf16.msra.mxu0 %v7011_v18  ;;  %7268 = vmatpush1.bf16.msra.mxu1 %v7267_v19  ;;  %v4198_v18 = vld [vmem:[#allocation2 + $0xdd8] sm:$0xff]  ;;  %v4232_v5 = vld [vmem:[#allocation2 + $0xee8] sm:$0xff]  ;;  %v7303_v16 = vpack.c.bf16 %v4225_v15, %v4221_v4  ;;  %v4229_v14 = vld [vmem:[#allocation2 + $0xed0] sm:$0xff] }
 0x436   :  { %7014 = vmatprep.subr.bf16.mxu0 %v7013_v23  ;;  %7270 = vmatprep.subr.bf16.mxu1 %v7269_v24  ;;  %v4202_v19 = vld [vmem:[#allocation2 + $0xdf8] sm:$0xff]  ;;  %v4195_v23 = vld [vmem:[#allocation2 + $0xdc0] sm:$0xff]  ;;  %v7049_v11 = vpack.c.bf16 %v4232_v5, %v4228_v3  ;;  %v4233_v17 = vld [vmem:[#allocation2 + $0xef0] sm:$0xff] }
 0x437   :  { %v4199_v24 = vld [vmem:[#allocation2 + $0xde0] sm:$0xff]  ;;  %v7289_v27 = vpack.c.bf16 %v4202_v19, %v4198_v18  ;;  %v4236_v18 = vld [vmem:[#allocation2 + $0xf08] sm:$0xff]  ;;  %v4249_v43 = vld [vmem:[#allocation2 + $0xf70] sm:$0xff] }
 0x438   :  { %v7035_v21 = vpack.c.bf16 %v4199_v24, %v4195_v23  ;;  %v4240_v19 = vld [vmem:[#allocation2 + $0xf28] sm:$0xff]  ;;  %v7307_v24 = vpack.c.bf16 %v4233_v17, %v4229_v14  ;;  %v4253_v57 = vld [vmem:[#allocation2 + $0xf90] sm:$0xff]  ;;  %v4263_v4 = vld [vmem:[#allocation2 + $0xfe0] sm:$0xff] }
 0x439   :  { %7016 = vmatpush1.bf16.msra.mxu0 %v7015_v33  ;;  %7272 = vmatpush1.bf16.msra.mxu1 %v7271_v48  ;;  %v4206_v33 = vld [vmem:[#allocation2 + $0xe18] sm:$0xff]  ;;  %v7053_v28 = vpack.c.bf16 %v4240_v19, %v4236_v18  ;;  %v7479_v15 = vld [vmem:[%s12898_s2] sm:$0xff]  ;;  %v4862_v18 = vld [vmem:[%s12901_s5 + $0x8] sm:$0xff] }
 0x43a   :  { %7018 = vmatprep.subr.bf16.mxu0 %v7017_v35  ;;  %7274 = vmatprep.subr.bf16.mxu1 %v7273_v36  ;;  %v4210_v48 = vld [vmem:[#allocation2 + $0xe38] sm:$0xff]  ;;  %v4203_v35 = vld [vmem:[#allocation2 + $0xe00] sm:$0xff]  ;;  %v1746_v3 = vrot.slane %v7479_v15, %v1745_v55  ;;  %v4915_v55 = vld [vmem:[%s12901_s5 + $0x1b0] sm:$0xff] }
 0x43b   :  { %v4207_v36 = vld [vmem:[#allocation2 + $0xe20] sm:$0xff]  ;;  %v7293_v38 = vpack.c.bf16 %v4210_v48, %v4206_v33  ;;  %v4244_v33 = vld [vmem:[#allocation2 + $0xf48] sm:$0xff] }
 0x43c   :  { %v7039_v46 = vpack.c.bf16 %v4207_v36, %v4203_v35  ;;  %v4248_v48 = vld [vmem:[#allocation2 + $0xf68] sm:$0xff]  ;;  %v7311_v36 = vpack.c.bf16 %v4241_v32, %v4237_v30  ;;  %v4861_v17 = vld [vmem:[%s12901_s5] sm:$0xff]  ;;  %v7395_v19 = vadd.f32 %v12680_v53, %v1746_v3  ;;  %v4880_v53 = vld [vmem:[%s12901_s5 + $0x98] sm:$0xff] }
 0x43d   :  { %7020 = vmatpush1.bf16.msra.mxu0 %v7019_v44  ;;  %7276 = vmatpush1.bf16.msra.mxu1 %v7275_v45  ;;  %v4214_v44 = vld [vmem:[#allocation2 + $0xe58] sm:$0xff]  ;;  %v7057_v39 = vpack.c.bf16 %v4248_v48, %v4244_v33  ;;  %v4863_v32 = vld [vmem:[%s12901_s5 + $0x10] sm:$0xff]  ;;  %v4918_v15 = vld [vmem:[%s12901_s5 + $0x1c8] sm:$0xff] }
 0x43e   :  { %7022 = vmatprep.subr.bf16.mxu0 %v7021_v49  ;;  %7278 = vmatprep.subr.bf16.mxu1 %v7277_v50  ;;  %v4218_v45 = vld [vmem:[#allocation2 + $0xe78] sm:$0xff]  ;;  %v4211_v49 = vld [vmem:[#allocation2 + $0xe40] sm:$0xff]  ;;  %v3753_v48 = vmax.f32 %v7395_v19, 0.0 }
 0x43f   :  { %v4215_v50 = vld [vmem:[#allocation2 + $0xe60] sm:$0xff]  ;;  %v7297_v52 = vpack.c.bf16 %v4218_v45, %v4214_v44  ;;  %v4252_v44 = vld [vmem:[#allocation2 + $0xf88] sm:$0xff]  ;;  %v4864_v33 = vld [vmem:[%s12901_s5 + $0x18] sm:$0xff] }
 0x440   :  { %v7043_v60 = vpack.c.bf16 %v4215_v50, %v4211_v49  ;;  %v4256_v45 = vld [vmem:[#allocation2 + $0xfa8] sm:$0xff]  ;;  %v7315_v50 = vpack.c.bf16 %v4249_v43, %v4245_v42  ;;  %v7331_v42 = vpack.c.bf16 %v4864_v33, %v4863_v32 }
 0x441   :  { %7024 = vmatpush1.bf16.msra.mxu0 %v7023_v58  ;;  %7280 = vmatpush1.bf16.msra.mxu1 %v7279_v59  ;;  %v4222_v58 = vld [vmem:[#allocation2 + $0xe98] sm:$0xff]  ;;  %v7061_v22 = vpack.c.bf16 %v4256_v45, %v4252_v44  ;;  %v4865_v44 = vld [vmem:[%s12901_s5 + $0x20] sm:$0xff]  ;;  %v4866_v45 = vld [vmem:[%s12901_s5 + $0x28] sm:$0xff] }
 0x442   :  { %7026 = vmatprep.subr.bf16.mxu0 %v7025_v62  ;;  %7282 = vmatprep.subr.bf16.mxu1 %v7281_v0  ;;  %v4226_v59 = vld [vmem:[#allocation2 + $0xeb8] sm:$0xff]  ;;  %v4219_v62 = vld [vmem:[#allocation2 + $0xe80] sm:$0xff] }
 0x443   :  { %v4223_v0 = vld [vmem:[#allocation2 + $0xea0] sm:$0xff]  ;;  %v7301_v2 = vpack.c.bf16 %v4226_v59, %v4222_v58  ;;  %v4257_v58 = vld [vmem:[#allocation2 + $0xfb0] sm:$0xff]  ;;  %v4260_v59 = vld [vmem:[#allocation2 + $0xfc8] sm:$0xff] }
 0x444   :  { %v7047_v8 = vpack.c.bf16 %v4223_v0, %v4219_v62  ;;  %v4266_v62 = vld [vmem:[#allocation2 + $0xff8] sm:$0xff] }
 0x445   :  { %7028 = vmatpush1.bf16.msra.mxu0 %v7027_v6  ;;  %7284 = vmatpush1.bf16.msra.mxu1 %v7283_v7  ;;  %v4230_v6 = vld [vmem:[#allocation2 + $0xed8] sm:$0xff] }
 0x446   :  { %7030 = vmatprep.subr.bf16.mxu0 %v7029_v9  ;;  %7286 = vmatprep.subr.bf16.mxu1 %v7285_v10  ;;  %v4234_v7 = vld [vmem:[#allocation2 + $0xef8] sm:$0xff]  ;;  %v4227_v9 = vld [vmem:[#allocation2 + $0xec0] sm:$0xff] }
 0x447   :  { %v4231_v10 = vld [vmem:[#allocation2 + $0xee0] sm:$0xff]  ;;  %v7305_v13 = vpack.c.bf16 %v4234_v7, %v4230_v6  ;;  %v4261_v7 = vld [vmem:[#allocation2 + $0xfd0] sm:$0xff] }
 0x448   :  { %v7051_v23 = vpack.c.bf16 %v4231_v10, %v4227_v9  ;;  %v4878_v9 = vld [vmem:[%s12901_s5 + $0x88] sm:$0xff]  ;;  %v4909_v10 = vld [vmem:[%s12901_s5 + $0x180] sm:$0xff] }
 0x449   :  { %7032 = vmatpush1.bf16.msra.mxu0 %v7031_v25  ;;  %7288 = vmatpush1.bf16.msra.mxu1 %v7287_v20  ;;  %v4238_v25 = vld [vmem:[#allocation2 + $0xf18] sm:$0xff] }
 0x44a   :  { %7034 = vmatprep.subr.bf16.mxu0 %v7033_v26  ;;  %7290 = vmatprep.subr.bf16.mxu1 %v7289_v27  ;;  %v4242_v20 = vld [vmem:[#allocation2 + $0xf38] sm:$0xff]  ;;  %v4235_v26 = vld [vmem:[#allocation2 + $0xf00] sm:$0xff] }
 0x44b   :  { %v4239_v27 = vld [vmem:[#allocation2 + $0xf20] sm:$0xff]  ;;  %v7309_v29 = vpack.c.bf16 %v4242_v20, %v4238_v25 }
 0x44c   :  { %v7055_v35 = vpack.c.bf16 %v4239_v27, %v4235_v26  ;;  %v4879_v26 = vld [vmem:[%s12901_s5 + $0x90] sm:$0xff] }
 0x44d   :  { %7036 = vmatpush1.bf16.msra.mxu0 %v7035_v21  ;;  %7292 = vmatpush1.bf16.msra.mxu1 %v7291_v34  ;;  %v4246_v21 = vld [vmem:[#allocation2 + $0xf58] sm:$0xff]  ;;  %v4911_v27 = vld [vmem:[%s12901_s5 + $0x190] sm:$0xff] }
 0x44e   :  { %7038 = vmatprep.subr.bf16.mxu0 %v7037_v37  ;;  %7294 = vmatprep.subr.bf16.mxu1 %v7293_v38  ;;  %v4250_v34 = vld [vmem:[#allocation2 + $0xf78] sm:$0xff]  ;;  %v4243_v37 = vld [vmem:[#allocation2 + $0xf40] sm:$0xff] }
 0x44f   :  { %v4247_v38 = vld [vmem:[#allocation2 + $0xf60] sm:$0xff]  ;;  %v7313_v41 = vpack.c.bf16 %v4250_v34, %v4246_v21  ;;  %v7329_v21 = vpack.c.bf16 %v4880_v53, %v4879_v26  ;;  %v4903_v26 = vld [vmem:[%s12901_s5 + $0x150] sm:$0xff]  ;;  %v4904_v53 = vld [vmem:[%s12901_s5 + $0x158] sm:$0xff] }
 0x450   :  { %v7059_v49 = vpack.c.bf16 %v4247_v38, %v4243_v37  ;;  %v4881_v37 = vld [vmem:[%s12901_s5 + $0xa0] sm:$0xff]  ;;  %v4882_v38 = vld [vmem:[%s12901_s5 + $0xa8] sm:$0xff]  ;;  %v7379_v33 = vpack.c.bf16 %v4904_v53, %v4903_v26 }
 0x451   :  { %7040 = vmatpush1.bf16.msra.mxu0 %v7039_v46  ;;  %7296 = vmatpush1.bf16.msra.mxu1 %v7295_v47  ;;  %v4254_v46 = vld [vmem:[#allocation2 + $0xf98] sm:$0xff] }
 0x452   :  { %7042 = vmatprep.subr.bf16.mxu0 %v7041_v51  ;;  %7298 = vmatprep.subr.bf16.mxu1 %v7297_v52  ;;  %v4258_v47 = vld [vmem:[#allocation2 + $0xfb8] sm:$0xff]  ;;  %v4251_v51 = vld [vmem:[#allocation2 + $0xf80] sm:$0xff] }
 0x453   :  { %v4255_v52 = vld [vmem:[#allocation2 + $0xfa0] sm:$0xff]  ;;  %v7317_v56 = vpack.c.bf16 %v4258_v47, %v4254_v46  ;;  %v7333_v46 = vpack.c.bf16 %v4882_v38, %v4881_v37  ;;  %v4906_v38 = vld [vmem:[%s12901_s5 + $0x168] sm:$0xff] }
 0x454   :  { %v7063_v0 = vpack.c.bf16 %v4255_v52, %v4251_v51  ;;  %v4883_v51 = vld [vmem:[%s12901_s5 + $0xb0] sm:$0xff]  ;;  %v4884_v52 = vld [vmem:[%s12901_s5 + $0xb8] sm:$0xff] }
 0x455   :  { %7044 = vmatpush1.bf16.msra.mxu0 %v7043_v60  ;;  %7300 = vmatpush1.bf16.msra.mxu1 %v7299_v61  ;;  %v4264_v60 = vld [vmem:[#allocation2 + $0xfe8] sm:$0xff]  ;;  %v4262_v61 = vld [vmem:[#allocation2 + $0xfd8] sm:$0xff] }
 0x456   :  { %7046 = vmatprep.subr.bf16.mxu0 %v7045_v1  ;;  %7302 = vmatprep.subr.bf16.mxu1 %v7301_v2  ;;  %v7319_v1 = vpack.c.bf16 %v4257_v58, %v4253_v57  ;;  %v4259_v2 = vld [vmem:[#allocation2 + $0xfc0] sm:$0xff]  ;;  %v7065_v5 = vpack.c.bf16 %v4264_v60, %v4260_v59  ;;  %v7321_v6 = vpack.c.bf16 %v4266_v62, %v4262_v61  ;;  %v4867_v58 = vld [vmem:[%s12901_s5 + $0x30] sm:$0xff]  ;;  %v4868_v59 = vld [vmem:[%s12901_s5 + $0x38] sm:$0xff] }
 0x457   :  { %v7337_v60 = vpack.c.bf16 %v4884_v52, %v4883_v51  ;;  %v4899_v62 = vld [vmem:[%s12901_s5 + $0x130] sm:$0xff]  ;;  %v7339_v3 = vpack.c.bf16 %v4868_v59, %v4867_v58  ;;  %v4908_v52 = vld [vmem:[%s12901_s5 + $0x178] sm:$0xff] }
 0x458   :  { %v4907_v51 = vld [vmem:[%s12901_s5 + $0x170] sm:$0xff] }
 0x459   :  { %7048 = vmatpush1.bf16.msra.mxu0 %v7047_v8  ;;  %7304 = vmatpush1.bf16.msra.mxu1 %v7303_v16  ;;  %v4265_v8 = vld [vmem:[#allocation2 + $0xff0] sm:$0xff]  ;;  %v4877_v16 = vld [vmem:[%s12901_s5 + $0x80] sm:$0xff] }
 0x45a   :  { %7050 = vmatprep.subr.bf16.mxu0 %v7049_v11  ;;  %7306 = vmatprep.subr.bf16.mxu1 %v7305_v13  ;;  %v4910_v11 = vld [vmem:[%s12901_s5 + $0x188] sm:$0xff]  ;;  %v7067_v13 = vpack.c.bf16 %v4263_v4, %v4259_v2  ;;  %v7323_v14 = vpack.c.bf16 %v4265_v8, %v4261_v7  ;;  %v7325_v25 = vpack.c.bf16 %v4878_v9, %v4877_v16  ;;  %v4917_v4 = vld [vmem:[%s12901_s5 + $0x1c0] sm:$0xff] }
 0x45b   :  { %v7357_v20 = vpack.c.bf16 %v4910_v11, %v4909_v10  ;;  %v4886_v2 = vld [vmem:[%s12901_s5 + $0xc8] sm:$0xff]  ;;  %v7373_v16 = vpack.c.bf16 %v4918_v15, %v4917_v4  ;;  %v4901_v9 = vld [vmem:[%s12901_s5 + $0x140] sm:$0xff]  ;;  %v4887_v11 = vld [vmem:[%s12901_s5 + $0xd0] sm:$0xff] }
 0x45c   :  { %v4870_v7 = vld [vmem:[%s12901_s5 + $0x48] sm:$0xff] }
 0x45d   :  { %7052 = vmatpush1.bf16.msra.mxu0 %v7051_v23  ;;  %7308 = vmatpush1.bf16.msra.mxu1 %v7307_v24  ;;  %v4893_v23 = vld [vmem:[%s12901_s5 + $0x100] sm:$0xff]  ;;  %v4894_v24 = vld [vmem:[%s12901_s5 + $0x108] sm:$0xff] }
 0x45e   :  { %7054 = vmatprep.subr.bf16.mxu0 %v7053_v28  ;;  %7310 = vmatprep.subr.bf16.mxu1 %v7309_v29  ;;  %v4912_v28 = vld [vmem:[%s12901_s5 + $0x198] sm:$0xff]  ;;  %v7327_v29 = vpack.c.bf16 %v4862_v18, %v4861_v17  ;;  %v7359_v30 = vpack.c.bf16 %v4894_v24, %v4893_v23  ;;  %v4902_v10 = vld [vmem:[%s12901_s5 + $0x148] sm:$0xff] }
 0x45f   :  { %v7361_v34 = vpack.c.bf16 %v4912_v28, %v4911_v27  ;;  %v4920_v17 = vld [vmem:[%s12901_s5 + $0x1d8] sm:$0xff]  ;;  %v7375_v19 = vpack.c.bf16 %v4902_v10, %v4901_v9  ;;  %v4889_v27 = vld [vmem:[%s12901_s5 + $0xe0] sm:$0xff]  ;;  %v4890_v28 = vld [vmem:[%s12901_s5 + $0xe8] sm:$0xff] }
 0x461   :  { %7056 = vmatpush1.bf16.msra.mxu0 %v7055_v35  ;;  %7312 = vmatpush1.bf16.msra.mxu1 %v7311_v36  ;;  %v4895_v35 = vld [vmem:[%s12901_s5 + $0x110] sm:$0xff]  ;;  %v4896_v36 = vld [vmem:[%s12901_s5 + $0x118] sm:$0xff] }
 0x462   :  { %7058 = vmatprep.subr.bf16.mxu0 %v7057_v39  ;;  %7314 = vmatprep.subr.bf16.mxu1 %v7313_v41  ;;  %v4913_v39 = vld [vmem:[%s12901_s5 + $0x1a0] sm:$0xff]  ;;  %v4914_v41 = vld [vmem:[%s12901_s5 + $0x1a8] sm:$0xff]  ;;  %v7363_v43 = vpack.c.bf16 %v4896_v36, %v4895_v35 }
 0x463   :  { %v7365_v47 = vpack.c.bf16 %v4914_v41, %v4913_v39  ;;  %v4874_v35 = vld [vmem:[%s12901_s5 + $0x68] sm:$0xff]  ;;  %v4905_v36 = vld [vmem:[%s12901_s5 + $0x160] sm:$0xff]  ;;  %v4891_v41 = vld [vmem:[%s12901_s5 + $0xf0] sm:$0xff] }
 0x464   :  { %v7383_v39 = vpack.c.bf16 %v4906_v38, %v4905_v36 }
 0x465   :  { %7060 = vmatpush1.bf16.msra.mxu0 %v7059_v49  ;;  %7316 = vmatpush1.bf16.msra.mxu1 %v7315_v50  ;;  %v4897_v49 = vld [vmem:[%s12901_s5 + $0x120] sm:$0xff]  ;;  %v4898_v50 = vld [vmem:[%s12901_s5 + $0x128] sm:$0xff] }
 0x466   :  { %7062 = vmatprep.subr.bf16.mxu0 %v7061_v22  ;;  %7318 = vmatprep.subr.bf16.mxu1 %v7317_v56  ;;  %v4916_v22 = vld [vmem:[%s12901_s5 + $0x1b8] sm:$0xff]  ;;  %v7335_v56 = vpack.c.bf16 %v4866_v45, %v4865_v44  ;;  %v7367_v57 = vpack.c.bf16 %v4898_v50, %v4897_v49 }
 0x467   :  { %v7369_v61 = vpack.c.bf16 %v4916_v22, %v4915_v55  ;;  %v4924_v45 = vld [vmem:[%s12901_s5 + $0x1f8] sm:$0xff]  ;;  %v7387_v55 = vpack.c.bf16 %v4908_v52, %v4907_v51  ;;  %v4267_v22 = vld [vmem:[%s12900_s4] sm:$0xf] }
 0x468   :  { %v4276_v58 = vrot.slane %v4267_v22, %v1725_v12  ;;  %v4284_v59 = vrot.slane %v4267_v22, %v1733_v40 }
 0x469   :  { %7064 = vmatpush1.bf16.msra.mxu0 %v7063_v0  ;;  %7320 = vmatpush1.bf16.msra.mxu1 %v7319_v1  ;;  %v4900_v0 = vld [vmem:[%s12901_s5 + $0x138] sm:$0xff]  ;;  %v4885_v1 = vld [vmem:[%s12901_s5 + $0xc0] sm:$0xff] }
 0x46a   :  { %7066 = vmatprep.subr.bf16.mxu0 %v7065_v5  ;;  %7322 = vmatprep.subr.bf16.mxu1 %v7321_v6  ;;  %v7371_v5 = vpack.c.bf16 %v4900_v0, %v4899_v62  ;;  %v4869_v6 = vld [vmem:[%s12901_s5 + $0x40] sm:$0xff]  ;;  %v7341_v8 = vpack.c.bf16 %v4886_v2, %v4885_v1 }
 0x46b   :  { %v7343_v18 = vpack.c.bf16 %v4870_v7, %v4869_v6 }
 0x46d   :  { %7068 = vmatpush1.bf16.msra.mxu0 %v7067_v13  ;;  %7324 = vmatpush1.bf16.msra.mxu1 %v7323_v14  ;;  %v4888_v13 = vld [vmem:[%s12901_s5 + $0xd8] sm:$0xff]  ;;  %v4919_v14 = vld [vmem:[%s12901_s5 + $0x1d0] sm:$0xff] }
 0x46e   :  { %7326 = vmatprep.subr.bf16.mxu0 %v7325_v25  ;;  %7358 = vmatprep.subr.bf16.mxu1 %v7357_v20  ;;  %v4871_v25 = vld [vmem:[%s12901_s5 + $0x50] sm:$0xff]  ;;  %v4872_v20 = vld [vmem:[%s12901_s5 + $0x58] sm:$0xff]  ;;  %v7345_v23 = vpack.c.bf16 %v4888_v13, %v4887_v11  ;;  %v7377_v24 = vpack.c.bf16 %v4920_v17, %v4919_v14 }
 0x46f   :  { %v7347_v32 = vpack.c.bf16 %v4872_v20, %v4871_v25 }
 0x470   :  { %4567 = vmatmul.mubr.f32.vlgmr.msra.gmra.mrb[4].mxu0 %v3753_v48  ;;  %4851 = vmatmul.mubr.f32.vlgmr.msra.gmra.mrb[4].mxu1 %v3753_v48  ;;  %v7349_v48 = vpack.c.bf16 %v4890_v28, %v4889_v27 }
 0x471   :  { %7328 = vmatpush3.bf16.msra.mxu0 %v7327_v29  ;;  %7360 = vmatpush3.bf16.msra.mxu1 %v7359_v30  ;;  %v4921_v29 = vld [vmem:[%s12901_s5 + $0x1e0] sm:$0xff]  ;;  %v4922_v30 = vld [vmem:[%s12901_s5 + $0x1e8] sm:$0xff] }
 0x472   :  { %7330 = vmatprep.subr.bf16.mxu0 %v7329_v21  ;;  %7362 = vmatprep.subr.bf16.mxu1 %v7361_v34  ;;  %v7381_v21 = vpack.c.bf16 %v4922_v30, %v4921_v29  ;;  %v4873_v34 = vld [vmem:[%s12901_s5 + $0x60] sm:$0xff] }
 0x473   :  { %v7351_v37 = vpack.c.bf16 %v4874_v35, %v4873_v34 }
 0x475   :  { %7332 = vmatpush3.bf16.msra.mxu0 %v7331_v42  ;;  %7364 = vmatpush3.bf16.msra.mxu1 %v7363_v43  ;;  %v4892_v42 = vld [vmem:[%s12901_s5 + $0xf8] sm:$0xff]  ;;  %v4923_v43 = vld [vmem:[%s12901_s5 + $0x1f0] sm:$0xff] }
 0x476   :  { %7334 = vmatprep.subr.bf16.mxu0 %v7333_v46  ;;  %7366 = vmatprep.subr.bf16.mxu1 %v7365_v47  ;;  %v7353_v44 = vpack.c.bf16 %v4892_v42, %v4891_v41  ;;  %v4875_v46 = vld [vmem:[%s12901_s5 + $0x70] sm:$0xff]  ;;  %v4876_v47 = vld [vmem:[%s12901_s5 + $0x78] sm:$0xff]  ;;  %v7385_v49 = vpack.c.bf16 %v4924_v45, %v4923_v43 }
 0x477   :  { %v7355_v50 = vpack.c.bf16 %v4876_v47, %v4875_v46 }
 0x479   :  { %7336 = vmatpush3.bf16.msra.mxu0 %v7335_v56  ;;  %7368 = vmatpush3.bf16.msra.mxu1 %v7367_v57  ;;  %v4272_v56 = vrot.slane %v4267_v22, %v1721_v31  ;;  %v4280_v57 = vrot.slane %v4267_v22, %v1729_v54 }
 0x47a   :  { %7338 = vmatprep.subr.bf16.mxu0 %v7337_v60  ;;  %7370 = vmatprep.subr.bf16.mxu1 %v7369_v61 }
 0x47d   :  { %7340 = vmatpush3.bf16.msra.mxu0 %v7339_v3  ;;  %7372 = vmatpush3.bf16.msra.mxu1 %v7371_v5 }
 0x47e   :  { %7342 = vmatprep.subr.bf16.mxu0 %v7341_v8  ;;  %7374 = vmatprep.subr.bf16.mxu1 %v7373_v16 }
 0x481   :  { %7344 = vmatpush3.bf16.msra.mxu0 %v7343_v18  ;;  %7376 = vmatpush3.bf16.msra.mxu1 %v7375_v19 }
 0x482   :  { %7346 = vmatprep.subr.bf16.mxu0 %v7345_v23  ;;  %7378 = vmatprep.subr.bf16.mxu1 %v7377_v24 }
 0x485   :  { %7348 = vmatpush3.bf16.msra.mxu0 %v7347_v32  ;;  %7380 = vmatpush3.bf16.msra.mxu1 %v7379_v33 }
 0x486   :  { %7350 = vmatprep.subr.bf16.mxu0 %v7349_v48  ;;  %7382 = vmatprep.subr.bf16.mxu1 %v7381_v21 }
 0x489   :  { %7352 = vmatpush3.bf16.msra.mxu0 %v7351_v37  ;;  %7384 = vmatpush3.bf16.msra.mxu1 %v7383_v39 }
 0x48a   :  { %7354 = vmatprep.subr.bf16.mxu0 %v7353_v44  ;;  %7386 = vmatprep.subr.bf16.mxu1 %v7385_v49 }
 0x48d   :  { %7356 = vmatpush3.bf16.msra.mxu0 %v7355_v50  ;;  %7388 = vmatpush3.bf16.msra.mxu1 %v7387_v55 }
 0x543   :  { %v4568_v60 = vpop.f32.mrb[4].mxu0  ;;  %v4852_v61 = vpop.f32.mrb[4].mxu1 }
 0x544   :  { %v7397_v62 = vadd.f32 %v4568_v60, %v4272_v56  ;;  %v7399_v0 = vadd.f32 %v4852_v61, %v4280_v57  ;;  %v4570_v1 = vpop.f32.mrb[5].mxu0  ;;  %v4854_v2 = vpop.f32.mrb[5].mxu1 }
 0x545   :  { %v7398_v4 = vadd.f32 %v4570_v1, %v4276_v58  ;;  %v7400_v15 = vadd.f32 %v4854_v2, %v4284_v59 }
 0x546   :  { %v4857_v31 = vmax.f32 %v7397_v62, 0.0  ;;  %v4859_v6 = vmax.f32 %v7399_v0, 0.0 }
 0x547   :  { %v4858_v3 = vmax.f32 %v7398_v4, 0.0  ;;  %v4860_v5 = vmax.f32 %v7400_v15, 0.0 }
 0x549   :  { %4996 = vmatprep.mubr.f32.mxu0 %v4858_v3  ;;  %5066 = vmatprep.mubr.f32.mxu1 %v4860_v5 }
 0x54a   :  { %4997 = vmatmul.mubr.f32.vlgmr.msra.gmra.mrb[6].mxu0 %v4857_v31  ;;  %5067 = vmatmul.mubr.f32.vlgmr.msra.gmra.mrb[6].mxu1 %v4859_v6 }
 0x61d   :  { %v5111_v12 = vpop.f32.mrb[6].mxu0  ;;  %v5146_v54 = vpop.f32.mrb[6].mxu1 }
 0x61e   :  { %v5112_v40 = vpop.f32.mrb[7].mxu0  ;;  %v5147_v7 = vpop.f32.mrb[7].mxu1 }
 0x61f   :  { %v5113_v8 = vadd.f32 %v5112_v40, %v5111_v12  ;;  %v5148_v16 = vadd.f32 %v5147_v7, %v5146_v54 }
 0x621   :  { %v4999_v9 = vadd.f32 %v5113_v8, %v5078_v63 }
 0x623   :  { %v5069_v10 = vadd.f32 %v5148_v16, %v4999_v9 }
 0x625   :  { %5072 = vst [vmem:[%s12903_s7] sm:$0xff] %v5069_v10 }
 0x626   :  { %5077 = vsyncpa [#allocation3], 1 }

</bundles_post_ra>
